<compile_context>
chip_gen: v5e
topology: v5e:2x2
jax: 0.10.0
libtpu: 0.0.40
codegen_flags: <defaults>
</compile_context>

<pallas_src>
import math
import functools

import jax
import jax.numpy as jnp
from jax import lax
from jax.experimental import pallas as pl
from jax.experimental.pallas import tpu as pltpu


def mha_kernel(q_ref, k_ref, v_ref,
               wqkv_ref, bqkv_ref, wc_ref, bc_ref,
               o_ref,
               *, n_head: int):
    # q_ref/k_ref/v_ref/o_ref: (Bt, T, D) block.
    # wqkv_ref: (D, 3D) bf16 pre-transposed fused weight (Q slice carries 1/sqrt(dh)).
    # bqkv_ref: (1, 3D) f32 fused bias.  wc_ref: (D, D) bf16.  bc_ref: (1, D) f32.
    Bt, T, D = q_ref.shape
    dh = D // n_head
    R = Bt * T

    # Flatten batch rows so the projection matmuls have a fat M dimension; cast the
    # activations to bf16 once (MXU fast dtype), accumulate in f32.
    q2d = q_ref[...].reshape(R, D).astype(jnp.bfloat16)
    k2d = k_ref[...].reshape(R, D).astype(jnp.bfloat16)
    v2d = v_ref[...].reshape(R, D).astype(jnp.bfloat16)

    # Static, 128-lane-aligned column slices of the fused QKV weight / bias.
    qp = jnp.dot(q2d, wqkv_ref[:, 0:D],
                 preferred_element_type=jnp.float32) + bqkv_ref[:, 0:D]
    kp = jnp.dot(k2d, wqkv_ref[:, D:2 * D],
                 preferred_element_type=jnp.float32) + bqkv_ref[:, D:2 * D]
    vp = jnp.dot(v2d, wqkv_ref[:, 2 * D:3 * D],
                 preferred_element_type=jnp.float32) + bqkv_ref[:, 2 * D:3 * D]

    # Contract the last dim of both operands: q_h @ k_h^T without an explicit transpose.
    qk_dims = (((1,), (1,)), ((), ()))

    merged_rows = []
    for b in range(Bt):            # static (unrolled) loops: Bt and n_head are Python ints
        r0 = b * T
        heads = []
        for h in range(n_head):
            c0 = h * dh
            qh = qp[r0:r0 + T, c0:c0 + dh].astype(jnp.bfloat16)   # (T, dh)
            kh = kp[r0:r0 + T, c0:c0 + dh].astype(jnp.bfloat16)
            vh = vp[r0:r0 + T, c0:c0 + dh].astype(jnp.bfloat16)

            s = lax.dot_general(qh, kh, qk_dims,
                                preferred_element_type=jnp.float32)    # (T, T) f32

            # Numerically stable softmax (f32); normalization deferred past PV so only
            # the (T, dh) result is normalized.
            m = jnp.max(s, axis=-1, keepdims=True)
            e = jnp.exp(s - m)
            l = jnp.sum(e, axis=-1, keepdims=True)

            pv = jnp.dot(e.astype(jnp.bfloat16), vh,
                         preferred_element_type=jnp.float32)           # (T, dh) f32
            pv = pv * pl.reciprocal(l, approx=False)                   # exact: (T,1), free
            heads.append(pv.astype(jnp.bfloat16))

        # Lane-dense (T, D) merged-head tile per batch element (no 32-lane stores).
        merged_rows.append(jnp.concatenate(heads, axis=-1))

    merged2d = jnp.concatenate(merged_rows, axis=0)                    # (R, D) bf16

    # Output projection on the merged heads (bf16 x bf16 -> f32).
    out2d = jnp.dot(merged2d, wc_ref[...],
                    preferred_element_type=jnp.float32) + bc_ref[...]
    o_ref[...] = out2d.reshape(Bt, T, D).astype(o_ref.dtype)


def _pick_block_batch(B, T, target_rows=256, max_rows=1024):
    """Largest batch block with flattened rows <= max_rows, aiming for >= target_rows,
    while keeping the grid at >= 2 steps when B > 1 (v7x has 2 TensorCores)."""
    cap = B if B == 1 else max(1, B // 2)
    best = 1
    for bt in range(1, cap + 1):
        if B % bt != 0:
            continue
        if bt * T <= max_rows:
            best = bt
        if bt * T >= target_rows:
            break
    return best


def multi_head_attention(q, k, v, params, n_head, block_batch=None):
    B, T, D = q.shape
    assert D % n_head == 0, "d_model must be divisible by n_head"
    wq, bq, wk, bk, wv, bv, wc, bc = params
    dh = D // n_head
    scale = 1.0 / math.sqrt(dh)

    # Host-side weight prep (done once): transpose to x @ W_t form, fold the attention
    # scale into the Q slice, fuse Q|K|V along the output dim, cast weights to bf16.
    wqkv = jnp.concatenate([wq.T * scale, wk.T, wv.T], axis=1).astype(jnp.bfloat16)
    bqkv = jnp.concatenate([bq * scale, bk, bv], axis=0).reshape(1, 3 * D)
    bqkv = bqkv.astype(jnp.float32)
    wc_t = wc.T.astype(jnp.bfloat16)
    bc2 = bc.reshape(1, D).astype(jnp.float32)

    if block_batch is None:
        block_batch = _pick_block_batch(B, T)
    assert B % block_batch == 0
    Bt = block_batch

    act_spec = pl.BlockSpec((Bt, T, D), lambda b: (b, 0, 0))
    wqkv_spec = pl.BlockSpec((D, 3 * D), lambda b: (0, 0))
    bqkv_spec = pl.BlockSpec((1, 3 * D), lambda b: (0, 0))
    wc_spec = pl.BlockSpec((D, D), lambda b: (0, 0))
    bc_spec = pl.BlockSpec((1, D), lambda b: (0, 0))
    # NOTE: at realistic D (1k-8k), single-buffer the grid-invariant weights with
    # pipeline_mode=pl.Buffered(1) and re-budget vmem_limit_bytes against v7x's 64 MiB.

    kernel = functools.partial(mha_kernel, n_head=n_head)

    return pl.pallas_call(
        kernel,
        out_shape=jax.ShapeDtypeStruct((B, T, D), q.dtype),
        grid_spec=pltpu.PrefetchScalarGridSpec(
            num_scalar_prefetch=0,
            grid=(B // Bt,),
            in_specs=[act_spec, act_spec, act_spec,
                      wqkv_spec, bqkv_spec, wc_spec, bc_spec],
            out_specs=act_spec,
        ),
        compiler_params=pltpu.CompilerParams(
            dimension_semantics=("parallel",),
            vmem_limit_bytes=32 * 1024 * 1024),
    )(q, k, v, wqkv, bqkv, wc_t, bc2)


def mha_reference(q, k, v, params, n_head):
    B, T, D = q.shape
    dh = D // n_head
    wq, bq, wk, bk, wv, bv, wc, bc = params
    qp = q @ wq.T + bq
    kp = k @ wk.T + bk
    vp = v @ wv.T + bv
    qh = qp.reshape(B, T, n_head, dh).transpose(0, 2, 1, 3)
    kh = kp.reshape(B, T, n_head, dh).transpose(0, 2, 1, 3)
    vh = vp.reshape(B, T, n_head, dh).transpose(0, 2, 1, 3)
    score = jnp.einsum('bhtd,bhsd->bhts', qh, kh) / math.sqrt(dh)
    p = jax.nn.softmax(score, axis=-1)
    out = jnp.einsum('bhts,bhsd->bhtd', p, vh)
    out = out.transpose(0, 2, 1, 3).reshape(B, T, D)
    return out @ wc.T + bc


if __name__ == "__main__":
    # Lane-dense, MXU-friendly but still small shapes: D and T multiples of 128.
    B, T, D, H = 4, 128, 128, 4

    key = jax.random.PRNGKey(0)
    keys = jax.random.split(key, 11)

    q = jax.random.normal(keys[0], (B, T, D), dtype=jnp.float32)
    k = jax.random.normal(keys[1], (B, T, D), dtype=jnp.float32)
    v = jax.random.normal(keys[2], (B, T, D), dtype=jnp.float32)

    # Deterministic parameter init (PyTorch Linear weight shape: (out, in))
    lim = 1.0 / math.sqrt(D)
    wq = jax.random.uniform(keys[3], (D, D), minval=-lim, maxval=lim)
    bq = jax.random.uniform(keys[4], (D,), minval=-lim, maxval=lim)
    wk = jax.random.uniform(keys[5], (D, D), minval=-lim, maxval=lim)
    bk = jax.random.uniform(keys[6], (D,), minval=-lim, maxval=lim)
    wv = jax.random.uniform(keys[7], (D, D), minval=-lim, maxval=lim)
    bv = jax.random.uniform(keys[8], (D,), minval=-lim, maxval=lim)
    wc = jax.random.uniform(keys[9], (D, D), minval=-lim, maxval=lim)
    bc = jax.random.uniform(keys[10], (D,), minval=-lim, maxval=lim)
    params = (wq, bq, wk, bk, wv, bv, wc, bc)

    out = multi_head_attention(q, k, v, params, H)
    out = jax.block_until_ready(out)

    ref = mha_reference(q, k, v, params, H)
    assert out.shape == (B, T, D)
    # Tolerance covers bf16 matmul operands (f32 accumulation, f32 softmax).
    max_err = float(jnp.max(jnp.abs(out - ref)))
    assert jnp.allclose(out, ref, atol=5e-3, rtol=5e-3), \
        f"mismatch vs JAX reference (max abs err {max_err})"

    print("KERNEL_OK")
</pallas_src>

<mosaic_0001>
module attributes {stable_mosaic.version = 11 : i64} {
  func.func @mha_kernel(%arg0: i32, %arg1: memref<2x128x128xf32, #tpu.memory_space<vmem>>, %arg2: memref<2x128x128xf32, #tpu.memory_space<vmem>>, %arg3: memref<2x128x128xf32, #tpu.memory_space<vmem>>, %arg4: memref<128x384xbf16, #tpu.memory_space<vmem>>, %arg5: memref<1x384xf32, #tpu.memory_space<vmem>>, %arg6: memref<128x128xbf16, #tpu.memory_space<vmem>>, %arg7: memref<1x128xf32, #tpu.memory_space<vmem>>, %arg8: memref<2x128x128xf32, #tpu.memory_space<vmem>>) attributes {dimension_semantics = [#tpu.dimension_semantics<parallel>], iteration_bounds = array<i64: 2>, scalar_prefetch = 0 : i64, scratch_operands = 0 : i64, tpu.core_type = #tpu.core_type<tc>, window_params = [{transform_indices = @transform_0, window_bounds = array<i64: 2, 128, 128>}, {transform_indices = @transform_1, window_bounds = array<i64: 2, 128, 128>}, {transform_indices = @transform_2, window_bounds = array<i64: 2, 128, 128>}, {pipeline_mode = #tpu.pipeline_mode<synchronous>, transform_indices = @transform_3, window_bounds = array<i64: 128, 384>}, {pipeline_mode = #tpu.pipeline_mode<synchronous>, transform_indices = @transform_4, window_bounds = array<i64: 1, 384>}, {pipeline_mode = #tpu.pipeline_mode<synchronous>, transform_indices = @transform_5, window_bounds = array<i64: 128, 128>}, {pipeline_mode = #tpu.pipeline_mode<synchronous>, transform_indices = @transform_6, window_bounds = array<i64: 1, 128>}, {transform_indices = @transform_7, window_bounds = array<i64: 2, 128, 128>}]} {
    %c0 = arith.constant 0 : index
    %c0_0 = arith.constant 0 : index
    %c0_1 = arith.constant 0 : index
    %0 = vector.load %arg1[%c0, %c0_0, %c0_1] : memref<2x128x128xf32, #tpu.memory_space<vmem>>, vector<2x128x128xf32>
    %1 = vector.shape_cast %0 : vector<2x128x128xf32> to vector<256x128xf32>
    %2 = arith.truncf %1 : vector<256x128xf32> to vector<256x128xbf16>
    %c0_2 = arith.constant 0 : index
    %c0_3 = arith.constant 0 : index
    %c0_4 = arith.constant 0 : index
    %3 = vector.load %arg2[%c0_2, %c0_3, %c0_4] : memref<2x128x128xf32, #tpu.memory_space<vmem>>, vector<2x128x128xf32>
    %4 = vector.shape_cast %3 : vector<2x128x128xf32> to vector<256x128xf32>
    %5 = arith.truncf %4 : vector<256x128xf32> to vector<256x128xbf16>
    %c0_5 = arith.constant 0 : index
    %c0_6 = arith.constant 0 : index
    %c0_7 = arith.constant 0 : index
    %6 = vector.load %arg3[%c0_5, %c0_6, %c0_7] : memref<2x128x128xf32, #tpu.memory_space<vmem>>, vector<2x128x128xf32>
    %7 = vector.shape_cast %6 : vector<2x128x128xf32> to vector<256x128xf32>
    %8 = arith.truncf %7 : vector<256x128xf32> to vector<256x128xbf16>
    %c0_8 = arith.constant 0 : index
    %c0_9 = arith.constant 0 : index
    %9 = vector.load %arg4[%c0_8, %c0_9] : memref<128x384xbf16, #tpu.memory_space<vmem>>, vector<128x128xbf16>
    %cst = arith.constant dense<0.000000e+00> : vector<256x128xf32>
    %10 = tpu.matmul %2, %9, %cst {dimension_numbers = #tpu.dot_dimension_numbers<[1], [0], [0], [1], [0, 0, 1, 1], [], []>} : vector<256x128xbf16>, vector<128x128xbf16>, vector<256x128xf32> -> vector<256x128xf32>
    %c0_10 = arith.constant 0 : index
    %c0_11 = arith.constant 0 : index
    %11 = vector.load %arg5[%c0_10, %c0_11] : memref<1x384xf32, #tpu.memory_space<vmem>>, vector<1x128xf32>
    %12 = vector.broadcast %11 : vector<1x128xf32> to vector<256x128xf32>
    %13 = arith.addf %10, %12 : vector<256x128xf32>
    %c0_12 = arith.constant 0 : index
    %c128 = arith.constant 128 : index
    %14 = vector.load %arg4[%c0_12, %c128] : memref<128x384xbf16, #tpu.memory_space<vmem>>, vector<128x128xbf16>
    %cst_13 = arith.constant dense<0.000000e+00> : vector<256x128xf32>
    %15 = tpu.matmul %5, %14, %cst_13 {dimension_numbers = #tpu.dot_dimension_numbers<[1], [0], [0], [1], [0, 0, 1, 1], [], []>} : vector<256x128xbf16>, vector<128x128xbf16>, vector<256x128xf32> -> vector<256x128xf32>
    %c0_14 = arith.constant 0 : index
    %c128_15 = arith.constant 128 : index
    %16 = vector.load %arg5[%c0_14, %c128_15] : memref<1x384xf32, #tpu.memory_space<vmem>>, vector<1x128xf32>
    %17 = vector.broadcast %16 : vector<1x128xf32> to vector<256x128xf32>
    %18 = arith.addf %15, %17 : vector<256x128xf32>
    %c0_16 = arith.constant 0 : index
    %c256 = arith.constant 256 : index
    %19 = vector.load %arg4[%c0_16, %c256] : memref<128x384xbf16, #tpu.memory_space<vmem>>, vector<128x128xbf16>
    %cst_17 = arith.constant dense<0.000000e+00> : vector<256x128xf32>
    %20 = tpu.matmul %8, %19, %cst_17 {dimension_numbers = #tpu.dot_dimension_numbers<[1], [0], [0], [1], [0, 0, 1, 1], [], []>} : vector<256x128xbf16>, vector<128x128xbf16>, vector<256x128xf32> -> vector<256x128xf32>
    %c0_18 = arith.constant 0 : index
    %c256_19 = arith.constant 256 : index
    %21 = vector.load %arg5[%c0_18, %c256_19] : memref<1x384xf32, #tpu.memory_space<vmem>>, vector<1x128xf32>
    %22 = vector.broadcast %21 : vector<1x128xf32> to vector<256x128xf32>
    %23 = arith.addf %20, %22 : vector<256x128xf32>
    %24 = vector.extract_strided_slice %13 {offsets = [0, 0], sizes = [128, 32], strides = [1, 1]} : vector<256x128xf32> to vector<128x32xf32>
    %25 = arith.truncf %24 : vector<128x32xf32> to vector<128x32xbf16>
    %26 = vector.extract_strided_slice %18 {offsets = [0, 0], sizes = [128, 32], strides = [1, 1]} : vector<256x128xf32> to vector<128x32xf32>
    %27 = arith.truncf %26 : vector<128x32xf32> to vector<128x32xbf16>
    %28 = vector.extract_strided_slice %23 {offsets = [0, 0], sizes = [128, 32], strides = [1, 1]} : vector<256x128xf32> to vector<128x32xf32>
    %29 = arith.truncf %28 : vector<128x32xf32> to vector<128x32xbf16>
    %cst_20 = arith.constant dense<0.000000e+00> : vector<128x128xf32>
    %30 = tpu.matmul %25, %27, %cst_20 {dimension_numbers = #tpu.dot_dimension_numbers<[1], [1], [0], [0], [0, 0, 1, 0], [], []>} : vector<128x32xbf16>, vector<128x32xbf16>, vector<128x128xf32> -> vector<128x128xf32>
    %cst_21 = arith.constant dense<0xFF800000> : vector<128xf32>
    %31 = vector.multi_reduction <maximumf>, %30, %cst_21 [1] : vector<128x128xf32> to vector<128xf32>
    %32 = vector.shape_cast %31 : vector<128xf32> to vector<128x1xf32>
    %33 = vector.broadcast %32 : vector<128x1xf32> to vector<128x128xf32>
    %34 = arith.subf %30, %33 : vector<128x128xf32>
    %35 = math.exp %34 : vector<128x128xf32>
    %cst_22 = arith.constant dense<0.000000e+00> : vector<128xf32>
    %36 = vector.multi_reduction <add>, %35, %cst_22 [1] : vector<128x128xf32> to vector<128xf32>
    %37 = vector.shape_cast %36 : vector<128xf32> to vector<128x1xf32>
    %38 = arith.truncf %35 : vector<128x128xf32> to vector<128x128xbf16>
    %cst_23 = arith.constant dense<0.000000e+00> : vector<128x32xf32>
    %39 = tpu.matmul %38, %29, %cst_23 {dimension_numbers = #tpu.dot_dimension_numbers<[1], [0], [0], [1], [0, 0, 1, 1], [], []>} : vector<128x128xbf16>, vector<128x32xbf16>, vector<128x32xf32> -> vector<128x32xf32>
    %40 = tpu.reciprocal %37 : vector<128x1xf32> -> vector<128x1xf32>
    %41 = vector.broadcast %40 : vector<128x1xf32> to vector<128x32xf32>
    %42 = arith.mulf %39, %41 : vector<128x32xf32>
    %43 = arith.truncf %42 : vector<128x32xf32> to vector<128x32xbf16>
    %44 = vector.extract_strided_slice %13 {offsets = [0, 32], sizes = [128, 32], strides = [1, 1]} : vector<256x128xf32> to vector<128x32xf32>
    %45 = arith.truncf %44 : vector<128x32xf32> to vector<128x32xbf16>
    %46 = vector.extract_strided_slice %18 {offsets = [0, 32], sizes = [128, 32], strides = [1, 1]} : vector<256x128xf32> to vector<128x32xf32>
    %47 = arith.truncf %46 : vector<128x32xf32> to vector<128x32xbf16>
    %48 = vector.extract_strided_slice %23 {offsets = [0, 32], sizes = [128, 32], strides = [1, 1]} : vector<256x128xf32> to vector<128x32xf32>
    %49 = arith.truncf %48 : vector<128x32xf32> to vector<128x32xbf16>
    %cst_24 = arith.constant dense<0.000000e+00> : vector<128x128xf32>
    %50 = tpu.matmul %45, %47, %cst_24 {dimension_numbers = #tpu.dot_dimension_numbers<[1], [1], [0], [0], [0, 0, 1, 0], [], []>} : vector<128x32xbf16>, vector<128x32xbf16>, vector<128x128xf32> -> vector<128x128xf32>
    %cst_25 = arith.constant dense<0xFF800000> : vector<128xf32>
    %51 = vector.multi_reduction <maximumf>, %50, %cst_25 [1] : vector<128x128xf32> to vector<128xf32>
    %52 = vector.shape_cast %51 : vector<128xf32> to vector<128x1xf32>
    %53 = vector.broadcast %52 : vector<128x1xf32> to vector<128x128xf32>
    %54 = arith.subf %50, %53 : vector<128x128xf32>
    %55 = math.exp %54 : vector<128x128xf32>
    %cst_26 = arith.constant dense<0.000000e+00> : vector<128xf32>
    %56 = vector.multi_reduction <add>, %55, %cst_26 [1] : vector<128x128xf32> to vector<128xf32>
    %57 = vector.shape_cast %56 : vector<128xf32> to vector<128x1xf32>
    %58 = arith.truncf %55 : vector<128x128xf32> to vector<128x128xbf16>
    %cst_27 = arith.constant dense<0.000000e+00> : vector<128x32xf32>
    %59 = tpu.matmul %58, %49, %cst_27 {dimension_numbers = #tpu.dot_dimension_numbers<[1], [0], [0], [1], [0, 0, 1, 1], [], []>} : vector<128x128xbf16>, vector<128x32xbf16>, vector<128x32xf32> -> vector<128x32xf32>
    %60 = tpu.reciprocal %57 : vector<128x1xf32> -> vector<128x1xf32>
    %61 = vector.broadcast %60 : vector<128x1xf32> to vector<128x32xf32>
    %62 = arith.mulf %59, %61 : vector<128x32xf32>
    %63 = arith.truncf %62 : vector<128x32xf32> to vector<128x32xbf16>
    %64 = vector.extract_strided_slice %13 {offsets = [0, 64], sizes = [128, 32], strides = [1, 1]} : vector<256x128xf32> to vector<128x32xf32>
    %65 = arith.truncf %64 : vector<128x32xf32> to vector<128x32xbf16>
    %66 = vector.extract_strided_slice %18 {offsets = [0, 64], sizes = [128, 32], strides = [1, 1]} : vector<256x128xf32> to vector<128x32xf32>
    %67 = arith.truncf %66 : vector<128x32xf32> to vector<128x32xbf16>
    %68 = vector.extract_strided_slice %23 {offsets = [0, 64], sizes = [128, 32], strides = [1, 1]} : vector<256x128xf32> to vector<128x32xf32>
    %69 = arith.truncf %68 : vector<128x32xf32> to vector<128x32xbf16>
    %cst_28 = arith.constant dense<0.000000e+00> : vector<128x128xf32>
    %70 = tpu.matmul %65, %67, %cst_28 {dimension_numbers = #tpu.dot_dimension_numbers<[1], [1], [0], [0], [0, 0, 1, 0], [], []>} : vector<128x32xbf16>, vector<128x32xbf16>, vector<128x128xf32> -> vector<128x128xf32>
    %cst_29 = arith.constant dense<0xFF800000> : vector<128xf32>
    %71 = vector.multi_reduction <maximumf>, %70, %cst_29 [1] : vector<128x128xf32> to vector<128xf32>
    %72 = vector.shape_cast %71 : vector<128xf32> to vector<128x1xf32>
    %73 = vector.broadcast %72 : vector<128x1xf32> to vector<128x128xf32>
    %74 = arith.subf %70, %73 : vector<128x128xf32>
    %75 = math.exp %74 : vector<128x128xf32>
    %cst_30 = arith.constant dense<0.000000e+00> : vector<128xf32>
    %76 = vector.multi_reduction <add>, %75, %cst_30 [1] : vector<128x128xf32> to vector<128xf32>
    %77 = vector.shape_cast %76 : vector<128xf32> to vector<128x1xf32>
    %78 = arith.truncf %75 : vector<128x128xf32> to vector<128x128xbf16>
    %cst_31 = arith.constant dense<0.000000e+00> : vector<128x32xf32>
    %79 = tpu.matmul %78, %69, %cst_31 {dimension_numbers = #tpu.dot_dimension_numbers<[1], [0], [0], [1], [0, 0, 1, 1], [], []>} : vector<128x128xbf16>, vector<128x32xbf16>, vector<128x32xf32> -> vector<128x32xf32>
    %80 = tpu.reciprocal %77 : vector<128x1xf32> -> vector<128x1xf32>
    %81 = vector.broadcast %80 : vector<128x1xf32> to vector<128x32xf32>
    %82 = arith.mulf %79, %81 : vector<128x32xf32>
    %83 = arith.truncf %82 : vector<128x32xf32> to vector<128x32xbf16>
    %84 = vector.extract_strided_slice %13 {offsets = [0, 96], sizes = [128, 32], strides = [1, 1]} : vector<256x128xf32> to vector<128x32xf32>
    %85 = arith.truncf %84 : vector<128x32xf32> to vector<128x32xbf16>
    %86 = vector.extract_strided_slice %18 {offsets = [0, 96], sizes = [128, 32], strides = [1, 1]} : vector<256x128xf32> to vector<128x32xf32>
    %87 = arith.truncf %86 : vector<128x32xf32> to vector<128x32xbf16>
    %88 = vector.extract_strided_slice %23 {offsets = [0, 96], sizes = [128, 32], strides = [1, 1]} : vector<256x128xf32> to vector<128x32xf32>
    %89 = arith.truncf %88 : vector<128x32xf32> to vector<128x32xbf16>
    %cst_32 = arith.constant dense<0.000000e+00> : vector<128x128xf32>
    %90 = tpu.matmul %85, %87, %cst_32 {dimension_numbers = #tpu.dot_dimension_numbers<[1], [1], [0], [0], [0, 0, 1, 0], [], []>} : vector<128x32xbf16>, vector<128x32xbf16>, vector<128x128xf32> -> vector<128x128xf32>
    %cst_33 = arith.constant dense<0xFF800000> : vector<128xf32>
    %91 = vector.multi_reduction <maximumf>, %90, %cst_33 [1] : vector<128x128xf32> to vector<128xf32>
    %92 = vector.shape_cast %91 : vector<128xf32> to vector<128x1xf32>
    %93 = vector.broadcast %92 : vector<128x1xf32> to vector<128x128xf32>
    %94 = arith.subf %90, %93 : vector<128x128xf32>
    %95 = math.exp %94 : vector<128x128xf32>
    %cst_34 = arith.constant dense<0.000000e+00> : vector<128xf32>
    %96 = vector.multi_reduction <add>, %95, %cst_34 [1] : vector<128x128xf32> to vector<128xf32>
    %97 = vector.shape_cast %96 : vector<128xf32> to vector<128x1xf32>
    %98 = arith.truncf %95 : vector<128x128xf32> to vector<128x128xbf16>
    %cst_35 = arith.constant dense<0.000000e+00> : vector<128x32xf32>
    %99 = tpu.matmul %98, %89, %cst_35 {dimension_numbers = #tpu.dot_dimension_numbers<[1], [0], [0], [1], [0, 0, 1, 1], [], []>} : vector<128x128xbf16>, vector<128x32xbf16>, vector<128x32xf32> -> vector<128x32xf32>
    %100 = tpu.reciprocal %97 : vector<128x1xf32> -> vector<128x1xf32>
    %101 = vector.broadcast %100 : vector<128x1xf32> to vector<128x32xf32>
    %102 = arith.mulf %99, %101 : vector<128x32xf32>
    %103 = arith.truncf %102 : vector<128x32xf32> to vector<128x32xbf16>
    %104 = tpu.concatenate %43, %63, %83, %103 in 1 : vector<128x32xbf16>, vector<128x32xbf16>, vector<128x32xbf16>, vector<128x32xbf16> -> vector<128x128xbf16>
    %105 = vector.extract_strided_slice %13 {offsets = [128, 0], sizes = [128, 32], strides = [1, 1]} : vector<256x128xf32> to vector<128x32xf32>
    %106 = arith.truncf %105 : vector<128x32xf32> to vector<128x32xbf16>
    %107 = vector.extract_strided_slice %18 {offsets = [128, 0], sizes = [128, 32], strides = [1, 1]} : vector<256x128xf32> to vector<128x32xf32>
    %108 = arith.truncf %107 : vector<128x32xf32> to vector<128x32xbf16>
    %109 = vector.extract_strided_slice %23 {offsets = [128, 0], sizes = [128, 32], strides = [1, 1]} : vector<256x128xf32> to vector<128x32xf32>
    %110 = arith.truncf %109 : vector<128x32xf32> to vector<128x32xbf16>
    %cst_36 = arith.constant dense<0.000000e+00> : vector<128x128xf32>
    %111 = tpu.matmul %106, %108, %cst_36 {dimension_numbers = #tpu.dot_dimension_numbers<[1], [1], [0], [0], [0, 0, 1, 0], [], []>} : vector<128x32xbf16>, vector<128x32xbf16>, vector<128x128xf32> -> vector<128x128xf32>
    %cst_37 = arith.constant dense<0xFF800000> : vector<128xf32>
    %112 = vector.multi_reduction <maximumf>, %111, %cst_37 [1] : vector<128x128xf32> to vector<128xf32>
    %113 = vector.shape_cast %112 : vector<128xf32> to vector<128x1xf32>
    %114 = vector.broadcast %113 : vector<128x1xf32> to vector<128x128xf32>
    %115 = arith.subf %111, %114 : vector<128x128xf32>
    %116 = math.exp %115 : vector<128x128xf32>
    %cst_38 = arith.constant dense<0.000000e+00> : vector<128xf32>
    %117 = vector.multi_reduction <add>, %116, %cst_38 [1] : vector<128x128xf32> to vector<128xf32>
    %118 = vector.shape_cast %117 : vector<128xf32> to vector<128x1xf32>
    %119 = arith.truncf %116 : vector<128x128xf32> to vector<128x128xbf16>
    %cst_39 = arith.constant dense<0.000000e+00> : vector<128x32xf32>
    %120 = tpu.matmul %119, %110, %cst_39 {dimension_numbers = #tpu.dot_dimension_numbers<[1], [0], [0], [1], [0, 0, 1, 1], [], []>} : vector<128x128xbf16>, vector<128x32xbf16>, vector<128x32xf32> -> vector<128x32xf32>
    %121 = tpu.reciprocal %118 : vector<128x1xf32> -> vector<128x1xf32>
    %122 = vector.broadcast %121 : vector<128x1xf32> to vector<128x32xf32>
    %123 = arith.mulf %120, %122 : vector<128x32xf32>
    %124 = arith.truncf %123 : vector<128x32xf32> to vector<128x32xbf16>
    %125 = vector.extract_strided_slice %13 {offsets = [128, 32], sizes = [128, 32], strides = [1, 1]} : vector<256x128xf32> to vector<128x32xf32>
    %126 = arith.truncf %125 : vector<128x32xf32> to vector<128x32xbf16>
    %127 = vector.extract_strided_slice %18 {offsets = [128, 32], sizes = [128, 32], strides = [1, 1]} : vector<256x128xf32> to vector<128x32xf32>
    %128 = arith.truncf %127 : vector<128x32xf32> to vector<128x32xbf16>
    %129 = vector.extract_strided_slice %23 {offsets = [128, 32], sizes = [128, 32], strides = [1, 1]} : vector<256x128xf32> to vector<128x32xf32>
    %130 = arith.truncf %129 : vector<128x32xf32> to vector<128x32xbf16>
    %cst_40 = arith.constant dense<0.000000e+00> : vector<128x128xf32>
    %131 = tpu.matmul %126, %128, %cst_40 {dimension_numbers = #tpu.dot_dimension_numbers<[1], [1], [0], [0], [0, 0, 1, 0], [], []>} : vector<128x32xbf16>, vector<128x32xbf16>, vector<128x128xf32> -> vector<128x128xf32>
    %cst_41 = arith.constant dense<0xFF800000> : vector<128xf32>
    %132 = vector.multi_reduction <maximumf>, %131, %cst_41 [1] : vector<128x128xf32> to vector<128xf32>
    %133 = vector.shape_cast %132 : vector<128xf32> to vector<128x1xf32>
    %134 = vector.broadcast %133 : vector<128x1xf32> to vector<128x128xf32>
    %135 = arith.subf %131, %134 : vector<128x128xf32>
    %136 = math.exp %135 : vector<128x128xf32>
    %cst_42 = arith.constant dense<0.000000e+00> : vector<128xf32>
    %137 = vector.multi_reduction <add>, %136, %cst_42 [1] : vector<128x128xf32> to vector<128xf32>
    %138 = vector.shape_cast %137 : vector<128xf32> to vector<128x1xf32>
    %139 = arith.truncf %136 : vector<128x128xf32> to vector<128x128xbf16>
    %cst_43 = arith.constant dense<0.000000e+00> : vector<128x32xf32>
    %140 = tpu.matmul %139, %130, %cst_43 {dimension_numbers = #tpu.dot_dimension_numbers<[1], [0], [0], [1], [0, 0, 1, 1], [], []>} : vector<128x128xbf16>, vector<128x32xbf16>, vector<128x32xf32> -> vector<128x32xf32>
    %141 = tpu.reciprocal %138 : vector<128x1xf32> -> vector<128x1xf32>
    %142 = vector.broadcast %141 : vector<128x1xf32> to vector<128x32xf32>
    %143 = arith.mulf %140, %142 : vector<128x32xf32>
    %144 = arith.truncf %143 : vector<128x32xf32> to vector<128x32xbf16>
    %145 = vector.extract_strided_slice %13 {offsets = [128, 64], sizes = [128, 32], strides = [1, 1]} : vector<256x128xf32> to vector<128x32xf32>
    %146 = arith.truncf %145 : vector<128x32xf32> to vector<128x32xbf16>
    %147 = vector.extract_strided_slice %18 {offsets = [128, 64], sizes = [128, 32], strides = [1, 1]} : vector<256x128xf32> to vector<128x32xf32>
    %148 = arith.truncf %147 : vector<128x32xf32> to vector<128x32xbf16>
    %149 = vector.extract_strided_slice %23 {offsets = [128, 64], sizes = [128, 32], strides = [1, 1]} : vector<256x128xf32> to vector<128x32xf32>
    %150 = arith.truncf %149 : vector<128x32xf32> to vector<128x32xbf16>
    %cst_44 = arith.constant dense<0.000000e+00> : vector<128x128xf32>
    %151 = tpu.matmul %146, %148, %cst_44 {dimension_numbers = #tpu.dot_dimension_numbers<[1], [1], [0], [0], [0, 0, 1, 0], [], []>} : vector<128x32xbf16>, vector<128x32xbf16>, vector<128x128xf32> -> vector<128x128xf32>
    %cst_45 = arith.constant dense<0xFF800000> : vector<128xf32>
    %152 = vector.multi_reduction <maximumf>, %151, %cst_45 [1] : vector<128x128xf32> to vector<128xf32>
    %153 = vector.shape_cast %152 : vector<128xf32> to vector<128x1xf32>
    %154 = vector.broadcast %153 : vector<128x1xf32> to vector<128x128xf32>
    %155 = arith.subf %151, %154 : vector<128x128xf32>
    %156 = math.exp %155 : vector<128x128xf32>
    %cst_46 = arith.constant dense<0.000000e+00> : vector<128xf32>
    %157 = vector.multi_reduction <add>, %156, %cst_46 [1] : vector<128x128xf32> to vector<128xf32>
    %158 = vector.shape_cast %157 : vector<128xf32> to vector<128x1xf32>
    %159 = arith.truncf %156 : vector<128x128xf32> to vector<128x128xbf16>
    %cst_47 = arith.constant dense<0.000000e+00> : vector<128x32xf32>
    %160 = tpu.matmul %159, %150, %cst_47 {dimension_numbers = #tpu.dot_dimension_numbers<[1], [0], [0], [1], [0, 0, 1, 1], [], []>} : vector<128x128xbf16>, vector<128x32xbf16>, vector<128x32xf32> -> vector<128x32xf32>
    %161 = tpu.reciprocal %158 : vector<128x1xf32> -> vector<128x1xf32>
    %162 = vector.broadcast %161 : vector<128x1xf32> to vector<128x32xf32>
    %163 = arith.mulf %160, %162 : vector<128x32xf32>
    %164 = arith.truncf %163 : vector<128x32xf32> to vector<128x32xbf16>
    %165 = vector.extract_strided_slice %13 {offsets = [128, 96], sizes = [128, 32], strides = [1, 1]} : vector<256x128xf32> to vector<128x32xf32>
    %166 = arith.truncf %165 : vector<128x32xf32> to vector<128x32xbf16>
    %167 = vector.extract_strided_slice %18 {offsets = [128, 96], sizes = [128, 32], strides = [1, 1]} : vector<256x128xf32> to vector<128x32xf32>
    %168 = arith.truncf %167 : vector<128x32xf32> to vector<128x32xbf16>
    %169 = vector.extract_strided_slice %23 {offsets = [128, 96], sizes = [128, 32], strides = [1, 1]} : vector<256x128xf32> to vector<128x32xf32>
    %170 = arith.truncf %169 : vector<128x32xf32> to vector<128x32xbf16>
    %cst_48 = arith.constant dense<0.000000e+00> : vector<128x128xf32>
    %171 = tpu.matmul %166, %168, %cst_48 {dimension_numbers = #tpu.dot_dimension_numbers<[1], [1], [0], [0], [0, 0, 1, 0], [], []>} : vector<128x32xbf16>, vector<128x32xbf16>, vector<128x128xf32> -> vector<128x128xf32>
    %cst_49 = arith.constant dense<0xFF800000> : vector<128xf32>
    %172 = vector.multi_reduction <maximumf>, %171, %cst_49 [1] : vector<128x128xf32> to vector<128xf32>
    %173 = vector.shape_cast %172 : vector<128xf32> to vector<128x1xf32>
    %174 = vector.broadcast %173 : vector<128x1xf32> to vector<128x128xf32>
    %175 = arith.subf %171, %174 : vector<128x128xf32>
    %176 = math.exp %175 : vector<128x128xf32>
    %cst_50 = arith.constant dense<0.000000e+00> : vector<128xf32>
    %177 = vector.multi_reduction <add>, %176, %cst_50 [1] : vector<128x128xf32> to vector<128xf32>
    %178 = vector.shape_cast %177 : vector<128xf32> to vector<128x1xf32>
    %179 = arith.truncf %176 : vector<128x128xf32> to vector<128x128xbf16>
    %cst_51 = arith.constant dense<0.000000e+00> : vector<128x32xf32>
    %180 = tpu.matmul %179, %170, %cst_51 {dimension_numbers = #tpu.dot_dimension_numbers<[1], [0], [0], [1], [0, 0, 1, 1], [], []>} : vector<128x128xbf16>, vector<128x32xbf16>, vector<128x32xf32> -> vector<128x32xf32>
    %181 = tpu.reciprocal %178 : vector<128x1xf32> -> vector<128x1xf32>
    %182 = vector.broadcast %181 : vector<128x1xf32> to vector<128x32xf32>
    %183 = arith.mulf %180, %182 : vector<128x32xf32>
    %184 = arith.truncf %183 : vector<128x32xf32> to vector<128x32xbf16>
    %185 = tpu.concatenate %124, %144, %164, %184 in 1 : vector<128x32xbf16>, vector<128x32xbf16>, vector<128x32xbf16>, vector<128x32xbf16> -> vector<128x128xbf16>
    %186 = tpu.concatenate %104, %185 in 0 : vector<128x128xbf16>, vector<128x128xbf16> -> vector<256x128xbf16>
    %c0_52 = arith.constant 0 : index
    %c0_53 = arith.constant 0 : index
    %187 = vector.load %arg6[%c0_52, %c0_53] : memref<128x128xbf16, #tpu.memory_space<vmem>>, vector<128x128xbf16>
    %cst_54 = arith.constant dense<0.000000e+00> : vector<256x128xf32>
    %188 = tpu.matmul %186, %187, %cst_54 {dimension_numbers = #tpu.dot_dimension_numbers<[1], [0], [0], [1], [0, 0, 1, 1], [], []>} : vector<256x128xbf16>, vector<128x128xbf16>, vector<256x128xf32> -> vector<256x128xf32>
    %c0_55 = arith.constant 0 : index
    %c0_56 = arith.constant 0 : index
    %189 = vector.load %arg7[%c0_55, %c0_56] : memref<1x128xf32, #tpu.memory_space<vmem>>, vector<1x128xf32>
    %190 = vector.broadcast %189 : vector<1x128xf32> to vector<256x128xf32>
    %191 = arith.addf %188, %190 : vector<256x128xf32>
    %192 = vector.shape_cast %191 : vector<256x128xf32> to vector<2x128x128xf32>
    %c0_57 = arith.constant 0 : index
    %c0_58 = arith.constant 0 : index
    %c0_59 = arith.constant 0 : index
    %193 = vector.load %arg8[%c0_57, %c0_58, %c0_59] : memref<2x128x128xf32, #tpu.memory_space<vmem>>, vector<2x128x128xf32>
    tpu.vector_store %arg8[%c0_57, %c0_58, %c0_59], %192 {strides = array<i32>} : memref<2x128x128xf32, #tpu.memory_space<vmem>>, vector<2x128x128xf32>,
    return
  }
  func.func @transform_0(%arg0: i32) -> (i32, i32, i32) {
    %c0_i32 = arith.constant 0 : i32
    %c0_i32_0 = arith.constant 0 : i32
    %c0_i32_1 = arith.constant 0 : i32
    return %arg0, %c0_i32, %c0_i32_0 : i32, i32, i32
  }
  func.func @transform_1(%arg0: i32) -> (i32, i32, i32) {
    %c0_i32 = arith.constant 0 : i32
    %c0_i32_0 = arith.constant 0 : i32
    %c0_i32_1 = arith.constant 0 : i32
    return %arg0, %c0_i32, %c0_i32_0 : i32, i32, i32
  }
  func.func @transform_2(%arg0: i32) -> (i32, i32, i32) {
    %c0_i32 = arith.constant 0 : i32
    %c0_i32_0 = arith.constant 0 : i32
    %c0_i32_1 = arith.constant 0 : i32
    return %arg0, %c0_i32, %c0_i32_0 : i32, i32, i32
  }
  func.func @transform_3(%arg0: i32) -> (i32, i32) {
    %c0_i32 = arith.constant 0 : i32
    %c0_i32_0 = arith.constant 0 : i32
    %c0_i32_1 = arith.constant 0 : i32
    return %c0_i32, %c0_i32_0 : i32, i32
  }
  func.func @transform_4(%arg0: i32) -> (i32, i32) {
    %c0_i32 = arith.constant 0 : i32
    %c0_i32_0 = arith.constant 0 : i32
    %c0_i32_1 = arith.constant 0 : i32
    return %c0_i32, %c0_i32_0 : i32, i32
  }
  func.func @transform_5(%arg0: i32) -> (i32, i32) {
    %c0_i32 = arith.constant 0 : i32
    %c0_i32_0 = arith.constant 0 : i32
    %c0_i32_1 = arith.constant 0 : i32
    return %c0_i32, %c0_i32_0 : i32, i32
  }
  func.func @transform_6(%arg0: i32) -> (i32, i32) {
    %c0_i32 = arith.constant 0 : i32
    %c0_i32_0 = arith.constant 0 : i32
    %c0_i32_1 = arith.constant 0 : i32
    return %c0_i32, %c0_i32_0 : i32, i32
  }
  func.func @transform_7(%arg0: i32) -> (i32, i32, i32) {
    %c0_i32 = arith.constant 0 : i32
    %c0_i32_0 = arith.constant 0 : i32
    %c0_i32_1 = arith.constant 0 : i32
    return %arg0, %c0_i32, %c0_i32_0 : i32, i32, i32
  }
}

</mosaic_0001>

<bundles_post_ra>
// kernel: tpu_custom_call.1
= control target key start
LH: loop header
LB: loop body
LE: loop exit
PB: predicated region body
PF: predicated region fallthrough
CT: control target
= control target key end

     0   :  { %s12739_s0 = inlined_call_operand.hbm [shape: f32[4,128,128], index: 0, kind: input, shape index: {}]   ;;  %s12740_s1 = inlined_call_operand.hbm [shape: f32[4,128,128], index: 1, kind: input, shape index: {}]   ;;  %s12741_s2 = inlined_call_operand.hbm [shape: f32[4,128,128], index: 2, kind: input, shape index: {}]   ;;  %s12742_s3 = inlined_call_operand.hbm [shape: bf16[128,384], index: 3, kind: input, shape index: {}]   ;;  %s12743_s4 = inlined_call_operand.vmem [shape: f32[1,384], index: 4, kind: input, shape index: {}]   ;;  %s12744_s5 = inlined_call_operand.hbm [shape: bf16[128,128], index: 5, kind: input, shape index: {}]   ;;  %s12745_s6 = inlined_call_operand.vmem [shape: f32[1,128], index: 6, kind: input, shape index: {}]   ;;  %s12746_s7 = inlined_call_operand.hbm [shape: f32[4,128,128], index: 7, kind: output, shape index: {}]  }
   0x1   :  { %12874 = sst [smem:[#allocation142_spill]] %s12740_s1 }
   0x2   :  { %12875 = sst [smem:[#allocation143_spill]] %s12742_s3 }
   0x3   :  { %12876 = sst [smem:[#allocation144_spill]] %s12744_s5 }
   0x4   :  { %12877 = sst [smem:[#allocation145_spill]] %s12746_s7 }
   0x5   :  { %12 = vsyncpa [#allocation3], 0 }
   0x6   :  { %14 = vsyncpa [#allocation3 + $0x1], 0 }
   0x7   :  { %15 = vsyncpa [#allocation6], 0 }
   0x8   :  { %17 = vsyncpa [#allocation6 + $0x1], 0 }
   0x9   :  { %18 = vsyncpa [#allocation9], 0 }
   0xa   :  { %19 = vsyncpa [#allocation4], 0 }
   0xb   :  { %21 = vsyncpa [#allocation4 + $0x1], 0  ;;  %s7690_s24 = smov 0   ;;  %s7692_s25 = smov 0  }
   0xc   :  { %s7694_s26 = smov 0   ;;  %s7696_s27 = smov 0  }
   0xd LB: > { %12878 = sst [smem:[#allocation16_spill]] %s7623_s24  ;;  %s7711_s28 = sadd.s32 4294967295, %s7635_s27   ;;  %s7635_s27 = sphi %s7696_s27, %s13515_s27   ;;  %s7631_s26 = sphi %s7694_s26, %s13519_s26   ;;  %s7627_s25 = sphi %s7692_s25, %s13518_s25   ;;  %s7623_s24 = sphi %s7690_s24, %s13517_s24  }
   0xe   : > { %12879 = sst [smem:[#allocation17_spill]] %s7635_s27  ;;  %s6531_s29 = sadd.s32 4294967294, %s7635_s27  }
   0xf   : > { %p47_p0 = scmp.ne.s32.totalorder %s7627_s25, %s7623_s24  ;;  %p12753_p1 = scmp.eq.s32.totalorder %s7711_s28, 0 }
  0x10   : > { %p207_p2 = scmp.eq.s32.totalorder %s7711_s28, 1  ;;  %p213_p3 = scmp.eq.s32.totalorder %s6531_s29, 1 }
  0x11   : > { %p7720_p4 = por %p12753_p1, %p47_p0  ;;  %p6532_p5 = scmp.ge.s32.totalorder %s7635_s27, 1 }
  0x12   : > { %p7725_p6 = por %p213_p3, %p47_p0  ;;  %p220_p7 = scmp.lt.s32.totalorder %s7635_s27, 3 }
  0x13   : > { %s12883_s3 = sld [smem:[#allocation143_spill]]  ;;  %s7637_s13 = smov [#allocation8]  }
  0x14   : > { %s12881_s8 = scalar_select %p7725_p6, 1, 0 }
  0x15   : > { %p7733_p8 = pnand %p6532_p5, %p220_p7  ;;  %s233_s14 = sshll.u32 %s7637_s13, 4  ;;  %s234_s14 = int_to_ptr.vmem [resolvable:$true] %s233_s14 }
  0x16   : > { %12882 = sst [smem:[#allocation18_spill]] %s12881_s8  ;;  %s7747_s16 = sadd.s32 1, %s7635_s27  }
  0x17   : > { %p6817_p9 = pneg %p7733_p8  ;;  %12886 = sst [smem:[#allocation19_spill]] %s7747_s16 }
  0x18   : > { %s7638_s17 = smov 192   ;;  %s7639_s18 = smov 12  }
  0x19   : > { %s231_s11 = sshll.u32 %s12883_s3, 4  ;;  %p7741_p10 = pnand %p6817_p9, %p12753_p1  ;;  %s232_s11 = int_to_ptr.hbm [resolvable:$true] %s231_s11 }
  0x1a   : > { %s31_s19 = ssub.s32 %s7635_s27, %s7747_s16  ;;  %s34_s20 = sadd.s32 1, %s7631_s26 }
  0x1b   : > { %6820 = dma.hbm_to_vmem [thread:$0]  (!%p7741_p10), %s232_s11, 3072, %s234_s14, [#allocation9], %s7638_s17, %s7638_s17, %s7639_s18  }
  0x1c   : > { %p32_p12 = scmp.eq.s32.totalorder %s31_s19, 0  ;;  %p41_p13 = scmp.ne.s32.totalorder %s7631_s26, %s7627_s25 }
  0x1d   : > { %p42_p0 = scmp.eq.s32.totalorder %s7635_s27, 0  ;;  %p6840_p3 = scmp.lt.s32.totalorder %s7635_s27, 2 }
  0x1e   : > { %s7759_s21 = scalar_select %p32_p12, %s7631_s26, %s34_s20  }
  0x1f   : > { %p43_p5 = por %p42_p0, %p41_p13  ;;  %p7763_p7 = por %p207_p2, %p41_p13 }
  0x20   : > { %12887 = sst [smem:[#allocation20_spill]] %s7759_s21  ;;  %s12747_s23 = sand.u32 1, %s7631_s26  }
  0x21   : > { %s7769_s29 = sshll.u32 %s7635_s27, 8  ;;  %s7773_s9 = sshll.u32 %s12747_s23, 8 }
  0x22   : > { %p7775_p9 = pnand %p6840_p3, %p43_p5  ;;  %s290_s11 = sand.u32 1, %s7635_s27  }
  0x23   : > { %s12890_s1 = sld [smem:[#allocation142_spill]]  ;;  %s294_s18 = scalar_lea.vmem [#allocation5], %s7773_s9 }
  0x24   : > { %s303_s19 = sshll.u32 %s294_s18, 4  ;;  %s12891_s5 = sld [smem:[#allocation144_spill]]  ;;  %s304_s19 = int_to_ptr.vmem [resolvable:$true] %s303_s19 }
  0x25   : > { %s7788_s16 = scalar_lea.sflag [#allocation6], %s290_s11  ;;  %p7445_p12 = pneg %p7775_p9 }
  0x29   : > { %s300_s17 = scalar_lea.hbm %s12890_s1, %s7769_s29 }
  0x2a   : > { %s301_s20 = sshll.u32 %s300_s17, 4  ;;  %s248_s21 = sshll.u32 %s12891_s5, 4  ;;  %s302_s20 = int_to_ptr.hbm [resolvable:$true] %s301_s20  ;;  %s249_s21 = int_to_ptr.hbm [resolvable:$true] %s248_s21 }
  0x2b   : > { %s7441_s8 = sshra.s32 %s302_s20, 4  ;;  %s7448_s17 = scalar_lea.hbm %s12890_s1, 512  ;;  %s7442_s8 = int_to_ptr.hbm [resolvable:$true] %s7441_s8 }
  0x2c   : > { %s7443_s24 = scalar_lea.hbm %s7442_s8, 256  ;;  %p7449_p3 = scmp.lt.s32.totalorder %s7442_s8, %s12890_s1 }
  0x2d   : > { %p7444_p2 = scmp.ne.s32.totalorder %s7442_s8, %s7443_s24  ;;  %p7450_p5 = scmp.lt.s32.totalorder %s7448_s17, %s7443_s24 }
  0x2f   : > { %p7446_p13 = pnand %p7445_p12, %p7444_p2  ;;  %p7451_p11 = por %p7450_p5, %p7449_p3 }
  0x31   : > { %p7447_p0 = pneg %p7446_p13 }
  0x33   : > { %p7452_p1 = pnand %p7451_p11, %p7447_p0 }
  0x35   : > { %7455 = shalt.err (!%p7452_p1)
}
  0x36   : > { %s7640_s3 = smov 128   ;;  %s7641_s23 = smov 8  }
  0x37   : > { %6830 = dma.hbm_to_vmem [thread:$0]  (!%p7775_p9), %s302_s20, 4096, %s304_s19, %s7788_s16, %s7640_s3, %s7640_s3, %s7641_s23  }
  0x38   : > { %s7642_s27 = smov [#allocation10]   ;;  %s7643_s24 = smov 64  }
  0x39   : > { %s250_s8 = sshll.u32 %s7642_s27, 4  ;;  %s7644_s11 = smov 4   ;;  %s251_s8 = int_to_ptr.vmem [resolvable:$true] %s250_s8 }
  0x3a   : > { %6823 = dma.hbm_to_vmem [thread:$0]  (!%p7741_p10), %s249_s21, 1024, %s251_s8, [#allocation9], %s7643_s24, %s7643_s24, %s7644_s11  }
  0x3b   : > { %s277_s17 = scalar_lea.hbm %s12739_s0, %s7769_s29  ;;  %s271_s18 = scalar_lea.vmem [#allocation2], %s7773_s9 }
  0x3c   : > { %s280_s1 = sshll.u32 %s271_s18, 4  ;;  %s278_s5 = sshll.u32 %s277_s17, 4  ;;  %s281_s1 = int_to_ptr.vmem [resolvable:$true] %s280_s1  ;;  %s279_s5 = int_to_ptr.hbm [resolvable:$true] %s278_s5 }
  0x3d   : > { %s12892_s7 = sand.u32 1, %s7631_s26   ;;  %s7501_s20 = sshra.s32 %s279_s5, 4  ;;  %s7502_s20 = int_to_ptr.hbm [resolvable:$true] %s7501_s20 }
  0x3e   : > { %s268_s19 = scalar_lea.sflag [#allocation3], %s12892_s7  ;;  %s7503_s27 = scalar_lea.hbm %s7502_s20, 256 }
  0x3f   : > { %p7504_p1 = scmp.ne.s32.totalorder %s7502_s20, %s7503_s27  ;;  %s7508_s8 = scalar_lea.hbm %s12739_s0, 512 }
  0x40   : > { %p7509_p10 = scmp.lt.s32.totalorder %s7502_s20, %s12739_s0  ;;  %p7510_p13 = scmp.lt.s32.totalorder %s7508_s8, %s7503_s27 }
  0x41   : > { %p7506_p11 = pnand %p7504_p1, %p7445_p12 }
  0x42   : > { %p7511_p0 = por %p7510_p13, %p7509_p10 }
  0x43   : > { %p7507_p2 = pneg %p7506_p11 }
  0x45   : > { %p7512_p3 = pnand %p7511_p0, %p7507_p2 }
  0x47   : > { %7515 = shalt.err (!%p7512_p3)
}
  0x48   : > { %6827 = dma.hbm_to_vmem [thread:$0]  (!%p7775_p9), %s279_s5, 4096, %s281_s1, %s268_s19, %s7640_s3, %s7640_s3, %s7641_s23  }
  0x49   : > { %s323_s14 = scalar_lea.hbm %s12741_s2, %s7769_s29  ;;  %s317_s17 = scalar_lea.vmem [#allocation7], %s7773_s9 }
  0x4a   : > { %s326_s18 = sshll.u32 %s317_s17, 4  ;;  %s324_s20 = sshll.u32 %s323_s14, 4  ;;  %s327_s18 = int_to_ptr.vmem [resolvable:$true] %s326_s18  ;;  %s325_s20 = int_to_ptr.hbm [resolvable:$true] %s324_s20 }
  0x4b   : > { %s7531_s27 = sshra.s32 %s325_s20, 4  ;;  %s7538_s1 = scalar_lea.hbm %s12741_s2, 512  ;;  %s7532_s27 = int_to_ptr.hbm [resolvable:$true] %s7531_s27 }
  0x4c   : > { %s7533_s15 = scalar_lea.hbm %s7532_s27, 256  ;;  %p7539_p2 = scmp.lt.s32.totalorder %s7532_s27, %s12741_s2 }
  0x4d   : > { %p7534_p5 = scmp.ne.s32.totalorder %s7532_s27, %s7533_s15  ;;  %p7540_p10 = scmp.lt.s32.totalorder %s7538_s1, %s7533_s15 }
  0x4f   : > { %p7536_p1 = pnand %p7534_p5, %p7445_p12  ;;  %p7541_p13 = por %p7540_p10, %p7539_p2 }
  0x51   : > { %p7537_p11 = pneg %p7536_p1 }
  0x53   : > { %p7542_p0 = pnand %p7541_p13, %p7537_p11 }
  0x55   : > { %7545 = shalt.err (!%p7542_p0)
}
  0x56   : > { %6833 = dma.hbm_to_vmem [thread:$0]  (!%p7775_p9), %s325_s20, 4096, %s327_s18, %s7788_s16, %s7640_s3, %s7640_s3, %s7641_s23  }
  0x57   : > { %338 = sbr.rel (%p7733_p8) target bundleno = 2698 (0xa8a), region = 48 }
  0x5c   : > { %s7853_s29 = sand.u32 1, %s7627_s25  }
  0x5d   : > { %s7856_s9 = sshll.u32 %s7853_s29, 8  ;;  %s341_s24 = scalar_lea.sflag [#allocation3], %s7853_s29 }
  0x5e   : > { %s7860_s11 = scalar_lea.vmem [#allocation2], %s7856_s9 }
  0x5f   : > { %7606 = dma.done.wait (%p7720_p4), %s341_s24, 4096  }
  0x60   : > { %7608 = vsyncadd (%p7720_p4), %s341_s24, 4294963200  ;;  %s350_s12 = sand.u32 1, %s7711_s28   ;;  %s7868_s10 = scalar_lea.vmem [#allocation5], %s7856_s9 }
  0x61   : > { %s351_s16 = scalar_lea.sflag [#allocation6], %s350_s12 }
  0x62   : > { %7610 = dma.done.wait (%p7720_p4), %s351_s16, 8192  }
  0x63   : > { %7612 = vsyncadd (%p7720_p4), %s351_s16, 4294959104  ;;  %s7875_s3 = scalar_lea.vmem [#allocation7], %s7856_s9  ;;  %p12893_p8 = scmp.eq.s32.totalorder %s7711_s28, 0 }
  0x65   : > { %7614 = dma.done.wait (%p12893_p8), [#allocation9], 4096   ;;  %p12894_p9 = pmov %p12893_p8 }
  0x66   : > { %v6585_v0 = vld [vmem:[#allocation8 + $0xa8] sm:$0xf]  ;;  %v6766_v1 = vld [vmem:[#allocation8 + $0xb0] sm:$0xf0]  ;;  %v6617_v2 = vld [vmem:[#allocation8 + $0xac] sm:$0xf] }
  0x67   : > { %7616 = vsyncadd (%p12894_p9), [#allocation9], 4294963200  ;;  %v6586_v3 = vor.u32 %v6766_v1, %v6585_v0  ;;  %v6774_v4 = vld [vmem:[#allocation8 + $0xb4] sm:$0xf0]  ;;  %v6649_v5 = vld [vmem:[#allocation8 + $0xb0] sm:$0xf] }
  0x68   : > { %v6782_v6 = vld [vmem:[#allocation8 + $0xb8] sm:$0xf0]  ;;  %v6618_v7 = vor.u32 %v6774_v4, %v6617_v2  ;;  %v6581_v9 = vld [vmem:[#allocation8 + $0x90] sm:$0xf]  ;;  %v6613_v11 = vld [vmem:[#allocation8 + $0x94] sm:$0xf] }
  0x69   : > { %v6650_v8 = vor.u32 %v6782_v6, %v6649_v5  ;;  %v6765_v10 = vld [vmem:[#allocation8 + $0x98] sm:$0xf0]  ;;  %632 = vmatpush.bf16.msra.mxu0 %v6586_v3  ;;  %v6773_v13 = vld [vmem:[#allocation8 + $0x9c] sm:$0xf0]  ;;  %v6645_v14 = vld [vmem:[#allocation8 + $0x98] sm:$0xf] }
  0x6a   : > { %v6582_v12 = vor.u32 %v6765_v10, %v6581_v9  ;;  %v6781_v15 = vld [vmem:[#allocation8 + $0xa0] sm:$0xf0]  ;;  %789 = vmatpush.bf16.msra.mxu1 %v6618_v7  ;;  %v6614_v16 = vor.u32 %v6773_v13, %v6613_v11  ;;  %v6577_v18 = vld [vmem:[#allocation8 + $0x78] sm:$0xf]  ;;  %v6609_v20 = vld [vmem:[#allocation8 + $0x7c] sm:$0xf] }
  0x6b   : > { %946 = vmatpush.bf16.msra.mxu2 %v6650_v8  ;;  %v6646_v17 = vor.u32 %v6781_v15, %v6645_v14  ;;  %v6764_v19 = vld [vmem:[#allocation8 + $0x80] sm:$0xf0]  ;;  %v6772_v21 = vld [vmem:[#allocation8 + $0x84] sm:$0xf0]  ;;  %v6641_v22 = vld [vmem:[#allocation8 + $0x80] sm:$0xf]  ;;  %6793 = vmatpush.bf16.msra.mxu3 %v6650_v8 }
  0x6c   : > { %v6780_v23 = vld [vmem:[#allocation8 + $0x88] sm:$0xf0]  ;;  %v6578_v24 = vor.u32 %v6764_v19, %v6577_v18  ;;  %v6610_v25 = vor.u32 %v6772_v21, %v6609_v20  ;;  %v6573_v27 = vld [vmem:[#allocation8 + $0x60] sm:$0xf]  ;;  %v6605_v29 = vld [vmem:[#allocation8 + $0x64] sm:$0xf] }
  0x6d   : > { %633 = vmatpush.bf16.msra.mxu0 %v6582_v12  ;;  %v6642_v26 = vor.u32 %v6780_v23, %v6641_v22  ;;  %v6763_v28 = vld [vmem:[#allocation8 + $0x68] sm:$0xf0]  ;;  %v6771_v30 = vld [vmem:[#allocation8 + $0x6c] sm:$0xf0]  ;;  %v6637_v31 = vld [vmem:[#allocation8 + $0x68] sm:$0xf] }
  0x6e   : > { %790 = vmatpush.bf16.msra.mxu1 %v6614_v16  ;;  %v6779_v32 = vld [vmem:[#allocation8 + $0x70] sm:$0xf0]  ;;  %v6574_v33 = vor.u32 %v6763_v28, %v6573_v27  ;;  %v6606_v34 = vor.u32 %v6771_v30, %v6605_v29  ;;  %v6569_v36 = vld [vmem:[#allocation8 + $0x48] sm:$0xf]  ;;  %v6601_v38 = vld [vmem:[#allocation8 + $0x4c] sm:$0xf] }
  0x6f   : > { %947 = vmatpush.bf16.msra.mxu2 %v6646_v17  ;;  %6794 = vmatpush.bf16.msra.mxu3 %v6646_v17  ;;  %v6638_v35 = vor.u32 %v6779_v32, %v6637_v31  ;;  %v6762_v37 = vld [vmem:[#allocation8 + $0x50] sm:$0xf0]  ;;  %v6770_v39 = vld [vmem:[#allocation8 + $0x54] sm:$0xf0]  ;;  %v6633_v40 = vld [vmem:[#allocation8 + $0x50] sm:$0xf] }
  0x70   : > { %v6778_v41 = vld [vmem:[#allocation8 + $0x58] sm:$0xf0]  ;;  %v6570_v42 = vor.u32 %v6762_v37, %v6569_v36  ;;  %v6602_v43 = vor.u32 %v6770_v39, %v6601_v38  ;;  %v6565_v45 = vld [vmem:[#allocation8 + $0x30] sm:$0xf]  ;;  %v6597_v47 = vld [vmem:[#allocation8 + $0x34] sm:$0xf] }
  0x71   : > { %634 = vmatpush.bf16.msra.mxu0 %v6578_v24  ;;  %v6634_v44 = vor.u32 %v6778_v41, %v6633_v40  ;;  %v6761_v46 = vld [vmem:[#allocation8 + $0x38] sm:$0xf0]  ;;  %v6769_v48 = vld [vmem:[#allocation8 + $0x3c] sm:$0xf0]  ;;  %v6629_v49 = vld [vmem:[#allocation8 + $0x38] sm:$0xf] }
  0x72   : > { %791 = vmatpush.bf16.msra.mxu1 %v6610_v25  ;;  %v6777_v50 = vld [vmem:[#allocation8 + $0x40] sm:$0xf0]  ;;  %v6561_v51 = vld [vmem:[#allocation8 + $0x18] sm:$0xf]  ;;  %v6566_v52 = vor.u32 %v6761_v46, %v6565_v45  ;;  %v6593_v54 = vld [vmem:[#allocation8 + $0x1c] sm:$0xf]  ;;  %v6598_v56 = vor.u32 %v6769_v48, %v6597_v47 }
  0x73   : > { %948 = vmatpush.bf16.msra.mxu2 %v6642_v26  ;;  %6795 = vmatpush.bf16.msra.mxu3 %v6642_v26  ;;  %v6760_v53 = vld [vmem:[#allocation8 + $0x20] sm:$0xf0]  ;;  %v6768_v55 = vld [vmem:[#allocation8 + $0x24] sm:$0xf0]  ;;  %v6630_v57 = vor.u32 %v6777_v50, %v6629_v49  ;;  %v6625_v58 = vld [vmem:[#allocation8 + $0x20] sm:$0xf] }
  0x74   : > { %v6776_v59 = vld [vmem:[#allocation8 + $0x28] sm:$0xf0]  ;;  %v6562_v60 = vor.u32 %v6760_v53, %v6561_v51  ;;  %v6594_v61 = vor.u32 %v6768_v55, %v6593_v54  ;;  %v6557_v63 = vld [vmem:[#allocation8] sm:$0xf]  ;;  %v6589_v1 = vld [vmem:[#allocation8 + $0x4] sm:$0xf] }
  0x75   : > { %635 = vmatpush.bf16.msra.mxu0 %v6574_v33  ;;  %v6626_v62 = vor.u32 %v6776_v59, %v6625_v58  ;;  %v6759_v0 = vld [vmem:[#allocation8 + $0x8] sm:$0xf0]  ;;  %v6767_v2 = vld [vmem:[#allocation8 + $0xc] sm:$0xf0]  ;;  %v6621_v3 = vld [vmem:[#allocation8 + $0x8] sm:$0xf] }
  0x76   : > { %792 = vmatpush.bf16.msra.mxu1 %v6606_v34  ;;  %v6775_v4 = vld [vmem:[#allocation8 + $0x10] sm:$0xf0]  ;;  %v6558_v5 = vor.u32 %v6759_v0, %v6557_v63  ;;  %v420_v6 = vld [vmem:[%s7860_s11] sm:$0xff]  ;;  %v421_v7 = vld [vmem:[%s7860_s11 + $0x8] sm:$0xff]  ;;  %v6590_v9 = vor.u32 %v6767_v2, %v6589_v1  ;;  %s7645_s14 = smov 96   ;;  %s7646_s17 = smov 32  }
  0x77   : > { %949 = vmatpush.bf16.msra.mxu2 %v6638_v35  ;;  %6796 = vmatpush.bf16.msra.mxu3 %v6638_v35  ;;  %v468_v8 = vld [vmem:[%s7868_s10] sm:$0xff]  ;;  %v6622_v10 = vor.u32 %v6775_v4, %v6621_v3  ;;  %v469_v11 = vld [vmem:[%s7868_s10 + $0x8] sm:$0xff]  ;;  %v452_v14 = vpack.c.bf16 %v421_v7, %v420_v6  ;;  %v422_v17 = vld [vmem:[%s7860_s11 + $0x10] sm:$0xff]  ;;  %s7647_s18 = smov 64   ;;  %vm1059_vm0 = vcmask 261120   ;;  %s10559_s12 = scalar_lea.vmem [#allocation11], %s7856_s9 }
  0x78   : > { %v516_v12 = vld [vmem:[%s7875_s3] sm:$0xff]  ;;  %v517_v13 = vld [vmem:[%s7875_s3 + $0x8] sm:$0xff]  ;;  %v500_v15 = vpack.c.bf16 %v469_v11, %v468_v8  ;;  %v423_v18 = vld [vmem:[%s7860_s11 + $0x18] sm:$0xff]  ;;  %s6792_s7 = sshll.u32 %s7711_s28, 8  ;;  %s6393_s20 = sshll.u32 %s10559_s12, 4  ;;  %s6394_s20 = int_to_ptr.vmem [resolvable:$true] %s6393_s20 }
  0x79   : > { %636 = vmatpush.bf16.msra.mxu0 %v6570_v42  ;;  %v548_v16 = vpack.c.bf16 %v517_v13, %v516_v12  ;;  %v470_v19 = vld [vmem:[%s7868_s10 + $0x10] sm:$0xff]  ;;  %v471_v20 = vld [vmem:[%s7868_s10 + $0x18] sm:$0xff]  ;;  %v453_v23 = vpack.c.bf16 %v423_v18, %v422_v17  ;;  %v532_v26 = vld [vmem:[%s7875_s3 + $0x80] sm:$0xff]  ;;  %s6380_s15 = scalar_lea.sflag [#allocation4], %s7853_s29 }
  0x7a   : > { %793 = vmatpush.bf16.msra.mxu1 %v6602_v43  ;;  %v518_v21 = vld [vmem:[%s7875_s3 + $0x10] sm:$0xff]  ;;  %v519_v22 = vld [vmem:[%s7875_s3 + $0x18] sm:$0xff]  ;;  %v501_v24 = vpack.c.bf16 %v471_v20, %v470_v19  ;;  %v533_v27 = vld [vmem:[%s7875_s3 + $0x88] sm:$0xff] }
  0x7b   : > { %950 = vmatpush.bf16.msra.mxu2 %v6634_v44  ;;  %6797 = vmatpush.bf16.msra.mxu3 %v6634_v44  ;;  %v549_v25 = vpack.c.bf16 %v519_v22, %v518_v21  ;;  %v556_v28 = vpack.c.bf16 %v533_v27, %v532_v26  ;;  %v424_v29 = vld [vmem:[%s7860_s11 + $0x20] sm:$0xff]  ;;  %v425_v30 = vld [vmem:[%s7860_s11 + $0x28] sm:$0xff]  ;;  %v534_v38 = vld [vmem:[%s7875_s3 + $0x90] sm:$0xff] }
  0x7c   : > { %v472_v31 = vld [vmem:[%s7868_s10 + $0x20] sm:$0xff]  ;;  %v473_v32 = vld [vmem:[%s7868_s10 + $0x28] sm:$0xff]  ;;  %v454_v35 = vpack.c.bf16 %v425_v30, %v424_v29  ;;  %v535_v39 = vld [vmem:[%s7875_s3 + $0x98] sm:$0xff] }
  0x7d   : > { %637 = vmatpush.bf16.msra.mxu0 %v6566_v52  ;;  %v520_v33 = vld [vmem:[%s7875_s3 + $0x20] sm:$0xff]  ;;  %v521_v34 = vld [vmem:[%s7875_s3 + $0x28] sm:$0xff]  ;;  %v502_v36 = vpack.c.bf16 %v473_v32, %v472_v31  ;;  %v557_v40 = vpack.c.bf16 %v535_v39, %v534_v38  ;;  %v474_v41 = vld [vmem:[%s7868_s10 + $0x30] sm:$0xff] }
  0x7e   : > { %794 = vmatpush.bf16.msra.mxu1 %v6598_v56  ;;  %v550_v37 = vpack.c.bf16 %v521_v34, %v520_v33  ;;  %v426_v42 = vld [vmem:[%s7860_s11 + $0x30] sm:$0xff]  ;;  %v427_v43 = vld [vmem:[%s7860_s11 + $0x38] sm:$0xff]  ;;  %v536_v50 = vld [vmem:[%s7875_s3 + $0xa0] sm:$0xff] }
  0x7f   : > { %951 = vmatpush.bf16.msra.mxu2 %v6630_v57  ;;  %6798 = vmatpush.bf16.msra.mxu3 %v6630_v57  ;;  %v475_v44 = vld [vmem:[%s7868_s10 + $0x38] sm:$0xff]  ;;  %v522_v45 = vld [vmem:[%s7875_s3 + $0x30] sm:$0xff]  ;;  %v455_v47 = vpack.c.bf16 %v427_v43, %v426_v42  ;;  %v537_v51 = vld [vmem:[%s7875_s3 + $0xa8] sm:$0xff] }
  0x80   : > { %v523_v46 = vld [vmem:[%s7875_s3 + $0x38] sm:$0xff]  ;;  %v503_v48 = vpack.c.bf16 %v475_v44, %v474_v41  ;;  %v558_v52 = vpack.c.bf16 %v537_v51, %v536_v50  ;;  %v476_v53 = vld [vmem:[%s7868_s10 + $0x40] sm:$0xff]  ;;  %v429_v55 = vld [vmem:[%s7860_s11 + $0x48] sm:$0xff] }
  0x81   : > { %638 = vmatpush.bf16.msra.mxu0 %v6562_v60  ;;  %v551_v49 = vpack.c.bf16 %v523_v46, %v522_v45  ;;  %v428_v54 = vld [vmem:[%s7860_s11 + $0x40] sm:$0xff]  ;;  %v477_v56 = vld [vmem:[%s7868_s10 + $0x48] sm:$0xff]  ;;  %v539_v63 = vld [vmem:[%s7875_s3 + $0xb8] sm:$0xff] }
  0x82   : > { %795 = vmatpush.bf16.msra.mxu1 %v6594_v61  ;;  %v524_v57 = vld [vmem:[%s7875_s3 + $0x40] sm:$0xff]  ;;  %v525_v58 = vld [vmem:[%s7875_s3 + $0x48] sm:$0xff]  ;;  %v456_v59 = vpack.c.bf16 %v429_v55, %v428_v54  ;;  %v504_v60 = vpack.c.bf16 %v477_v56, %v476_v53  ;;  %v478_v1 = vld [vmem:[%s7868_s10 + $0x50] sm:$0xff] }
  0x83   : > { %952 = vmatpush.bf16.msra.mxu2 %v6626_v62  ;;  %6799 = vmatpush.bf16.msra.mxu3 %v6626_v62  ;;  %v552_v61 = vpack.c.bf16 %v525_v58, %v524_v57  ;;  %v538_v62 = vld [vmem:[%s7875_s3 + $0xb0] sm:$0xff]  ;;  %v431_v3 = vld [vmem:[%s7860_s11 + $0x58] sm:$0xff]  ;;  %v541_v11 = vld [vmem:[%s7875_s3 + $0xc8] sm:$0xff] }
  0x84   : > { %v559_v0 = vpack.c.bf16 %v539_v63, %v538_v62  ;;  %v430_v2 = vld [vmem:[%s7860_s11 + $0x50] sm:$0xff]  ;;  %v479_v4 = vld [vmem:[%s7868_s10 + $0x58] sm:$0xff]  ;;  %v480_v13 = vld [vmem:[%s7868_s10 + $0x60] sm:$0xff] }
  0x85   : > { %639 = vmatpush.bf16.msra.mxu0 %v6558_v5  ;;  %v526_v5 = vld [vmem:[%s7875_s3 + $0x50] sm:$0xff]  ;;  %v527_v6 = vld [vmem:[%s7875_s3 + $0x58] sm:$0xff]  ;;  %v457_v7 = vpack.c.bf16 %v431_v3, %v430_v2  ;;  %v505_v8 = vpack.c.bf16 %v479_v4, %v478_v1  ;;  %v433_v17 = vld [vmem:[%s7860_s11 + $0x68] sm:$0xff] }
  0x86   : > { %796 = vmatpush.bf16.msra.mxu1 %v6590_v9  ;;  %v553_v9 = vpack.c.bf16 %v527_v6, %v526_v5  ;;  %v542_v19 = vld [vmem:[%s7875_s3 + $0xd0] sm:$0xff]  ;;  %v543_v20 = vld [vmem:[%s7875_s3 + $0xd8] sm:$0xff]  ;;  %v545_v26 = vld [vmem:[%s7875_s3 + $0xe8] sm:$0xff] }
  0x87   : > { %953 = vmatpush.bf16.msra.mxu2 %v6622_v10  ;;  %6800 = vmatpush.bf16.msra.mxu3 %v6622_v10  ;;  %v540_v10 = vld [vmem:[%s7875_s3 + $0xc0] sm:$0xff]  ;;  %v561_v21 = vpack.c.bf16 %v543_v20, %v542_v19  ;;  %v482_v22 = vld [vmem:[%s7868_s10 + $0x70] sm:$0xff]  ;;  %v529_v29 = vld [vmem:[%s7875_s3 + $0x68] sm:$0xff] }
  0x88   : > { %640 = vmatmul.bf16.vlgmr.msra.gmra.mxu0 %v452_v14  ;;  %v560_v12 = vpack.c.bf16 %v541_v11, %v540_v10  ;;  %v481_v14 = vld [vmem:[%s7868_s10 + $0x68] sm:$0xff]  ;;  %v7942_v33 = vld [vmem:[%s12743_s4] ss:$0 sm:$0xff]  ;;  %v530_v34 = vld [vmem:[%s7875_s3 + $0x70] sm:$0xff] }
  0x89   : > { %797 = vmatmul.bf16.vlgmr.msra.gmra.mxu1 %v500_v15  ;;  %v506_v15 = vpack.c.bf16 %v481_v14, %v480_v13  ;;  %v434_v42 = vld [vmem:[%s7860_s11 + $0x70] sm:$0xff]  ;;  %v435_v43 = vld [vmem:[%s7860_s11 + $0x78] sm:$0xff]  ;;  %v484_v6 = vld [vmem:[%s7868_s10 + $0x80] sm:$0xff] }
  0x8a   : > { %954 = vmatmul.bf16.vlgmr.msra.gmra.mxu2 %v548_v16  ;;  %994 = vmatmul.bf16.vlgmr.msra.gmra.mxu3 %v556_v28  ;;  %v432_v16 = vld [vmem:[%s7860_s11 + $0x60] sm:$0xff] }
  0x8b   : > { %v458_v18 = vpack.c.bf16 %v433_v17, %v432_v16  ;;  %v528_v28 = vld [vmem:[%s7875_s3 + $0x60] sm:$0xff]  ;;  %v438_v16 = vld [vmem:[%s7860_s11 + $0x90] sm:$0xff]  ;;  %v439_v17 = vld [vmem:[%s7860_s11 + $0x98] sm:$0xff] }
  0x8c   : > { %v554_v30 = vpack.c.bf16 %v529_v29, %v528_v28  ;;  %v546_v29 = vld [vmem:[%s7875_s3 + $0xf0] sm:$0xff] }
  0x98   : > { %645 = vmatmul.bf16.gmra.mxu0 %v453_v23  ;;  %v483_v23 = vld [vmem:[%s7868_s10 + $0x78] sm:$0xff] }
  0x99   : > { %802 = vmatmul.bf16.gmra.mxu1 %v501_v24  ;;  %v507_v24 = vpack.c.bf16 %v483_v23, %v482_v22 }
  0x9a   : > { %959 = vmatmul.bf16.gmra.mxu2 %v549_v25  ;;  %999 = vmatmul.bf16.gmra.mxu3 %v557_v40  ;;  %v544_v25 = vld [vmem:[%s7875_s3 + $0xe0] sm:$0xff] }
  0x9b   : > { %v562_v27 = vpack.c.bf16 %v545_v26, %v544_v25  ;;  %v486_v26 = vld [vmem:[%s7868_s10 + $0x90] sm:$0xff] }
  0xa8   : > { %650 = vmatmul.bf16.gmra.mxu0 %v454_v35  ;;  %v531_v35 = vld [vmem:[%s7875_s3 + $0x78] sm:$0xff] }
  0xa9   : > { %807 = vmatmul.bf16.gmra.mxu1 %v502_v36  ;;  %v7949_v36 = vld [vmem:[%s12743_s4 + $0x1] ss:$0 sm:$0xff] }
  0xaa   : > { %964 = vmatmul.bf16.gmra.mxu2 %v550_v37  ;;  %1004 = vmatmul.bf16.gmra.mxu3 %v558_v52  ;;  %v555_v37 = vpack.c.bf16 %v531_v35, %v530_v34  ;;  %v7970_v52 = vld [vmem:[%s12743_s4 + $0x2] ss:$0 sm:$0xff] }
  0xab   : > { %v440_v35 = vld [vmem:[%s7860_s11 + $0xa0] sm:$0xff] }
  0xb8   : > { %655 = vmatmul.bf16.gmra.mxu0 %v455_v47  ;;  %v459_v47 = vpack.c.bf16 %v435_v43, %v434_v42 }
  0xb9   : > { %812 = vmatmul.bf16.gmra.mxu1 %v503_v48 }
  0xba   : > { %969 = vmatmul.bf16.gmra.mxu2 %v551_v49  ;;  %1009 = vmatmul.bf16.gmra.mxu3 %v559_v0 }
  0xc8   : > { %660 = vmatmul.bf16.gmra.mxu0 %v456_v59 }
  0xc9   : > { %817 = vmatmul.bf16.gmra.mxu1 %v504_v60  ;;  %v436_v60 = vld [vmem:[%s7860_s11 + $0x80] sm:$0xff] }
  0xca   : > { %974 = vmatmul.bf16.gmra.mxu2 %v552_v61  ;;  %1014 = vmatmul.bf16.gmra.mxu3 %v560_v12  ;;  %v437_v61 = vld [vmem:[%s7860_s11 + $0x88] sm:$0xff] }
  0xcb   : > { %v460_v62 = vpack.c.bf16 %v437_v61, %v436_v60 }
  0xd8   : > { %665 = vmatmul.bf16.gmra.mxu0 %v457_v7  ;;  %v485_v7 = vld [vmem:[%s7868_s10 + $0x88] sm:$0xff] }
  0xd9   : > { %822 = vmatmul.bf16.gmra.mxu1 %v505_v8 }
  0xda   : > { %979 = vmatmul.bf16.gmra.mxu2 %v553_v9  ;;  %1019 = vmatmul.bf16.gmra.mxu3 %v561_v21  ;;  %v508_v9 = vpack.c.bf16 %v485_v7, %v484_v6  ;;  %v490_v7 = vld [vmem:[%s7868_s10 + $0xb0] sm:$0xff] }
  0xe8   : > { %670 = vmatmul.bf16.gmra.mxu0 %v458_v18  ;;  %v461_v18 = vpack.c.bf16 %v439_v17, %v438_v16 }
  0xe9   : > { %827 = vmatmul.bf16.gmra.mxu1 %v506_v15 }
  0xea   : > { %1024 = vmatmul.bf16.gmra.mxu3 %v562_v27  ;;  %984 = vmatmul.bf16.gmra.mxu2 %v554_v30  ;;  %v487_v27 = vld [vmem:[%s7868_s10 + $0x98] sm:$0xff] }
  0xeb   : > { %v509_v28 = vpack.c.bf16 %v487_v27, %v486_v26  ;;  %v547_v30 = vld [vmem:[%s7875_s3 + $0xf8] sm:$0xff] }
  0xf8   : > { %675 = vmatmul.bf16.gmra.mxu0 %v459_v47 }
  0xf9   : > { %832 = vmatmul.bf16.gmra.mxu1 %v507_v24 }
  0xfa   : > { %989 = vmatmul.bf16.gmra.mxu2 %v555_v37  ;;  %v441_v37 = vld [vmem:[%s7860_s11 + $0xa8] sm:$0xff] }
 0x105   : > { %v641_v31 = vpop.f32.mrf.mxu0 }
 0x106   : > { %v798_v32 = vpop.f32.mrf.mxu1  ;;  %v642_v39 = vadd.f32 %v7942_v33, %v641_v31  ;;  %v563_v31 = vpack.c.bf16 %v547_v30, %v546_v29  ;;  %v492_v30 = vld [vmem:[%s7868_s10 + $0xc0] sm:$0xff] }
 0x107   : > { %v799_v44 = vadd.f32 %v7949_v36, %v798_v32 }
 0x108   : > { %680 = vmatmul.bf16.gmra.mxu0 %v460_v62  ;;  %1029 = vmatmul.bf16.gmra.mxu3 %v563_v31  ;;  %v493_v31 = vld [vmem:[%s7868_s10 + $0xc8] sm:$0xff] }
 0x109   : > { %837 = vmatmul.bf16.gmra.mxu1 %v508_v9  ;;  %v491_v9 = vld [vmem:[%s7868_s10 + $0xb8] sm:$0xff] }
 0x10d   : > { %v643_v38 = vpop.f32.mrf.mxu0  ;;  %v955_v46 = vpop.f32.mrf.mxu2 }
 0x10e   : > { %v644_v40 = vadd.f32 %v7942_v33, %v643_v38  ;;  %v800_v41 = vpop.f32.mrf.mxu1  ;;  %v956_v54 = vadd.f32 %v7970_v52, %v955_v46  ;;  %v7996_v8 = vpop.f32.mrf.mxu3 }
 0x10f   : > { %v801_v45 = vadd.f32 %v7949_v36, %v800_v41  ;;  %12895 = vst [vmem:[#allocation21_spill] sm:$0xff] %v7996_v8 }
 0x110   : > { %v7957_v48 = vpack.c.bf16 %v644_v40, %v642_v39  ;;  %v462_v39 = vpack.c.bf16 %v441_v37, %v440_v35  ;;  %v512_v35 = vpack.c.bf16 %v493_v31, %v492_v30 }
 0x111   : > { %v7959_v49 = vpack.c.bf16 %v801_v45, %v799_v44 }
 0x112   : > { %1590 = vrot.lane.b32.xlu2 %v7957_v48, %s7645_s14 }
 0x113   : > { %2778 = vrot.lane.b32.xlu0 %v7959_v49, %s7646_s17  ;;  %2200 = vrot.lane.b32.xlu1 %v7959_v49, %s7647_s18 }
 0x115   : > { %v646_v50 = vpop.f32.mrf.mxu0  ;;  %v957_v53 = vpop.f32.mrf.mxu2 }
 0x116   : > { %v803_v51 = vpop.f32.mrf.mxu1  ;;  %v958_v55 = vadd.f32 %v7970_v52, %v957_v53  ;;  %v647_v57 = vadd.f32 %v7942_v33, %v646_v50  ;;  %v8012_v20 = vpop.f32.mrf.mxu3  ;;  %v488_v50 = vld [vmem:[%s7868_s10 + $0xa0] sm:$0xff] }
 0x117   : > { %v804_v2 = vadd.f32 %v7949_v36, %v803_v51  ;;  %12896 = vst [vmem:[#allocation22_spill] sm:$0xff] %v8012_v20  ;;  %v489_v51 = vld [vmem:[%s7868_s10 + $0xa8] sm:$0xff] }
 0x118   : > { %v7984_v0 = vpack.c.bf16 %v958_v55, %v956_v54  ;;  %685 = vmatmul.bf16.gmra.mxu0 %v461_v18  ;;  %v510_v53 = vpack.c.bf16 %v489_v51, %v488_v50 }
 0x119   : > { %842 = vmatmul.bf16.gmra.mxu1 %v509_v28 }
 0x11a   : > { %1614 = vrot.lane.b32.xlu2 %v7959_v49, %s7645_s14 }
 0x11b   : > { %2762 = vrot.lane.b32.xlu1 %v7957_v48, %s7646_s17 }
 0x11d   : > { %v648_v56 = vpop.f32.mrf.mxu0  ;;  %v960_v1 = vpop.f32.mrf.mxu2 }
 0x11e   : > { %v649_v58 = vadd.f32 %v7942_v33, %v648_v56  ;;  %v805_v59 = vpop.f32.mrf.mxu1  ;;  %v961_v21 = vadd.f32 %v7970_v52, %v960_v1  ;;  %v8034_v32 = vpop.f32.mrf.mxu3 }
 0x11f   : > { %v806_v3 = vadd.f32 %v7949_v36, %v805_v59  ;;  %12897 = vst [vmem:[#allocation23_spill] sm:$0xff] %v8034_v32  ;;  %v443_v59 = vld [vmem:[%s7860_s11 + $0xb8] sm:$0xff] }
 0x120   : > { %v7982_v63 = vpack.c.bf16 %v649_v58, %v647_v57  ;;  %v442_v58 = vld [vmem:[%s7860_s11 + $0xb0] sm:$0xff] }
 0x121   : > { %v7998_v10 = vpack.c.bf16 %v806_v3, %v804_v2  ;;  %v463_v61 = vpack.c.bf16 %v443_v59, %v442_v58 }
 0x122   : > { %1592 = vrot.lane.b32.xlu0 %v7982_v63, %s7645_s14  ;;  %2184 = vrot.lane.b32.xlu2 %v7957_v48, %s7647_s18 }
 0x123   : > { %1855 = vrot.lane.b32.xlu1 %v7984_v0, %s7645_s14 }
 0x125   : > { %v651_v4 = vpop.f32.mrf.mxu0  ;;  %v962_v11 = vpop.f32.mrf.mxu2 }
 0x126   : > { %v808_v5 = vpop.f32.mrf.mxu1  ;;  %v652_v13 = vadd.f32 %v7942_v33, %v651_v4  ;;  %v963_v22 = vadd.f32 %v7970_v52, %v962_v11  ;;  %v8048_v45 = vpop.f32.mrf.mxu3 }
 0x127   : > { %v809_v43 = vadd.f32 %v7949_v36, %v808_v5  ;;  %12898 = vst [vmem:[#allocation24_spill] sm:$0xff] %v8048_v45 }
 0x128   : > { %v8022_v25 = vpack.c.bf16 %v963_v22, %v961_v21  ;;  %690 = vmatmul.bf16.gmra.mxu0 %v462_v39  ;;  %v444_v21 = vld [vmem:[%s7860_s11 + $0xc0] sm:$0xff]  ;;  %v445_v22 = vld [vmem:[%s7860_s11 + $0xc8] sm:$0xff] }
 0x129   : > { %847 = vmatmul.bf16.gmra.mxu1 %v510_v53 }
 0x12a   : > { %2186 = vrot.lane.b32.xlu0 %v7982_v63, %s7647_s18  ;;  %2433 = vrot.lane.b32.xlu2 %v7984_v0, %s7647_s18 }
 0x12b   : > { %1616 = vrot.lane.b32.xlu1 %v7998_v10, %s7645_s14 }
 0x12d   : > { %v653_v12 = vpop.f32.mrf.mxu0  ;;  %v965_v23 = vpop.f32.mrf.mxu2 }
 0x12e   : > { %v654_v14 = vadd.f32 %v7942_v33, %v653_v12  ;;  %v810_v15 = vpop.f32.mrf.mxu1  ;;  %v966_v40 = vadd.f32 %v7970_v52, %v965_v23  ;;  %v8064_v60 = vpop.f32.mrf.mxu3  ;;  %v511_v12 = vpack.c.bf16 %v491_v9, %v490_v7  ;;  %v464_v23 = vpack.c.bf16 %v445_v22, %v444_v21 }
 0x12f   : > { %v811_v44 = vadd.f32 %v7949_v36, %v810_v15  ;;  %12899 = vst [vmem:[#allocation25_spill] sm:$0xff] %v8064_v60 }
 0x130   : > { %v8010_v19 = vpack.c.bf16 %v654_v14, %v652_v13 }
 0x131   : > { %v8054_v54 = vpack.c.bf16 %v811_v44, %v809_v43  ;;  %v446_v43 = vld [vmem:[%s7860_s11 + $0xd0] sm:$0xff]  ;;  %v447_v44 = vld [vmem:[%s7860_s11 + $0xd8] sm:$0xff] }
 0x132   : > { %2764 = vrot.lane.b32.xlu0 %v7982_v63, %s7646_s17  ;;  %3011 = vrot.lane.b32.xlu2 %v7984_v0, %s7646_s17  ;;  %v465_v51 = vpack.c.bf16 %v447_v44, %v446_v43 }
 0x133   : > { %1594 = vrot.lane.b32.xlu1 %v8010_v19, %s7645_s14 }
 0x135   : > { %v967_v38 = vpop.f32.mrf.mxu2  ;;  %v656_v42 = vpop.f32.mrf.mxu0 }
 0x136   : > { %v813_v24 = vpop.f32.mrf.mxu1  ;;  %v968_v41 = vadd.f32 %v7970_v52, %v967_v38  ;;  %v657_v62 = vadd.f32 %v7942_v33, %v656_v42  ;;  %v8084_v14 = vpop.f32.mrf.mxu3 }
 0x137   : > { %v814_v2 = vadd.f32 %v7949_v36, %v813_v24  ;;  %12900 = vst [vmem:[#allocation26_spill] sm:$0xff] %v8084_v14 }
 0x138   : > { %v8050_v47 = vpack.c.bf16 %v968_v41, %v966_v40  ;;  %695 = vmatmul.bf16.gmra.mxu0 %v463_v61 }
 0x139   : > { %852 = vmatmul.bf16.gmra.mxu1 %v511_v12 }
 0x13a   : > { %1857 = vrot.lane.b32.xlu0 %v8022_v25, %s7645_s14  ;;  %2202 = vrot.lane.b32.xlu2 %v7998_v10, %s7647_s18 }
 0x13b   : > { %2188 = vrot.lane.b32.xlu1 %v8010_v19, %s7647_s18 }
 0x13d   : > { %v658_v55 = vpop.f32.mrf.mxu0  ;;  %v970_v56 = vpop.f32.mrf.mxu2 }
 0x13e   : > { %v815_v34 = vpop.f32.mrf.mxu1  ;;  %v659_v1 = vadd.f32 %v7942_v33, %v658_v55  ;;  %v971_v15 = vadd.f32 %v7970_v52, %v970_v56  ;;  %v1010_v26 = vpop.f32.mrf.mxu3 }
 0x13f   : > { %v816_v3 = vadd.f32 %v7949_v36, %v815_v34  ;;  %v1011_v55 = vadd.f32 %v7970_v52, %v1010_v26 }
 0x140   : > { %v8076_v4 = vpack.c.bf16 %v659_v1, %v657_v62  ;;  %v494_v62 = vld [vmem:[%s7868_s10 + $0xd0] sm:$0xff]  ;;  %v495_v1 = vld [vmem:[%s7868_s10 + $0xd8] sm:$0xff] }
 0x141   : > { %v8082_v13 = vpack.c.bf16 %v816_v3, %v814_v2 }
 0x142   : > { %2435 = vrot.lane.b32.xlu0 %v8022_v25, %s7647_s18  ;;  %2780 = vrot.lane.b32.xlu2 %v7998_v10, %s7646_s17 }
 0x143   : > { %2766 = vrot.lane.b32.xlu1 %v8010_v19, %s7646_s17 }
 0x145   : > { %v661_v6 = vpop.f32.mrf.mxu0  ;;  %v972_v11 = vpop.f32.mrf.mxu2 }
 0x146   : > { %v818_v46 = vpop.f32.mrf.mxu1  ;;  %v973_v16 = vadd.f32 %v7970_v52, %v972_v11  ;;  %v662_v40 = vadd.f32 %v7942_v33, %v661_v6  ;;  %v1012_v42 = vpop.f32.mrf.mxu3  ;;  %v513_v6 = vpack.c.bf16 %v495_v1, %v494_v62 }
 0x147   : > { %v819_v28 = vadd.f32 %v7949_v36, %v818_v46  ;;  %v1013_v56 = vadd.f32 %v7970_v52, %v1012_v42 }
 0x148   : > { %v8096_v18 = vpack.c.bf16 %v973_v16, %v971_v15  ;;  %700 = vmatmul.bf16.gmra.mxu0 %v464_v23  ;;  %v448_v23 = vld [vmem:[%s7860_s11 + $0xe0] sm:$0xff] }
 0x149   : > { %857 = vmatmul.bf16.gmra.mxu1 %v512_v35  ;;  %v8140_v3 = vpack.c.bf16 %v1013_v56, %v1011_v55 }
 0x14a   : > { %3013 = vrot.lane.b32.xlu0 %v8022_v25, %s7646_s17  ;;  %1859 = vrot.lane.b32.xlu2 %v8050_v47, %s7645_s14 }
 0x14b   : > { %2782 = vrot.lane.b32.xlu1 %v8054_v54, %s7646_s17  ;;  %12901 = vst [vmem:[#allocation27_spill] sm:$0xff] %v8140_v3 }
 0x14d   : > { %v663_v24 = vpop.f32.mrf.mxu0  ;;  %v975_v27 = vpop.f32.mrf.mxu2 }
 0x14e   : > { %v820_v57 = vpop.f32.mrf.mxu1  ;;  %v664_v41 = vadd.f32 %v7942_v33, %v663_v24  ;;  %v976_v59 = vadd.f32 %v7970_v52, %v975_v27  ;;  %v8142_v7 = vpop.f32.mrf.mxu3  ;;  %v449_v24 = vld [vmem:[%s7860_s11 + $0xe8] sm:$0xff] }
 0x14f   : > { %v821_v29 = vadd.f32 %v7949_v36, %v820_v57  ;;  %v466_v27 = vpack.c.bf16 %v449_v24, %v448_v23 }
 0x150   : > { %v8124_v53 = vpack.c.bf16 %v664_v41, %v662_v40 }
 0x151   : > { %v8110_v37 = vpack.c.bf16 %v821_v29, %v819_v28 }
 0x152   : > { %1618 = vrot.lane.b32.xlu0 %v8054_v54, %s7645_s14  ;;  %3015 = vrot.lane.b32.xlu2 %v8050_v47, %s7646_s17 }
 0x153   : > { %2437 = vrot.lane.b32.xlu1 %v8050_v47, %s7647_s18 }
 0x155   : > { %v666_v38 = vpop.f32.mrf.mxu0  ;;  %v977_v50 = vpop.f32.mrf.mxu2 }
 0x156   : > { %v8078_v5 = vpop.f32.mrf.mxu1  ;;  %v978_v61 = vadd.f32 %v7970_v52, %v977_v50  ;;  %v667_v16 = vadd.f32 %v7942_v33, %v666_v38  ;;  %v1017_v38 = vpop.f32.mrf.mxu3  ;;  %v496_v50 = vld [vmem:[%s7868_s10 + $0xe0] sm:$0xff] }
 0x158   : > { %705 = vmatmul.bf16.gmra.mxu0 %v465_v51  ;;  %v8144_v11 = vpack.c.bf16 %v978_v61, %v976_v59  ;;  %v497_v51 = vld [vmem:[%s7868_s10 + $0xe8] sm:$0xff]  ;;  %v824_v61 = vadd.f32 %v7949_v36, %v8078_v5 }
 0x159   : > { %862 = vmatmul.bf16.gmra.mxu1 %v513_v6  ;;  %v514_v56 = vpack.c.bf16 %v497_v51, %v496_v50 }
 0x15a   : > { %2204 = vrot.lane.b32.xlu0 %v8054_v54, %s7647_s18  ;;  %1596 = vrot.lane.b32.xlu2 %v8076_v4, %s7645_s14 }
 0x15b   : > { %2206 = vrot.lane.b32.xlu1 %v8082_v13, %s7647_s18 }
 0x15d   : > { %v668_v58 = vpop.f32.mrf.mxu0  ;;  %v980_v9 = vpop.f32.mrf.mxu2 }
 0x15e   : > { %v8094_v17 = vpop.f32.mrf.mxu1  ;;  %v669_v21 = vadd.f32 %v7942_v33, %v668_v58  ;;  %v981_v43 = vadd.f32 %v7970_v52, %v980_v9  ;;  %v1020_v1 = vpop.f32.mrf.mxu3 }
 0x15f   : > { %v826_v62 = vadd.f32 %v7949_v36, %v8094_v17 }
 0x160   : > { %v8162_v31 = vpack.c.bf16 %v669_v21, %v667_v16  ;;  %v450_v16 = vld [vmem:[%s7860_s11 + $0xf0] sm:$0xff]  ;;  %v451_v21 = vld [vmem:[%s7860_s11 + $0xf8] sm:$0xff] }
 0x161   : > { %v467_v23 = vpack.c.bf16 %v451_v21, %v450_v16  ;;  %v1048_v5 = vpack.c.bf16 %v826_v62, %v824_v61 }
 0x162   : > { %1861 = vrot.lane.b32.xlu0 %v8096_v18, %s7645_s14  ;;  %1620 = vrot.lane.b32.xlu2 %v8082_v13, %s7645_s14 }
 0x163   : > { %2784 = vrot.lane.b32.xlu1 %v8082_v13, %s7646_s17  ;;  %v1100_v17 = vsel %vm1059_vm0, %v1048_v5, 0 }
 0x165   : > { %v671_v15 = vpop.f32.mrf.mxu0  ;;  %v982_v40 = vpop.f32.mrf.mxu2 }
 0x166   : > { %v828_v34 = vpop.f32.mrf.mxu1  ;;  %v983_v44 = vadd.f32 %v7970_v52, %v982_v40  ;;  %v1022_v50 = vpop.f32.mrf.mxu3 }
 0x167   : > { %v829_v29 = vadd.f32 %v7949_v36, %v828_v34 }
 0x168   : > { %710 = vmatmul.bf16.gmra.mxu0 %v466_v27  ;;  %v8184_v58 = vpack.c.bf16 %v983_v44, %v981_v43  ;;  %v1018_v27 = vadd.f32 %v7970_v52, %v1017_v38  ;;  %v498_v43 = vld [vmem:[%s7868_s10 + $0xf0] sm:$0xff]  ;;  %v499_v44 = vld [vmem:[%s7868_s10 + $0xf8] sm:$0xff] }
 0x169   : > { %867 = vmatmul.bf16.gmra.mxu1 %v514_v56  ;;  %v515_v56 = vpack.c.bf16 %v499_v44, %v498_v43 }
 0x16a   : > { %2439 = vrot.lane.b32.xlu0 %v8096_v18, %s7647_s18  ;;  %2190 = vrot.lane.b32.xlu2 %v8076_v4, %s7647_s18 }
 0x16b   : > { %1622 = vrot.lane.b32.xlu1 %v8110_v37, %s7645_s14 }
 0x16c   : > { %v8118_v39 = vpop.permute.xlu2 %1590 }
 0x16d   : > { %v673_v55 = vpop.f32.mrf.mxu0  ;;  %v8215_v24 = vpop.f32.mrf.mxu2 }
 0x16e   : > { %v830_v46 = vpop.f32.mrf.mxu1  ;;  %v674_v40 = vadd.f32 %v7942_v33, %v673_v55  ;;  %v1025_v21 = vpop.f32.mrf.mxu3 }
 0x16f   : > { %v831_v30 = vadd.f32 %v7949_v36, %v830_v46 }
 0x171   : > { %v8176_v42 = vpack.c.bf16 %v831_v30, %v829_v29  ;;  %v672_v30 = vadd.f32 %v7942_v33, %v671_v15  ;;  %v1097_v15 = vsel %vm1059_vm0, %v8110_v37, 0 }
 0x172   : > { %3017 = vrot.lane.b32.xlu0 %v8096_v18, %s7646_s17  ;;  %2768 = vrot.lane.b32.xlu2 %v8076_v4, %s7646_s17 }
 0x173   : > { %2770 = vrot.lane.b32.xlu1 %v8124_v53, %s7646_s17  ;;  %v1103_v59 = vsel %vm1059_vm0, %v8176_v42, 0  ;;  %v8234_v38 = vpack.c.bf16 %v674_v40, %v672_v30 }
 0x174   : > { %v8134_v57 = vpop.permute.xlu2 %1614 }
 0x175   : > { %v987_v62 = vpop.f32.mrf.mxu2 }
 0x176   : > { %v833_v2 = vpop.f32.mrf.mxu1  ;;  %v988_v14 = vadd.f32 %v7970_v52, %v987_v62 }
 0x177   : > { %v834_v22 = vadd.f32 %v7949_v36, %v833_v2 }
 0x178   : > { %715 = vmatmul.bf16.gmra.mxu0 %v467_v23  ;;  %v1021_v23 = vadd.f32 %v7970_v52, %v1020_v1 }
 0x179   : > { %872 = vmatmul.bf16.gmra.mxu1 %v515_v56 }
 0x17a   : > { %4439 = vrot.lane.b32.xlu0 %v8140_v3, %s7645_s14  ;;  %2208 = vrot.lane.b32.xlu2 %v8110_v37, %s7647_s18 }
 0x17b   : > { %1863 = vrot.lane.b32.xlu1 %v8144_v11, %s7645_s14 }
 0x17c   : > { %v8152_v12 = vpop.permute.xlu2 %2184 }
 0x17d   : > { %v990_v56 = vpop.f32.mrf.mxu2 }
 0x17e   : > { %v835_v26 = vpop.f32.mrf.mxu1 }
 0x17f   : > { %v836_v28 = vadd.f32 %v7949_v36, %v835_v26  ;;  %v1016_v26 = vadd.f32 %v7970_v52, %v8142_v7 }
 0x181   : > { %v8164_v35 = vpack.c.bf16 %v836_v28, %v834_v22  ;;  %v8206_v22 = vpop.f32.mrf.mxu0  ;;  %v8232_v7 = vpack.c.bf16 %v1018_v27, %v1016_v26 }
 0x182   : > { %1598 = vrot.lane.b32.xlu0 %v8124_v53, %s7645_s14  ;;  %2441 = vrot.lane.b32.xlu2 %v8144_v11, %s7647_s18 }
 0x183   : > { %2194 = vrot.lane.b32.xlu1 %v8162_v31, %s7647_s18  ;;  %v1106_v34 = vsel %vm1059_vm0, %v8164_v35, 0  ;;  %12904 = vst [vmem:[#allocation30_spill] sm:$0xff] %v8232_v7 }
 0x184   : > { %1108 = vmatpush.bf16.xpose.msrb.mxu3 %v1106_v34  ;;  %v8174_v41 = vpop.permute.xlu2 %2433 }
 0x185   : > { %v8180_v46 = vpop.permute.xlu1 %2200  ;;  %v8198_v2 = vpop.permute.xlu0 %2778 }
 0x186   : > { %12902 = vst [vmem:[#allocation28_spill] sm:$0xff] %v8198_v2  ;;  %v838_v43 = vpop.f32.mrf.mxu1 }
 0x189   : > { %v8230_v51 = vpop.f32.mrf.mxu0 }
 0x18a   : > { %2192 = vrot.lane.b32.xlu0 %v8124_v53, %s7647_s18  ;;  %3019 = vrot.lane.b32.xlu2 %v8144_v11, %s7646_s17 }
 0x18b   : > { %2443 = vrot.lane.b32.xlu1 %v8184_v58, %s7647_s18 }
 0x18c   : > { %1109 = vmatpush.bf16.xpose.msrb.mxu3 %v1103_v59  ;;  %v8200_v6 = vpop.permute.xlu2 %3011 }
 0x18d   : > { %v8202_v9 = vpop.permute.xlu1 %2762 }
 0x18e   : > { %12903 = vst [vmem:[#allocation29_spill] sm:$0xff] %v8202_v9  ;;  %v840_v8 = vpop.f32.mrf.mxu1 }
 0x191   : > { %v681_v16 = vpop.f32.mrf.mxu0 }
 0x192   : > { %2786 = vrot.lane.b32.xlu0 %v8110_v37, %s7646_s17  ;;  %1600 = vrot.lane.b32.xlu2 %v8162_v31, %s7645_s14  ;;  %v1094_v37 = vsel %vm1059_vm0, %v8082_v13, 0  ;;  %v1091_v13 = vsel %vm1059_vm0, %v8054_v54, 0  ;;  %v992_v54 = vpop.f32.mrf.mxu2 }
 0x193   : > { %3021 = vrot.lane.b32.xlu1 %v8184_v58, %s7646_s17 }
 0x194   : > { %1110 = vmatpush.bf16.xpose.msrb.mxu3 %v1100_v17  ;;  %v8220_v28 = vpop.permute.xlu0 %1592  ;;  %v8222_v29 = vpop.permute.xlu2 %2202  ;;  %v1023_v17 = vadd.f32 %v7970_v52, %v1022_v50 }
 0x195   : > { %v8226_v34 = vpop.permute.xlu1 %1855 }
 0x196   : > { %v8265_v44 = vpack.c.bf16 %v1023_v17, %v1021_v23  ;;  %v843_v32 = vpop.f32.mrf.mxu1 }
 0x198   : > { %12908 = vst [vmem:[#allocation34_spill] sm:$0xff] %v8265_v44 }
 0x199   : > { %v683_v40 = vpop.f32.mrf.mxu0 }
 0x19a   : > { %4441 = vrot.lane.b32.xlu0 %v8232_v7, %s7645_s14  ;;  %2772 = vrot.lane.b32.xlu2 %v8162_v31, %s7646_s17 }
 0x19b   : > { %1602 = vrot.lane.b32.xlu1 %v8234_v38, %s7645_s14 }
 0x19c   : > { %1111 = vmatpush.bf16.xpose.msrb.mxu3 %v1097_v15  ;;  %v8244_v55 = vpop.permute.xlu0 %2186  ;;  %v8246_v59 = vpop.permute.xlu2 %2780 }
 0x19d   : > { %12905 = vst [vmem:[#allocation31_spill] sm:$0xff] %v8246_v59  ;;  %v8248_v61 = vpop.permute.xlu1 %1616  ;;  %v1027_v15 = vpop.f32.mrf.mxu3 }
 0x19e   : > { %v1028_v23 = vadd.f32 %v7970_v52, %v1027_v15 }
 0x1a1   : > { %v8282_v20 = vpop.f32.mrf.mxu0 }
 0x1a2   : > { %1624 = vrot.lane.b32.xlu0 %v1048_v5, %s7645_s14  ;;  %1865 = vrot.lane.b32.xlu2 %v8184_v58, %s7645_s14 }
 0x1a3   : > { %2212 = vrot.lane.b32.xlu1 %v8176_v42, %s7647_s18 }
 0x1a4   : > { %1112 = vmatpush.bf16.xpose.msrb.mxu3 %v1094_v37  ;;  %v8259_v26 = vpop.permute.xlu0 %2764  ;;  %v8261_v27 = vpop.permute.xlu2 %1859  ;;  %v1026_v37 = vadd.f32 %v7970_v52, %v1025_v21  ;;  %v1088_v21 = vsel %vm1059_vm0, %v7998_v10, 0 }
 0x1a5   : > { %12906 = vst [vmem:[#allocation32_spill] sm:$0xff] %v8259_v26  ;;  %v8263_v30 = vpop.permute.xlu1 %1594  ;;  %v986_v26 = vadd.f32 %v7970_v52, %v8215_v24 }
 0x1a6   : > { %12907 = vst [vmem:[#allocation33_spill] sm:$0xff] %v8263_v30  ;;  %v8284_v45 = vpack.c.bf16 %v1028_v23, %v1026_v37  ;;  %v991_v37 = vadd.f32 %v7970_v52, %v990_v56  ;;  %v1085_v56 = vsel %vm1059_vm0, %v7959_v49, 0  ;;  %v682_v49 = vadd.f32 %v7942_v33, %v681_v16 }
 0x1a7   : > { %v1057_v62 = vpack.c.bf16 %v988_v14, %v986_v26  ;;  %v684_v14 = vadd.f32 %v7942_v33, %v683_v40 }
 0x1a8   : > { %12909 = vst [vmem:[#allocation35_spill] sm:$0xff] %v8284_v45 }
 0x1a9   : > { %v8301_v3 = vpop.f32.mrf.mxu0 }
 0x1aa   : > { %2210 = vrot.lane.b32.xlu0 %v1048_v5, %s7647_s18  ;;  %4443 = vrot.lane.b32.xlu2 %v8265_v44, %s7645_s14  ;;  %v689_v9 = vadd.f32 %v7942_v33, %v8301_v3 }
 0x1ab   : > { %2774 = vrot.lane.b32.xlu1 %v8234_v38, %s7646_s17 }
 0x1ac   : > { %1113 = vmatpush.bf16.xpose.msrb.mxu3 %v1091_v13  ;;  %v8274_v1 = vpop.permute.xlu0 %1857  ;;  %v8276_v50 = vpop.permute.xlu2 %3015 }
 0x1ad   : > { %v8280_v17 = vpop.permute.xlu1 %2188 }
 0x1b2   : > { %2788 = vrot.lane.b32.xlu0 %v1048_v5, %s7646_s17  ;;  %1626 = vrot.lane.b32.xlu2 %v8176_v42, %s7645_s14  ;;  %v993_v5 = vadd.f32 %v7970_v52, %v992_v54 }
 0x1b3   : > { %4445 = vrot.lane.b32.xlu1 %v8284_v45, %s7645_s14 }
 0x1b4   : > { %1114 = vmatpush.bf16.xpose.msrb.mxu3 %v1088_v21  ;;  %v8293_v15 = vpop.permute.xlu0 %2435  ;;  %v8295_v13 = vpop.permute.xlu2 %1596  ;;  %v8306_v10 = vpack.c.bf16 %v993_v5, %v991_v37 }
 0x1b5   : > { %12910 = vst [vmem:[#allocation36_spill] sm:$0xff] %v8295_v13  ;;  %v8298_v23 = vpop.permute.xlu1 %2766  ;;  %v8323_v37 = vpop.f32.mrf.mxu0 }
 0x1b6   : > { %12911 = vst [vmem:[#allocation37_spill] sm:$0xff] %v8298_v23  ;;  %v8341_v23 = vpack.c.bf16 %v684_v14, %v682_v49  ;;  %v677_v49 = vadd.f32 %v7942_v33, %v8206_v22 }
 0x1b8   : > { %12913 = vst [vmem:[#allocation39_spill] sm:$0xff] %v8341_v23 }
 0x1ba   : > { %2790 = vrot.lane.b32.xlu0 %v8176_v42, %s7646_s17  ;;  %2196 = vrot.lane.b32.xlu2 %v8234_v38, %s7647_s18  ;;  %v845_v42 = vpop.f32.mrf.mxu1 }
 0x1bb   : > { %1628 = vrot.lane.b32.xlu1 %v8164_v35, %s7645_s14 }
 0x1bc   : > { %1115 = vmatpush.bf16.xpose.msrb.mxu3 %v1085_v56  ;;  %v8316_v54 = vpop.permute.xlu0 %3013  ;;  %v8318_v24 = vpop.permute.xlu2 %1620 }
 0x1bd   : > { %v8321_v21 = vpop.permute.xlu1 %2782  ;;  %v693_v40 = vpop.f32.mrf.mxu0 }
 0x1be   : > { %12912 = vst [vmem:[#allocation38_spill] sm:$0xff] %v8321_v21 }
 0x1c2   : > { %1867 = vrot.lane.b32.xlu0 %v1057_v62, %s7645_s14  ;;  %2214 = vrot.lane.b32.xlu2 %v8164_v35, %s7647_s18  ;;  %v8344_v16 = vpop.f32.mrf.mxu1 }
 0x1c3   : > { %1869 = vrot.lane.b32.xlu1 %v8306_v10, %s7645_s14  ;;  %6651 = vmatmul.msk.bf16.vlgmr.msrb.gmra.mxu3 %vm1059_vm0, %v7957_v48  ;;  %v839_v48 = vadd.f32 %v7949_v36, %v838_v43 }
 0x1c4   : > { %1277 = vmatpush.bf16.msra.mxu3 %v8306_v10  ;;  %v8334_v26 = vpop.permute.xlu0 %1618  ;;  %v8336_v5 = vpop.permute.xlu2 %2190 }
 0x1c5   : > { %v8339_v56 = vpop.permute.xlu1 %2437 }
 0x1c8   : > { %1278 = vmatpush.bf16.msra.mxu3 %v1057_v62 }
 0x1ca   : > { %2445 = vrot.lane.b32.xlu0 %v1057_v62, %s7647_s18  ;;  %2792 = vrot.lane.b32.xlu2 %v8164_v35, %s7646_s17 }
 0x1cb   : > { %4168 = vrot.lane.b32.xlu1 %v8341_v23, %s7645_s14 }
 0x1cc   : > { %1279 = vmatpush.bf16.msra.mxu3 %v8184_v58  ;;  %v841_v58 = vadd.f32 %v7949_v36, %v840_v8  ;;  %v8357_v14 = vpop.permute.xlu0 %2204  ;;  %v8359_v60 = vpop.permute.xlu2 %2768 }
 0x1cd   : > { %12914 = vst [vmem:[#allocation40_spill] sm:$0xff] %v8359_v60  ;;  %v8362_v35 = vpop.permute.xlu1 %2206  ;;  %v1030_v8 = vpop.f32.mrf.mxu3 }
 0x1ce   : > { %v8364_v43 = vpack.c.bf16 %v841_v58, %v839_v48  ;;  %v846_v48 = vadd.f32 %v7949_v36, %v845_v42  ;;  %v1031_v45 = vadd.f32 %v7970_v52, %v1030_v8  ;;  %v687_v42 = vadd.f32 %v7942_v33, %v8282_v20 }
 0x1d0   : > { %1280 = vmatpush.bf16.msra.mxu3 %v8144_v11  ;;  %v679_v11 = vadd.f32 %v7942_v33, %v8230_v51  ;;  %12915 = vst [vmem:[#allocation41_spill] sm:$0xff] %v8364_v43 }
 0x1d2   : > { %v8366_v7 = vpack.c.bf16 %v679_v11, %v677_v49  ;;  %3023 = vrot.lane.b32.xlu0 %v1057_v62, %s7646_s17  ;;  %v8383_v62 = vpop.f32.mrf.mxu0 }
 0x1d3   : > { %4778 = vrot.lane.b32.xlu1 %v8364_v43, %s7647_s18  ;;  %6652 = vmatmul.msk.bf16.gmra.mxu3 %vm1059_vm0, %v7982_v63  ;;  %v844_v63 = vadd.f32 %v7949_v36, %v843_v32 }
 0x1d4   : > { %1281 = vmatpush.bf16.msra.mxu3 %v8096_v18  ;;  %2776 = vrot.lane.b32.xlu2 %v8366_v7, %s7646_s17  ;;  %v850_v18 = vpop.f32.mrf.mxu1  ;;  %v8376_v22 = vpop.permute.xlu0 %1861 }
 0x1d5   : > { %v8378_v51 = vpop.permute.xlu2 %2208  ;;  %v8400_v11 = vpack.c.bf16 %v846_v48, %v844_v63  ;;  %v1032_v60 = vpop.f32.mrf.mxu3 }
 0x1d6   : > { %v1033_v32 = vadd.f32 %v7970_v52, %v1032_v60  ;;  %v8424_v52 = vpack.c.bf16 %v689_v9, %v687_v42  ;;  %v692_v9 = vadd.f32 %v7942_v33, %v8323_v37  ;;  %v849_v37 = vadd.f32 %v7949_v36, %v8344_v16 }
 0x1d8   : > { %1282 = vmatpush.bf16.msra.mxu3 %v8050_v47  ;;  %v8381_v47 = vpop.permute.xlu1 %2784  ;;  %12918 = vst [vmem:[#allocation44_spill] sm:$0xff] %v8424_v52 }
 0x1da   : > { %1604 = vrot.lane.b32.xlu0 %v8366_v7, %s7645_s14  ;;  %v698_v44 = vpop.f32.mrf.mxu0 }
 0x1db   : > { %4762 = vrot.lane.b32.xlu1 %v8341_v23, %s7647_s18 }
 0x1dc   : > { %1283 = vmatpush.bf16.msra.mxu3 %v8022_v25  ;;  %2447 = vrot.lane.b32.xlu2 %v8306_v10, %s7647_s18  ;;  %v8394_v25 = vpop.permute.xlu0 %2439 }
 0x1dd   : > { %v8396_v58 = vpop.permute.xlu2 %2441 }
 0x1e0   : > { %1284 = vmatpush.bf16.msra.mxu3 %v7984_v0  ;;  %v8398_v49 = vpop.permute.xlu1 %1622  ;;  %v853_v0 = vpop.f32.mrf.mxu1 }
 0x1e2   : > { %2198 = vrot.lane.b32.xlu0 %v8366_v7, %s7647_s18  ;;  %v701_v60 = vpop.f32.mrf.mxu0 }
 0x1e3   : > { %4194 = vrot.lane.b32.xlu1 %v8400_v11, %s7645_s14  ;;  %6653 = vmatmul.msk.bf16.gmra.mxu3 %vm1059_vm0, %v8010_v19  ;;  %v702_v21 = vadd.f32 %v7942_v33, %v701_v60 }
 0x1e4   : > { %3025 = vrot.lane.b32.xlu2 %v8306_v10, %s7646_s17  ;;  %v8416_v8 = vpop.permute.xlu0 %3017  ;;  %v8422_v10 = vpack.c.bf16 %v1033_v32, %v1031_v45  ;;  %v694_v32 = vadd.f32 %v7942_v33, %v693_v40  ;;  %v851_v40 = vadd.f32 %v7949_v36, %v850_v18 }
 0x1e5   : > { %v8418_v63 = vpop.permute.xlu2 %3019 }
 0x1e6   : > { %12917 = vst [vmem:[#allocation43_spill] sm:$0xff] %v8422_v10  ;;  %v8455_v2 = vpack.c.bf16 %v694_v32, %v692_v9 }
 0x1e8   : > { %v8420_v48 = vpop.permute.xlu1 %2770  ;;  %v855_v20 = vpop.f32.mrf.mxu1  ;;  %12924 = vst [vmem:[#allocation50_spill] sm:$0xff] %v8455_v2 }
 0x1e9   : > { %12916 = vst [vmem:[#allocation42_spill] sm:$0xff] %v8420_v48 }
 0x1ea   : > { %4192 = vrot.lane.b32.xlu0 %v8364_v43, %s7645_s14  ;;  %v703_v42 = vpop.f32.mrf.mxu0 }
 0x1eb   : > { %4170 = vrot.lane.b32.xlu1 %v8424_v52, %s7645_s14  ;;  %v704_v30 = vadd.f32 %v7942_v33, %v703_v42 }
 0x1ec   : > { %4447 = vrot.lane.b32.xlu2 %v8422_v10, %s7645_s14  ;;  %v8432_v19 = vpop.permute.xlu0 %4439 }
 0x1ed   : > { %12919 = vst [vmem:[#allocation45_spill] sm:$0xff] %v8432_v19  ;;  %v8434_v3 = vpop.permute.xlu2 %1600 }
 0x1ee   : > { %12920 = vst [vmem:[#allocation46_spill] sm:$0xff] %v8434_v3 }
 0x1f0   : > { %v8436_v48 = vpop.permute.xlu1 %1863  ;;  %v858_v45 = vpop.f32.mrf.mxu1 }
 0x1f2   : > { %5356 = vrot.lane.b32.xlu0 %v8364_v43, %s7646_s17  ;;  %v706_v18 = vpop.f32.mrf.mxu0 }
 0x1f3   : > { %4764 = vrot.lane.b32.xlu1 %v8424_v52, %s7647_s18  ;;  %6654 = vmatmul.msk.bf16.gmra.mxu3 %vm1059_vm0, %v8076_v4  ;;  %v854_v4 = vadd.f32 %v7949_v36, %v853_v0 }
 0x1f4   : > { %5340 = vrot.lane.b32.xlu2 %v8341_v23, %s7646_s17  ;;  %v8449_v19 = vpop.permute.xlu0 %1598 }
 0x1f5   : > { %12921 = vst [vmem:[#allocation47_spill] sm:$0xff] %v8449_v19  ;;  %v8451_v10 = vpop.permute.xlu2 %2772  ;;  %v8474_v19 = vpack.c.bf16 %v851_v40, %v849_v37 }
 0x1f6   : > { %12922 = vst [vmem:[#allocation48_spill] sm:$0xff] %v8451_v10  ;;  %v856_v10 = vadd.f32 %v7949_v36, %v855_v20 }
 0x1f8   : > { %v8453_v3 = vpop.permute.xlu1 %2194  ;;  %v860_v9 = vpop.f32.mrf.mxu1 }
 0x1f9   : > { %12923 = vst [vmem:[#allocation49_spill] sm:$0xff] %v8453_v3  ;;  %v8476_v3 = vpack.c.bf16 %v856_v10, %v854_v4  ;;  %v699_v4 = vadd.f32 %v7942_v33, %v698_v44  ;;  %v859_v44 = vadd.f32 %v7949_v36, %v858_v45 }
 0x1fa   : > { %4780 = vrot.lane.b32.xlu0 %v8400_v11, %s7647_s18  ;;  %v708_v40 = vpop.f32.mrf.mxu0 }
 0x1fb   : > { %4766 = vrot.lane.b32.xlu1 %v8455_v2, %s7647_s18 }
 0x1fc   : > { %5358 = vrot.lane.b32.xlu2 %v8400_v11, %s7646_s17  ;;  %v8468_v32 = vpop.permute.xlu0 %2192 }
 0x1fd   : > { %12925 = vst [vmem:[#allocation51_spill] sm:$0xff] %v8468_v32  ;;  %v8470_v23 = vpop.permute.xlu2 %1865 }
 0x200   : > { %v8472_v16 = vpop.permute.xlu1 %2443  ;;  %v863_v10 = vpop.f32.mrf.mxu1 }
 0x201   : > { %v864_v45 = vadd.f32 %v7949_v36, %v863_v10  ;;  %v709_v10 = vadd.f32 %v7942_v33, %v708_v40 }
 0x202   : > { %4196 = vrot.lane.b32.xlu0 %v8474_v19, %s7645_s14  ;;  %v711_v43 = vpop.f32.mrf.mxu0 }
 0x203   : > { %4198 = vrot.lane.b32.xlu1 %v8476_v3, %s7645_s14  ;;  %6655 = vmatmul.msk.bf16.gmra.mxu3 %vm1059_vm0, %v8124_v53  ;;  %v697_v53 = vadd.f32 %v7942_v33, %v8383_v62  ;;  %v861_v62 = vadd.f32 %v7949_v36, %v860_v9 }
 0x204   : > { %5342 = vrot.lane.b32.xlu2 %v8424_v52, %s7646_s17  ;;  %v8486_v0 = vpop.permute.xlu0 %2786 }
 0x205   : > { %v8488_v20 = vpop.permute.xlu2 %4443  ;;  %v8507_v59 = vpack.c.bf16 %v699_v4, %v697_v53  ;;  %v8525_v4 = vpack.c.bf16 %v704_v30, %v702_v21 }
 0x206   : > { %12926 = vst [vmem:[#allocation52_spill] sm:$0xff] %v8488_v20 }
 0x207   : > { %12929 = vst [vmem:[#allocation55_spill] sm:$0xff] %v8507_v59 }
 0x208   : > { %v8490_v37 = vpop.permute.xlu1 %3021  ;;  %v865_v32 = vpop.f32.mrf.mxu1  ;;  %12930 = vst [vmem:[#allocation56_spill] sm:$0xff] %v8525_v4 }
 0x20a   : > { %4782 = vrot.lane.b32.xlu0 %v8474_v19, %s7647_s18  ;;  %v713_v9 = vpop.f32.mrf.mxu0 }
 0x20b   : > { %5362 = vrot.lane.b32.xlu1 %v8476_v3, %s7646_s17 }
 0x20c   : > { %4172 = vrot.lane.b32.xlu2 %v8455_v2, %s7645_s14  ;;  %v8501_v52 = vpop.permute.xlu0 %4441 }
 0x20d   : > { %12927 = vst [vmem:[#allocation53_spill] sm:$0xff] %v8501_v52  ;;  %v8503_v20 = vpop.permute.xlu2 %1626  ;;  %v8527_v52 = vpack.c.bf16 %v861_v62, %v859_v44 }
 0x210   : > { %v8505_v13 = vpop.permute.xlu1 %1602 }
 0x211   : > { %12928 = vst [vmem:[#allocation54_spill] sm:$0xff] %v8505_v13  ;;  %v868_v13 = vpop.f32.mrf.mxu1 }
 0x212   : > { %4174 = vrot.lane.b32.xlu0 %v8507_v59, %s7645_s14 }
 0x213   : > { %4768 = vrot.lane.b32.xlu1 %v8507_v59, %s7647_s18  ;;  %6656 = vmatmul.msk.bf16.gmra.mxu3 %vm1059_vm0, %v8162_v31  ;;  %v866_v31 = vadd.f32 %v7949_v36, %v865_v32  ;;  %v707_v32 = vadd.f32 %v7942_v33, %v706_v18  ;;  %v869_v33 = vadd.f32 %v7949_v36, %v868_v13 }
 0x214   : > { %5360 = vrot.lane.b32.xlu2 %v8474_v19, %s7646_s17  ;;  %v8521_v53 = vpop.permute.xlu0 %1624 }
 0x215   : > { %v8523_v60 = vpop.permute.xlu2 %2196  ;;  %v8540_v62 = vpack.c.bf16 %v866_v31, %v864_v45  ;;  %v8559_v18 = vpack.c.bf16 %v709_v10, %v707_v32 }
 0x217   : > { %12933 = vst [vmem:[#allocation59_spill] sm:$0xff] %v8559_v18 }
 0x218   : > { %v2213_v42 = vpop.permute.xlu1 %2212 }
 0x21a   : > { %4176 = vrot.lane.b32.xlu0 %v8525_v4, %s7645_s14  ;;  %v716_v4 = vpop.f32.mrf.mxu0 }
 0x21b   : > { %5364 = vrot.lane.b32.xlu1 %v8527_v52, %s7646_s17 }
 0x21c   : > { %5344 = vrot.lane.b32.xlu2 %v8455_v2, %s7646_s17  ;;  %v2211_v59 = vpop.permute.xlu0 %2210 }
 0x21d   : > { %v2215_v30 = vpop.permute.xlu2 %2214  ;;  %v2256_v32 = vsel %vm1059_vm0, %v2211_v59, 0 }
 0x21e   : > { %v2262_v44 = vsel %vm1059_vm0, %v2215_v30, 0  ;;  %v870_v30 = vpop.f32.mrf.mxu1 }
 0x21f   : > { %2264 = vmatpush.bf16.xpose.msrb.mxu2 %v2262_v44 }
 0x220   : > { %v8537_v21 = vpop.permute.xlu1 %2774 }
 0x221   : > { %12931 = vst [vmem:[#allocation57_spill] sm:$0xff] %v8537_v21  ;;  %v2259_v21 = vsel %vm1059_vm0, %v2213_v42, 0 }
 0x222   : > { %4202 = vrot.lane.b32.xlu0 %v8540_v62, %s7645_s14  ;;  %v718_v2 = vpop.f32.mrf.mxu0 }
 0x223   : > { %4788 = vrot.lane.b32.xlu1 %v8540_v62, %s7647_s18  ;;  %6657 = vmatmul.msk.bf16.gmra.mxu3 %vm1059_vm0, %v8234_v38  ;;  %v871_v38 = vadd.f32 %v7949_v36, %v870_v30  ;;  %v7405_v36 = vld [vmem:[%s12743_s4] ss:$0 sm:$0xff] }
 0x224   : > { %4784 = vrot.lane.b32.xlu2 %v8476_v3, %s7647_s18  ;;  %v8552_v45 = vpop.permute.xlu0 %2788  ;;  %v717_v30 = vadd.f32 %v7405_v36, %v716_v4  ;;  %v719_v59 = vadd.f32 %v7405_v36, %v718_v2  ;;  %v2253_v4 = vsel %vm1059_vm0, %v8378_v51, 0  ;;  %v1673_v2 = vsel %vm1059_vm0, %v8503_v20, 0 }
 0x225   : > { %v8554_v31 = vpop.permute.xlu2 %2792  ;;  %v8574_v10 = vpack.c.bf16 %v871_v38, %v869_v33  ;;  %v712_v33 = vadd.f32 %v7405_v36, %v711_v43  ;;  %v714_v38 = vadd.f32 %v7405_v36, %v713_v9 }
 0x227   : > { %2265 = vmatpush.bf16.xpose.msrb.mxu2 %v2259_v21  ;;  %v8594_v43 = vpack.c.bf16 %v714_v38, %v712_v33 }
 0x228   : > { %v8556_v44 = vpop.permute.xlu1 %4445 }
 0x229   : > { %12932 = vst [vmem:[#allocation58_spill] sm:$0xff] %v8556_v44  ;;  %v873_v44 = vpop.f32.mrf.mxu1 }
 0x22a   : > { %5366 = vrot.lane.b32.xlu0 %v8540_v62, %s7646_s17  ;;  %12936 = vst [vmem:[#allocation62_spill] sm:$0xff] %v8594_v43 }
 0x22b   : > { %4178 = vrot.lane.b32.xlu1 %v8559_v18, %s7645_s14 }
 0x22c   : > { %4200 = vrot.lane.b32.xlu2 %v8527_v52, %s7645_s14  ;;  %v8569_v40 = vpop.permute.xlu0 %2790 }
 0x22e   : > { %v8571_v42 = vpop.permute.xlu2 %2776 }
 0x22f   : > { %12934 = vst [vmem:[#allocation60_spill] sm:$0xff] %v8571_v42  ;;  %2266 = vmatpush.bf16.xpose.msrb.mxu2 %v2256_v32  ;;  %v8590_v42 = vpack.c.bf16 %v719_v59, %v717_v30  ;;  %v2250_v59 = vsel %vm1059_vm0, %v8362_v35, 0  ;;  %v2247_v35 = vsel %vm1059_vm0, %v8357_v14, 0  ;;  %v2244_v14 = vsel %vm1059_vm0, %v8222_v29, 0 }
 0x230   : > { %v1629_v21 = vpop.permute.xlu1 %1628  ;;  %v2241_v29 = vsel %vm1059_vm0, %v8180_v46, 0 }
 0x231   : > { %v1676_v13 = vsel %vm1059_vm0, %v1629_v21, 0  ;;  %12935 = vst [vmem:[#allocation61_spill] sm:$0xff] %v8590_v42  ;;  %v875_v9 = vpop.f32.mrf.mxu1 }
 0x232   : > { %1678 = vmatpush.bf16.xpose.msrb.mxu0 %v1676_v13  ;;  %5368 = vrot.lane.b32.xlu0 %v8574_v10, %s7646_s17 }
 0x233   : > { %4204 = vrot.lane.b32.xlu1 %v8574_v10, %s7645_s14  ;;  %6658 = vmatmul.msk.bf16.gmra.mxu3 %vm1059_vm0, %v8366_v7  ;;  %v7406_v7 = vld [vmem:[%s12743_s4 + $0x1] ss:$0 sm:$0xff] }
 0x234   : > { %4786 = vrot.lane.b32.xlu2 %v8527_v52, %s7647_s18  ;;  %v1868_v21 = vpop.permute.xlu0 %1867  ;;  %v874_v51 = vadd.f32 %v7406_v7, %v873_v44  ;;  %v876_v20 = vadd.f32 %v7406_v7, %v875_v9  ;;  %v1670_v44 = vsel %vm1059_vm0, %v8521_v53, 0 }
 0x236   : > { %v2448_v32 = vpop.permute.xlu2 %2447  ;;  %v3629_v38 = vpack.c.bf16 %v876_v20, %v874_v51 }
 0x237   : > { %2457 = vmatpush.bf16.msrb.mxu3 %v2448_v32  ;;  %2267 = vmatpush.bf16.xpose.msrb.mxu2 %v2253_v4 }
 0x238   : > { %v1870_v13 = vpop.permute.xlu1 %1869 }
 0x239   : > { %1879 = vmatpush.bf16.msrb.mxu1 %v1870_v13  ;;  %v3681_v13 = vsel %vm1059_vm0, %v8574_v10, 0 }
 0x23a   : > { %1679 = vmatpush.bf16.xpose.msrb.mxu0 %v1673_v2  ;;  %4182 = vrot.lane.b32.xlu0 %v8590_v42, %s7645_s14 }
 0x23b   : > { %4790 = vrot.lane.b32.xlu1 %v8574_v10, %s7647_s18  ;;  %v2840_v10 = vsel %vm1059_vm0, %v8554_v31, 0 }
 0x23c   : > { %4180 = vrot.lane.b32.xlu2 %v8594_v43, %s7645_s14  ;;  %v2446_v36 = vpop.permute.xlu0 %2445 }
 0x23d   : > { %1880 = vmatpush.bf16.msrb.mxu1 %v1868_v21  ;;  %2458 = vmatpush.bf16.msrb.mxu3 %v2446_v36  ;;  %v3669_v36 = vsel %vm1059_vm0, %v8474_v19, 0 }
 0x23e   : > { %v3026_v30 = vpop.permute.xlu2 %3025 }
 0x23f   : > { %2268 = vmatpush.bf16.xpose.msrb.mxu2 %v2250_v59 }
 0x240   : > { %v8607_v33 = vpop.permute.xlu1 %4168 }
 0x241   : > { %1881 = vmatpush.bf16.msrb.mxu1 %v8470_v23  ;;  %2459 = vmatpush.bf16.msrb.mxu3 %v8472_v16  ;;  %v1667_v16 = vsel %vm1059_vm0, %v8398_v49, 0 }
 0x242   : > { %1680 = vmatpush.bf16.xpose.msrb.mxu0 %v1670_v44  ;;  %v3666_v44 = vsel %vm1059_vm0, %v8400_v11, 0 }
 0x244   : > { %4206 = vrot.lane.b32.xlu2 %v3629_v38, %s7645_s14 }
 0x245   : > { %1882 = vmatpush.bf16.msrb.mxu1 %v8436_v48  ;;  %2460 = vmatpush.bf16.msrb.mxu3 %v8396_v58  ;;  %v3024_v58 = vpop.permute.xlu0 %3023 }
 0x246   : > { %v8615_v21 = vpop.permute.xlu2 %4447  ;;  %v8622_v32 = vpop.f32.mrf.mxu3 }
 0x247   : > { %2269 = vmatpush.bf16.xpose.msrb.mxu2 %v2247_v35 }
 0x248   : > { %v8620_v23 = vpop.permute.xlu1 %4778 }
 0x249   : > { %1883 = vmatpush.bf16.msrb.mxu1 %v8376_v22  ;;  %2461 = vmatpush.bf16.msrb.mxu3 %v8394_v25  ;;  %v1664_v25 = vsel %vm1059_vm0, %v8318_v24, 0  ;;  %v3684_v24 = vsel %vm1059_vm0, %v3629_v38, 0 }
 0x24a   : > { %1681 = vmatpush.bf16.xpose.msrb.mxu0 %v1667_v16  ;;  %v12937_v16 = vld [vmem:[#allocation33_spill] sm:$0xff] }
 0x24c   : > { %4792 = vrot.lane.b32.xlu2 %v3629_v38, %s7647_s18 }
 0x24d   : > { %1884 = vmatpush.bf16.msrb.mxu1 %v8261_v27  ;;  %2462 = vmatpush.bf16.msrb.mxu3 %v8339_v56 }
 0x24e   : > { %v8630_v48 = vpop.permute.xlu2 %5340  ;;  %v8637_v53 = vpop.f32.mrf.mxu3 }
 0x24f   : > { %2270 = vmatpush.bf16.xpose.msrb.mxu2 %v2244_v14 }
 0x250   : > { %v8635_v22 = vpop.permute.xlu1 %4762 }
 0x251   : > { %1885 = vmatpush.bf16.msrb.mxu1 %v8274_v1  ;;  %2463 = vmatpush.bf16.msrb.mxu3 %v8293_v15  ;;  %v1661_v15 = vsel %vm1059_vm0, %v8334_v26, 0  ;;  %v1658_v26 = vsel %vm1059_vm0, %v8248_v61, 0 }
 0x252   : > { %1682 = vmatpush.bf16.xpose.msrb.mxu0 %v1664_v25 }
 0x254   : > { %5370 = vrot.lane.b32.xlu2 %v3629_v38, %s7646_s17 }
 0x255   : > { %1886 = vmatpush.bf16.msrb.mxu1 %v8226_v34  ;;  %2464 = vmatpush.bf16.msrb.mxu3 %v8174_v41  ;;  %v8657_v34 = vpop.permute.xlu0 %1604 }
 0x256   : > { %v8645_v27 = vpop.permute.xlu2 %5358  ;;  %v8653_v56 = vpop.f32.mrf.mxu3 }
 0x257   : > { %2271 = vmatpush.bf16.xpose.msrb.mxu2 %v2241_v29 }
 0x258   : > { %v8650_v1 = vpop.permute.xlu1 %4194 }
 0x259   : > { %3035 = vmatpush.bf16.msra.mxu1 %v3026_v30 }
 0x25a   : > { %1683 = vmatpush.bf16.xpose.msrb.mxu0 %v1661_v15  ;;  %v12940_v15 = vld [vmem:[#allocation31_spill] sm:$0xff] }
 0x25d   : > { %3036 = vmatpush.bf16.msra.mxu1 %v3024_v58  ;;  %v12939_v58 = vld [vmem:[#allocation41_spill] sm:$0xff] }
 0x25e   : > { %v8660_v41 = vpop.permute.xlu2 %5342  ;;  %6667 = vmatmul.msk.bf16.vlgmr.msrb.gmra.mxu2 %vm1059_vm0, %v8152_v12  ;;  %v8666_v49 = vpop.f32.mrf.mxu3  ;;  %v3663_v14 = vsel %vm1059_vm0, %v12939_v58, 0  ;;  %v12944_v58 = vld [vmem:[#allocation49_spill] sm:$0xff] }
 0x25f   : > { %3686 = vmatpush.bf16.xpose.msra.mxu2 %v3684_v24 }
 0x260   : > { %v8664_v46 = vpop.permute.xlu1 %4170 }
 0x261   : > { %3037 = vmatpush.bf16.msra.mxu1 %v8490_v37  ;;  %v8673_v37 = vpop.permute.xlu0 %2198 }
 0x262   : > { %1684 = vmatpush.bf16.xpose.msrb.mxu0 %v1658_v26  ;;  %v2822_v26 = vsel %vm1059_vm0, %v12940_v15, 0 }
 0x264   : > { %1157 = vmax.xlane.f32.xlu0 %v8622_v32 }
 0x265   : > { %3038 = vmatpush.bf16.msra.mxu1 %v8418_v63  ;;  %1161 = vmax.xlane.f32.xlu1 %v8653_v56  ;;  %v1655_v63 = vsel %vm1059_vm0, %v8134_v57, 0 }
 0x266   : > { %v8677_v12 = vpop.permute.xlu2 %4172  ;;  %v8682_v61 = vpop.f32.mrf.mxu3 }
 0x267   : > { %3687 = vmatpush.bf16.xpose.msra.mxu2 %v3681_v13 }
 0x268   : > { %v8680_v4 = vpop.permute.xlu1 %4764 }
 0x269   : > { %3039 = vmatpush.bf16.msra.mxu1 %v8416_v8  ;;  %v3678_v8 = vsel %vm1059_vm0, %v8540_v62, 0  ;;  %v8691_v2 = vpop.permute.xlu0 %4192  ;;  %v3675_v62 = vsel %vm1059_vm0, %v8527_v52, 0 }
 0x26a   : > { %1685 = vmatpush.bf16.xpose.msrb.mxu0 %v1655_v63  ;;  %v12941_v63 = vld [vmem:[#allocation51_spill] sm:$0xff] }
 0x26c   : > { %1159 = vmax.xlane.f32.xlu0 %v8637_v53 }
 0x26d   : > { %3040 = vmatpush.bf16.msra.mxu1 %v8276_v50  ;;  %1163 = vmax.xlane.f32.xlu1 %v8666_v49 }
 0x26e   : > { %v8695_v9 = vpop.permute.xlu2 %5360  ;;  %6668 = vmatmul.msk.bf16.gmra.mxu2 %vm1059_vm0, %v8244_v55  ;;  %v8702_v50 = vpop.f32.mrf.mxu3 }
 0x26f   : > { %3688 = vmatpush.bf16.xpose.msra.mxu2 %v3678_v8 }
 0x270   : > { %v8700_v57 = vpop.permute.xlu1 %4766 }
 0x271   : > { %3041 = vmatpush.bf16.msra.mxu1 %v8316_v54  ;;  %6659 = vmatmul.msk.bf16.vlgmr.msrb.gmra.mxu0 %vm1059_vm0, %v8118_v39  ;;  %v2837_v54 = vsel %vm1059_vm0, %v8569_v40, 0  ;;  %v8711_v31 = vpop.permute.xlu0 %5356  ;;  %v2834_v39 = vsel %vm1059_vm0, %v8552_v45, 0 }
 0x272   : > { %2842 = vmatpush.bf16.xpose.msra.mxu0 %v2840_v10 }
 0x275   : > { %3042 = vmatpush.bf16.msra.mxu1 %v8200_v6  ;;  %v3672_v6 = vsel %vm1059_vm0, %v8476_v3, 0  ;;  %v2831_v3 = vsel %vm1059_vm0, %v8486_v0, 0 }
 0x276   : > { %v8713_v55 = vpop.permute.xlu2 %5344  ;;  %v8717_v51 = vpop.f32.mrf.mxu3 }
 0x277   : > { %3689 = vmatpush.bf16.xpose.msra.mxu2 %v3675_v62  ;;  %1169 = vmax.xlane.f32.xlu0 %v8717_v51  ;;  %v12942_v62 = vld [vmem:[#allocation36_spill] sm:$0xff] }
 0x278   : > { %v8715_v7 = vpop.permute.xlu1 %4198 }
 0x279   : > { %v8735_v45 = vpop.permute.xlu0 %4780 }
 0x27a   : > { %2843 = vmatpush.bf16.xpose.msra.mxu0 %v2837_v54 }
 0x27d   : > { %1165 = vmax.xlane.f32.xlu2 %v8682_v61 }
 0x27e   : > { %v8725_v52 = vpop.permute.xlu2 %4784  ;;  %6669 = vmatmul.msk.bf16.gmra.mxu2 %vm1059_vm0, %v8280_v17  ;;  %v8731_v20 = vpop.f32.mrf.mxu3 }
 0x27f   : > { %3690 = vmatpush.bf16.xpose.msra.mxu2 %v3672_v6  ;;  %1171 = vmax.xlane.f32.xlu1 %v8731_v20  ;;  %v12943_v6 = vld [vmem:[#allocation28_spill] sm:$0xff] }
 0x280   : > { %v8729_v40 = vpop.permute.xlu1 %5362 }
 0x281   : > { %6660 = vmatmul.msk.bf16.gmra.mxu0 %vm1059_vm0, %v8220_v28  ;;  %v2828_v28 = vsel %vm1059_vm0, %v8381_v47, 0  ;;  %v8751_v0 = vpop.permute.xlu0 %4196  ;;  %v12938_v47 = vld [vmem:[#allocation38_spill] sm:$0xff] }
 0x282   : > { %2844 = vmatpush.bf16.xpose.msra.mxu0 %v2834_v39  ;;  %v2825_v11 = vsel %vm1059_vm0, %v12938_v47, 0 }
 0x285   : > { %1167 = vmax.xlane.f32.xlu2 %v8702_v50 }
 0x286   : > { %v4201_v17 = vpop.permute.xlu2 %4200  ;;  %v8745_v59 = vpop.f32.mrf.mxu3 }
 0x287   : > { %3691 = vmatpush.bf16.xpose.msra.mxu2 %v3669_v36 }
 0x288   : > { %v8743_v30 = vpop.permute.xlu1 %4768 }
 0x289   : > { %v4783_v25 = vpop.permute.xlu0 %4782 }
 0x28a   : > { %2845 = vmatpush.bf16.xpose.msra.mxu0 %v2831_v3  ;;  %v2819_v3 = vsel %vm1059_vm0, %v12943_v6, 0 }
 0x28d   : > { %1173 = vmax.xlane.f32.xlu2 %v8745_v59 }
 0x28e   : > { %v4787_v19 = vpop.permute.xlu2 %4786  ;;  %6670 = vmatmul.msk.bf16.gmra.mxu2 %vm1059_vm0, %v8336_v5  ;;  %v8758_v35 = vpop.f32.mrf.mxu3 }
 0x28f   : > { %3692 = vmatpush.bf16.xpose.msra.mxu2 %v3666_v44  ;;  %1175 = vmax.xlane.f32.xlu0 %v8758_v35 }
 0x290   : > { %v8756_v38 = vpop.permute.xlu1 %5364 }
 0x291   : > { %6661 = vmatmul.msk.bf16.gmra.mxu0 %vm1059_vm0, %v12937_v16  ;;  %v8774_v13 = vpop.permute.xlu0 %4174 }
 0x292   : > { %2846 = vmatpush.bf16.xpose.msra.mxu0 %v2828_v28 }
 0x296   : > { %v8767_v5 = vpop.permute.xlu2 %4180  ;;  %v8769_v24 = vpop.f32.mrf.mxu3 }
 0x297   : > { %3693 = vmatpush.bf16.xpose.msra.mxu2 %v3663_v14  ;;  %1177 = vmax.xlane.f32.xlu1 %v8769_v24 }
 0x298   : > { %v4789_v29 = vpop.permute.xlu1 %4788 }
 0x299   : > { %v4834_v6 = vsel %vm1059_vm0, %v4789_v29, 0  ;;  %v4242_v29 = vsel %vm1059_vm0, %v8715_v7, 0  ;;  %v4236_v7 = vsel %vm1059_vm0, %v8650_v1, 0  ;;  %v4819_v1 = vsel %vm1059_vm0, %v8620_v23, 0 }
 0x29a   : > { %2847 = vmatpush.bf16.xpose.msra.mxu0 %v2825_v11  ;;  %v8793_v11 = vpop.permute.xlu0 %4176 }
 0x29e   : > { %6671 = vmatmul.msk.bf16.gmra.mxu2 %vm1059_vm0, %v12941_v63  ;;  %v4207_v8 = vpop.permute.xlu2 %4206  ;;  %v8780_v54 = vpop.f32.mrf.mxu3 }
 0x29f   : > { %v4254_v39 = vsel %vm1059_vm0, %v4207_v8, 0  ;;  %1179 = vmax.xlane.f32.xlu2 %v8780_v54 }
 0x2a0   : > { %v8778_v10 = vpop.permute.xlu1 %4178 }
 0x2a1   : > { %6662 = vmatmul.msk.bf16.gmra.mxu0 %vm1059_vm0, %v12942_v62 }
 0x2a2   : > { %2848 = vmatpush.bf16.xpose.msra.mxu0 %v2822_v26  ;;  %v12945_v26 = vld [vmem:[#allocation47_spill] sm:$0xff]  ;;  %v4203_v8 = vpop.permute.xlu0 %4202 }
 0x2a3   : > { %v4248_v62 = vsel %vm1059_vm0, %v4203_v8, 0 }
 0x2a6   : > { %v4793_v28 = vpop.permute.xlu2 %4792  ;;  %v8788_v44 = vpop.f32.mrf.mxu3 }
 0x2a7   : > { %v4840_v47 = vsel %vm1059_vm0, %v4793_v28, 0  ;;  %1181 = vmax.xlane.f32.xlu0 %v8788_v44  ;;  %v12946_v28 = vld [vmem:[#allocation46_spill] sm:$0xff] }
 0x2a8   : > { %v4205_v36 = vpop.permute.xlu1 %4204  ;;  %4842 = vmatpush.bf16.xpose.msrb.mxu2 %v4840_v47 }
 0x2a9   : > { %v4251_v16 = vsel %vm1059_vm0, %v4205_v36, 0 }
 0x2aa   : > { %2849 = vmatpush.bf16.xpose.msra.mxu0 %v2819_v3  ;;  %v4245_v3 = vsel %vm1059_vm0, %v4201_v17, 0  ;;  %v8811_v36 = vpop.permute.xlu0 %5366  ;;  %v4828_v17 = vsel %vm1059_vm0, %v8725_v52, 0  ;;  %v4822_v52 = vsel %vm1059_vm0, %v8735_v45, 0 }
 0x2ae   : > { %6672 = vmatmul.msk.bf16.gmra.mxu2 %vm1059_vm0, %v12944_v58  ;;  %v8797_v15 = vpop.f32.mrf.mxu3  ;;  %v12947_v58 = vld [vmem:[#allocation54_spill] sm:$0xff] }
 0x2af   : > { %1183 = vmax.xlane.f32.xlu1 %v8797_v15 }
 0x2b0   : > { %v4791_v14 = vpop.permute.xlu1 %4790 }
 0x2b1   : > { %6663 = vmatmul.msk.bf16.gmra.mxu0 %vm1059_vm0, %v12945_v26  ;;  %v4837_v63 = vsel %vm1059_vm0, %v4791_v14, 0 }
 0x2b2   : > { %4256 = vmatpush.bf16.xpose.msrb.mxu0 %v4254_v39  ;;  %4843 = vmatpush.bf16.xpose.msrb.mxu2 %v4837_v63  ;;  %v5369_v47 = vpop.permute.xlu0 %5368 }
 0x2b6   : > { %v8804_v39 = vpop.f32.mrf.mxu3 }
 0x2b7   : > { %1185 = vmax.xlane.f32.xlu2 %v8804_v39 }
 0x2ba   : > { %4257 = vmatpush.bf16.xpose.msrb.mxu0 %v4251_v16  ;;  %4844 = vmatpush.bf16.xpose.msrb.mxu2 %v4834_v6  ;;  %v4831_v16 = vsel %vm1059_vm0, %v4787_v19, 0  ;;  %v4825_v19 = vsel %vm1059_vm0, %v4783_v25, 0  ;;  %v8827_v14 = vpop.permute.xlu0 %4182  ;;  %v12948_v25 = vld [vmem:[#allocation39_spill] sm:$0xff] }
 0x2be   : > { %6673 = vmatmul.msk.bf16.gmra.mxu2 %vm1059_vm0, %v8523_v60  ;;  %v4239_v60 = vsel %vm1059_vm0, %v8751_v0, 0 }
 0x2c1   : > { %6664 = vmatmul.msk.bf16.gmra.mxu0 %vm1059_vm0, %v12946_v28 }
 0x2c2   : > { %4258 = vmatpush.bf16.xpose.msrb.mxu0 %v4248_v62  ;;  %4845 = vmatpush.bf16.xpose.msrb.mxu2 %v4831_v16 }
 0x2ca   : > { %4259 = vmatpush.bf16.xpose.msrb.mxu0 %v4245_v3  ;;  %4846 = vmatpush.bf16.xpose.msrb.mxu2 %v4828_v17  ;;  %v5371_v3 = vpop.permute.xlu2 %5370 }
 0x2ce   : > { %6674 = vmatmul.msk.bf16.gmra.mxu2 %vm1059_vm0, %v8673_v37  ;;  %v4233_v37 = vsel %vm1059_vm0, %v8691_v2, 0 }
 0x2d1   : > { %6665 = vmatmul.msk.bf16.gmra.mxu0 %vm1059_vm0, %v12947_v58 }
 0x2d2   : > { %4260 = vmatpush.bf16.xpose.msrb.mxu0 %v4242_v29  ;;  %4847 = vmatpush.bf16.xpose.msrb.mxu2 %v4825_v19  ;;  %v5418_v19 = vsel %vm1059_vm0, %v5371_v3, 0 }
 0x2d7   : > { %v1158_v0 = vpop.xlane.xlu0 %1157 }
 0x2d8   : > { %v1189_v26 = vsub.f32 %v8622_v32, %v1158_v0  ;;  %v1162_v63 = vpop.xlane.xlu1 %1161 }
 0x2da   : > { %4261 = vmatpush.bf16.xpose.msrb.mxu0 %v4239_v60  ;;  %4848 = vmatpush.bf16.xpose.msrb.mxu2 %v4822_v52  ;;  %v1205_v8 = vmul.f32 1.442695, %v1189_v26  ;;  %v12949_v60 = vld [vmem:[#allocation44_spill] sm:$0xff]  ;;  %v12951_v52 = vld [vmem:[#allocation43_spill] sm:$0xff] }
 0x2dc   : > { %6893 = vpow2.f32 %v1205_v8 }
 0x2de   : > { %6683 = vmatmul.msk.bf16.vlgmr.msra.gmra.mxu2 %vm1059_vm0, %v12948_v25  ;;  %v5415_v25 = vsel %vm1059_vm0, %v5369_v47, 0  ;;  %v8881_v47 = vpop.f32.mrf.mxu3 }
 0x2df   : > { %v1160_v45 = vpop.xlane.xlu0 %1159 }
 0x2e0   : > { %v1190_v62 = vsub.f32 %v8637_v53, %v1160_v45  ;;  %v1164_v32 = vpop.xlane.xlu1 %1163  ;;  %v1191_v53 = vsub.f32 %v8653_v56, %v1162_v63  ;;  %v12952_v56 = vld [vmem:[#allocation35_spill] sm:$0xff]  ;;  %v12953_v63 = vld [vmem:[#allocation34_spill] sm:$0xff] }
 0x2e1   : > { %6666 = vmatmul.msk.bf16.gmra.mxu0 %vm1059_vm0, %v8657_v34  ;;  %v8843_v6 = vpop.f32.mrf.mxu2  ;;  %v1192_v23 = vsub.f32 %v8666_v49, %v1164_v32  ;;  %v12954_v32 = vld [vmem:[#allocation30_spill] sm:$0xff] }
 0x2e2   : > { %4262 = vmatpush.bf16.xpose.msrb.mxu0 %v4236_v7  ;;  %4849 = vmatpush.bf16.xpose.msrb.mxu2 %v4819_v1  ;;  %v1207_v2 = vmul.f32 1.442695, %v1190_v62  ;;  %v6894_v16 = vpop.eup %6893  ;;  %v12950_v7 = vld [vmem:[#allocation29_spill] sm:$0xff]  ;;  %v1209_v0 = vmul.f32 1.442695, %v1191_v53 }
 0x2e3   : > { %v1211_v58 = vmul.f32 1.442695, %v1192_v23  ;;  %v7407_v53 = vld [vmem:[%s12743_s4 + $0x2] ss:$0 sm:$0xff] }
 0x2e4   : > { %6895 = vpow2.f32 %v1207_v2 }
 0x2e5   : > { %6897 = vpow2.f32 %v1211_v58  ;;  %v12956_v58 = vld [vmem:[#allocation26_spill] sm:$0xff] }
 0x2e6   : > { %6899 = vpow2.f32 %v1209_v0  ;;  %v12957_v0 = vld [vmem:[#allocation32_spill] sm:$0xff] }
 0x2e9   : > { %v8845_v28 = vpop.f32.mrf.mxu2 }
 0x2ea   : > { %4263 = vmatpush.bf16.xpose.msrb.mxu0 %v4233_v37  ;;  %2315 = vmax.xlane.f32.xlu1 %v8845_v28  ;;  %v6896_v34 = vpop.eup %6895 }
 0x2eb   : > { %v1269_v29 = vpack.c.bf16 %v6896_v34, %v6894_v16  ;;  %v8868_v8 = vpop.eup %6897 }
 0x2ec   : > { %v8872_v62 = vpop.eup %6899 }
 0x2ed   : > { %1285 = vmatmul.bf16.vlgmr.msra.gmra.mxu3 %v1269_v29  ;;  %v1270_v23 = vpack.c.bf16 %v8868_v8, %v8872_v62 }
 0x2ee   : > { %v8849_v17 = vpop.f32.mrf.mxu0  ;;  %6684 = vmatmul.msk.bf16.gmra.mxu2 %vm1059_vm0, %v12949_v60  ;;  %3855 = vmatpush.bf16.msra.mxu3 %v12951_v52 }
 0x2ef   : > { %1727 = vmax.xlane.f32.xlu0 %v8849_v17 }
 0x2f0   : > { %v1166_v49 = vpop.xlane.xlu2 %1165 }
 0x2f1   : > { %6675 = vmatmul.msk.bf16.vlgmr.msra.gmra.mxu0 %vm1059_vm0, %v12950_v7  ;;  %v8859_v37 = vpop.f32.mrf.mxu2  ;;  %v1193_v29 = vsub.f32 %v8682_v61, %v1166_v49  ;;  %v12958_v61 = vld [vmem:[#allocation50_spill] sm:$0xff]  ;;  %v5412_v49 = vsel %vm1059_vm0, %v8811_v36, 0  ;;  %v12962_v36 = vld [vmem:[#allocation21_spill] sm:$0xff] }
 0x2f2   : > { %5420 = vmatpush.bf16.xpose.msra.mxu0 %v5418_v19  ;;  %3856 = vmatpush.bf16.msra.mxu3 %v12952_v56  ;;  %v1008_v19 = vadd.f32 %v7407_v53, %v12956_v58  ;;  %v12960_v58 = vld [vmem:[#allocation23_spill] sm:$0xff] }
 0x2f6   : > { %v8862_v26 = vpop.f32.mrf.mxu0  ;;  %3857 = vmatpush.bf16.msra.mxu3 %v12953_v63  ;;  %v12961_v63 = vld [vmem:[#allocation24_spill] sm:$0xff] }
 0x2f7   : > { %2313 = vmax.xlane.f32.xlu0 %v8843_v6  ;;  %1729 = vmax.xlane.f32.xlu2 %v8862_v26 }
 0x2f8   : > { %v1168_v1 = vpop.xlane.xlu2 %1167 }
 0x2f9   : > { %v8870_v45 = vpop.f32.mrf.mxu2  ;;  %v1194_v2 = vsub.f32 %v8702_v50, %v1168_v1  ;;  %v12955_v50 = vld [vmem:[#allocation25_spill] sm:$0xff]  ;;  %v1213_v1 = vmul.f32 1.442695, %v1193_v29 }
 0x2fa   : > { %5421 = vmatpush.bf16.xpose.msra.mxu0 %v5415_v25  ;;  %3858 = vmatpush.bf16.msra.mxu3 %v12954_v32  ;;  %v1006_v60 = vadd.f32 %v7407_v53, %v12955_v50  ;;  %v12959_v25 = vld [vmem:[#allocation27_spill] sm:$0xff]  ;;  %v1001_v32 = vadd.f32 %v7407_v53, %v12960_v58 }
 0x2fb   : > { %v1215_v7 = vmul.f32 1.442695, %v1194_v2 }
 0x2fc   : > { %v8902_v2 = vpack.c.bf16 %v1008_v19, %v1006_v60  ;;  %v1172_v60 = vpop.xlane.xlu1 %1171 }
 0x2fd   : > { %1290 = vmatmul.bf16.gmra.mxu3 %v1270_v23  ;;  %v1003_v23 = vadd.f32 %v7407_v53, %v12961_v63  ;;  %6901 = vpow2.f32 %v1215_v7  ;;  %v5409_v63 = vsel %vm1059_vm0, %v8756_v38, 0 }
 0x2fe   : > { %v8876_v3 = vpop.f32.mrf.mxu0  ;;  %6685 = vmatmul.msk.bf16.gmra.mxu2 %vm1059_vm0, %v12958_v61  ;;  %3859 = vmatpush.bf16.msra.mxu3 %v12959_v25  ;;  %6903 = vpow2.f32 %v1213_v1  ;;  %v996_v61 = vadd.f32 %v7407_v53, %v12962_v36  ;;  %v12966_v36 = vld [vmem:[#allocation37_spill] sm:$0xff] }
 0x2ff   : > { %1731 = vmax.xlane.f32.xlu1 %v8876_v3  ;;  %2317 = vmax.xlane.f32.xlu2 %v8859_v37  ;;  %v8909_v25 = vpack.c.bf16 %v1003_v23, %v1001_v32  ;;  %v1196_v32 = vsub.f32 %v8731_v20, %v1172_v60  ;;  %v12967_v20 = vld [vmem:[#allocation55_spill] sm:$0xff] }
 0x300   : > { %1187 = vmax.xlane.f32.xlu0 %v8881_v47 }
 0x301   : > { %6676 = vmatmul.msk.bf16.gmra.mxu0 %vm1059_vm0, %v12957_v0  ;;  %v8898_v50 = vpop.f32.mrf.mxu2  ;;  %12964 = vst [vmem:[#allocation33_spill] sm:$0xff] %v8909_v25  ;;  %v1219_v23 = vmul.f32 1.442695, %v1196_v32  ;;  %v1174_v32 = vpop.xlane.xlu2 %1173 }
 0x302   : > { %5422 = vmatpush.bf16.xpose.msra.mxu0 %v5412_v49  ;;  %3860 = vmatpush.bf16.msra.mxu3 %v8902_v2  ;;  %v12963_v49 = vld [vmem:[#allocation22_spill] sm:$0xff] }
 0x303   : > { %v998_v29 = vadd.f32 %v7407_v53, %v12963_v49  ;;  %v8915_v19 = vpop.eup %6901  ;;  %6905 = vpow2.f32 %v1219_v23 }
 0x304   : > { %v6904_v1 = vpop.eup %6903 }
 0x305   : > { %v1271_v38 = vpack.c.bf16 %v8915_v19, %v6904_v1 }
 0x306   : > { %v8905_v0 = vpop.f32.mrf.mxu0  ;;  %3861 = vmatpush.bf16.msra.mxu3 %v8909_v25 }
 0x307   : > { %1237 = vadd.xlane.f32.xlu1 %v6894_v16  ;;  %1239 = vadd.xlane.f32.xlu2 %v6896_v34  ;;  %v8919_v16 = vpack.c.bf16 %v998_v29, %v996_v61  ;;  %v1170_v34 = vpop.xlane.xlu0 %1169  ;;  %v5406_v61 = vsel %vm1059_vm0, %v8729_v40, 0 }
 0x308   : > { %1733 = vmax.xlane.f32.xlu0 %v8905_v0  ;;  %v1195_v58 = vsub.f32 %v8717_v51, %v1170_v34 }
 0x309   : > { %v8917_v7 = vpop.f32.mrf.mxu2  ;;  %12965 = vst [vmem:[#allocation38_spill] sm:$0xff] %v8919_v16  ;;  %v6906_v40 = vpop.eup %6905 }
 0x30a   : > { %5423 = vmatpush.bf16.xpose.msra.mxu0 %v5409_v63  ;;  %3862 = vmatpush.bf16.msra.mxu3 %v8919_v16  ;;  %v1217_v49 = vmul.f32 1.442695, %v1195_v58  ;;  %v5403_v63 = vsel %vm1059_vm0, %v8695_v9, 0 }
 0x30c   : > { %6907 = vpow2.f32 %v1217_v49  ;;  %v12969_v49 = vld [vmem:[#allocation56_spill] sm:$0xff] }
 0x30d   : > { %1295 = vmatmul.bf16.gmra.mxu3 %v1271_v38 }
 0x30e   : > { %v8923_v53 = vpop.f32.mrf.mxu0  ;;  %6686 = vmatmul.msk.bf16.gmra.mxu2 %vm1059_vm0, %v12967_v20 }
 0x30f   : > { %2321 = vmax.xlane.f32.xlu1 %v8898_v50  ;;  %1735 = vmax.xlane.f32.xlu2 %v8923_v53  ;;  %v1176_v60 = vpop.xlane.xlu0 %1175 }
 0x310   : > { %2319 = vmax.xlane.f32.xlu0 %v8870_v45  ;;  %v1198_v58 = vsub.f32 %v8758_v35, %v1176_v60  ;;  %v5400_v35 = vsel %vm1059_vm0, %v8645_v27, 0 }
 0x311   : > { %6677 = vmatmul.msk.bf16.gmra.mxu0 %vm1059_vm0, %v12966_v36  ;;  %v8936_v51 = vpop.f32.mrf.mxu2 }
 0x312   : > { %5424 = vmatpush.bf16.xpose.msra.mxu0 %v5406_v61  ;;  %v6908_v38 = vpop.eup %6907  ;;  %v1197_v61 = vsub.f32 %v8745_v59, %v1174_v32  ;;  %v1223_v9 = vmul.f32 1.442695, %v1198_v58  ;;  %v1178_v32 = vpop.xlane.xlu1 %1177 }
 0x313   : > { %v1272_v36 = vpack.c.bf16 %v6906_v40, %v6908_v38 }
 0x314   : > { %6909 = vpow2.f32 %v1223_v9 }
 0x316   : > { %v8938_v29 = vpop.f32.mrf.mxu0 }
 0x317   : > { %1737 = vmax.xlane.f32.xlu1 %v8938_v29  ;;  %2323 = vmax.xlane.f32.xlu2 %v8917_v7 }
 0x318   : > { %1241 = vadd.xlane.f32.xlu0 %v8872_v62  ;;  %v12968_v62 = vld [vmem:[#allocation40_spill] sm:$0xff] }
 0x319   : > { %v8945_v34 = vpop.f32.mrf.mxu2 }
 0x31a   : > { %5425 = vmatpush.bf16.xpose.msra.mxu0 %v5403_v63  ;;  %v1221_v63 = vmul.f32 1.442695, %v1197_v61  ;;  %v6910_v27 = vpop.eup %6909 }
 0x31c   : > { %6911 = vpow2.f32 %v1221_v63  ;;  %v12970_v63 = vld [vmem:[#allocation42_spill] sm:$0xff] }
 0x31d   : > { %1300 = vmatmul.bf16.gmra.mxu3 %v1272_v36 }
 0x31e   : > { %v8948_v23 = vpop.f32.mrf.mxu0  ;;  %6687 = vmatmul.msk.bf16.gmra.mxu2 %vm1059_vm0, %v12969_v49 }
 0x31f   : > { %1243 = vadd.xlane.f32.xlu1 %v8868_v8  ;;  %1245 = vadd.xlane.f32.xlu2 %v6904_v1  ;;  %v5397_v8 = vsel %vm1059_vm0, %v8711_v31, 0  ;;  %v1180_v1 = vpop.xlane.xlu2 %1179 }
 0x320   : > { %1739 = vmax.xlane.f32.xlu0 %v8948_v23  ;;  %v1200_v61 = vsub.f32 %v8780_v54, %v1180_v1 }
 0x321   : > { %6678 = vmatmul.msk.bf16.gmra.mxu0 %vm1059_vm0, %v12968_v62  ;;  %v8959_v60 = vpop.f32.mrf.mxu2 }
 0x322   : > { %5426 = vmatpush.bf16.xpose.msra.mxu0 %v5400_v35  ;;  %v6912_v36 = vpop.eup %6911  ;;  %v1199_v35 = vsub.f32 %v8769_v24, %v1178_v32  ;;  %v1227_v31 = vmul.f32 1.442695, %v1200_v61  ;;  %v1184_v24 = vpop.xlane.xlu1 %1183 }
 0x323   : > { %v1273_v62 = vpack.c.bf16 %v6910_v27, %v6912_v36  ;;  %v1182_v32 = vpop.xlane.xlu0 %1181 }
 0x324   : > { %v1225_v54 = vmul.f32 1.442695, %v1199_v35  ;;  %6913 = vpow2.f32 %v1227_v31  ;;  %v1201_v35 = vsub.f32 %v8788_v44, %v1182_v32 }
 0x326   : > { %v8961_v59 = vpop.f32.mrf.mxu0  ;;  %6915 = vpow2.f32 %v1225_v54 }
 0x327   : > { %2327 = vmax.xlane.f32.xlu1 %v8945_v34  ;;  %1741 = vmax.xlane.f32.xlu2 %v8961_v59 }
 0x328   : > { %2325 = vmax.xlane.f32.xlu0 %v8936_v51 }
 0x329   : > { %v8968_v58 = vpop.f32.mrf.mxu2 }
 0x32a   : > { %5427 = vmatpush.bf16.xpose.msra.mxu0 %v5397_v8 }
 0x32d   : > { %1305 = vmatmul.bf16.gmra.mxu3 %v1273_v62  ;;  %v1202_v62 = vsub.f32 %v8797_v15, %v1184_v24  ;;  %v1229_v15 = vmul.f32 1.442695, %v1201_v35  ;;  %v12972_v35 = vld [vmem:[#allocation57_spill] sm:$0xff] }
 0x32e   : > { %v8971_v9 = vpop.f32.mrf.mxu0  ;;  %6688 = vmatmul.msk.bf16.gmra.mxu2 %vm1059_vm0, %v8559_v18 }
 0x32f   : > { %1743 = vmax.xlane.f32.xlu1 %v8971_v9  ;;  %2329 = vmax.xlane.f32.xlu2 %v8959_v60 }
 0x330   : > { %1247 = vadd.xlane.f32.xlu0 %v8915_v19  ;;  %v6914_v19 = vpop.eup %6913 }
 0x331   : > { %6679 = vmatmul.msk.bf16.gmra.mxu0 %vm1059_vm0, %v12970_v63  ;;  %v8981_v8 = vpop.f32.mrf.mxu2  ;;  %v6916_v61 = vpop.eup %6915 }
 0x332   : > { %v1274_v56 = vpack.c.bf16 %v6914_v19, %v6916_v61 }
 0x336   : > { %v8983_v1 = vpop.f32.mrf.mxu0 }
 0x337   : > { %1249 = vadd.xlane.f32.xlu1 %v6908_v38  ;;  %1251 = vadd.xlane.f32.xlu2 %v6906_v40  ;;  %v1231_v40 = vmul.f32 1.442695, %v1202_v62  ;;  %v12971_v38 = vld [vmem:[#allocation48_spill] sm:$0xff] }
 0x338   : > { %1745 = vmax.xlane.f32.xlu0 %v8983_v1 }
 0x339   : > { %v8992_v31 = vpop.f32.mrf.mxu2  ;;  %6917 = vpow2.f32 %v1231_v40 }
 0x33a   : > { %6919 = vpow2.f32 %v1229_v15  ;;  %v1186_v15 = vpop.xlane.xlu2 %1185 }
 0x33d   : > { %1310 = vmatmul.bf16.gmra.mxu3 %v1274_v56 }
 0x33e   : > { %v8987_v63 = vpop.f32.mrf.mxu0  ;;  %6689 = vmatmul.msk.bf16.gmra.mxu2 %vm1059_vm0, %v8594_v43 }
 0x33f   : > { %2333 = vmax.xlane.f32.xlu1 %v8981_v8  ;;  %1747 = vmax.xlane.f32.xlu2 %v8987_v63  ;;  %v6918_v56 = vpop.eup %6917 }
 0x340   : > { %2331 = vmax.xlane.f32.xlu0 %v8968_v58  ;;  %v6920_v24 = vpop.eup %6919 }
 0x341   : > { %6680 = vmatmul.msk.bf16.gmra.mxu0 %vm1059_vm0, %v12971_v38  ;;  %v9003_v44 = vpop.f32.mrf.mxu2  ;;  %v1275_v62 = vpack.c.bf16 %v6918_v56, %v6920_v24  ;;  %v12973_v38 = vld [vmem:[#allocation60_spill] sm:$0xff] }
 0x346   : > { %v8999_v54 = vpop.f32.mrf.mxu0 }
 0x347   : > { %1749 = vmax.xlane.f32.xlu1 %v8999_v54  ;;  %2335 = vmax.xlane.f32.xlu2 %v8992_v31 }
 0x348   : > { %1253 = vadd.xlane.f32.xlu0 %v6912_v36 }
 0x349   : > { %v9012_v40 = vpop.f32.mrf.mxu2 }
 0x34d   : > { %1315 = vmatmul.bf16.gmra.mxu3 %v1275_v62 }
 0x34e   : > { %v9005_v32 = vpop.f32.mrf.mxu0  ;;  %6690 = vmatmul.msk.bf16.gmra.mxu2 %vm1059_vm0, %v8590_v42 }
 0x34f   : > { %1255 = vadd.xlane.f32.xlu1 %v6910_v27  ;;  %1257 = vadd.xlane.f32.xlu2 %v6916_v61 }
 0x350   : > { %1751 = vmax.xlane.f32.xlu0 %v9005_v32 }
 0x351   : > { %6681 = vmatmul.msk.bf16.gmra.mxu0 %vm1059_vm0, %v12972_v35  ;;  %v9019_v27 = vpop.f32.mrf.mxu2 }
 0x356   : > { %v9014_v36 = vpop.f32.mrf.mxu0 }
 0x357   : > { %2339 = vmax.xlane.f32.xlu1 %v9012_v40  ;;  %1753 = vmax.xlane.f32.xlu2 %v9014_v36 }
 0x358   : > { %2337 = vmax.xlane.f32.xlu0 %v9003_v44 }
 0x35d   : > { %v2316_v43 = vpop.xlane.xlu1 %2315 }
 0x35e   : > { %v9021_v61 = vpop.f32.mrf.mxu0  ;;  %6699 = vmatmul.msk.bf16.vlgmr.msrb.gmra.mxu2 %vm1059_vm0, %v8635_v22 }
 0x35f   : > { %1755 = vmax.xlane.f32.xlu1 %v9021_v61  ;;  %2341 = vmax.xlane.f32.xlu2 %v9019_v27 }
 0x360   : > { %1259 = vadd.xlane.f32.xlu0 %v6914_v19 }
 0x361   : > { %6682 = vmatmul.msk.bf16.gmra.mxu0 %vm1059_vm0, %v12973_v38 }
 0x362   : > { %v1728_v62 = vpop.xlane.xlu0 %1727 }
 0x363   : > { %v1759_v35 = vsub.f32 %v8849_v17, %v1728_v62  ;;  %v1203_v17 = vsub.f32 %v8804_v39, %v1186_v15  ;;  %v9038_v62 = vpop.f32.mrf.mxu2 }
 0x365   : > { %v1775_v52 = vmul.f32 1.442695, %v1759_v35 }
 0x366   : > { %v9030_v42 = vpop.f32.mrf.mxu0 }
 0x367   : > { %6921 = vpow2.f32 %v1775_v52  ;;  %1261 = vadd.xlane.f32.xlu1 %v6920_v24  ;;  %1263 = vadd.xlane.f32.xlu2 %v6918_v56  ;;  %v2346_v52 = vsub.f32 %v8845_v28, %v2316_v43 }
 0x368   : > { %1757 = vmax.xlane.f32.xlu0 %v9030_v42 }
 0x369   : > { %v2363_v39 = vmul.f32 1.442695, %v2346_v52  ;;  %v12974_v52 = vld [vmem:[#allocation58_spill] sm:$0xff] }
 0x36a   : > { %v2314_v19 = vpop.xlane.xlu0 %2313  ;;  %v1730_v18 = vpop.xlane.xlu2 %1729 }
 0x36b   : > { %v2345_v38 = vsub.f32 %v8843_v6, %v2314_v19  ;;  %v1760_v16 = vsub.f32 %v8862_v26, %v1730_v18  ;;  %v1233_v26 = vmul.f32 1.442695, %v1203_v17  ;;  %v9060_v19 = vpop.f32.mrf.mxu2 }
 0x36d   : > { %v6922_v22 = vpop.eup %6921  ;;  %v2361_v49 = vmul.f32 1.442695, %v2345_v38  ;;  %v1777_v25 = vmul.f32 1.442695, %v1760_v16 }
 0x36e   : > { %v9035_v20 = vpop.f32.mrf.mxu0  ;;  %6700 = vmatmul.msk.bf16.gmra.mxu2 %vm1059_vm0, %v8680_v4 }
 0x36f   : > { %6923 = vpow2.f32 %v2361_v49  ;;  %1807 = vadd.xlane.f32.xlu2 %v6922_v22 }
 0x370   : > { %6925 = vpow2.f32 %v1777_v25  ;;  %2343 = vmax.xlane.f32.xlu0 %v9038_v62 }
 0x371   : > { %6691 = vmatmul.msk.bf16.vlgmr.msrb.gmra.mxu0 %vm1059_vm0, %v8607_v33  ;;  %6927 = vpow2.f32 %v1233_v26 }
 0x372   : > { %v1732_v18 = vpop.xlane.xlu1 %1731  ;;  %v2318_v6 = vpop.xlane.xlu2 %2317  ;;  %6929 = vpow2.f32 %v2363_v39 }
 0x373   : > { %v1188_v16 = vpop.xlane.xlu0 %1187  ;;  %v1761_v33 = vsub.f32 %v8876_v3, %v1732_v18 }
 0x374   : > { %v1204_v56 = vsub.f32 %v8881_v47, %v1188_v16  ;;  %v2347_v16 = vsub.f32 %v8859_v37, %v2318_v6  ;;  %v12976_v37 = vld [vmem:[#allocation53_spill] sm:$0xff] }
 0x375   : > { %v9047_v49 = vpop.eup %6923  ;;  %v1779_v15 = vmul.f32 1.442695, %v1761_v33 }
 0x376   : > { %v6926_v24 = vpop.eup %6925  ;;  %v1235_v43 = vmul.f32 1.442695, %v1204_v56  ;;  %v9049_v28 = vpop.f32.mrf.mxu0  ;;  %2393 = vadd.xlane.f32.xlu1 %v9047_v49 }
 0x377   : > { %2893 = vmax.xlane.f32.xlu2 %v9049_v28  ;;  %v1839_v4 = vpack.c.bf16 %v6926_v24, %v6922_v22  ;;  %v6928_v38 = vpop.eup %6927 }
 0x378   : > { %2891 = vmax.xlane.f32.xlu0 %v9035_v20  ;;  %6931 = vpow2.f32 %v1235_v43  ;;  %v6930_v17 = vpop.eup %6929 }
 0x379   : > { %1887 = vmatmul.bf16.vlgmr.msrb.gmra.mxu1 %v1839_v4  ;;  %6933 = vpow2.f32 %v1779_v15  ;;  %v2365_v4 = vmul.f32 1.442695, %v2347_v16 }
 0x37a   : > { %4457 = vmatpush.bf16.msrb.mxu1 %v8615_v21  ;;  %v9056_v47 = vpop.xlane.xlu1 %1237  ;;  %v9058_v25 = vpop.xlane.xlu2 %1239 }
 0x37b   : > { %v1734_v35 = vpop.xlane.xlu0 %1733 }
 0x37c   : > { %v1762_v3 = vsub.f32 %v8905_v0, %v1734_v35  ;;  %v12975_v0 = vld [vmem:[#allocation52_spill] sm:$0xff]  ;;  %v9073_v35 = vpop.f32.mrf.mxu2 }
 0x37e   : > { %v1781_v22 = vmul.f32 1.442695, %v1762_v3  ;;  %4458 = vmatpush.bf16.msrb.mxu1 %v12974_v52  ;;  %v9064_v18 = vpop.f32.mrf.mxu0  ;;  %3735 = vmax.xlane.f32.xlu1 %v9060_v19  ;;  %v6932_v21 = vpop.eup %6931 }
 0x37f   : > { %2395 = vadd.xlane.f32.xlu2 %v6930_v17  ;;  %v1276_v26 = vpack.c.bf16 %v6932_v21, %v6928_v38  ;;  %6701 = vmatmul.msk.bf16.gmra.mxu2 %vm1059_vm0, %v8700_v57  ;;  %v6934_v33 = vpop.eup %6933 }
 0x380   : > { %6935 = vpow2.f32 %v1781_v22  ;;  %1265 = vadd.xlane.f32.xlu0 %v6928_v38  ;;  %v12977_v38 = vld [vmem:[#allocation45_spill] sm:$0xff] }
 0x381   : > { %6692 = vmatmul.msk.bf16.gmra.mxu0 %vm1059_vm0, %v8664_v46  ;;  %1320 = vmatmul.bf16.gmra.mxu3 %v1276_v26  ;;  %6937 = vpow2.f32 %v2365_v4 }
 0x382   : > { %4459 = vmatpush.bf16.msrb.mxu1 %v12975_v0  ;;  %v2322_v39 = vpop.xlane.xlu1 %2321  ;;  %v1736_v56 = vpop.xlane.xlu2 %1735 }
 0x383   : > { %v2320_v43 = vpop.xlane.xlu0 %2319  ;;  %v1763_v3 = vsub.f32 %v8923_v53, %v1736_v56  ;;  %v2349_v4 = vsub.f32 %v8898_v50, %v2322_v39 }
 0x384   : > { %v2348_v56 = vsub.f32 %v8870_v45, %v2320_v43 }
 0x385   : > { %v1783_v57 = vmul.f32 1.442695, %v1763_v3 }
 0x386   : > { %v6936_v15 = vpop.eup %6935  ;;  %4460 = vmatpush.bf16.msrb.mxu1 %v12976_v37  ;;  %v9077_v6 = vpop.f32.mrf.mxu0  ;;  %1809 = vadd.xlane.f32.xlu1 %v6926_v24  ;;  %v2367_v3 = vmul.f32 1.442695, %v2348_v56 }
 0x387   : > { %3737 = vmax.xlane.f32.xlu2 %v9073_v35  ;;  %v1840_v46 = vpack.c.bf16 %v6936_v15, %v6934_v33  ;;  %6939 = vpow2.f32 %v1783_v57  ;;  %v6938_v24 = vpop.eup %6937 }
 0x388   : > { %1811 = vadd.xlane.f32.xlu0 %v6934_v33  ;;  %v2425_v33 = vpack.c.bf16 %v6930_v17, %v9047_v49 }
 0x389   : > { %1892 = vmatmul.bf16.gmra.mxu1 %v1840_v46 }
 0x38a   : > { %4461 = vmatpush.bf16.msrb.mxu1 %v12977_v38  ;;  %v1738_v22 = vpop.xlane.xlu1 %1737  ;;  %v2324_v52 = vpop.xlane.xlu2 %2323 }
 0x38b   : > { %v1764_v26 = vsub.f32 %v8938_v29, %v1738_v22  ;;  %v9082_v16 = vpop.xlane.xlu0 %1241 }
 0x38c   : > { %12978 = vst [vmem:[#allocation41_spill] sm:$0xff] %v9082_v16 }
 0x38d   : > { %v1785_v53 = vmul.f32 1.442695, %v1764_v26  ;;  %v6940_v43 = vpop.eup %6939 }
 0x38e   : > { %v9084_v0 = vpop.f32.mrf.mxu0  ;;  %1267 = vadd.xlane.f32.xlu1 %v6932_v21 }
 0x38f   : > { %6941 = vpow2.f32 %v1785_v53  ;;  %1813 = vadd.xlane.f32.xlu2 %v6936_v15  ;;  %6702 = vmatmul.msk.bf16.gmra.mxu2 %vm1059_vm0, %v8743_v30  ;;  %v2369_v15 = vmul.f32 1.442695, %v2349_v4  ;;  %v2350_v30 = vsub.f32 %v8917_v7, %v2324_v52 }
 0x390   : > { %2397 = vadd.xlane.f32.xlu0 %v6938_v24  ;;  %6943 = vpow2.f32 %v2367_v3 }
 0x391   : > { %6693 = vmatmul.msk.bf16.gmra.mxu0 %vm1059_vm0, %v8677_v12  ;;  %2465 = vmatmul.bf16.vlgmr.msrb.gmra.mxu3 %v2425_v33  ;;  %6945 = vpow2.f32 %v2369_v15  ;;  %v2371_v26 = vmul.f32 1.442695, %v2350_v30 }
 0x392   : > { %v9093_v29 = vpop.xlane.xlu1 %1243  ;;  %v9095_v21 = vpop.xlane.xlu2 %1245 }
 0x393   : > { %12979 = vst [vmem:[#allocation31_spill] sm:$0xff] %v9093_v29  ;;  %v1740_v45 = vpop.xlane.xlu0 %1739 }
 0x394   : > { %12980 = vst [vmem:[#allocation51_spill] sm:$0xff] %v9095_v21  ;;  %v1765_v12 = vsub.f32 %v8948_v23, %v1740_v45 }
 0x395   : > { %v6942_v37 = vpop.eup %6941 }
 0x396   : > { %v9097_v49 = vpop.f32.mrf.mxu0  ;;  %2895 = vmax.xlane.f32.xlu1 %v9064_v18  ;;  %v1841_v50 = vpack.c.bf16 %v6942_v37, %v6940_v43  ;;  %v1787_v46 = vmul.f32 1.442695, %v1765_v12  ;;  %v6944_v22 = vpop.eup %6943 }
 0x397   : > { %2899 = vmax.xlane.f32.xlu2 %v9084_v0  ;;  %v6946_v56 = vpop.eup %6945  ;;  %v2426_v23 = vpack.c.bf16 %v6944_v22, %v6938_v24 }
 0x398   : > { %2897 = vmax.xlane.f32.xlu0 %v9077_v6  ;;  %6947 = vpow2.f32 %v1787_v46 }
 0x399   : > { %1897 = vmatmul.bf16.gmra.mxu1 %v1841_v50 }
 0x39a   : > { %v2328_v17 = vpop.xlane.xlu1 %2327  ;;  %v1742_v39 = vpop.xlane.xlu2 %1741 }
 0x39b   : > { %v1766_v57 = vsub.f32 %v8961_v59, %v1742_v39  ;;  %v2326_v38 = vpop.xlane.xlu0 %2325  ;;  %v2352_v3 = vsub.f32 %v8945_v34, %v2328_v17 }
 0x39c   : > { %v2351_v15 = vsub.f32 %v8936_v51, %v2326_v38 }
 0x39d   : > { %v1789_v53 = vmul.f32 1.442695, %v1766_v57 }
 0x39e   : > { %v9105_v33 = vpop.f32.mrf.mxu0  ;;  %2399 = vadd.xlane.f32.xlu1 %v6944_v22  ;;  %v6948_v4 = vpop.eup %6947  ;;  %v2373_v30 = vmul.f32 1.442695, %v2351_v15 }
 0x39f   : > { %2401 = vadd.xlane.f32.xlu2 %v6946_v56  ;;  %6949 = vpow2.f32 %v1789_v53 }
 0x3a0   : > { %1817 = vadd.xlane.f32.xlu0 %v6942_v37  ;;  %6951 = vpow2.f32 %v2371_v26 }
 0x3a1   : > { %6694 = vmatmul.msk.bf16.gmra.mxu0 %vm1059_vm0, %v8774_v13  ;;  %2470 = vmatmul.bf16.gmra.mxu3 %v2426_v23  ;;  %v2375_v13 = vmul.f32 1.442695, %v2352_v3 }
 0x3a2   : > { %v1744_v7 = vpop.xlane.xlu1 %1743  ;;  %v2330_v59 = vpop.xlane.xlu2 %2329 }
 0x3a3   : > { %v9109_v52 = vpop.xlane.xlu0 %1247  ;;  %v1767_v24 = vsub.f32 %v8971_v9, %v1744_v7  ;;  %6953 = vpow2.f32 %v2375_v13  ;;  %v2353_v38 = vsub.f32 %v8959_v60, %v2330_v59 }
 0x3a4   : > { %12981 = vst [vmem:[#allocation36_spill] sm:$0xff] %v9109_v52  ;;  %6955 = vpow2.f32 %v2373_v30 }
 0x3a5   : > { %v6950_v45 = vpop.eup %6949  ;;  %v1791_v34 = vmul.f32 1.442695, %v1767_v24 }
 0x3a6   : > { %v9113_v50 = vpop.f32.mrf.mxu0  ;;  %1815 = vadd.xlane.f32.xlu1 %v6940_v43  ;;  %v6952_v37 = vpop.eup %6951  ;;  %v1842_v12 = vpack.c.bf16 %v6950_v45, %v6948_v4 }
 0x3a7   : > { %1819 = vadd.xlane.f32.xlu2 %v6948_v4  ;;  %6957 = vpow2.f32 %v1791_v34  ;;  %v2427_v9 = vpack.c.bf16 %v6952_v37, %v6946_v56  ;;  %v2377_v4 = vmul.f32 1.442695, %v2353_v38  ;;  %v9132_v56 = vpop.f32.mrf.mxu3 }
 0x3a8   : > { %2403 = vadd.xlane.f32.xlu0 %v6952_v37  ;;  %12984 = vst [vmem:[#allocation47_spill] sm:$0xff] %v9132_v56 }
 0x3a9   : > { %1902 = vmatmul.bf16.gmra.mxu1 %v1842_v12  ;;  %v6954_v26 = vpop.eup %6953 }
 0x3aa   : > { %v9116_v39 = vpop.xlane.xlu1 %1249  ;;  %v9118_v46 = vpop.xlane.xlu2 %1251 }
 0x3ab   : > { %12982 = vst [vmem:[#allocation28_spill] sm:$0xff] %v9116_v39  ;;  %v1746_v17 = vpop.xlane.xlu0 %1745  ;;  %v6956_v23 = vpop.eup %6955 }
 0x3ac   : > { %12983 = vst [vmem:[#allocation49_spill] sm:$0xff] %v9118_v46  ;;  %v1768_v51 = vsub.f32 %v8983_v1, %v1746_v17 }
 0x3ad   : > { %v6958_v7 = vpop.eup %6957 }
 0x3ae   : > { %v1793_v43 = vmul.f32 1.442695, %v1768_v51  ;;  %v9121_v57 = vpop.f32.mrf.mxu0  ;;  %2901 = vmax.xlane.f32.xlu1 %v9097_v49 }
 0x3af   : > { %2905 = vmax.xlane.f32.xlu2 %v9113_v50 }
 0x3b0   : > { %6959 = vpow2.f32 %v1793_v43  ;;  %2903 = vmax.xlane.f32.xlu0 %v9105_v33  ;;  %v2428_v43 = vpack.c.bf16 %v6954_v26, %v6956_v23 }
 0x3b1   : > { %6695 = vmatmul.msk.bf16.gmra.mxu0 %vm1059_vm0, %v8793_v11  ;;  %2475 = vmatmul.bf16.gmra.mxu3 %v2427_v9  ;;  %6961 = vpow2.f32 %v2377_v4  ;;  %v9141_v9 = vpop.f32.mrf.mxu3 }
 0x3b2   : > { %v2334_v1 = vpop.xlane.xlu1 %2333  ;;  %v1748_v22 = vpop.xlane.xlu2 %1747  ;;  %12986 = vst [vmem:[#allocation54_spill] sm:$0xff] %v9141_v9 }
 0x3b3   : > { %v2332_v53 = vpop.xlane.xlu0 %2331  ;;  %v1769_v15 = vsub.f32 %v8987_v63, %v1748_v22  ;;  %v2355_v51 = vsub.f32 %v8981_v8, %v2334_v1 }
 0x3b4   : > { %v2354_v17 = vsub.f32 %v8968_v58, %v2332_v53 }
 0x3b5   : > { %v1795_v11 = vmul.f32 1.442695, %v1769_v15  ;;  %v2381_v58 = vmul.f32 1.442695, %v2355_v51 }
 0x3b6   : > { %v6960_v3 = vpop.eup %6959  ;;  %v9130_v24 = vpop.f32.mrf.mxu0  ;;  %2405 = vadd.xlane.f32.xlu1 %v6956_v23 }
 0x3b7   : > { %2407 = vadd.xlane.f32.xlu2 %v6954_v26  ;;  %v1843_v60 = vpack.c.bf16 %v6960_v3, %v6958_v7  ;;  %6963 = vpow2.f32 %v1795_v11  ;;  %v6962_v34 = vpop.eup %6961 }
 0x3b8   : > { %1823 = vadd.xlane.f32.xlu0 %v6958_v7 }
 0x3b9   : > { %1907 = vmatmul.bf16.gmra.mxu1 %v1843_v60  ;;  %v9157_v11 = vpop.f32.mrf.mxu3 }
 0x3ba   : > { %v1750_v59 = vpop.xlane.xlu1 %1749  ;;  %v2336_v37 = vpop.xlane.xlu2 %2335  ;;  %12989 = vst [vmem:[#allocation29_spill] sm:$0xff] %v9157_v11  ;;  %v13042_v11 = vld [vmem:[#allocation61_spill] sm:$0xff] }
 0x3bb   : > { %v1770_v12 = vsub.f32 %v8999_v54, %v1750_v59  ;;  %v9135_v13 = vpop.xlane.xlu0 %1253 }
 0x3bc   : > { %12985 = vst [vmem:[#allocation46_spill] sm:$0xff] %v9135_v13 }
 0x3bd   : > { %v1797_v30 = vmul.f32 1.442695, %v1770_v12  ;;  %v6964_v7 = vpop.eup %6963 }
 0x3be   : > { %v9137_v63 = vpop.f32.mrf.mxu0  ;;  %1821 = vadd.xlane.f32.xlu1 %v6950_v45  ;;  %v2379_v45 = vmul.f32 1.442695, %v2354_v17 }
 0x3bf   : > { %6965 = vpow2.f32 %v1797_v30  ;;  %1825 = vadd.xlane.f32.xlu2 %v6960_v3 }
 0x3c0   : > { %2409 = vadd.xlane.f32.xlu0 %v6962_v34  ;;  %6967 = vpow2.f32 %v2379_v45 }
 0x3c1   : > { %6696 = vmatmul.msk.bf16.gmra.mxu0 %vm1059_vm0, %v8778_v10  ;;  %2480 = vmatmul.bf16.gmra.mxu3 %v2428_v43  ;;  %6969 = vpow2.f32 %v2381_v58  ;;  %v2356_v10 = vsub.f32 %v8992_v31, %v2336_v37  ;;  %v9166_v58 = vpop.f32.mrf.mxu3 }
 0x3c2   : > { %v9145_v54 = vpop.xlane.xlu1 %1255  ;;  %v9147_v38 = vpop.xlane.xlu2 %1257  ;;  %12991 = vst [vmem:[#allocation26_spill] sm:$0xff] %v9166_v58 }
 0x3c3   : > { %12987 = vst [vmem:[#allocation39_spill] sm:$0xff] %v9145_v54  ;;  %v1752_v22 = vpop.xlane.xlu0 %1751  ;;  %v2383_v12 = vmul.f32 1.442695, %v2356_v10 }
 0x3c4   : > { %12988 = vst [vmem:[#allocation44_spill] sm:$0xff] %v9147_v38  ;;  %v1771_v1 = vsub.f32 %v9005_v32, %v1752_v22 }
 0x3c5   : > { %v6966_v53 = vpop.eup %6965 }
 0x3c6   : > { %v9149_v4 = vpop.f32.mrf.mxu0  ;;  %2907 = vmax.xlane.f32.xlu1 %v9121_v57  ;;  %v1844_v8 = vpack.c.bf16 %v6966_v53, %v6964_v7  ;;  %v1799_v3 = vmul.f32 1.442695, %v1771_v1  ;;  %v6968_v59 = vpop.eup %6967 }
 0x3c7   : > { %2911 = vmax.xlane.f32.xlu2 %v9137_v63  ;;  %v6970_v32 = vpop.eup %6969  ;;  %v2429_v31 = vpack.c.bf16 %v6968_v59, %v6962_v34 }
 0x3c8   : > { %2909 = vmax.xlane.f32.xlu0 %v9130_v24  ;;  %6971 = vpow2.f32 %v1799_v3 }
 0x3c9   : > { %1912 = vmatmul.bf16.gmra.mxu1 %v1844_v8 }
 0x3ca   : > { %v2340_v26 = vpop.xlane.xlu1 %2339  ;;  %v1754_v23 = vpop.xlane.xlu2 %1753 }
 0x3cb   : > { %v1772_v15 = vsub.f32 %v9014_v36, %v1754_v23  ;;  %v2338_v60 = vpop.xlane.xlu0 %2337  ;;  %v2358_v45 = vsub.f32 %v9012_v40, %v2340_v26 }
 0x3cc   : > { %v2357_v8 = vsub.f32 %v9003_v44, %v2338_v60 }
 0x3cd   : > { %v1801_v30 = vmul.f32 1.442695, %v1772_v15  ;;  %v2387_v10 = vmul.f32 1.442695, %v2358_v45 }
 0x3ce   : > { %v9159_v17 = vpop.f32.mrf.mxu0  ;;  %2411 = vadd.xlane.f32.xlu1 %v6968_v59  ;;  %v6972_v43 = vpop.eup %6971  ;;  %v2385_v23 = vmul.f32 1.442695, %v2357_v8 }
 0x3cf   : > { %2413 = vadd.xlane.f32.xlu2 %v6970_v32  ;;  %6973 = vpow2.f32 %v1801_v30 }
 0x3d0   : > { %1829 = vadd.xlane.f32.xlu0 %v6966_v53  ;;  %6975 = vpow2.f32 %v2383_v12 }
 0x3d1   : > { %6697 = vmatmul.msk.bf16.gmra.mxu0 %vm1059_vm0, %v8767_v5  ;;  %2485 = vmatmul.bf16.gmra.mxu3 %v2429_v31  ;;  %6977 = vpow2.f32 %v2387_v10 }
 0x3d2   : > { %v2342_v36 = vpop.xlane.xlu2 %2341  ;;  %v1756_v51 = vpop.xlane.xlu1 %1755  ;;  %6979 = vpow2.f32 %v2385_v23 }
 0x3d3   : > { %v9163_v37 = vpop.xlane.xlu0 %1259  ;;  %v1773_v34 = vsub.f32 %v9021_v61, %v1756_v51  ;;  %v9177_v61 = vpop.f32.mrf.mxu3  ;;  %v2359_v60 = vsub.f32 %v9019_v27, %v2342_v36 }
 0x3d4   : > { %12990 = vst [vmem:[#allocation25_spill] sm:$0xff] %v9163_v37 }
 0x3d5   : > { %v6974_v22 = vpop.eup %6973  ;;  %v1803_v40 = vmul.f32 1.442695, %v1773_v34  ;;  %12993 = vst [vmem:[#allocation50_spill] sm:$0xff] %v9177_v61  ;;  %v2389_v45 = vmul.f32 1.442695, %v2359_v60 }
 0x3d6   : > { %1827 = vadd.xlane.f32.xlu1 %v6964_v7  ;;  %v6976_v53 = vpop.eup %6975  ;;  %v9170_v1 = vpop.f32.mrf.mxu0  ;;  %v1845_v5 = vpack.c.bf16 %v6974_v22, %v6972_v43 }
 0x3d7   : > { %1831 = vadd.xlane.f32.xlu2 %v6972_v43  ;;  %6981 = vpow2.f32 %v1803_v40  ;;  %v2430_v7 = vpack.c.bf16 %v6976_v53, %v6970_v32  ;;  %v6978_v30 = vpop.eup %6977 }
 0x3d8   : > { %2415 = vadd.xlane.f32.xlu0 %v6976_v53  ;;  %v6980_v51 = vpop.eup %6979 }
 0x3d9   : > { %1917 = vmatmul.bf16.gmra.mxu1 %v1845_v5 }
 0x3da   : > { %v9172_v3 = vpop.xlane.xlu2 %1263  ;;  %v9181_v59 = vpop.xlane.xlu1 %1261 }
 0x3db   : > { %12992 = vst [vmem:[#allocation32_spill] sm:$0xff] %v9172_v3  ;;  %v1758_v26 = vpop.xlane.xlu0 %1757  ;;  %v9191_v36 = vpop.f32.mrf.mxu3 }
 0x3dc   : > { %v1774_v15 = vsub.f32 %v9030_v42, %v1758_v26  ;;  %12994 = vst [vmem:[#allocation23_spill] sm:$0xff] %v9181_v59 }
 0x3dd   : > { %v6982_v43 = vpop.eup %6981  ;;  %12995 = vst [vmem:[#allocation24_spill] sm:$0xff] %v9191_v36 }
 0x3de   : > { %v1805_v44 = vmul.f32 1.442695, %v1774_v15  ;;  %2913 = vmax.xlane.f32.xlu1 %v9149_v4  ;;  %v9183_v12 = vpop.f32.mrf.mxu0 }
 0x3df   : > { %2917 = vmax.xlane.f32.xlu2 %v9170_v1 }
 0x3e0   : > { %6983 = vpow2.f32 %v1805_v44  ;;  %2915 = vmax.xlane.f32.xlu0 %v9159_v17  ;;  %v2431_v44 = vpack.c.bf16 %v6978_v30, %v6980_v51 }
 0x3e1   : > { %6698 = vmatmul.msk.bf16.gmra.mxu0 %vm1059_vm0, %v8827_v14  ;;  %2490 = vmatmul.bf16.gmra.mxu3 %v2430_v7  ;;  %6985 = vpow2.f32 %v2389_v45 }
 0x3e2   : > { %v9187_v42 = vpop.xlane.xlu2 %1807 }
 0x3e3   : > { %v2344_v31 = vpop.xlane.xlu0 %2343  ;;  %vm1933_vm5 = vweird.f32 %v9187_v42 }
 0x3e4   : > { %v2360_v15 = vsub.f32 %v9038_v62, %v2344_v31 }
 0x3e6   : > { %v6984_v8 = vpop.eup %6983  ;;  %2417 = vadd.xlane.f32.xlu1 %v6980_v51  ;;  %v9193_v53 = vpop.f32.mrf.mxu0  ;;  %v2391_v60 = vmul.f32 1.442695, %v2360_v15 }
 0x3e7   : > { %2419 = vadd.xlane.f32.xlu2 %v6978_v30  ;;  %v1846_v32 = vpack.c.bf16 %v6984_v8, %v6982_v43  ;;  %v6986_v26 = vpop.eup %6985 }
 0x3e8   : > { %1835 = vadd.xlane.f32.xlu0 %v6982_v43  ;;  %v9204_v43 = vpop.f32.mrf.mxu3 }
 0x3e9   : > { %1922 = vmatmul.bf16.gmra.mxu1 %v1846_v32  ;;  %v9189_v27 = vpop.xlane.xlu1 %2393  ;;  %12997 = vst [vmem:[#allocation22_spill] sm:$0xff] %v9204_v43 }
 0x3ea   : > { %v2894_v14 = vpop.xlane.xlu2 %2893  ;;  %vm2511_vm13 = vweird.f32 %v9189_v27 }
 0x3eb   : > { %v2924_v34 = vsub.f32 %v9049_v28, %v2894_v14  ;;  %v2892_v5 = vpop.xlane.xlu0 %2891 }
 0x3ec   : > { %v2923_v10 = vsub.f32 %v9035_v20, %v2892_v5 }
 0x3ed   : > { %v2941_v23 = vmul.f32 1.442695, %v2924_v34 }
 0x3ee   : > { %v2939_v40 = vmul.f32 1.442695, %v2923_v10  ;;  %1833 = vadd.xlane.f32.xlu1 %v6974_v22  ;;  %v9206_v45 = vpop.f32.mrf.mxu0 }
 0x3ef   : > { %6987 = vpow2.f32 %v2941_v23  ;;  %1837 = vadd.xlane.f32.xlu2 %v6984_v8 }
 0x3f0   : > { %6989 = vpow2.f32 %v2939_v40  ;;  %2421 = vadd.xlane.f32.xlu0 %v6986_v26  ;;  %v9214_v32 = vpop.f32.mrf.mxu3 }
 0x3f1   : > { %6707 = vmatmul.msk.bf16.vlgmr.msra.gmra.mxu0 %vm1059_vm0, %v8630_v48  ;;  %v3736_v7 = vpop.xlane.xlu1 %3735  ;;  %2495 = vmatmul.bf16.gmra.mxu3 %v2431_v44  ;;  %6991 = vpow2.f32 %v2391_v60  ;;  %12998 = vst [vmem:[#allocation37_spill] sm:$0xff] %v9214_v32 }
 0x3f2   : > { %v9200_v28 = vpop.xlane.xlu2 %2395  ;;  %v3767_v10 = vsub.f32 %v9060_v19, %v3736_v7 }
 0x3f3   : > { %v9202_v20 = vpop.xlane.xlu0 %1265  ;;  %vm2525_vm10 = vweird.f32 %v9200_v28 }
 0x3f4   : > { %12996 = vst [vmem:[#allocation21_spill] sm:$0xff] %v9202_v20  ;;  %v3783_v60 = vmul.f32 1.442695, %v3767_v10 }
 0x3f5   : > { %v6988_v22 = vpop.eup %6987 }
 0x3f6   : > { %v6990_v62 = vpop.eup %6989  ;;  %2919 = vmax.xlane.f32.xlu1 %v9183_v12  ;;  %v9216_v14 = vpop.f32.mrf.mxu0 }
 0x3f7   : > { %v3003_v30 = vpack.c.bf16 %v6988_v22, %v6990_v62  ;;  %2971 = vadd.xlane.f32.xlu2 %v6990_v62  ;;  %v6992_v8 = vpop.eup %6991 }
 0x3f8   : > { %2921 = vmax.xlane.f32.xlu0 %v9193_v53  ;;  %v2432_v5 = vpack.c.bf16 %v6992_v8, %v6986_v26 }
 0x3f9   : > { %3043 = vmatmul.bf16.vlgmr.msra.gmra.mxu1 %v3003_v30  ;;  %v9210_v48 = vpop.xlane.xlu1 %1809 }
 0x3fa   : > { %v3738_v31 = vpop.xlane.xlu2 %3737  ;;  %vm1947_vm2 = vweird.f32 %v9210_v48 }
 0x3fb   : > { %v9212_v51 = vpop.xlane.xlu0 %1811  ;;  %v3768_v34 = vsub.f32 %v9073_v35, %v3738_v31  ;;  %v9230_v35 = vpop.f32.mrf.mxu3 }
 0x3fc   : > { %13000 = vst [vmem:[#allocation42_spill] sm:$0xff] %v9230_v35 }
 0x3fd   : > { %v3785_v15 = vmul.f32 1.442695, %v3768_v34 }
 0x3fe   : > { %2423 = vadd.xlane.f32.xlu1 %v6992_v8 }
 0x3ff   : > { %6993 = vpow2.f32 %v3785_v15 }
 0x400   : > { %4307 = vmax.xlane.f32.xlu0 %v9216_v14  ;;  %6995 = vpow2.f32 %v3783_v60 }
 0x401   : > { %6708 = vmatmul.msk.bf16.gmra.mxu0 %vm1059_vm0, %v8660_v41  ;;  %v9223_v23 = vpop.xlane.xlu1 %1267  ;;  %2500 = vmatmul.bf16.gmra.mxu3 %v2432_v5 }
 0x402   : > { %12999 = vst [vmem:[#allocation40_spill] sm:$0xff] %v9223_v23  ;;  %v9225_v40 = vpop.xlane.xlu2 %1813 }
 0x403   : > { %v9227_v44 = vpop.xlane.xlu0 %2397  ;;  %v9246_v10 = vpop.f32.mrf.mxu3 }
 0x404   : > { %13003 = vst [vmem:[#allocation60_spill] sm:$0xff] %v9246_v10 }
 0x405   : > { %v9233_v30 = vpop.eup %6993 }
 0x406   : > { %4305 = vmax.xlane.f32.xlu1 %v9206_v45  ;;  %13001 = vst [vmem:[#allocation48_spill] sm:$0xff] %v9233_v30  ;;  %v9236_v8 = vpop.eup %6995 }
 0x407   : > { %13002 = vst [vmem:[#allocation57_spill] sm:$0xff] %v9236_v8  ;;  %v3847_v5 = vpack.c.bf16 %v9233_v30, %v9236_v8 }
 0x409   : > { %v2896_v26 = vpop.xlane.xlu1 %2895 }
 0x40a   : > { %v2925_v19 = vsub.f32 %v9064_v18, %v2896_v26  ;;  %v2900_v7 = vpop.xlane.xlu2 %2899 }
 0x40b   : > { %v2898_v41 = vpop.xlane.xlu0 %2897 }
 0x40c   : > { %v2943_v62 = vmul.f32 1.442695, %v2925_v19  ;;  %v2926_v31 = vsub.f32 %v9077_v6, %v2898_v41 }
 0x40e   : > { %6997 = vpow2.f32 %v2943_v62  ;;  %2973 = vadd.xlane.f32.xlu1 %v6988_v22  ;;  %v2945_v34 = vmul.f32 1.442695, %v2926_v31 }
 0x40f   : > { %4437 = vrot.lane.b32.xlu2 %v8902_v2, %s7645_s14 }
 0x410   : > { %6999 = vpow2.f32 %v2945_v34 }
 0x411   : > { %6709 = vmatmul.msk.bf16.gmra.mxu0 %vm1059_vm0, %v8713_v55  ;;  %v9244_v18 = vpop.xlane.xlu1 %2399  ;;  %3863 = vmatmul.bf16.vlgmr.msra.gmra.mxu3 %v3847_v5  ;;  %v2927_v55 = vsub.f32 %v9084_v0, %v2900_v7 }
 0x412   : > { %v9248_v6 = vpop.xlane.xlu2 %2401 }
 0x413   : > { %v9250_v22 = vpop.xlane.xlu0 %1817  ;;  %v2947_v31 = vmul.f32 1.442695, %v2927_v55  ;;  %v13009_v55 = vld [vmem:[#allocation33_spill] sm:$0xff] }
 0x414   : > { %v6998_v15 = vpop.eup %6997 }
 0x415   : > { %2975 = vadd.xlane.f32.xlu0 %v6998_v15  ;;  %7001 = vpow2.f32 %v2947_v31 }
 0x416   : > { %v7000_v60 = vpop.eup %6999 }
 0x417   : > { %v3004_v26 = vpack.c.bf16 %v7000_v60, %v6998_v15  ;;  %v13005_v15 = vld [vmem:[#allocation55_spill] sm:$0xff] }
 0x419   : > { %v9252_v19 = vpop.xlane.xlu1 %1815  ;;  %3048 = vmatmul.bf16.gmra.mxu1 %v3004_v26 }
 0x41a   : > { %v9254_v41 = vpop.xlane.xlu2 %1819 }
 0x41b   : > { %13004 = vst [vmem:[#allocation58_spill] sm:$0xff] %v9254_v41  ;;  %v9256_v62 = vpop.xlane.xlu0 %2403  ;;  %v7002_v30 = vpop.eup %7001 }
 0x421   : > { %v2902_v34 = vpop.xlane.xlu1 %2901 }
 0x422   : > { %v2928_v5 = vsub.f32 %v9097_v49, %v2902_v34  ;;  %v2906_v23 = vpop.xlane.xlu2 %2905 }
 0x423   : > { %v2904_v20 = vpop.xlane.xlu0 %2903  ;;  %v2930_v49 = vsub.f32 %v9113_v50, %v2906_v23 }
 0x424   : > { %v2949_v3 = vmul.f32 1.442695, %v2928_v5 }
 0x425   : > { %v2953_v5 = vmul.f32 1.442695, %v2930_v49 }
 0x426   : > { %7003 = vpow2.f32 %v2949_v3  ;;  %v2929_v3 = vsub.f32 %v9105_v33, %v2904_v20  ;;  %v9282_v20 = vpop.f32.mrf.mxu1 }
 0x427   : > { %5346 = vrot.lane.b32.xlu1 %v13005_v15, %s7646_s17  ;;  %7005 = vpow2.f32 %v2953_v5 }
 0x428   : > { %v2951_v8 = vmul.f32 1.442695, %v2929_v3 }
 0x429   : > { %v9262_v59 = vpop.xlane.xlu1 %2405 }
 0x42a   : > { %13006 = vst [vmem:[#allocation52_spill] sm:$0xff] %v9262_v59  ;;  %v9264_v26 = vpop.xlane.xlu2 %2407  ;;  %7007 = vpow2.f32 %v2951_v8 }
 0x42b   : > { %13007 = vst [vmem:[#allocation53_spill] sm:$0xff] %v9264_v26  ;;  %v9266_v37 = vpop.xlane.xlu0 %1823 }
 0x42c   : > { %13008 = vst [vmem:[#allocation45_spill] sm:$0xff] %v9266_v37  ;;  %v7004_v0 = vpop.eup %7003 }
 0x42d   : > { %2981 = vadd.xlane.f32.xlu0 %v7004_v0  ;;  %v3005_v7 = vpack.c.bf16 %v7004_v0, %v7002_v30 }
 0x42f   : > { %4435 = vrot.lane.b32.xlu1 %v13009_v55, %s7645_s14  ;;  %3053 = vmatmul.bf16.gmra.mxu1 %v3005_v7  ;;  %v7006_v7 = vpop.eup %7005 }
 0x430   : > { %v9279_v10 = vpop.eup %7007 }
 0x431   : > { %v9272_v31 = vpop.xlane.xlu1 %1821  ;;  %v3006_v49 = vpack.c.bf16 %v7006_v7, %v9279_v10 }
 0x432   : > { %13010 = vst [vmem:[#allocation55_spill] sm:$0xff] %v9272_v31  ;;  %v9274_v34 = vpop.xlane.xlu2 %1825 }
 0x433   : > { %13011 = vst [vmem:[#allocation33_spill] sm:$0xff] %v9274_v34  ;;  %v9276_v15 = vpop.xlane.xlu0 %2409 }
 0x434   : > { %13012 = vst [vmem:[#allocation63_spill] sm:$0xff] %v9276_v15  ;;  %v13037_v15 = vld [vmem:[#allocation62_spill] sm:$0xff] }
 0x438   : > { %2977 = vadd.xlane.f32.xlu2 %v7000_v60 }
 0x439   : > { %v2908_v0 = vpop.xlane.xlu1 %2907 }
 0x43a   : > { %v2931_v50 = vsub.f32 %v9121_v57, %v2908_v0  ;;  %v2912_v23 = vpop.xlane.xlu2 %2911 }
 0x43b   : > { %v2910_v38 = vpop.xlane.xlu0 %2909 }
 0x43c   : > { %v2955_v35 = vmul.f32 1.442695, %v2931_v50  ;;  %v2932_v33 = vsub.f32 %v9130_v24, %v2910_v38  ;;  %v9295_v24 = vpop.f32.mrf.mxu1 }
 0x43e   : > { %7009 = vpow2.f32 %v2955_v35  ;;  %v2957_v8 = vmul.f32 1.442695, %v2932_v33  ;;  %v13019_v33 = vld [vmem:[#allocation56_spill] sm:$0xff] }
 0x43f   : > { %3058 = vmatmul.bf16.gmra.mxu1 %v3006_v49  ;;  %v2933_v49 = vsub.f32 %v9137_v63, %v2912_v23 }
 0x440   : > { %7011 = vpow2.f32 %v2957_v8 }
 0x441   : > { %v9285_v3 = vpop.xlane.xlu1 %2411  ;;  %v2959_v46 = vmul.f32 1.442695, %v2933_v49 }
 0x442   : > { %13013 = vst [vmem:[#allocation64_spill] sm:$0xff] %v9285_v3  ;;  %v9287_v60 = vpop.xlane.xlu2 %2413 }
 0x443   : > { %13014 = vst [vmem:[#allocation65_spill] sm:$0xff] %v9287_v60  ;;  %v9289_v57 = vpop.xlane.xlu0 %1829 }
 0x444   : > { %13015 = vst [vmem:[#allocation66_spill] sm:$0xff] %v9289_v57  ;;  %v7010_v5 = vpop.eup %7009 }
 0x445   : > { %2987 = vadd.xlane.f32.xlu0 %v7010_v5 }
 0x446   : > { %v7012_v50 = vpop.eup %7011 }
 0x447   : > { %v3007_v13 = vpack.c.bf16 %v7012_v50, %v7010_v5 }
 0x449   : > { %v9291_v0 = vpop.xlane.xlu1 %1827 }
 0x44a   : > { %13016 = vst [vmem:[#allocation67_spill] sm:$0xff] %v9291_v0  ;;  %v9293_v35 = vpop.xlane.xlu2 %1831 }
 0x44b   : > { %13017 = vst [vmem:[#allocation68_spill] sm:$0xff] %v9293_v35  ;;  %v9297_v38 = vpop.xlane.xlu0 %2415  ;;  %v9303_v35 = vpop.f32.mrf.mxu1 }
 0x44c   : > { %13018 = vst [vmem:[#allocation69_spill] sm:$0xff] %v9297_v38 }
 0x44d   : > { %2989 = vadd.xlane.f32.xlu0 %v7012_v50 }
 0x44f   : > { %3063 = vmatmul.bf16.gmra.mxu1 %v3007_v13 }
 0x450   : > { %4770 = vrot.lane.b32.xlu2 %v13019_v33, %s7647_s18 }
 0x451   : > { %v2914_v54 = vpop.xlane.xlu1 %2913 }
 0x452   : > { %v2934_v32 = vsub.f32 %v9149_v4, %v2914_v54  ;;  %v2918_v8 = vpop.xlane.xlu2 %2917 }
 0x453   : > { %v2916_v43 = vpop.xlane.xlu0 %2915  ;;  %v9312_v4 = vpop.f32.mrf.mxu1 }
 0x454   : > { %v2961_v60 = vmul.f32 1.442695, %v2934_v32  ;;  %v2935_v38 = vsub.f32 %v9159_v17, %v2916_v43  ;;  %v9317_v17 = vpop.f32.mrf.mxu2 }
 0x456   : > { %7013 = vpow2.f32 %v2961_v60  ;;  %v2963_v54 = vmul.f32 1.442695, %v2935_v38 }
 0x457   : > { %7015 = vpow2.f32 %v2959_v46  ;;  %v2936_v46 = vsub.f32 %v9170_v1, %v2918_v8  ;;  %v13027_v1 = vld [vmem:[#allocation38_spill] sm:$0xff] }
 0x458   : > { %7017 = vpow2.f32 %v2963_v54 }
 0x459   : > { %2979 = vadd.xlane.f32.xlu1 %v7002_v30  ;;  %v9308_v63 = vpop.xlane.xlu1 %2417  ;;  %v2965_v50 = vmul.f32 1.442695, %v2936_v46 }
 0x45a   : > { %v9306_v39 = vpop.xlane.xlu2 %2419  ;;  %13021 = vst [vmem:[#allocation70_spill] sm:$0xff] %v9308_v63 }
 0x45b   : > { %13020 = vst [vmem:[#allocation56_spill] sm:$0xff] %v9306_v39  ;;  %v9310_v23 = vpop.xlane.xlu0 %1835  ;;  %v9323_v38 = vpop.f32.mrf.mxu1  ;;  %7019 = vpow2.f32 %v2965_v50 }
 0x45c   : > { %v7014_v61 = vpop.eup %7013  ;;  %13022 = vst [vmem:[#allocation71_spill] sm:$0xff] %v9310_v23 }
 0x45d   : > { %2993 = vadd.xlane.f32.xlu0 %v7014_v61  ;;  %v7016_v13 = vpop.eup %7015  ;;  %13026 = vst [vmem:[#allocation75_spill] sm:$0xff] %v9323_v38 }
 0x45e   : > { %v3008_v32 = vpack.c.bf16 %v7014_v61, %v7016_v13  ;;  %v7018_v5 = vpop.eup %7017  ;;  %v9327_v61 = vpop.f32.mrf.mxu2 }
 0x460   : > { %3068 = vmatmul.bf16.gmra.mxu1 %v3008_v32 }
 0x461   : > { %2985 = vadd.xlane.f32.xlu1 %v7006_v7  ;;  %v9319_v43 = vpop.xlane.xlu1 %1833  ;;  %v7020_v8 = vpop.eup %7019 }
 0x462   : > { %v9314_v60 = vpop.xlane.xlu2 %1837  ;;  %13024 = vst [vmem:[#allocation73_spill] sm:$0xff] %v9319_v43  ;;  %v3009_v23 = vpack.c.bf16 %v7020_v8, %v7018_v5 }
 0x463   : > { %13023 = vst [vmem:[#allocation72_spill] sm:$0xff] %v9314_v60  ;;  %v9321_v30 = vpop.xlane.xlu0 %2421 }
 0x464   : > { %13025 = vst [vmem:[#allocation74_spill] sm:$0xff] %v9321_v30  ;;  %v9332_v30 = vpop.f32.mrf.mxu1 }
 0x465   : > { %13028 = vst [vmem:[#allocation38_spill] sm:$0xff] %v9332_v30 }
 0x469   : > { %2995 = vadd.xlane.f32.xlu1 %v7018_v5  ;;  %v2920_v7 = vpop.xlane.xlu1 %2919 }
 0x46a   : > { %v9325_v49 = vpop.xlane.xlu2 %2971  ;;  %v2937_v46 = vsub.f32 %v9183_v12, %v2920_v7 }
 0x46b   : > { %v2922_v54 = vpop.xlane.xlu0 %2921 }
 0x46c   : > { %v2938_v60 = vsub.f32 %v9193_v53, %v2922_v54  ;;  %v2967_v50 = vmul.f32 1.442695, %v2937_v46  ;;  %v9337_v39 = vpop.f32.mrf.mxu1  ;;  %v9347_v53 = vpop.f32.mrf.mxu0 }
 0x46d   : > { %13029 = vst [vmem:[#allocation76_spill] sm:$0xff] %v9337_v39  ;;  %v9363_v54 = vpop.f32.mrf.mxu2 }
 0x46e   : > { %v2969_v63 = vmul.f32 1.442695, %v2938_v60  ;;  %7021 = vpow2.f32 %v2967_v50 }
 0x470   : > { %3073 = vmatmul.bf16.gmra.mxu1 %v3009_v23  ;;  %7023 = vpow2.f32 %v2969_v63 }
 0x471   : > { %4433 = vrot.lane.b32.xlu0 %v13027_v1, %s7645_s14  ;;  %3741 = vmax.xlane.f32.xlu1 %v9327_v61  ;;  %v9339_v43 = vpop.xlane.xlu1 %2423 }
 0x472   : > { %v4438_v32 = vpop.permute.xlu2 %4437  ;;  %13030 = vst [vmem:[#allocation77_spill] sm:$0xff] %v9339_v43 }
 0x473   : > { %4462 = vmatpush.bf16.msrb.mxu1 %v4438_v32 }
 0x474   : > { %v9341_v36 = vpop.eup %7021  ;;  %v9349_v23 = vpop.f32.mrf.mxu1 }
 0x475   : > { %13031 = vst [vmem:[#allocation78_spill] sm:$0xff] %v9341_v36  ;;  %v9372_v50 = vpop.f32.mrf.mxu2 }
 0x476   : > { %v9343_v57 = vpop.eup %7023  ;;  %13033 = vst [vmem:[#allocation80_spill] sm:$0xff] %v9349_v23 }
 0x477   : > { %13032 = vst [vmem:[#allocation79_spill] sm:$0xff] %v9343_v57  ;;  %v3010_v12 = vpack.c.bf16 %v9343_v57, %v9341_v36 }
 0x479   : > { %2983 = vadd.xlane.f32.xlu2 %v9279_v10  ;;  %v4306_v60 = vpop.xlane.xlu1 %4305  ;;  %v9354_v10 = vpop.f32.mrf.mxu0 }
 0x47a   : > { %v4337_v52 = vsub.f32 %v9206_v45, %v4306_v60 }
 0x47c   : > { %v4353_v37 = vmul.f32 1.442695, %v4337_v52 }
 0x47d   : > { %v9381_v43 = vpop.f32.mrf.mxu2 }
 0x47e   : > { %7025 = vpow2.f32 %v4353_v37 }
 0x480   : > { %3078 = vmatmul.bf16.gmra.mxu1 %v3010_v12 }
 0x481   : > { %2991 = vadd.xlane.f32.xlu2 %v7016_v13  ;;  %v9356_v63 = vpop.xlane.xlu1 %2973  ;;  %v9361_v7 = vpop.f32.mrf.mxu0 }
 0x484   : > { %v9411_v45 = vpop.eup %7025 }
 0x485   : > { %13044 = vst [vmem:[#allocation85_spill] sm:$0xff] %v9411_v45  ;;  %v9415_v52 = vpop.f32.mrf.mxu2 }
 0x489   : > { %3739 = vmax.xlane.f32.xlu2 %v9317_v17  ;;  %v9370_v46 = vpop.f32.mrf.mxu0 }
 0x48a   : > { %5348 = vrot.lane.b32.xlu1 %v13019_v33, %s7646_s17  ;;  %v13034_v33 = vld [vmem:[#allocation59_spill] sm:$0xff] }
 0x491   : > { %4311 = vmax.xlane.f32.xlu2 %v9354_v10 }
 0x499   : > { %v5347_v13 = vpop.permute.xlu1 %5346 }
 0x49a   : > { %6710 = vmatmul.msk.bf16.gmra.mxu0 %vm1059_vm0, %v5347_v13  ;;  %v9377_v13 = vpop.f32.mrf.mxu0 }
 0x49b   : > { %2997 = vadd.xlane.f32.xlu0 %v7020_v8  ;;  %v4308_v8 = vpop.xlane.xlu0 %4307 }
 0x49c   : > { %v4338_v57 = vsub.f32 %v9216_v14, %v4308_v8 }
 0x49e   : > { %v4355_v34 = vmul.f32 1.442695, %v4338_v57 }
 0x4a0   : > { %7027 = vpow2.f32 %v4355_v34  ;;  %v9425_v34 = vpop.f32.mrf.mxu2 }
 0x4a1   : > { %v4436_v5 = vpop.permute.xlu1 %4435 }
 0x4a2   : > { %4463 = vmatpush.bf16.msrb.mxu1 %v4436_v5  ;;  %v9386_v3 = vpop.f32.mrf.mxu0 }
 0x4a3   : > { %4309 = vmax.xlane.f32.xlu0 %v9347_v53  ;;  %v9379_v5 = vpop.xlane.xlu0 %2975 }
 0x4a6   : > { %v9413_v60 = vpop.eup %7027 }
 0x4a7   : > { %13045 = vst [vmem:[#allocation86_spill] sm:$0xff] %v9413_v60  ;;  %v4417_v57 = vpack.c.bf16 %v9413_v60, %v9411_v45 }
 0x4a9   : > { %4772 = vrot.lane.b32.xlu2 %v13034_v33, %s7647_s18 }
 0x4aa   : > { %v9431_v58 = vpop.f32.mrf.mxu0 }
 0x4ab   : > { %v9367_v32 = vpop.xlane.xlu2 %2977  ;;  %3743 = vmax.xlane.f32.xlu0 %v9363_v54  ;;  %v9384_v0 = vpop.xlane.xlu0 %2981 }
 0x4ac   : > { %13035 = vst [vmem:[#allocation59_spill] sm:$0xff] %v9384_v0 }
 0x4b3   : > { %v4771_v12 = vpop.permute.xlu2 %4770  ;;  %4315 = vmax.xlane.f32.xlu0 %v9370_v46 }
 0x4b4   : > { %6703 = vmatmul.msk.bf16.gmra.mxu2 %vm1059_vm0, %v4771_v12  ;;  %3745 = vmax.xlane.f32.xlu1 %v9372_v50 }
 0x4b8   : > { %v9391_v12 = vpop.xlane.xlu0 %2987 }
 0x4b9   : > { %13036 = vst [vmem:[#allocation81_spill] sm:$0xff] %v9391_v12  ;;  %v9405_v12 = vpop.f32.mrf.mxu1 }
 0x4ba   : > { %13041 = vst [vmem:[#allocation84_spill] sm:$0xff] %v9405_v12 }
 0x4bc   : > { %3747 = vmax.xlane.f32.xlu1 %v9381_v43 }
 0x4c0   : > { %v9396_v21 = vpop.xlane.xlu0 %2989 }
 0x4c1   : > { %13038 = vst [vmem:[#allocation62_spill] sm:$0xff] %v9396_v21  ;;  %v9419_v37 = vpop.f32.mrf.mxu1 }
 0x4c2   : > { %13046 = vst [vmem:[#allocation87_spill] sm:$0xff] %v9419_v37 }
 0x4c4   : > { %4319 = vmax.xlane.f32.xlu1 %v9386_v3 }
 0x4c7   : > { %5350 = vrot.lane.b32.xlu0 %v13034_v33, %s7646_s17 }
 0x4c9   : > { %v9471_v23 = vpop.f32.mrf.mxu1 }
 0x4ca   : > { %13055 = vst [vmem:[#allocation96_spill] sm:$0xff] %v9471_v23 }
 0x4cc   : > { %v9400_v36 = vpop.xlane.xlu1 %2979 }
 0x4cd   : > { %13039 = vst [vmem:[#allocation82_spill] sm:$0xff] %v9400_v36 }
 0x4cf   : > { %4774 = vrot.lane.b32.xlu0 %v13037_v15, %s7647_s18 }
 0x4d0   : > { %v9403_v33 = vpop.xlane.xlu0 %2993 }
 0x4d1   : > { %13040 = vst [vmem:[#allocation83_spill] sm:$0xff] %v9403_v33 }
 0x4d2   : > { %4313 = vmax.xlane.f32.xlu2 %v9361_v7 }
 0x4d4   : > { %v9409_v21 = vpop.xlane.xlu1 %2985 }
 0x4d5   : > { %13043 = vst [vmem:[#allocation61_spill] sm:$0xff] %v9409_v21 }
 0x4da   : > { %4317 = vmax.xlane.f32.xlu2 %v9377_v13 }
 0x4dc   : > { %v9421_v8 = vpop.xlane.xlu1 %2995 }
 0x4dd   : > { %4776 = vrot.lane.b32.xlu1 %v13042_v11, %s7647_s18  ;;  %13047 = vst [vmem:[#allocation88_spill] sm:$0xff] %v9421_v8 }
 0x4e3   : > { %v4434_v14 = vpop.permute.xlu0 %4433 }
 0x4e4   : > { %4464 = vmatpush.bf16.msrb.mxu1 %v4434_v14  ;;  %v3742_v21 = vpop.xlane.xlu1 %3741  ;;  %v9433_v14 = vpop.f32.mrf.mxu2 }
 0x4e5   : > { %v3770_v60 = vsub.f32 %v9327_v61, %v3742_v21 }
 0x4e7   : > { %4465 = vmatmul.bf16.vlgmr.msrb.gmra.mxu1 %v4417_v57  ;;  %v3789_v57 = vmul.f32 1.442695, %v3770_v60 }
 0x4e9   : > { %7029 = vpow2.f32 %v3789_v57 }
 0x4ec   : > { %v9423_v33 = vpop.xlane.xlu2 %2983  ;;  %v9444_v59 = vpop.f32.mrf.mxu2 }
 0x4ed   : > { %13048 = vst [vmem:[#allocation89_spill] sm:$0xff] %v9423_v33 }
 0x4ef   : > { %v9446_v61 = vpop.eup %7029 }
 0x4f0   : > { %13051 = vst [vmem:[#allocation92_spill] sm:$0xff] %v9446_v61 }
 0x4f2   : > { %5352 = vrot.lane.b32.xlu2 %v13037_v15, %s7646_s17  ;;  %v9439_v15 = vpop.f32.mrf.mxu3 }
 0x4f3   : > { %13050 = vst [vmem:[#allocation91_spill] sm:$0xff] %v9439_v15 }
 0x4f4   : > { %v9429_v12 = vpop.xlane.xlu2 %2991 }
 0x4f5   : > { %13049 = vst [vmem:[#allocation90_spill] sm:$0xff] %v9429_v12  ;;  %v9441_v12 = vpop.f32.mrf.mxu0 }
 0x4f9   : > { %3749 = vmax.xlane.f32.xlu0 %v9415_v52 }
 0x4fc   : > { %v3740_v8 = vpop.xlane.xlu2 %3739  ;;  %v5349_v37 = vpop.permute.xlu1 %5348 }
 0x4fd   : > { %v3769_v45 = vsub.f32 %v9317_v17, %v3740_v8  ;;  %6711 = vmatmul.msk.bf16.gmra.mxu0 %vm1059_vm0, %v5349_v37  ;;  %v9456_v37 = vpop.f32.mrf.mxu0 }
 0x4ff   : > { %v3787_v33 = vmul.f32 1.442695, %v3769_v45  ;;  %v9454_v45 = vpop.f32.mrf.mxu3 }
 0x500   : > { %13053 = vst [vmem:[#allocation94_spill] sm:$0xff] %v9454_v45 }
 0x501   : > { %7031 = vpow2.f32 %v3787_v33  ;;  %4321 = vmax.xlane.f32.xlu0 %v9431_v58  ;;  %v9458_v33 = vpop.f32.mrf.mxu2 }
 0x504   : > { %v4312_v21 = vpop.xlane.xlu2 %4311 }
 0x505   : > { %v4340_v15 = vsub.f32 %v9354_v10, %v4312_v21  ;;  %v9465_v26 = vpop.f32.mrf.mxu0 }
 0x507   : > { %v9448_v60 = vpop.eup %7031  ;;  %3753 = vmax.xlane.f32.xlu1 %v9433_v14  ;;  %v9490_v23 = vpop.f32.mrf.mxu3 }
 0x508   : > { %13052 = vst [vmem:[#allocation93_spill] sm:$0xff] %v9448_v60  ;;  %v3848_v17 = vpack.c.bf16 %v9446_v61, %v9448_v60  ;;  %v4359_v60 = vmul.f32 1.442695, %v4340_v15 }
 0x509   : > { %4323 = vmax.xlane.f32.xlu0 %v9441_v12  ;;  %v9467_v61 = vpop.f32.mrf.mxu2  ;;  %13059 = vst [vmem:[#allocation100_spill] sm:$0xff] %v9490_v23 }
 0x50a   : > { %3868 = vmatmul.bf16.gmra.mxu3 %v3848_v17  ;;  %7033 = vpow2.f32 %v4359_v60 }
 0x50c   : > { %v4773_v8 = vpop.permute.xlu2 %4772 }
 0x50d   : > { %6704 = vmatmul.msk.bf16.gmra.mxu2 %vm1059_vm0, %v4773_v8  ;;  %v9476_v10 = vpop.f32.mrf.mxu0 }
 0x50e   : > { %v9461_v57 = vpop.xlane.xlu0 %2997 }
 0x50f   : > { %13054 = vst [vmem:[#allocation95_spill] sm:$0xff] %v9461_v57  ;;  %4325 = vmax.xlane.f32.xlu1 %v9456_v37 }
 0x510   : > { %v9479_v15 = vpop.eup %7033 }
 0x511   : > { %13056 = vst [vmem:[#allocation97_spill] sm:$0xff] %v9479_v15 }
 0x516   : > { %v4310_v45 = vpop.xlane.xlu0 %4309 }
 0x517   : > { %v4339_v39 = vsub.f32 %v9347_v53, %v4310_v45  ;;  %3759 = vmax.xlane.f32.xlu1 %v9467_v61  ;;  %v9487_v45 = vpop.f32.mrf.mxu1 }
 0x518   : > { %13058 = vst [vmem:[#allocation99_spill] sm:$0xff] %v9487_v45 }
 0x519   : > { %v4357_v17 = vmul.f32 1.442695, %v4339_v39 }
 0x51b   : > { %7035 = vpow2.f32 %v4357_v17  ;;  %3751 = vmax.xlane.f32.xlu2 %v9425_v34 }
 0x51d   : > { %5354 = vrot.lane.b32.xlu0 %v13042_v11, %s7646_s17 }
 0x51e   : > { %v3744_v21 = vpop.xlane.xlu0 %3743 }
 0x51f   : > { %4329 = vmax.xlane.f32.xlu1 %v9476_v10  ;;  %v3771_v60 = vsub.f32 %v9363_v54, %v3744_v21  ;;  %v9497_v21 = vpop.f32.mrf.mxu2 }
 0x521   : > { %v9481_v53 = vpop.eup %7035  ;;  %v3791_v11 = vmul.f32 1.442695, %v3771_v60  ;;  %v13063_v60 = vld [vmem:[#allocation43_spill] sm:$0xff] }
 0x522   : > { %13057 = vst [vmem:[#allocation98_spill] sm:$0xff] %v9481_v53  ;;  %v4418_v39 = vpack.c.bf16 %v9479_v15, %v9481_v53 }
 0x523   : > { %3755 = vmax.xlane.f32.xlu2 %v9444_v59  ;;  %7037 = vpow2.f32 %v3791_v11 }
 0x524   : > { %4470 = vmatmul.bf16.gmra.mxu1 %v4418_v39 }
 0x526   : > { %v4316_v15 = vpop.xlane.xlu0 %4315 }
 0x527   : > { %v3746_v8 = vpop.xlane.xlu1 %3745  ;;  %v4342_v23 = vsub.f32 %v9370_v46, %v4316_v15 }
 0x528   : > { %v3772_v17 = vsub.f32 %v9372_v50, %v3746_v8  ;;  %v9502_v50 = vpop.f32.mrf.mxu3 }
 0x529   : > { %v9493_v16 = vpop.eup %7037  ;;  %13062 = vst [vmem:[#allocation103_spill] sm:$0xff] %v9502_v50 }
 0x52a   : > { %v3793_v57 = vmul.f32 1.442695, %v3772_v17  ;;  %13060 = vst [vmem:[#allocation101_spill] sm:$0xff] %v9493_v16  ;;  %v9510_v17 = vpop.f32.mrf.mxu2 }
 0x52b   : > { %4327 = vmax.xlane.f32.xlu2 %v9465_v26 }
 0x52c   : > { %7039 = vpow2.f32 %v3793_v57  ;;  %v9506_v57 = vpop.f32.mrf.mxu0 }
 0x52f   : > { %v3748_v8 = vpop.xlane.xlu1 %3747 }
 0x532   : > { %v9495_v54 = vpop.eup %7039  ;;  %v9519_v29 = vpop.f32.mrf.mxu2 }
 0x533   : > { %13061 = vst [vmem:[#allocation102_spill] sm:$0xff] %v9495_v54  ;;  %3761 = vmax.xlane.f32.xlu2 %v9497_v21  ;;  %v3849_v39 = vpack.c.bf16 %v9495_v54, %v9493_v16  ;;  %v4363_v54 = vmul.f32 1.442695, %v4342_v23 }
 0x535   : > { %3873 = vmatmul.bf16.gmra.mxu3 %v3849_v39  ;;  %v9515_v39 = vpop.f32.mrf.mxu1  ;;  %7041 = vpow2.f32 %v4363_v54 }
 0x536   : > { %13064 = vst [vmem:[#allocation43_spill] sm:$0xff] %v9515_v39 }
 0x537   : > { %v4320_v53 = vpop.xlane.xlu1 %4319 }
 0x538   : > { %5025 = vrot.lane.b32.xlu1 %v13063_v60, %s7647_s18  ;;  %v4344_v54 = vsub.f32 %v9386_v3, %v4320_v53  ;;  %v9542_v3 = vpop.f32.mrf.mxu0 }
 0x539   : > { %v5351_v11 = vpop.permute.xlu0 %5350 }
 0x53a   : > { %6712 = vmatmul.msk.bf16.gmra.mxu0 %vm1059_vm0, %v5351_v11  ;;  %v4367_v41 = vmul.f32 1.442695, %v4344_v54 }
 0x53b   : > { %4331 = vmax.xlane.f32.xlu2 %v9506_v57  ;;  %v9522_v15 = vpop.eup %7041 }
 0x53c   : > { %13065 = vst [vmem:[#allocation104_spill] sm:$0xff] %v9522_v15 }
 0x541   : > { %v4775_v45 = vpop.permute.xlu0 %4774 }
 0x542   : > { %6705 = vmatmul.msk.bf16.gmra.mxu2 %vm1059_vm0, %v4775_v45  ;;  %v9524_v45 = vpop.f32.mrf.mxu1 }
 0x543   : > { %3763 = vmax.xlane.f32.xlu2 %v9510_v17  ;;  %13066 = vst [vmem:[#allocation105_spill] sm:$0xff] %v9524_v45 }
 0x545   : > { %v4314_v16 = vpop.xlane.xlu2 %4313 }
 0x546   : > { %v4341_v50 = vsub.f32 %v9361_v7, %v4314_v16 }
 0x547   : > { %3757 = vmax.xlane.f32.xlu0 %v9458_v33 }
 0x548   : > { %v4361_v11 = vmul.f32 1.442695, %v4341_v50 }
 0x54a   : > { %7043 = vpow2.f32 %v4361_v11  ;;  %v9534_v45 = vpop.f32.mrf.mxu1 }
 0x54b   : > { %3765 = vmax.xlane.f32.xlu2 %v9519_v29  ;;  %13068 = vst [vmem:[#allocation107_spill] sm:$0xff] %v9534_v45  ;;  %v9555_v45 = vpop.f32.mrf.mxu3 }
 0x54d   : > { %v4318_v46 = vpop.xlane.xlu2 %4317 }
 0x54e   : > { %v4343_v23 = vsub.f32 %v9377_v13, %v4318_v46  ;;  %v13069_v13 = vld [vmem:[#allocation35_spill] sm:$0xff] }
 0x54f   : > { %v4777_v16 = vpop.permute.xlu1 %4776 }
 0x550   : > { %v9526_v39 = vpop.eup %7043  ;;  %v4365_v50 = vmul.f32 1.442695, %v4343_v23 }
 0x551   : > { %13067 = vst [vmem:[#allocation106_spill] sm:$0xff] %v9526_v39  ;;  %v4419_v7 = vpack.c.bf16 %v9522_v15, %v9526_v39 }
 0x552   : > { %6706 = vmatmul.msk.bf16.gmra.mxu2 %vm1059_vm0, %v4777_v16  ;;  %7045 = vpow2.f32 %v4365_v50  ;;  %v9547_v23 = vpop.f32.mrf.mxu1  ;;  %v13073_v16 = vld [vmem:[#allocation34_spill] sm:$0xff] }
 0x553   : > { %4475 = vmatmul.bf16.gmra.mxu1 %v4419_v7  ;;  %7047 = vpow2.f32 %v4367_v41  ;;  %13072 = vst [vmem:[#allocation109_spill] sm:$0xff] %v9547_v23  ;;  %v3773_v41 = vsub.f32 %v9381_v43, %v3748_v8 }
 0x554   : > { %13074 = vst [vmem:[#allocation34_spill] sm:$0xff] %v9555_v45 }
 0x555   : > { %v5353_v11 = vpop.permute.xlu2 %5352  ;;  %v3795_v7 = vmul.f32 1.442695, %v3773_v41  ;;  %v9566_v41 = vpop.f32.mrf.mxu3 }
 0x556   : > { %6713 = vmatmul.msk.bf16.gmra.mxu0 %vm1059_vm0, %v5353_v11  ;;  %13077 = vst [vmem:[#allocation112_spill] sm:$0xff] %v9566_v41 }
 0x557   : > { %7049 = vpow2.f32 %v3795_v7  ;;  %v13079_v7 = vld [vmem:[#allocation27_spill] sm:$0xff] }
 0x558   : > { %v9538_v46 = vpop.eup %7045 }
 0x559   : > { %13070 = vst [vmem:[#allocation35_spill] sm:$0xff] %v9538_v46  ;;  %v9540_v15 = vpop.eup %7047 }
 0x55a   : > { %13071 = vst [vmem:[#allocation108_spill] sm:$0xff] %v9540_v15  ;;  %v4420_v53 = vpack.c.bf16 %v9540_v15, %v9538_v46  ;;  %v9573_v45 = vpop.f32.mrf.mxu1 }
 0x55b   : > { %5023 = vrot.lane.b32.xlu0 %v13069_v13, %s7647_s18 }
 0x562   : > { %4333 = vmax.xlane.f32.xlu1 %v9542_v3 }
 0x563   : > { %5603 = vrot.lane.b32.xlu2 %v13063_v60, %s7646_s17  ;;  %4480 = vmatmul.bf16.gmra.mxu1 %v4420_v53  ;;  %v9559_v60 = vpop.eup %7049 }
 0x564   : > { %13075 = vst [vmem:[#allocation110_spill] sm:$0xff] %v9559_v60 }
 0x56b   : > { %5021 = vrot.lane.b32.xlu2 %v13073_v16, %s7647_s18 }
 0x56c   : > { %v3750_v54 = vpop.xlane.xlu0 %3749 }
 0x56d   : > { %v3774_v50 = vsub.f32 %v9415_v52, %v3750_v54  ;;  %v13078_v52 = vld [vmem:[#allocation30_spill] sm:$0xff] }
 0x56f   : > { %v3797_v11 = vmul.f32 1.442695, %v3774_v50 }
 0x571   : > { %7051 = vpow2.f32 %v3797_v11 }
 0x573   : > { %5601 = vrot.lane.b32.xlu2 %v13069_v13, %s7646_s17 }
 0x574   : > { %v4322_v23 = vpop.xlane.xlu0 %4321 }
 0x575   : > { %v4345_v43 = vsub.f32 %v9431_v58, %v4322_v23  ;;  %v9575_v58 = vpop.f32.mrf.mxu2  ;;  %v9581_v23 = vpop.f32.mrf.mxu0 }
 0x577   : > { %v9561_v53 = vpop.eup %7051  ;;  %v4369_v13 = vmul.f32 1.442695, %v4345_v43 }
 0x578   : > { %13076 = vst [vmem:[#allocation111_spill] sm:$0xff] %v9561_v53  ;;  %v3850_v8 = vpack.c.bf16 %v9561_v53, %v9559_v60 }
 0x579   : > { %7053 = vpow2.f32 %v4369_v13 }
 0x57a   : > { %3878 = vmatmul.bf16.gmra.mxu3 %v3850_v8  ;;  %v3754_v8 = vpop.xlane.xlu1 %3753 }
 0x57b   : > { %5019 = vrot.lane.b32.xlu2 %v13078_v52, %s7647_s18  ;;  %5017 = vrot.lane.b32.xlu1 %v13079_v7, %s7647_s18 }
 0x57c   : > { %v4324_v54 = vpop.xlane.xlu0 %4323 }
 0x57d   : > { %v4346_v50 = vsub.f32 %v9441_v12, %v4324_v54  ;;  %v9590_v54 = vpop.f32.mrf.mxu1 }
 0x57f   : > { %v4371_v11 = vmul.f32 1.442695, %v4346_v50  ;;  %v9584_v43 = vpop.eup %7053  ;;  %v3776_v50 = vsub.f32 %v9433_v14, %v3754_v8 }
 0x580   : > { %13080 = vst [vmem:[#allocation30_spill] sm:$0xff] %v9584_v43 }
 0x581   : > { %7055 = vpow2.f32 %v4371_v11  ;;  %v3801_v11 = vmul.f32 1.442695, %v3776_v50 }
 0x582   : > { %v4326_v53 = vpop.xlane.xlu1 %4325 }
 0x583   : > { %5599 = vrot.lane.b32.xlu2 %v13073_v16, %s7646_s17  ;;  %5015 = vrot.lane.b32.xlu1 %v8902_v2, %s7647_s18  ;;  %v9595_v16 = vpop.f32.mrf.mxu2  ;;  %7057 = vpow2.f32 %v3801_v11  ;;  %v4347_v50 = vsub.f32 %v9456_v37, %v4326_v53 }
 0x585   : > { %4335 = vmax.xlane.f32.xlu0 %v9581_v23 }
 0x587   : > { %v9586_v12 = vpop.eup %7055 }
 0x588   : > { %13081 = vst [vmem:[#allocation27_spill] sm:$0xff] %v9586_v12  ;;  %v4421_v13 = vpack.c.bf16 %v9586_v12, %v9584_v43  ;;  %v9600_v12 = vpop.f32.mrf.mxu3 }
 0x589   : > { %v9602_v8 = vpop.eup %7057 }
 0x58a   : > { %4485 = vmatmul.bf16.gmra.mxu1 %v4421_v13  ;;  %13082 = vst [vmem:[#allocation113_spill] sm:$0xff] %v9602_v8 }
 0x58b   : > { %5595 = vrot.lane.b32.xlu1 %v13079_v7, %s7646_s17  ;;  %v9604_v7 = vpop.xlane.xlu1 %3759 }
 0x58d   : > { %4893 = vmax.xlane.f32.xlu0 %v9595_v16 }
 0x58e   : > { %v3752_v41 = vpop.xlane.xlu2 %3751 }
 0x58f   : > { %v3775_v60 = vsub.f32 %v9425_v34, %v3752_v41  ;;  %v5355_v15 = vpop.permute.xlu0 %5354 }
 0x590   : > { %6714 = vmatmul.msk.bf16.gmra.mxu0 %vm1059_vm0, %v5355_v15  ;;  %v9611_v41 = vpop.f32.mrf.mxu3  ;;  %v4373_v15 = vmul.f32 1.442695, %v4347_v50 }
 0x591   : > { %v3799_v43 = vmul.f32 1.442695, %v3775_v60 }
 0x593   : > { %7059 = vpow2.f32 %v3799_v43  ;;  %v9614_v43 = vpop.f32.mrf.mxu1  ;;  %v4330_v39 = vpop.xlane.xlu1 %4329 }
 0x594   : > { %7061 = vpow2.f32 %v4373_v15 }
 0x596   : > { %v3756_v14 = vpop.xlane.xlu2 %3755 }
 0x599   : > { %v9606_v13 = vpop.eup %7059 }
 0x59a   : > { %13083 = vst [vmem:[#allocation114_spill] sm:$0xff] %v9606_v13  ;;  %v3851_v34 = vpack.c.bf16 %v9602_v8, %v9606_v13  ;;  %v9618_v53 = vpop.eup %7061 }
 0x59b   : > { %13084 = vst [vmem:[#allocation115_spill] sm:$0xff] %v9618_v53  ;;  %v9624_v50 = vpop.f32.mrf.mxu1 }
 0x59c   : > { %3883 = vmatmul.bf16.gmra.mxu3 %v3851_v34 }
 0x59e   : > { %v4328_v60 = vpop.xlane.xlu2 %4327 }
 0x59f   : > { %v4348_v11 = vsub.f32 %v9465_v26, %v4328_v60  ;;  %v4349_v26 = vsub.f32 %v9476_v10, %v4330_v39  ;;  %v9635_v10 = vpop.f32.mrf.mxu2  ;;  %v9638_v39 = vpop.f32.mrf.mxu3 }
 0x5a1   : > { %v4375_v46 = vmul.f32 1.442695, %v4348_v11  ;;  %5597 = vrot.lane.b32.xlu0 %v13078_v52, %s7646_s17  ;;  %v4377_v52 = vmul.f32 1.442695, %v4349_v26 }
 0x5a3   : > { %7063 = vpow2.f32 %v4375_v46  ;;  %v9630_v46 = vpop.f32.mrf.mxu0  ;;  %v9633_v31 = vpop.f32.mrf.mxu1 }
 0x5a4   : > { %13086 = vst [vmem:[#allocation117_spill] sm:$0xff] %v9633_v31  ;;  %7065 = vpow2.f32 %v4377_v52 }
 0x5a6   : > { %v3762_v37 = vpop.xlane.xlu2 %3761 }
 0x5a7   : > { %v9655_v9 = vpop.f32.mrf.mxu3 }
 0x5a9   : > { %v9620_v8 = vpop.eup %7063  ;;  %5013 = vrot.lane.b32.xlu0 %v13009_v55, %s7647_s18 }
 0x5aa   : > { %13085 = vst [vmem:[#allocation116_spill] sm:$0xff] %v9620_v8  ;;  %v5026_v34 = vpop.permute.xlu1 %5025  ;;  %v4422_v60 = vpack.c.bf16 %v9620_v8, %v9618_v53  ;;  %v9641_v8 = vpop.eup %7065 }
 0x5ab   : > { %5035 = vmatpush.bf16.msrb.mxu3 %v5026_v34  ;;  %v3777_v34 = vsub.f32 %v9444_v59, %v3756_v14  ;;  %13087 = vst [vmem:[#allocation118_spill] sm:$0xff] %v9641_v8  ;;  %v9643_v26 = vpop.f32.mrf.mxu0  ;;  %v9653_v14 = vpop.f32.mrf.mxu2 }
 0x5ac   : > { %4891 = vmax.xlane.f32.xlu2 %v9575_v58  ;;  %4490 = vmatmul.bf16.gmra.mxu1 %v4422_v60 }
 0x5ae   : > { %v4332_v15 = vpop.xlane.xlu2 %4331 }
 0x5af   : > { %v4350_v11 = vsub.f32 %v9506_v57, %v4332_v15  ;;  %v3803_v57 = vmul.f32 1.442695, %v3777_v34 }
 0x5b1   : > { %v4379_v13 = vmul.f32 1.442695, %v4350_v11  ;;  %v9650_v11 = vpop.f32.mrf.mxu1 }
 0x5b2   : > { %13089 = vst [vmem:[#allocation120_spill] sm:$0xff] %v9650_v11 }
 0x5b3   : > { %7067 = vpow2.f32 %v4379_v13  ;;  %v9657_v34 = vpop.f32.mrf.mxu0 }
 0x5b4   : > { %7069 = vpow2.f32 %v3803_v57 }
 0x5b5   : > { %5469 = vmax.xlane.f32.xlu1 %v9630_v46 }
 0x5b6   : > { %v3764_v60 = vpop.xlane.xlu2 %3763 }
 0x5b9   : > { %v9645_v53 = vpop.eup %7067  ;;  %v9732_v38 = vpop.f32.mrf.mxu1 }
 0x5ba   : > { %13088 = vst [vmem:[#allocation119_spill] sm:$0xff] %v9645_v53  ;;  %v3758_v15 = vpop.xlane.xlu0 %3757  ;;  %v4423_v13 = vpack.c.bf16 %v9645_v53, %v9641_v8  ;;  %v9659_v30 = vpop.eup %7069 }
 0x5bb   : > { %v3778_v52 = vsub.f32 %v9458_v33, %v3758_v15  ;;  %13090 = vst [vmem:[#allocation121_spill] sm:$0xff] %v9659_v30  ;;  %v3780_v15 = vsub.f32 %v9497_v21, %v3762_v37  ;;  %v9671_v53 = vpop.f32.mrf.mxu2  ;;  %v9673_v8 = vpop.f32.mrf.mxu3 }
 0x5bc   : > { %4495 = vmatmul.bf16.gmra.mxu1 %v4423_v13  ;;  %v3779_v13 = vsub.f32 %v9467_v61, %v9604_v7  ;;  %13092 = vst [vmem:[#allocation123_spill] sm:$0xff] %v9673_v8  ;;  %v9675_v11 = vpop.f32.mrf.mxu0 }
 0x5bd   : > { %v3805_v31 = vmul.f32 1.442695, %v3778_v52  ;;  %4895 = vmax.xlane.f32.xlu1 %v9635_v10  ;;  %v3809_v52 = vmul.f32 1.442695, %v3780_v15  ;;  %13101 = vst [vmem:[#allocation132_spill] sm:$0xff] %v9732_v38 }
 0x5be   : > { %v3766_v59 = vpop.xlane.xlu2 %3765  ;;  %v2529_v38 = vand.u32 2147483647, %v9200_v28 }
 0x5bf   : > { %7071 = vpow2.f32 %v3805_v31 }
 0x5c0   : > { %7073 = vpow2.f32 %v3809_v52  ;;  %vm2530_vm15 = vcmp.eq.f32.partialorder %v2529_v38, 8.507059e+37  ;;  %v3109_v38 = vand.u32 2147483648, %v9356_v63 }
 0x5c3   : > { %v9683_v7 = vpop.f32.mrf.mxu2  ;;  %v9685_v15 = vpop.f32.mrf.mxu3 }
 0x5c4   : > { %5593 = vrot.lane.b32.xlu2 %v8902_v2, %s7646_s17  ;;  %v3807_v2 = vmul.f32 1.442695, %v3779_v13  ;;  %13094 = vst [vmem:[#allocation125_spill] sm:$0xff] %v9685_v15 }
 0x5c5   : > { %v9663_v33 = vpop.eup %7071  ;;  %5473 = vmax.xlane.f32.xlu1 %v9657_v34 }
 0x5c6   : > { %13091 = vst [vmem:[#allocation122_spill] sm:$0xff] %v9663_v33  ;;  %v5604_v57 = vpop.permute.xlu2 %5603  ;;  %v3852_v31 = vpack.c.bf16 %v9663_v33, %v9659_v30  ;;  %7075 = vpow2.f32 %v3807_v2  ;;  %v9680_v61 = vpop.eup %7073  ;;  %v3781_v2 = vsub.f32 %v9510_v17, %v3764_v60 }
 0x5c7   : > { %5613 = vmatpush.bf16.msra.mxu1 %v5604_v57  ;;  %13093 = vst [vmem:[#allocation124_spill] sm:$0xff] %v9680_v61 }
 0x5c8   : > { %3888 = vmatmul.bf16.gmra.mxu3 %v3852_v31  ;;  %v3782_v31 = vsub.f32 %v9519_v29, %v3766_v59  ;;  %v3811_v33 = vmul.f32 1.442695, %v3781_v2 }
 0x5cb   : > { %v9701_v59 = vpop.f32.mrf.mxu2 }
 0x5cc   : > { %5011 = vrot.lane.b32.xlu2 %v13027_v1, %s7647_s18  ;;  %v9689_v57 = vpop.eup %7075 }
 0x5cd   : > { %5475 = vmax.xlane.f32.xlu1 %v9675_v11  ;;  %v5024_v21 = vpop.permute.xlu0 %5023  ;;  %13095 = vst [vmem:[#allocation126_spill] sm:$0xff] %v9689_v57  ;;  %v3853_v52 = vpack.c.bf16 %v9680_v61, %v9689_v57 }
 0x5ce   : > { %v5022_v37 = vpop.permute.xlu2 %5021  ;;  %5036 = vmatpush.bf16.msrb.mxu3 %v5024_v21  ;;  %v9696_v21 = vpop.f32.mrf.mxu0 }
 0x5d2   : > { %5037 = vmatpush.bf16.msrb.mxu3 %v5022_v37  ;;  %v3813_v37 = vmul.f32 1.442695, %v3782_v31 }
 0x5d3   : > { %5471 = vmax.xlane.f32.xlu0 %v9643_v26 }
 0x5d4   : > { %5591 = vrot.lane.b32.xlu2 %v13009_v55, %s7646_s17  ;;  %7077 = vpow2.f32 %v3813_v37  ;;  %v9699_v55 = vpop.f32.mrf.mxu3 }
 0x5d5   : > { %4901 = vmax.xlane.f32.xlu1 %v9683_v7  ;;  %13096 = vst [vmem:[#allocation127_spill] sm:$0xff] %v9699_v55  ;;  %7079 = vpow2.f32 %v3811_v33  ;;  %v4334_v60 = vpop.xlane.xlu1 %4333 }
 0x5d6   : > { %v5602_v13 = vpop.permute.xlu2 %5601  ;;  %v9703_v30 = vpop.f32.mrf.mxu0  ;;  %7081 = vrcp.f32 %v9210_v48 }
 0x5d7   : > { %5614 = vmatpush.bf16.msra.mxu1 %v5602_v13  ;;  %7083 = vrcp.f32 %v9187_v42 }
 0x5d8   : > { %3893 = vmatmul.bf16.gmra.mxu3 %v3853_v52  ;;  %v9717_v52 = vpop.f32.mrf.mxu2 }
 0x5d9   : > { %13100 = vst [vmem:[#allocation131_spill] sm:$0xff] %v9717_v52 }
 0x5da   : > { %v9705_v61 = vpop.eup %7077 }
 0x5db   : > { %13097 = vst [vmem:[#allocation128_spill] sm:$0xff] %v9705_v61  ;;  %v9707_v17 = vpop.eup %7079 }
 0x5dc   : > { %13098 = vst [vmem:[#allocation129_spill] sm:$0xff] %v9707_v17  ;;  %v3854_v13 = vpack.c.bf16 %v9705_v61, %v9707_v17  ;;  %v9714_v33 = vpop.f32.mrf.mxu3 }
 0x5dd   : > { %5477 = vmax.xlane.f32.xlu1 %v9696_v21  ;;  %13099 = vst [vmem:[#allocation130_spill] sm:$0xff] %v9714_v33 }
 0x5de   : > { %v5020_v29 = vpop.permute.xlu2 %5019  ;;  %v9719_v2 = vpop.f32.mrf.mxu0 }
 0x5df   : > { %5038 = vmatpush.bf16.msrb.mxu3 %v5020_v29  ;;  %v7082_v29 = vpop.eup %7081 }
 0x5e0   : > { %v1943_v61 = vmul.f32 %v7082_v29, %v9210_v48  ;;  %vm1948_vm1 = vweird.f32 %v7082_v29 }
 0x5e1   : > { %vm1949_vm3 = vmor %vm1947_vm2, %vm1948_vm1 }
 0x5e2   : > { %v1944_v33 = vsub.f32 1.0, %v1943_v61 }
 0x5e4   : > { %v1945_v56 = vmul.f32 %v7082_v29, %v1944_v33  ;;  %v1937_v33 = vand.u32 2147483647, %v9187_v42 }
 0x5e5   : > { %5479 = vmax.xlane.f32.xlu1 %v9703_v30 }
 0x5e6   : > { %v5600_v31 = vpop.permute.xlu2 %5599  ;;  %v9726_v17 = vpop.f32.mrf.mxu0  ;;  %v1946_v61 = vadd.f32 %v7082_v29, %v1945_v56  ;;  %v1939_v56 = vand.u32 2147483648, %v9187_v42  ;;  %vm1938_vm8 = vcmp.eq.f32.partialorder %v1937_v33, 8.507059e+37 }
 0x5e7   : > { %5589 = vrot.lane.b32.xlu0 %v13027_v1, %s7646_s17  ;;  %5615 = vmatpush.bf16.msra.mxu1 %v5600_v31  ;;  %v9724_v1 = vpop.f32.mrf.mxu2  ;;  %v7084_v31 = vpop.eup %7083 }
 0x5e8   : > { %3898 = vmatmul.bf16.gmra.mxu3 %v3854_v13  ;;  %v4351_v13 = vsub.f32 %v9542_v3, %v4334_v60  ;;  %v1929_v55 = vmul.f32 %v7084_v31, %v9187_v42  ;;  %vm1934_vm4 = vweird.f32 %v7084_v31 }
 0x5e9   : > { %vm1935_vm7 = vmor %vm1933_vm5, %vm1934_vm4  ;;  %vm3103_vm4 = vweird.f32 %v9356_v63 }
 0x5ea   : > { %v4381_v8 = vmul.f32 1.442695, %v4351_v13  ;;  %v9753_v13 = vpop.f32.mrf.mxu1 }
 0x5eb   : > { %13104 = vst [vmem:[#allocation135_spill] sm:$0xff] %v9753_v13 }
 0x5ec   : > { %7085 = vpow2.f32 %v4381_v8 }
 0x5ed   : > { %4905 = vmax.xlane.f32.xlu1 %v9717_v52  ;;  %v5018_v37 = vpop.permute.xlu1 %5017  ;;  %v1930_v52 = vsub.f32 1.0, %v1929_v55 }
 0x5ee   : > { %5039 = vmatpush.bf16.msrb.mxu3 %v5018_v37 }
 0x5ef   : > { %v9734_v36 = vpop.f32.mrf.mxu2  ;;  %v1931_v3 = vmul.f32 %v7084_v31, %v1930_v52 }
 0x5f1   : > { %v1932_v8 = vadd.f32 %v7084_v31, %v1931_v3  ;;  %v1940_v3 = vor.u32 1.1754944e-38, %v1939_v56 }
 0x5f5   : > { %5483 = vmax.xlane.f32.xlu1 %v9726_v17  ;;  %v5016_v57 = vpop.permute.xlu1 %5015 }
 0x5f6   : > { %5040 = vmatpush.bf16.msrb.mxu3 %v5016_v57  ;;  %v1953_v57 = vand.u32 2147483648, %v9210_v48 }
 0x5f8   : > { %v4336_v15 = vpop.xlane.xlu0 %4335  ;;  %v1954_v60 = vor.u32 1.1754944e-38, %v1953_v57 }
 0x5f9   : > { %v4352_v37 = vsub.f32 %v9581_v23, %v4336_v15  ;;  %v1951_v23 = vand.u32 2147483647, %v9210_v48  ;;  %v9742_v15 = vpop.eup %7085 }
 0x5fa   : > { %13102 = vst [vmem:[#allocation133_spill] sm:$0xff] %v9742_v15 }
 0x5fb   : > { %v4383_v0 = vmul.f32 1.442695, %v4352_v37  ;;  %vm1952_vm6 = vcmp.eq.f32.partialorder %v1951_v23, 8.507059e+37 }
 0x5fd   : > { %7087 = vpow2.f32 %v4383_v0  ;;  %4897 = vmax.xlane.f32.xlu2 %v9653_v14  ;;  %4909 = vmax.xlane.f32.xlu1 %v9734_v36  ;;  %v1950_v0 = vsel %vm1949_vm3, %v7082_v29, %v1946_v61  ;;  %v1936_v29 = vsel %vm1935_vm7, %v7084_v31, %v1932_v8 }
 0x5fe   : > { %7089 = vrcp.f32 %v9200_v28  ;;  %v1955_v52 = vsel %vm1952_vm6, %v1954_v60, %v1950_v0  ;;  %v1941_v42 = vsel %vm1938_vm8, %v1940_v3, %v1936_v29  ;;  %vm3089_vm6 = vweird.f32 %v9325_v49 }
 0x5ff   : > { %7091 = vrcp.f32 %v9189_v27  ;;  %v2153_v61 = vmul.f32 %v1955_v52, %v9295_v24  ;;  %v2152_v0 = vmul.f32 %v1941_v42, %v9282_v20  ;;  %v9774_v42 = vpop.f32.mrf.mxu0 }
 0x600   : > { %7093 = vrcp.f32 %v9356_v63  ;;  %v9762_v31 = vpop.xlane.xlu0 %4893 }
 0x601   : > { %7095 = vrcp.f32 %v9325_v49  ;;  %v2169_v8 = vpack.c.bf16 %v2153_v61, %v2153_v61  ;;  %v2168_v33 = vpack.c.bf16 %v2152_v0, %v2152_v0 }
 0x603   : > { %v9744_v55 = vpop.eup %7087  ;;  %v3397_v52 = vunpack.c.l.b16 %v2169_v8  ;;  %v3396_v3 = vunpack.c.l.b16 %v2168_v33  ;;  %v5596_v33 = vpop.permute.xlu1 %5595 }
 0x604   : > { %13103 = vst [vmem:[#allocation134_spill] sm:$0xff] %v9744_v55  ;;  %v4424_v48 = vpack.c.bf16 %v9744_v55, %v9742_v15  ;;  %v7090_v37 = vpop.eup %7089 }
 0x605   : > { %4903 = vmax.xlane.f32.xlu2 %v9701_v59  ;;  %v9757_v57 = vpop.eup %7091  ;;  %v2521_v23 = vmul.f32 %v7090_v37, %v9200_v28  ;;  %v3412_v13 = vpack.c.b16 %v3397_v52, %v3396_v3  ;;  %vm2526_vm9 = vweird.f32 %v7090_v37 }
 0x606   : > { %4500 = vmatmul.bf16.gmra.mxu1 %v4424_v48  ;;  %v2507_v56 = vmul.f32 %v9757_v57, %v9189_v27  ;;  %v9767_v24 = vpop.eup %7093  ;;  %vm2512_vm11 = vweird.f32 %v9757_v57  ;;  %vm9786_vm12 = vmor %vm2525_vm10, %vm2526_vm9 }
 0x607   : > { %v2522_v60 = vsub.f32 1.0, %v2521_v23  ;;  %v9769_v48 = vpop.eup %7095  ;;  %v3099_v20 = vmul.f32 %v9767_v24, %v9356_v63  ;;  %vm9798_vm14 = vmor %vm2511_vm13, %vm2512_vm11  ;;  %vm3104_vm1 = vweird.f32 %v9767_v24 }
 0x608   : > { %v2508_v29 = vsub.f32 1.0, %v2507_v56  ;;  %v3085_v55 = vmul.f32 %v9769_v48, %v9325_v49  ;;  %v2531_v56 = vand.u32 2147483648, %v9200_v28  ;;  %vm3090_vm3 = vweird.f32 %v9769_v48  ;;  %vm3105_vm5 = vmor %vm3103_vm4, %vm3104_vm1 }
 0x609   : > { %v2523_v61 = vmul.f32 %v7090_v37, %v2522_v60  ;;  %v3100_v0 = vsub.f32 1.0, %v3099_v20  ;;  %vm3091_vm7 = vmor %vm3089_vm6, %vm3090_vm3 }
 0x60a   : > { %v2509_v23 = vmul.f32 %v9757_v57, %v2508_v29  ;;  %v3086_v60 = vsub.f32 1.0, %v3085_v55  ;;  %v2515_v55 = vand.u32 2147483647, %v9189_v27  ;;  %v2532_v20 = vor.u32 1.1754944e-38, %v2531_v56 }
 0x60b   : > { %v2524_v8 = vadd.f32 %v7090_v37, %v2523_v61  ;;  %v3101_v29 = vmul.f32 %v9767_v24, %v3100_v0  ;;  %v9802_v0 = vpop.f32.mrf.mxu0 }
 0x60c   : > { %v3087_v3 = vmul.f32 %v9769_v48, %v3086_v60  ;;  %vm2516_vm2 = vcmp.eq.f32.partialorder %v2515_v55, 8.507059e+37 }
 0x60d   : > { %5481 = vmax.xlane.f32.xlu2 %v9719_v2  ;;  %v2528_v28 = vsel %vm9786_vm12, %v7090_v37, %v2524_v8  ;;  %v3102_v37 = vadd.f32 %v9767_v24, %v3101_v29  ;;  %v3095_v29 = vand.u32 2147483648, %v9325_v49  ;;  %vm1975_vm12 = vweird.f32 %v9225_v40 }
 0x60e   : > { %v2533_v52 = vsel %vm2530_vm15, %v2532_v20, %v2528_v28  ;;  %v3088_v56 = vadd.f32 %v9769_v48, %v3087_v3  ;;  %v3110_v20 = vor.u32 1.1754944e-38, %v3109_v38  ;;  %v9826_v38 = vpop.f32.mrf.mxu3 }
 0x60f   : > { %v2731_v8 = vmul.f32 %v2533_v52, %v9611_v41  ;;  %v3093_v41 = vand.u32 2147483647, %v9325_v49  ;;  %v3106_v28 = vsel %vm3105_vm5, %v9767_v24, %v3102_v37  ;;  %vm3131_vm5 = vweird.f32 %v9367_v32 }
 0x611   : > { %4899 = vmax.xlane.f32.xlu0 %v9671_v53  ;;  %v2747_v3 = vpack.c.bf16 %v2731_v8, %v2731_v8  ;;  %vm3094_vm9 = vcmp.eq.f32.partialorder %v3093_v41, 8.507059e+37 }
 0x613   : > { %v5598_v15 = vpop.permute.xlu0 %5597 }
 0x614   : > { %5616 = vmatpush.bf16.msra.mxu1 %v5598_v15  ;;  %v2510_v15 = vadd.f32 %v9757_v57, %v2509_v23  ;;  %v3096_v23 = vor.u32 1.1754944e-38, %v3095_v29 }
 0x615   : > { %4907 = vmax.xlane.f32.xlu2 %v9724_v1 }
 0x616   : > { %3420 = vrot.lane.b32.xlu1 %v3412_v13, %s7646_s17  ;;  %v2517_v13 = vand.u32 2147483648, %v9189_v27  ;;  %v9840_v41 = vpop.f32.mrf.mxu3 }
 0x618   : > { %5617 = vmatpush.bf16.msra.mxu1 %v5596_v33  ;;  %v2514_v33 = vsel %vm9798_vm14, %v9757_v57, %v2510_v15  ;;  %v2518_v27 = vor.u32 1.1754944e-38, %v2517_v13  ;;  %v3107_v57 = vand.u32 2147483647, %v9356_v63  ;;  %v4924_v63 = vsub.f32 %v9595_v16, %v9762_v31 }
 0x619   : > { %5485 = vmax.xlane.f32.xlu0 %v9774_v42  ;;  %vm1961_vm14 = vweird.f32 %v9212_v51 }
 0x61a   : > { %v2519_v15 = vsel %vm2516_vm2, %v2518_v27, %v2514_v33  ;;  %vm3108_vm8 = vcmp.eq.f32.partialorder %v3107_v57, 8.507059e+37  ;;  %v4941_v27 = vmul.f32 1.442695, %v4924_v63 }
 0x61b   : > { %v5014_v61 = vpop.permute.xlu0 %5013  ;;  %v2730_v13 = vmul.f32 %v2519_v15, %v9600_v12 }
 0x61c   : > { %5041 = vmatpush.bf16.msrb.mxu3 %v5014_v61  ;;  %v3092_v61 = vsel %vm3091_vm7, %v9769_v48, %v3088_v56 }
 0x61d   : > { %5487 = vmax.xlane.f32.xlu2 %v9802_v0  ;;  %v2746_v52 = vpack.c.bf16 %v2730_v13, %v2730_v13  ;;  %v3097_v12 = vsel %vm3094_vm9, %v3096_v23, %v3092_v61  ;;  %v9845_v61 = vpop.f32.mrf.mxu2 }
 0x61e   : > { %v3308_v16 = vmul.f32 %v3097_v12, %v9573_v45 }
 0x61f   : > { %v4892_v60 = vpop.xlane.xlu2 %4891  ;;  %v3452_v37 = vunpack.c.l.b16 %v2746_v52 }
 0x620   : > { %v4923_v55 = vsub.f32 %v9575_v58, %v4892_v60  ;;  %v3111_v58 = vsel %vm3108_vm8, %v3110_v20, %v3106_v28  ;;  %v3453_v60 = vunpack.c.l.b16 %v2747_v3  ;;  %v3324_v56 = vpack.c.bf16 %v3308_v16, %v3308_v16 }
 0x621   : > { %v3309_v24 = vmul.f32 %v3111_v58, %v9590_v54  ;;  %vm3117_vm8 = vweird.f32 %v9379_v5 }
 0x622   : > { %v4939_v33 = vmul.f32 1.442695, %v4923_v55  ;;  %v3468_v48 = vpack.c.b16 %v3453_v60, %v3452_v37  ;;  %v3508_v45 = vunpack.c.l.b16 %v3324_v56  ;;  %v1981_v37 = vand.u32 2147483648, %v9225_v40 }
 0x623   : > { %v3325_v8 = vpack.c.bf16 %v3309_v24, %v3309_v24  ;;  %v1965_v56 = vand.u32 2147483647, %v9212_v51 }
 0x624   : > { %7097 = vpow2.f32 %v4939_v33 }
 0x625   : > { %7099 = vpow2.f32 %v4941_v27  ;;  %v3509_v15 = vunpack.c.l.b16 %v3325_v8  ;;  %v1967_v8 = vand.u32 2147483648, %v9212_v51  ;;  %vm1966_vm2 = vcmp.eq.f32.partialorder %v1965_v56, 8.507059e+37 }
 0x626   : > { %7101 = vrcp.f32 %v9225_v40 }
 0x627   : > { %v5594_v49 = vpop.permute.xlu2 %5593  ;;  %7103 = vrcp.f32 %v9212_v51  ;;  %v3524_v20 = vpack.c.b16 %v3509_v15, %v3508_v45  ;;  %v9860_v15 = vpop.f32.mrf.mxu1  ;;  %v1982_v45 = vor.u32 1.1754944e-38, %v1981_v37 }
 0x628   : > { %5618 = vmatpush.bf16.msra.mxu1 %v5594_v49  ;;  %v9829_v31 = vpop.xlane.xlu1 %5469  ;;  %v9851_v49 = vpop.f32.mrf.mxu2  ;;  %7105 = vrcp.f32 %v9367_v32 }
 0x629   : > { %7107 = vrcp.f32 %v9379_v5 }
 0x62a   : > { %v9833_v57 = vpop.eup %7097  ;;  %7109 = vrcp.f32 %v9227_v44 }
 0x62b   : > { %v9836_v29 = vpop.eup %7099  ;;  %7111 = vrcp.f32 %v9244_v18 }
 0x62c   : > { %v5003_v55 = vpack.c.bf16 %v9836_v29, %v9833_v57  ;;  %v7102_v13 = vpop.eup %7101 }
 0x62d   : > { %3476 = vrot.lane.b32.xlu0 %v3468_v48, %s7647_s18  ;;  %v7104_v63 = vpop.eup %7103  ;;  %v1971_v3 = vmul.f32 %v7102_v13, %v9225_v40  ;;  %vm1976_vm10 = vweird.f32 %v7102_v13  ;;  %v1979_v48 = vand.u32 2147483647, %v9225_v40  ;;  %v1968_v40 = vor.u32 1.1754944e-38, %v1967_v8 }
 0x62e   : > { %v1957_v23 = vmul.f32 %v7104_v63, %v9212_v51  ;;  %vm1962_vm11 = vweird.f32 %v7104_v63  ;;  %vm1977_vm13 = vmor %vm1975_vm12, %vm1976_vm10 }
 0x62f   : > { %v5012_v54 = vpop.permute.xlu2 %5011  ;;  %v1972_v58 = vsub.f32 1.0, %v1971_v3  ;;  %vm1963_vm15 = vmor %vm1961_vm14, %vm1962_vm11  ;;  %vm1980_vm1 = vcmp.eq.f32.partialorder %v1979_v48, 8.507059e+37  ;;  %vm2553_vm11 = vweird.f32 %v9244_v18 }
 0x630   : > { %5042 = vmatpush.bf16.msrb.mxu3 %v5012_v54  ;;  %v9842_v28 = vpop.xlane.xlu1 %4895  ;;  %v1958_v52 = vsub.f32 1.0, %v1957_v23 }
 0x631   : > { %v1973_v12 = vmul.f32 %v7102_v13, %v1972_v58  ;;  %v9870_v58 = vpop.eup %7105 }
 0x632   : > { %v1959_v60 = vmul.f32 %v7104_v63, %v1958_v52  ;;  %v3127_v37 = vmul.f32 %v9870_v58, %v9367_v32  ;;  %vm3132_vm3 = vweird.f32 %v9870_v58 }
 0x633   : > { %5043 = vmatmul.bf16.vlgmr.msrb.gmra.mxu3 %v5003_v55  ;;  %v1974_v24 = vadd.f32 %v7102_v13, %v1973_v12  ;;  %v9875_v12 = vpop.eup %7107  ;;  %vm9924_vm7 = vmor %vm3131_vm5, %vm3132_vm3  ;;  %vm1345_vm5 = vweird.f32 %v9058_v25 }
 0x634   : > { %v1960_v16 = vadd.f32 %v7104_v63, %v1959_v60  ;;  %vm3118_vm4 = vweird.f32 %v9875_v12 }
 0x635   : > { %3532 = vrot.lane.b32.xlu2 %v3524_v20, %s7645_s14  ;;  %v1978_v54 = vsel %vm1977_vm13, %v7102_v13, %v1974_v24  ;;  %vm9942_vm10 = vmor %vm3117_vm8, %vm3118_vm4  ;;  %vm2539_vm13 = vweird.f32 %v9227_v44  ;;  %vm1331_vm4 = vweird.f32 %v9056_v47 }
 0x636   : > { %v1964_v55 = vsel %vm1963_vm15, %v7104_v63, %v1960_v16  ;;  %v1983_v23 = vsel %vm1980_vm1, %v1982_v45, %v1978_v54  ;;  %v5501_v63 = vsub.f32 %v9630_v46, %v9829_v31  ;;  %v9879_v16 = vpop.f32.mrf.mxu1  ;;  %v3113_v46 = vmul.f32 %v9875_v12, %v9379_v5 }
 0x637   : > { %v5592_v33 = vpop.permute.xlu2 %5591  ;;  %v1969_v51 = vsel %vm1966_vm2, %v1968_v40, %v1964_v55  ;;  %v3128_v54 = vsub.f32 1.0, %v3127_v37  ;;  %v9893_v55 = vpop.f32.mrf.mxu0 }
 0x638   : > { %5619 = vmatpush.bf16.msra.mxu1 %v5592_v33  ;;  %v9849_v27 = vpop.xlane.xlu1 %5473  ;;  %v2155_v33 = vmul.f32 %v1983_v23, %v9312_v4  ;;  %v2154_v52 = vmul.f32 %v1969_v51, %v9303_v35  ;;  %v5517_v4 = vmul.f32 1.442695, %v5501_v63  ;;  %v3114_v40 = vsub.f32 1.0, %v3113_v46 }
 0x63a   : > { %v2171_v24 = vpack.c.bf16 %v2155_v33, %v2155_v33  ;;  %v2170_v8 = vpack.c.bf16 %v2154_v52, %v2154_v52  ;;  %v3115_v52 = vmul.f32 %v9875_v12, %v3114_v40  ;;  %v3123_v40 = vand.u32 2147483648, %v9379_v5 }
 0x63c   : > { %v3399_v56 = vunpack.c.l.b16 %v2171_v24 }
 0x640   : > { %4913 = vmax.xlane.f32.xlu1 %v9851_v49  ;;  %v9863_v20 = vpop.xlane.xlu1 %5475 }
 0x646   : > { %v5472_v3 = vpop.xlane.xlu0 %5471 }
 0x647   : > { %v5502_v13 = vsub.f32 %v9643_v26, %v5472_v3  ;;  %v9881_v26 = vpop.eup %7109  ;;  %v3398_v3 = vunpack.c.l.b16 %v2170_v8 }
 0x648   : > { %v9883_v48 = vpop.eup %7111  ;;  %v9887_v31 = vpop.xlane.xlu1 %4901  ;;  %v2535_v35 = vmul.f32 %v9881_v26, %v9227_v44  ;;  %vm2540_vm6 = vweird.f32 %v9881_v26 }
 0x649   : > { %v5519_v60 = vmul.f32 1.442695, %v5502_v13  ;;  %v2549_v45 = vmul.f32 %v9883_v48, %v9244_v18  ;;  %v3413_v23 = vpack.c.b16 %v3399_v56, %v3398_v3  ;;  %v3129_v13 = vmul.f32 %v9870_v58, %v3128_v54  ;;  %vm2541_vm1 = vmor %vm2539_vm13, %vm2540_vm6 }
 0x64a   : > { %v2536_v51 = vsub.f32 1.0, %v2535_v35  ;;  %v5503_v3 = vsub.f32 %v9657_v34, %v9849_v27  ;;  %vm2554_vm9 = vweird.f32 %v9883_v48  ;;  %vm2003_vm13 = vweird.f32 %v9250_v22 }
 0x64b   : > { %7113 = vpow2.f32 %v5519_v60  ;;  %v2550_v63 = vsub.f32 1.0, %v2549_v45  ;;  %v9900_v60 = vpop.f32.mrf.mxu1  ;;  %v3130_v46 = vadd.f32 %v9870_v58, %v3129_v13  ;;  %v3137_v45 = vand.u32 2147483648, %v9367_v32  ;;  %vm9954_vm14 = vmor %vm2553_vm11, %vm2554_vm9 }
 0x64c   : > { %7115 = vpow2.f32 %v5517_v4  ;;  %v5504_v4 = vsub.f32 %v9675_v11, %v9863_v20  ;;  %v2537_v8 = vmul.f32 %v9881_v26, %v2536_v51  ;;  %v3116_v11 = vadd.f32 %v9875_v12, %v3115_v52  ;;  %v9928_v51 = vpop.f32.mrf.mxu0 }
 0x64d   : > { %v2551_v54 = vmul.f32 %v9883_v48, %v2550_v63  ;;  %v3135_v20 = vand.u32 2147483647, %v9367_v32  ;;  %v3121_v32 = vand.u32 2147483647, %v9379_v5  ;;  %v3134_v13 = vsel %vm9924_vm7, %v9870_v58, %v3130_v46 }
 0x64e   : > { %v5523_v34 = vmul.f32 1.442695, %v5504_v4  ;;  %v2538_v27 = vadd.f32 %v9881_v26, %v2537_v8  ;;  %v5521_v4 = vmul.f32 1.442695, %v5503_v3  ;;  %v2559_v5 = vand.u32 2147483648, %v9244_v18 }
 0x64f   : > { %v2552_v63 = vadd.f32 %v9883_v48, %v2551_v54  ;;  %v3120_v58 = vsel %vm9942_vm10, %v9875_v12, %v3116_v11  ;;  %vm3136_vm12 = vcmp.eq.f32.partialorder %v3135_v20, 8.507059e+37  ;;  %v2557_v8 = vand.u32 2147483647, %v9244_v18 }
 0x650   : > { %v9912_v56 = vpop.xlane.xlu1 %5477  ;;  %v3124_v46 = vor.u32 1.1754944e-38, %v3123_v40  ;;  %7117 = vpow2.f32 %v5523_v34  ;;  %v2545_v54 = vand.u32 2147483648, %v9227_v44  ;;  %vm3122_vm15 = vcmp.eq.f32.partialorder %v3121_v32, 8.507059e+37  ;;  %v6790_v34 = vld [vmem:[#allocation10 + $0x38] sm:$0xff] }
 0x651   : > { %v9897_v33 = vpop.eup %7113  ;;  %v2556_v18 = vsel %vm9954_vm14, %v9883_v48, %v2552_v63  ;;  %7119 = vpow2.f32 %v5521_v4  ;;  %v2560_v11 = vor.u32 1.1754944e-38, %v2559_v5  ;;  %v2542_v32 = vsel %vm2541_vm1, %v9881_v26, %v2538_v27  ;;  %6258 = vmatpush.bf16.msra.mxu2 %v6790_v34  ;;  %v6789_v5 = vld [vmem:[#allocation10 + $0x30] sm:$0xff]  ;;  %v9976_v27 = vpop.f32.mrf.mxu3 }
 0x652   : > { %v9903_v37 = vpop.eup %7115  ;;  %v3125_v12 = vsel %vm3122_vm15, %v3124_v46, %v3120_v58  ;;  %vm2558_vm2 = vcmp.eq.f32.partialorder %v2557_v8, 8.507059e+37  ;;  %7121 = vrcp.f32 %v9056_v47  ;;  %vm1989_vm9 = vweird.f32 %v9252_v19 }
 0x653   : > { %v5581_v35 = vpack.c.bf16 %v9897_v33, %v9903_v37  ;;  %v9958_v3 = vpop.f32.mrf.mxu1  ;;  %v2561_v52 = vsel %vm2558_vm2, %v2560_v11, %v2556_v18  ;;  %7123 = vrcp.f32 %v9252_v19 }
 0x654   : > { %v2733_v48 = vmul.f32 %v2561_v52, %v9655_v9  ;;  %7125 = vrcp.f32 %v9058_v25 }
 0x655   : > { %6259 = vmatpush.bf16.msra.mxu2 %v6789_v5  ;;  %7127 = vrcp.f32 %v9250_v22 }
 0x656   : > { %v2749_v9 = vpack.c.bf16 %v2733_v48, %v2733_v48 }
 0x657   : > { %4911 = vmax.xlane.f32.xlu0 %v9845_v61 }
 0x658   : > { %v5480_v20 = vpop.xlane.xlu1 %5479 }
 0x659   : > { %3422 = vrot.lane.b32.xlu1 %v3413_v23, %s7646_s17  ;;  %v5590_v24 = vpop.permute.xlu0 %5589  ;;  %v2543_v23 = vand.u32 2147483647, %v9227_v44  ;;  %v3310_v44 = vmul.f32 %v3125_v12, %v9614_v43  ;;  %v5506_v26 = vsub.f32 %v9703_v30, %v5480_v20  ;;  %v4925_v43 = vsub.f32 %v9635_v10, %v9842_v28  ;;  %v9998_v48 = vpop.f32.mrf.mxu3 }
 0x65a   : > { %5620 = vmatpush.bf16.msra.mxu1 %v5590_v24  ;;  %v3138_v24 = vor.u32 1.1754944e-38, %v3137_v45  ;;  %v6788_v45 = vld [vmem:[#allocation10 + $0x28] sm:$0xff]  ;;  %v3455_v12 = vunpack.c.l.b16 %v2749_v9 }
 0x65b   : > { %vm2544_vm3 = vcmp.eq.f32.partialorder %v2543_v23, 8.507059e+37  ;;  %v3326_v8 = vpack.c.bf16 %v3310_v44, %v3310_v44  ;;  %v5527_v23 = vmul.f32 1.442695, %v5506_v26  ;;  %v4943_v28 = vmul.f32 1.442695, %v4925_v43  ;;  %6260 = vmatpush.bf16.msra.mxu2 %v6788_v45  ;;  %v10011_v43 = vpop.f32.mrf.mxu2 }
 0x65d   : > { %5621 = vmatmul.bf16.vlgmr.msra.gmra.mxu1 %v5581_v35  ;;  %v3139_v35 = vsel %vm3136_vm12, %v3138_v24, %v3134_v13  ;;  %v2546_v13 = vor.u32 1.1754944e-38, %v2545_v54  ;;  %v9969_v24 = vpop.eup %7117  ;;  %v9984_v54 = vpop.f32.mrf.mxu1  ;;  %v3510_v10 = vunpack.c.l.b16 %v3326_v8  ;;  %7129 = vpow2.f32 %v5527_v23 }
 0x65e   : > { %5489 = vmax.xlane.f32.xlu2 %v9893_v55  ;;  %v3311_v40 = vmul.f32 %v3139_v35, %v9624_v50  ;;  %v9972_v58 = vpop.eup %7119  ;;  %v5505_v35 = vsub.f32 %v9696_v21, %v9912_v56  ;;  %7131 = vpow2.f32 %v4943_v28 }
 0x65f   : > { %5491 = vmax.xlane.f32.xlu0 %v9928_v51  ;;  %v2547_v63 = vsel %vm2544_vm3, %v2546_v13, %v2542_v32  ;;  %v5582_v46 = vpack.c.bf16 %v9969_v24, %v9972_v58  ;;  %v9994_v13 = vpop.eup %7121 }
 0x660   : > { %v3327_v4 = vpack.c.bf16 %v3311_v40, %v3311_v40  ;;  %v2732_v50 = vmul.f32 %v2547_v63, %v9638_v39  ;;  %v9988_v18 = vpop.xlane.xlu1 %4905  ;;  %v5525_v21 = vmul.f32 1.442695, %v5505_v35  ;;  %v6787_v40 = vld [vmem:[#allocation10 + $0x20] sm:$0xff]  ;;  %v9996_v44 = vpop.eup %7123  ;;  %v6786_v63 = vld [vmem:[#allocation10 + $0x18] sm:$0xff]  ;;  %v1327_v35 = vmul.f32 %v9994_v13, %v9056_v47 }
 0x661   : > { %6261 = vmatpush.bf16.msra.mxu2 %v6787_v40  ;;  %v1985_v8 = vmul.f32 %v9996_v44, %v9252_v19  ;;  %vm1332_vm6 = vweird.f32 %v9994_v13  ;;  %vm1990_vm8 = vweird.f32 %v9996_v44 }
 0x662   : > { %v3511_v39 = vunpack.c.l.b16 %v3327_v4  ;;  %v2748_v30 = vpack.c.bf16 %v2732_v50, %v2732_v50  ;;  %7133 = vpow2.f32 %v5525_v21  ;;  %v6785_v50 = vld [vmem:[#allocation10 + $0x10] sm:$0xff]  ;;  %vm10066_vm11 = vmor %vm1989_vm9, %vm1990_vm8 }
 0x663   : > { %v1986_v21 = vsub.f32 1.0, %v1985_v8  ;;  %vm10075_vm12 = vmor %vm1331_vm4, %vm1332_vm6  ;;  %vm2567_vm6 = vweird.f32 %v9248_v6 }
 0x664   : > { %v3525_v20 = vpack.c.b16 %v3511_v39, %v3510_v10  ;;  %v3454_v34 = vunpack.c.l.b16 %v2748_v30 }
 0x665   : > { %v10005_v5 = vpop.f32.mrf.mxu1  ;;  %6262 = vmatpush.bf16.msra.mxu2 %v6786_v63  ;;  %v1987_v63 = vmul.f32 %v9996_v44, %v1986_v21 }
 0x666   : > { %v3469_v52 = vpack.c.b16 %v3455_v12, %v3454_v34  ;;  %v6784_v12 = vld [vmem:[#allocation10 + $0x8] sm:$0xff] }
 0x668   : > { %v5484_v39 = vpop.xlane.xlu1 %5483 }
 0x669   : > { %6263 = vmatpush.bf16.msra.mxu2 %v6785_v50  ;;  %v4928_v50 = vsub.f32 %v9683_v7, %v9887_v31  ;;  %v10047_v7 = vpop.f32.mrf.mxu2 }
 0x66d   : > { %5626 = vmatmul.bf16.gmra.mxu1 %v5582_v46  ;;  %6264 = vmatpush.bf16.msra.mxu2 %v6784_v12  ;;  %v10045_v12 = vpop.f32.mrf.mxu1 }
 0x66e   : > { %13116 = vst [vmem:[#allocation137_spill] sm:$0xff] %v10045_v12 }
 0x670   : > { %v4898_v56 = vpop.xlane.xlu2 %4897 }
 0x671   : > { %v4926_v11 = vsub.f32 %v9653_v14, %v4898_v56  ;;  %v10000_v14 = vpop.eup %7125  ;;  %v5508_v56 = vsub.f32 %v9726_v17, %v5484_v39 }
 0x672   : > { %v10003_v4 = vpop.eup %7127  ;;  %v1341_v10 = vmul.f32 %v10000_v14, %v9058_v25  ;;  %vm1346_vm7 = vweird.f32 %v10000_v14 }
 0x673   : > { %v4945_v32 = vmul.f32 1.442695, %v4926_v11  ;;  %3534 = vrot.lane.b32.xlu0 %v3525_v20, %s7645_s14  ;;  %v10007_v26 = vpop.eup %7129  ;;  %v1999_v30 = vmul.f32 %v10003_v4, %v9250_v22  ;;  %v1328_v20 = vsub.f32 1.0, %v1327_v35  ;;  %v5531_v8 = vmul.f32 1.442695, %v5508_v56  ;;  %vm10104_vm15 = vmor %vm1345_vm5, %vm1346_vm7 }
 0x674   : > { %13115 = vst [vmem:[#allocation136_spill] sm:$0xff] %v10007_v26  ;;  %v10015_v9 = vpop.eup %7131  ;;  %v1342_v34 = vsub.f32 1.0, %v1341_v10  ;;  %v1337_v35 = vand.u32 2147483648, %v9056_v47  ;;  %v1351_v10 = vand.u32 2147483648, %v9058_v25  ;;  %vm2004_vm10 = vweird.f32 %v10003_v4 }
 0x675   : > { %7135 = vpow2.f32 %v4945_v32  ;;  %v10019_v45 = vpop.eup %7133  ;;  %v2000_v40 = vsub.f32 1.0, %v1999_v30  ;;  %v10032_v32 = vpop.f32.mrf.mxu3  ;;  %v1329_v17 = vmul.f32 %v9994_v13, %v1328_v20  ;;  %v1335_v30 = vand.u32 2147483647, %v9056_v47  ;;  %vm10089_vm14 = vmor %vm2003_vm13, %vm2004_vm10 }
 0x676   : > { %3478 = vrot.lane.b32.xlu2 %v3469_v52, %s7647_s18  ;;  %v5583_v28 = vpack.c.bf16 %v10007_v26, %v10019_v45  ;;  %v6783_v52 = vld [vmem:[#allocation10] sm:$0xff]  ;;  %v1343_v31 = vmul.f32 %v10000_v14, %v1342_v34  ;;  %7137 = vpow2.f32 %v5531_v8  ;;  %v1995_v20 = vand.u32 2147483648, %v9252_v19 }
 0x677   : > { %6265 = vmatpush.bf16.msra.mxu2 %v6783_v52  ;;  %v1993_v34 = vand.u32 2147483647, %v9252_v19  ;;  %vm1336_vm2 = vcmp.eq.f32.partialorder %v1335_v30, 8.507059e+37  ;;  %vm3572_vm5 = vcmask 523264   ;;  %vm3589_vm7 = vcmask 785408  }
 0x678   : > { %v10013_v46 = vpop.xlane.xlu2 %4903 }
 0x679   : > { %vm1994_vm1 = vcmp.eq.f32.partialorder %v1993_v34, 8.507059e+37 }
 0x67b   : > { %v10023_v23 = vpop.eup %7135 }
 0x67c   : > { %v5004_v11 = vpack.c.bf16 %v10023_v23, %v10015_v9 }
 0x67d   : > { %5631 = vmatmul.bf16.gmra.mxu1 %v5583_v28  ;;  %v2001_v28 = vmul.f32 %v10003_v4, %v2000_v40 }
 0x67e   : > { %5048 = vmatmul.bf16.gmra.mxu3 %v5004_v11  ;;  %v1330_v11 = vadd.f32 %v9994_v13, %v1329_v17 }
 0x67f   : > { %v2002_v52 = vadd.f32 %v10003_v4, %v2001_v28 }
 0x680   : > { %v5482_v26 = vpop.xlane.xlu2 %5481 }
 0x681   : > { %v5507_v39 = vsub.f32 %v9719_v2, %v5482_v26  ;;  %v1988_v2 = vadd.f32 %v9996_v44, %v1987_v63  ;;  %v4949_v26 = vmul.f32 1.442695, %v4928_v50  ;;  %v1344_v63 = vadd.f32 %v10000_v14, %v1343_v31  ;;  %v13127_v50 = vld [vmem:[#allocation82_spill] sm:$0xff] }
 0x682   : > { %v1338_v31 = vor.u32 1.1754944e-38, %v1337_v35 }
 0x683   : > { %v5529_v21 = vmul.f32 1.442695, %v5507_v39  ;;  %4917 = vmax.xlane.f32.xlu1 %v10047_v7  ;;  %v1992_v17 = vsel %vm10066_vm11, %v9996_v44, %v1988_v2  ;;  %v2007_v39 = vand.u32 2147483647, %v9250_v22  ;;  %v10095_v44 = vpop.eup %7137  ;;  %v2006_v2 = vsel %vm10089_vm14, %v10003_v4, %v2002_v52 }
 0x684   : > { %v4900_v56 = vpop.xlane.xlu0 %4899  ;;  %13123 = vst [vmem:[#allocation138_spill] sm:$0xff] %v10095_v44  ;;  %vm3145_vm14 = vweird.f32 %v13127_v50 }
 0x685   : > { %7139 = vpow2.f32 %v5529_v21  ;;  %v4927_v40 = vsub.f32 %v9671_v53, %v4900_v56  ;;  %v2009_v53 = vand.u32 2147483648, %v9250_v22  ;;  %v1349_v21 = vand.u32 2147483647, %v9058_v25 }
 0x686   : > { %7141 = vrcp.f32 %v9248_v6  ;;  %v1996_v56 = vor.u32 1.1754944e-38, %v1995_v20  ;;  %v1334_v22 = vsel %vm10075_vm12, %v9994_v13, %v1330_v11  ;;  %v1348_v13 = vsel %vm10104_vm15, %v10000_v14, %v1344_v63 }
 0x687   : > { %v4947_v8 = vmul.f32 1.442695, %v4927_v40  ;;  %7143 = vpow2.f32 %v4949_v26  ;;  %v10093_v40 = vpop.f32.mrf.mxu3  ;;  %v2010_v25 = vor.u32 1.1754944e-38, %v2009_v53  ;;  %v1352_v20 = vor.u32 1.1754944e-38, %v1351_v10  ;;  %v13129_v10 = vld [vmem:[#allocation75_spill] sm:$0xff] }
 0x688   : > { %v10084_v28 = vpop.xlane.xlu2 %4907  ;;  %v1997_v11 = vsel %vm1994_vm1, %v1996_v56, %v1992_v17  ;;  %vm2008_vm3 = vcmp.eq.f32.partialorder %v2007_v39, 8.507059e+37  ;;  %v1339_v52 = vsel %vm1336_vm2, %v1338_v31, %v1334_v22  ;;  %vm1350_vm4 = vcmp.eq.f32.partialorder %v1349_v21, 8.507059e+37  ;;  %v13130_v39 = vld [vmem:[#allocation59_spill] sm:$0xff]  ;;  %v13132_v22 = vld [vmem:[#allocation38_spill] sm:$0xff] }
 0x689   : > { %7145 = vpow2.f32 %v4947_v8  ;;  %v10118_v8 = vpop.f32.mrf.mxu1  ;;  %v2011_v30 = vsel %vm2008_vm3, %v2010_v25, %v2006_v2  ;;  %v1353_v63 = vsel %vm1350_vm4, %v1352_v20, %v1348_v13  ;;  %v2156_v53 = vmul.f32 %v1997_v11, %v13129_v10  ;;  %v13131_v31 = vld [vmem:[#allocation47_spill] sm:$0xff]  ;;  %v13133_v11 = vld [vmem:[#allocation54_spill] sm:$0xff] }
 0x68a   : > { %7147 = vrcp.f32 %v9256_v62  ;;  %13128 = vst [vmem:[#allocation82_spill] sm:$0xff] %v10118_v8  ;;  %v4929_v56 = vsub.f32 %v9701_v59, %v10013_v46  ;;  %v1550_v21 = vmul.f32 %v1339_v52, %v13131_v31  ;;  %v2157_v2 = vmul.f32 %v2011_v30, %v13132_v22 }
 0x68b   : > { %v10112_v26 = vpop.eup %7139  ;;  %7149 = vrcp.f32 %v13127_v50  ;;  %v1551_v20 = vmul.f32 %v1353_v63, %v13133_v11  ;;  %v2172_v46 = vpack.c.bf16 %v2156_v53, %v2156_v53  ;;  %vm2581_vm12 = vweird.f32 %v9256_v62 }
 0x68c   : > { %13126 = vst [vmem:[#allocation139_spill] sm:$0xff] %v10112_v26  ;;  %v5486_v34 = vpop.xlane.xlu0 %5485  ;;  %v5584_v19 = vpack.c.bf16 %v10095_v44, %v10112_v26  ;;  %v10122_v4 = vpop.eup %7141  ;;  %7151 = vrcp.f32 %v13130_v39  ;;  %v1566_v63 = vpack.c.bf16 %v1550_v21, %v1550_v21  ;;  %v2173_v22 = vpack.c.bf16 %v2157_v2, %v2157_v2 }
 0x68d   : > { %v5509_v47 = vsub.f32 %v9774_v42, %v5486_v34  ;;  %v10125_v14 = vpop.eup %7143  ;;  %v13134_v34 = vld [vmem:[#allocation131_spill] sm:$0xff]  ;;  %v2563_v59 = vmul.f32 %v10122_v4, %v9248_v6  ;;  %v10164_v26 = vpop.f32.mrf.mxu0  ;;  %vm2568_vm8 = vweird.f32 %v10122_v4  ;;  %vm3159_vm3 = vweird.f32 %v13130_v39 }
 0x68e   : > { %5636 = vmatmul.bf16.gmra.mxu1 %v5584_v19  ;;  %v4930_v19 = vsub.f32 %v13134_v34, %v9988_v18  ;;  %v10153_v18 = vpop.xlane.xlu1 %4909  ;;  %v3400_v34 = vunpack.c.l.b16 %v2172_v46  ;;  %v3356_v2 = vunpack.c.l.b16 %v1566_v63  ;;  %vm10206_vm11 = vmor %vm2567_vm6, %vm2568_vm8 }
 0x68f   : > { %v10128_v17 = vpop.eup %7145  ;;  %v5533_v42 = vmul.f32 1.442695, %v5509_v47  ;;  %v10149_v30 = vpop.f32.mrf.mxu3  ;;  %v4951_v47 = vmul.f32 1.442695, %v4929_v56  ;;  %v2564_v8 = vsub.f32 1.0, %v2563_v59  ;;  %v3401_v56 = vunpack.c.l.b16 %v2173_v22 }
 0x690   : > { %v10133_v35 = vpop.eup %7147  ;;  %v5488_v25 = vpop.xlane.xlu2 %5487  ;;  %v5005_v13 = vpack.c.bf16 %v10125_v14, %v10128_v17  ;;  %13135 = vst [vmem:[#allocation75_spill] sm:$0xff] %v10149_v30 }
 0x691   : > { %v5510_v10 = vsub.f32 %v9802_v0, %v5488_v25  ;;  %v10143_v44 = vpop.eup %7149  ;;  %v2577_v52 = vmul.f32 %v10133_v35, %v9256_v62  ;;  %v10151_v11 = vpop.f32.mrf.mxu1  ;;  %7153 = vpow2.f32 %v5533_v42  ;;  %v1567_v25 = vpack.c.bf16 %v1551_v20, %v1551_v20 }
 0x692   : > { %5053 = vmatmul.bf16.gmra.mxu3 %v5005_v13  ;;  %13136 = vst [vmem:[#allocation59_spill] sm:$0xff] %v10151_v11  ;;  %v10155_v0 = vpop.eup %7151  ;;  %v3141_v53 = vmul.f32 %v10143_v44, %v13127_v50  ;;  %v4953_v13 = vmul.f32 1.442695, %v4930_v19  ;;  %v3414_v20 = vpack.c.b16 %v3401_v56, %v3400_v34  ;;  %v2565_v12 = vmul.f32 %v10122_v4, %v2564_v8 }
 0x693   : > { %v5535_v31 = vmul.f32 1.442695, %v5510_v10  ;;  %v2578_v30 = vsub.f32 1.0, %v2577_v52  ;;  %v3155_v21 = vmul.f32 %v10155_v0, %v13130_v39  ;;  %v3357_v10 = vunpack.c.l.b16 %v1567_v25 }
 0x694   : > { %v3142_v11 = vsub.f32 1.0, %v3141_v53  ;;  %v10177_v8 = vadd.f32 %v10122_v4, %v2565_v12  ;;  %vm2582_vm9 = vweird.f32 %v10133_v35  ;;  %vm3146_vm10 = vweird.f32 %v10143_v44 }
 0x695   : > { %7155 = vpow2.f32 %v5535_v31  ;;  %v2579_v59 = vmul.f32 %v10133_v35, %v2578_v30  ;;  %v3156_v46 = vsub.f32 1.0, %v3155_v21  ;;  %v3372_v63 = vpack.c.b16 %v3357_v10, %v3356_v2  ;;  %vm10216_vm13 = vmor %vm2581_vm12, %vm2582_vm9 }
 0x696   : > { %7157 = vpow2.f32 %v4951_v47  ;;  %v3421_v52 = vpop.permute.xlu1 %3420  ;;  %v3143_v22 = vmul.f32 %v10143_v44, %v3142_v11  ;;  %vm10233_vm15 = vmor %vm3145_vm14, %vm3146_vm10  ;;  %vm3160_vm1 = vweird.f32 %v10155_v0 }
 0x697   : > { %7159 = vpow2.f32 %v4953_v13  ;;  %v10161_v42 = vpop.eup %7153  ;;  %v10180_v30 = vpop.f32.mrf.mxu3  ;;  %v2580_v11 = vadd.f32 %v10133_v35, %v2579_v59  ;;  %v4931_v13 = vsub.f32 %v9724_v1, %v10084_v28  ;;  %v3550_v12 = vsel %vm1059_vm0, %v3372_v63, %v3421_v52  ;;  %vm3161_vm6 = vmor %vm3159_vm3, %vm3160_vm1 }
 0x698   : > { %13137 = vst [vmem:[#allocation47_spill] sm:$0xff] %v10161_v42  ;;  %v3157_v56 = vmul.f32 %v10155_v0, %v3156_v46  ;;  %v3533_v21 = vpop.permute.xlu2 %3532  ;;  %v4932_v1 = vsub.f32 %v9734_v36, %v10153_v18  ;;  %v2585_v46 = vand.u32 2147483647, %v9256_v62  ;;  %v2587_v52 = vand.u32 2147483648, %v9256_v62  ;;  %v13151_v36 = vld [vmem:[#allocation117_spill] sm:$0xff] }
 0x699   : > { %13139 = vst [vmem:[#allocation54_spill] sm:$0xff] %v10180_v30  ;;  %v10182_v25 = vpop.f32.mrf.mxu1  ;;  %v3149_v18 = vand.u32 2147483647, %v13127_v50  ;;  %v4955_v63 = vmul.f32 1.442695, %v4931_v13  ;;  %v2570_v62 = vsel %vm10206_vm11, %v10122_v4, %v10177_v8  ;;  %v3165_v8 = vand.u32 2147483648, %v13130_v39 }
 0x69a   : > { %13140 = vst [vmem:[#allocation131_spill] sm:$0xff] %v10182_v25  ;;  %v3158_v13 = vadd.f32 %v10155_v0, %v3157_v56  ;;  %v4957_v4 = vmul.f32 1.442695, %v4932_v1  ;;  %vm2586_vm2 = vcmp.eq.f32.partialorder %v2585_v46, 8.507059e+37 }
 0x69b   : > { %v10166_v19 = vpop.eup %7155  ;;  %vm3150_vm4 = vcmp.eq.f32.partialorder %v3149_v18, 8.507059e+37  ;;  %7161 = vpow2.f32 %v4955_v63 }
 0x69c   : > { %13138 = vst [vmem:[#allocation38_spill] sm:$0xff] %v10166_v19  ;;  %3424 = vrot.lane.b32.xlu1 %v3414_v20, %s7646_s17  ;;  %v5585_v47 = vpack.c.bf16 %v10166_v19, %v10161_v42  ;;  %v10172_v31 = vpop.eup %7157  ;;  %v3144_v20 = vadd.f32 %v10143_v44, %v3143_v22  ;;  %v2571_v22 = vand.u32 2147483647, %v9248_v6  ;;  %v3162_v59 = vsel %vm3161_vm6, %v10155_v0, %v3158_v13 }
 0x69d   : > { %4915 = vmax.xlane.f32.xlu0 %v10011_v43  ;;  %v10184_v53 = vpop.eup %7159  ;;  %7163 = vpow2.f32 %v4957_v4  ;;  %v13155_v4 = vld [vmem:[#allocation55_spill] sm:$0xff] }
 0x69e   : > { %5641 = vmatmul.bf16.gmra.mxu1 %v5585_v47  ;;  %13141 = vst [vmem:[#allocation140_spill] sm:$0xff] %v10184_v53  ;;  %v5006_v10 = vpack.c.bf16 %v10184_v53, %v10172_v31  ;;  %v3151_v47 = vand.u32 2147483648, %v13127_v50  ;;  %v10237_v50 = vpop.f32.mrf.mxu0  ;;  %vm2572_vm8 = vcmp.eq.f32.partialorder %v2571_v22, 8.507059e+37  ;;  %7165 = vrcp.f32 %v13155_v4  ;;  %v13188_v53 = vld [vmem:[#allocation130_spill] sm:$0xff] }
 0x69f   : > { %v3477_v34 = vpop.permute.xlu0 %3476  ;;  %5493 = vmax.xlane.f32.xlu2 %v10164_v26  ;;  %v10248_v1 = vpop.f32.mrf.mxu3 }
 0x6a0   : > { %v3574_v2 = vsel %vm3572_vm5, %v3550_v12, %v3477_v34  ;;  %v2573_v12 = vand.u32 2147483648, %v9248_v6  ;;  %v2584_v34 = vsel %vm10216_vm13, %v10133_v35, %v2580_v11  ;;  %v3148_v6 = vsel %vm10233_vm15, %v10143_v44, %v3144_v20  ;;  %13148 = vst [vmem:[#allocation141_spill] sm:$0xff] %v10248_v1  ;;  %v13149_v44 = vld [vmem:[#allocation125_spill] sm:$0xff] }
 0x6a1   : > { %v3591_v28 = vsel %vm3589_vm7, %v3574_v2, %v3533_v21  ;;  %v2588_v35 = vor.u32 1.1754944e-38, %v2587_v52  ;;  %v3152_v11 = vor.u32 1.1754944e-38, %v3151_v47  ;;  %v3163_v2 = vand.u32 2147483647, %v13130_v39  ;;  %v13150_v47 = vld [vmem:[#allocation123_spill] sm:$0xff]  ;;  %v13153_v21 = vld [vmem:[#allocation120_spill] sm:$0xff] }
 0x6a2   : > { %5058 = vmatmul.bf16.gmra.mxu3 %v5006_v10  ;;  %6266 = vmatmul.bf16.vlgmr.msra.gmra.mxu2 %v3591_v28  ;;  %v2574_v56 = vor.u32 1.1754944e-38, %v2573_v12  ;;  %v3166_v52 = vor.u32 1.1754944e-38, %v3165_v8  ;;  %v10256_v12 = vpop.eup %7161  ;;  %vm2031_vm13 = vweird.f32 %v13155_v4 }
 0x6a3   : > { %v2589_v10 = vsel %vm2586_vm2, %v2588_v35, %v2584_v34  ;;  %v3153_v28 = vsel %vm3150_vm4, %v3152_v11, %v3148_v6  ;;  %vm3164_vm9 = vcmp.eq.f32.partialorder %v3163_v2, 8.507059e+37  ;;  %13152 = vst [vmem:[#allocation125_spill] sm:$0xff] %v10256_v12  ;;  %v10259_v6 = vpop.eup %7163 }
 0x6a4   : > { %v2735_v20 = vmul.f32 %v2589_v10, %v13149_v44  ;;  %v2575_v46 = vsel %vm2572_vm8, %v2574_v56, %v2570_v62  ;;  %v3312_v18 = vmul.f32 %v3153_v28, %v13151_v36  ;;  %v3167_v63 = vsel %vm3164_vm9, %v3166_v52, %v3162_v59  ;;  %13154 = vst [vmem:[#allocation123_spill] sm:$0xff] %v10259_v6  ;;  %v13157_v10 = vld [vmem:[#allocation58_spill] sm:$0xff]  ;;  %v13159_v52 = vld [vmem:[#allocation41_spill] sm:$0xff]  ;;  %v10272_v36 = vpop.f32.mrf.mxu2 }
 0x6a5   : > { %5495 = vmax.xlane.f32.xlu0 %v10237_v50  ;;  %v2734_v39 = vmul.f32 %v2575_v46, %v13150_v47  ;;  %v3313_v35 = vmul.f32 %v3167_v63, %v13153_v21  ;;  %v5007_v0 = vpack.c.bf16 %v10259_v6, %v10256_v12  ;;  %7167 = vrcp.f32 %v13157_v10  ;;  %v7166_v46 = vpop.eup %7165 }
 0x6a6   : > { %v2751_v34 = vpack.c.bf16 %v2735_v20, %v2735_v20  ;;  %v3328_v11 = vpack.c.bf16 %v3312_v18, %v3312_v18  ;;  %v13158_v20 = vld [vmem:[#allocation31_spill] sm:$0xff]  ;;  %vm2032_vm10 = vweird.f32 %v7166_v46  ;;  %vm2017_vm1 = vweird.f32 %v13157_v10 }
 0x6a7   : > { %v2750_v22 = vpack.c.bf16 %v2734_v39, %v2734_v39  ;;  %v3329_v13 = vpack.c.bf16 %v3313_v35, %v3313_v35  ;;  %v10264_v8 = vpop.f32.mrf.mxu3  ;;  %7169 = vrcp.f32 %v13158_v20  ;;  %v2027_v39 = vmul.f32 %v7166_v46, %v13155_v4  ;;  %vm10295_vm15 = vmor %vm2031_vm13, %vm2032_vm10 }
 0x6a8   : > { %v3457_v62 = vunpack.c.l.b16 %v2751_v34  ;;  %13156 = vst [vmem:[#allocation117_spill] sm:$0xff] %v10264_v8  ;;  %v3512_v56 = vunpack.c.l.b16 %v3328_v11  ;;  %7171 = vrcp.f32 %v13159_v52  ;;  %vm1373_vm14 = vweird.f32 %v13158_v20 }
 0x6a9   : > { %v3456_v2 = vunpack.c.l.b16 %v2750_v22  ;;  %v3513_v44 = vunpack.c.l.b16 %v3329_v13  ;;  %v2028_v21 = vsub.f32 1.0, %v2027_v39  ;;  %v1379_v25 = vand.u32 2147483648, %v13158_v20 }
 0x6aa   : > { %vm1359_vm9 = vweird.f32 %v13159_v52 }
 0x6ab   : > { %v3470_v28 = vpack.c.b16 %v3457_v62, %v3456_v2  ;;  %v3526_v59 = vpack.c.b16 %v3513_v44, %v3512_v56  ;;  %v7168_v47 = vpop.eup %7167 }
 0x6ac   : > { %v2013_v63 = vmul.f32 %v7168_v47, %v13157_v10  ;;  %v10283_v56 = vpop.f32.mrf.mxu2  ;;  %vm2018_vm12 = vweird.f32 %v7168_v47 }
 0x6ad   : > { %v10274_v18 = vpop.eup %7169  ;;  %vm10308_vm3 = vmor %vm2017_vm1, %vm2018_vm12 }
 0x6ae   : > { %v10277_v34 = vpop.eup %7171  ;;  %v1369_v35 = vmul.f32 %v10274_v18, %v13158_v20  ;;  %v2014_v22 = vsub.f32 1.0, %v2013_v63  ;;  %v2037_v63 = vand.u32 2147483648, %v13155_v4  ;;  %vm1374_vm2 = vweird.f32 %v10274_v18 }
 0x6af   : > { %v1355_v11 = vmul.f32 %v10277_v34, %v13159_v52  ;;  %vm1360_vm11 = vweird.f32 %v10277_v34  ;;  %vm10321_vm6 = vmor %vm1373_vm14, %vm1374_vm2 }
 0x6b0   : > { %v1370_v13 = vsub.f32 1.0, %v1369_v35  ;;  %v2015_v2 = vmul.f32 %v7168_v47, %v2014_v22  ;;  %vm10332_vm10 = vmor %vm1359_vm9, %vm1360_vm11 }
 0x6b2   : > { %5063 = vmatmul.bf16.gmra.mxu3 %v5007_v0  ;;  %v2029_v0 = vmul.f32 %v7166_v46, %v2028_v21  ;;  %v1371_v39 = vmul.f32 %v10274_v18, %v1370_v13  ;;  %v2016_v1 = vadd.f32 %v7168_v47, %v2015_v2  ;;  %v2035_v21 = vand.u32 2147483647, %v13155_v4 }
 0x6b3   : > { %v4914_v62 = vpop.xlane.xlu1 %4913 }
 0x6b4   : > { %v4934_v44 = vsub.f32 %v9851_v49, %v4914_v62  ;;  %v2023_v49 = vand.u32 2147483648, %v13157_v10  ;;  %v2021_v62 = vand.u32 2147483647, %v13157_v10  ;;  %v1372_v2 = vadd.f32 %v10274_v18, %v1371_v39  ;;  %v10316_v39 = vpop.f32.mrf.mxu3 }
 0x6b5   : > { %vm2036_vm4 = vcmp.eq.f32.partialorder %v2035_v21, 8.507059e+37  ;;  %13164 = vst [vmem:[#allocation120_spill] sm:$0xff] %v10316_v39  ;;  %v13178_v21 = vld [vmem:[#allocation29_spill] sm:$0xff] }
 0x6b6   : > { %vm2022_vm8 = vcmp.eq.f32.partialorder %v2021_v62, 8.507059e+37 }
 0x6b7   : > { %3480 = vrot.lane.b32.xlu2 %v3470_v28, %s7647_s18  ;;  %v1356_v28 = vsub.f32 1.0, %v1355_v11  ;;  %v4961_v11 = vmul.f32 1.442695, %v4934_v44  ;;  %v2038_v44 = vor.u32 1.1754944e-38, %v2037_v63  ;;  %v10349_v63 = vpop.f32.mrf.mxu1 }
 0x6b8   : > { %13175 = vst [vmem:[#allocation31_spill] sm:$0xff] %v10349_v63 }
 0x6b9   : > { %3536 = vrot.lane.b32.xlu0 %v3526_v59, %s7645_s14  ;;  %v2030_v59 = vadd.f32 %v7166_v46, %v2029_v0  ;;  %v1357_v35 = vmul.f32 %v10277_v34, %v1356_v28  ;;  %v1377_v28 = vand.u32 2147483647, %v13158_v20  ;;  %7173 = vpow2.f32 %v4961_v11 }
 0x6ba   : > { %v1380_v20 = vor.u32 1.1754944e-38, %v1379_v25  ;;  %v13172_v25 = vld [vmem:[#allocation53_spill] sm:$0xff] }
 0x6bb   : > { %v2034_v4 = vsel %vm10295_vm15, %v7166_v46, %v2030_v59  ;;  %v1358_v46 = vadd.f32 %v10277_v34, %v1357_v35  ;;  %v2024_v59 = vor.u32 1.1754944e-38, %v2023_v49  ;;  %v13169_v49 = vld [vmem:[#allocation80_spill] sm:$0xff]  ;;  %vm1378_vm12 = vcmp.eq.f32.partialorder %v1377_v28, 8.507059e+37 }
 0x6bc   : > { %v2039_v22 = vsel %vm2036_vm4, %v2038_v44, %v2034_v4  ;;  %vm2609_vm15 = vweird.f32 %v13172_v25 }
 0x6bd   : > { %v2159_v11 = vmul.f32 %v2039_v22, %v13169_v49  ;;  %v13174_v22 = vld [vmem:[#allocation52_spill] sm:$0xff] }
 0x6be   : > { %vm2595_vm1 = vweird.f32 %v13174_v22 }
 0x6c6   : > { %4921 = vmax.xlane.f32.xlu1 %v10283_v56 }
 0x6ca   : > { %v4912_v0 = vpop.xlane.xlu0 %4911 }
 0x6cb   : > { %v4933_v13 = vsub.f32 %v9845_v61, %v4912_v0  ;;  %v2020_v61 = vsel %vm10308_vm3, %v7168_v47, %v2016_v1  ;;  %v1365_v0 = vand.u32 2147483648, %v13159_v52  ;;  %v1363_v1 = vand.u32 2147483647, %v13159_v52 }
 0x6cc   : > { %v2025_v8 = vsel %vm2022_vm8, %v2024_v59, %v2020_v61  ;;  %v1376_v47 = vsel %vm10321_vm6, %v10274_v18, %v1372_v2  ;;  %v1362_v52 = vsel %vm10332_vm10, %v10277_v34, %v1358_v46  ;;  %v13170_v18 = vld [vmem:[#allocation76_spill] sm:$0xff] }
 0x6cd   : > { %v4959_v10 = vmul.f32 1.442695, %v4933_v13  ;;  %v1366_v4 = vor.u32 1.1754944e-38, %v1365_v0  ;;  %v2158_v2 = vmul.f32 %v2025_v8, %v13170_v18  ;;  %v1381_v44 = vsel %vm1378_vm12, %v1380_v20, %v1376_v47  ;;  %v13176_v0 = vld [vmem:[#allocation26_spill] sm:$0xff] }
 0x6ce   : > { %vm1364_vm11 = vcmp.eq.f32.partialorder %v1363_v1, 8.507059e+37  ;;  %v1553_v8 = vmul.f32 %v1381_v44, %v13176_v0  ;;  %v10354_v1 = vpop.f32.mrf.mxu3 }
 0x6cf   : > { %7175 = vpow2.f32 %v4959_v10  ;;  %v10343_v10 = vpop.eup %7173  ;;  %v1367_v34 = vsel %vm1364_vm11, %v1366_v4, %v1362_v52  ;;  %v2174_v47 = vpack.c.bf16 %v2158_v2, %v2158_v2  ;;  %13177 = vst [vmem:[#allocation41_spill] sm:$0xff] %v10354_v1 }
 0x6d0   : > { %13171 = vst [vmem:[#allocation55_spill] sm:$0xff] %v10343_v10  ;;  %7177 = vrcp.f32 %v13172_v25  ;;  %v1552_v20 = vmul.f32 %v1367_v34, %v13178_v21  ;;  %v1569_v52 = vpack.c.bf16 %v1553_v8, %v1553_v8  ;;  %v10376_v8 = vpop.f32.mrf.mxu1 }
 0x6d1   : > { %v5490_v35 = vpop.xlane.xlu2 %5489  ;;  %7179 = vrcp.f32 %v13174_v22  ;;  %13183 = vst [vmem:[#allocation53_spill] sm:$0xff] %v10376_v8 }
 0x6d2   : > { %v5511_v62 = vsub.f32 %v9893_v55, %v5490_v35  ;;  %v5492_v13 = vpop.xlane.xlu0 %5491  ;;  %v2175_v55 = vpack.c.bf16 %v2159_v11, %v2159_v11  ;;  %v1568_v18 = vpack.c.bf16 %v1552_v20, %v1552_v20  ;;  %v3423_v20 = vpop.permute.xlu1 %3422 }
 0x6d3   : > { %v5512_v61 = vsub.f32 %v9928_v51, %v5492_v13  ;;  %v13179_v13 = vld [vmem:[#allocation89_spill] sm:$0xff] }
 0x6d4   : > { %v5537_v59 = vmul.f32 1.442695, %v5511_v62  ;;  %v3403_v35 = vunpack.c.l.b16 %v2175_v55  ;;  %v3402_v62 = vunpack.c.l.b16 %v2174_v47  ;;  %v3359_v55 = vunpack.c.l.b16 %v1569_v52 }
 0x6d5   : > { %v10346_v28 = vpop.eup %7175  ;;  %v5539_v46 = vmul.f32 1.442695, %v5512_v61  ;;  %v13182_v61 = vld [vmem:[#allocation61_spill] sm:$0xff]  ;;  %vm3173_vm10 = vweird.f32 %v13179_v13 }
 0x6d6   : > { %13173 = vst [vmem:[#allocation58_spill] sm:$0xff] %v10346_v28  ;;  %7181 = vpow2.f32 %v5537_v59  ;;  %v5008_v51 = vpack.c.bf16 %v10343_v10, %v10346_v28  ;;  %v10357_v49 = vpop.eup %7177  ;;  %v10369_v59 = vpop.f32.mrf.mxu0  ;;  %v3415_v34 = vpack.c.b16 %v3403_v35, %v3402_v62  ;;  %v13184_v35 = vld [vmem:[#allocation33_spill] sm:$0xff]  ;;  %vm3187_vm11 = vweird.f32 %v13182_v61 }
 0x6d7   : > { %7183 = vpow2.f32 %v5539_v46  ;;  %v10359_v11 = vpop.eup %7179  ;;  %v2605_v2 = vmul.f32 %v10357_v49, %v13172_v25  ;;  %vm2610_vm13 = vweird.f32 %v10357_v49 }
 0x6d8   : > { %5068 = vmatmul.bf16.gmra.mxu3 %v5008_v51  ;;  %7185 = vrcp.f32 %v13179_v13  ;;  %v2591_v46 = vmul.f32 %v10359_v11, %v13174_v22  ;;  %v3358_v51 = vunpack.c.l.b16 %v1568_v18  ;;  %vm2596_vm14 = vweird.f32 %v10359_v11  ;;  %vm2611_vm2 = vmor %vm2609_vm15, %vm2610_vm13 }
 0x6d9   : > { %7187 = vrcp.f32 %v13182_v61  ;;  %v2606_v21 = vsub.f32 1.0, %v2605_v2  ;;  %v3479_v52 = vpop.permute.xlu2 %3478  ;;  %vm2597_vm3 = vmor %vm2595_vm1, %vm2596_vm14 }
 0x6da   : > { %7189 = vrcp.f32 %v13184_v35  ;;  %v2592_v62 = vsub.f32 1.0, %v2591_v46  ;;  %v3373_v1 = vpack.c.b16 %v3359_v55, %v3358_v51 }
 0x6dc   : > { %v10362_v4 = vpop.eup %7181  ;;  %v2593_v46 = vmul.f32 %v10359_v11, %v2592_v62 }
 0x6dd   : > { %13180 = vst [vmem:[#allocation80_spill] sm:$0xff] %v10362_v4  ;;  %v10364_v44 = vpop.eup %7183 }
 0x6de   : > { %13181 = vst [vmem:[#allocation76_spill] sm:$0xff] %v10364_v44  ;;  %v5586_v0 = vpack.c.bf16 %v10364_v44, %v10362_v4  ;;  %v10379_v47 = vpop.eup %7185  ;;  %v2607_v44 = vmul.f32 %v10357_v49, %v2606_v21  ;;  %v10395_v8 = vpop.f32.mrf.mxu0 }
 0x6df   : > { %3426 = vrot.lane.b32.xlu1 %v3415_v34, %s7646_s17  ;;  %v10382_v39 = vpop.eup %7187  ;;  %v13185_v34 = vld [vmem:[#allocation45_spill] sm:$0xff]  ;;  %v3169_v18 = vmul.f32 %v10379_v47, %v13179_v13  ;;  %vm3174_vm8 = vweird.f32 %v10379_v47 }
 0x6e0   : > { %5646 = vmatmul.bf16.gmra.mxu1 %v5586_v0  ;;  %4919 = vmax.xlane.f32.xlu2 %v10272_v36  ;;  %7191 = vrcp.f32 %v13185_v34  ;;  %v3553_v0 = vsel %vm1059_vm0, %v3373_v1, %v3423_v20  ;;  %v3183_v55 = vmul.f32 %v10382_v39, %v13182_v61  ;;  %v10397_v28 = vpop.eup %7189  ;;  %v2608_v1 = vadd.f32 %v10357_v49, %v2607_v44  ;;  %vm3175_vm12 = vmor %vm3173_vm10, %vm3174_vm8 }
 0x6e1   : > { %v3576_v2 = vsel %vm3572_vm5, %v3553_v0, %v3479_v52  ;;  %v3170_v10 = vsub.f32 1.0, %v3169_v18  ;;  %v2594_v20 = vadd.f32 %v10359_v11, %v2593_v46  ;;  %v2055_v52 = vmul.f32 %v10397_v28, %v13184_v35  ;;  %v13186_v0 = vld [vmem:[#allocation78_spill] sm:$0xff] }
 0x6e2   : > { %v3184_v62 = vsub.f32 1.0, %v3183_v55  ;;  %v2601_v18 = vand.u32 2147483648, %v13174_v22  ;;  %v2613_v44 = vand.u32 2147483647, %v13172_v25  ;;  %vm3188_vm9 = vweird.f32 %v10382_v39 }
 0x6e3   : > { %5497 = vmax.xlane.f32.xlu0 %v10369_v59  ;;  %v3171_v46 = vmul.f32 %v10379_v47, %v3170_v10  ;;  %v2598_v63 = vsel %vm2597_vm3, %v10359_v11, %v2594_v20  ;;  %v2056_v19 = vsub.f32 1.0, %v2055_v52  ;;  %v13187_v10 = vld [vmem:[#allocation79_spill] sm:$0xff]  ;;  %v3179_v11 = vand.u32 2147483648, %v13179_v13  ;;  %vm10436_vm13 = vmor %vm3187_vm11, %vm3188_vm9 }
 0x6e4   : > { %vm2614_vm4 = vcmp.eq.f32.partialorder %v2613_v44, 8.507059e+37  ;;  %v13189_v20 = vld [vmem:[#allocation127_spill] sm:$0xff]  ;;  %vm2060_vm15 = vweird.f32 %v10397_v28  ;;  %vm2059_vm3 = vweird.f32 %v13184_v35 }
 0x6e5   : > { %v3535_v4 = vpop.permute.xlu0 %3534  ;;  %v2057_v52 = vmul.f32 %v10397_v28, %v2056_v19  ;;  %v3180_v44 = vor.u32 1.1754944e-38, %v3179_v11 }
 0x6e6   : > { %v3594_v51 = vsel %vm3589_vm7, %v3576_v2, %v3535_v4  ;;  %v10402_v21 = vpop.eup %7191  ;;  %v2615_v4 = vand.u32 2147483648, %v13172_v25  ;;  %v2599_v2 = vand.u32 2147483647, %v13174_v22  ;;  %v3185_v25 = vmul.f32 %v10382_v39, %v3184_v62 }
 0x6e7   : > { %6271 = vmatmul.bf16.gmra.mxu2 %v3594_v51  ;;  %v2041_v55 = vmul.f32 %v10402_v21, %v13185_v34  ;;  %v2612_v51 = vsel %vm2611_vm2, %v10357_v49, %v2608_v1  ;;  %v3172_v22 = vadd.f32 %v10379_v47, %v3171_v46  ;;  %v3193_v62 = vand.u32 2147483648, %v13182_v61 }
 0x6e8   : > { %5499 = vmax.xlane.f32.xlu2 %v10395_v8  ;;  %v2616_v12 = vor.u32 1.1754944e-38, %v2615_v4  ;;  %vm2600_vm6 = vcmp.eq.f32.partialorder %v2599_v2, 8.507059e+37  ;;  %v3186_v1 = vadd.f32 %v10382_v39, %v3185_v25  ;;  %vm2046_vm2 = vweird.f32 %v10402_v21 }
 0x6e9   : > { %v2042_v6 = vsub.f32 1.0, %v2041_v55  ;;  %v3194_v2 = vor.u32 1.1754944e-38, %v3193_v62  ;;  %v13192_v55 = vld [vmem:[#allocation36_spill] sm:$0xff] }
 0x6ea   : > { %v2617_v42 = vsel %vm2614_vm4, %v2616_v12, %v2612_v51  ;;  %v3177_v12 = vand.u32 2147483647, %v13179_v13  ;;  %7193 = vrcp.f32 %v13192_v55  ;;  %vm2061_vm4 = vmor %vm2059_vm3, %vm2060_vm15 }
 0x6eb   : > { %2999 = vadd.xlane.f32.xlu0 %v13186_v0  ;;  %v2602_v0 = vor.u32 1.1754944e-38, %v2601_v18  ;;  %v2737_v49 = vmul.f32 %v2617_v42, %v13188_v53  ;;  %v3191_v42 = vand.u32 2147483647, %v13182_v61  ;;  %v3176_v53 = vsel %vm3175_vm12, %v10379_v47, %v3172_v22 }
 0x6ec   : > { %v2043_v13 = vmul.f32 %v10402_v21, %v2042_v6  ;;  %vm3178_vm14 = vcmp.eq.f32.partialorder %v3177_v12, 8.507059e+37  ;;  %v2058_v61 = vadd.f32 %v10397_v28, %v2057_v52  ;;  %v2065_v47 = vand.u32 2147483648, %v13184_v35 }
 0x6ed   : > { %v2603_v30 = vsel %vm2600_vm6, %v2602_v0, %v2598_v63  ;;  %v2753_v63 = vpack.c.bf16 %v2737_v49, %v2737_v49  ;;  %v3181_v46 = vsel %vm3178_vm14, %v3180_v44, %v3176_v53  ;;  %vm3192_vm1 = vcmp.eq.f32.partialorder %v3191_v42, 8.507059e+37  ;;  %v13193_v0 = vld [vmem:[#allocation132_spill] sm:$0xff] }
 0x6ee   : > { %v2736_v4 = vmul.f32 %v2603_v30, %v13189_v20  ;;  %v3190_v30 = vsel %vm10436_vm13, %v10382_v39, %v3186_v1  ;;  %v2044_v25 = vadd.f32 %v10402_v21, %v2043_v13  ;;  %v2063_v39 = vand.u32 2147483647, %v13184_v35  ;;  %v13195_v20 = vld [vmem:[#allocation135_spill] sm:$0xff] }
 0x6ef   : > { %v3459_v6 = vunpack.c.l.b16 %v2753_v63  ;;  %v3195_v51 = vsel %vm3192_vm1, %v3194_v2, %v3190_v30  ;;  %v3314_v22 = vmul.f32 %v3181_v46, %v13193_v0  ;;  %v2051_v49 = vand.u32 2147483648, %v13185_v34  ;;  %v13196_v13 = vld [vmem:[#allocation87_spill] sm:$0xff] }
 0x6f0   : > { %3001 = vadd.xlane.f32.xlu2 %v13187_v10  ;;  %v2752_v19 = vpack.c.bf16 %v2736_v4, %v2736_v4  ;;  %v13194_v10 = vld [vmem:[#allocation51_spill] sm:$0xff]  ;;  %vm2045_vm6 = vweird.f32 %v13185_v34  ;;  %v2049_v1 = vand.u32 2147483647, %v13185_v34  ;;  %v2062_v12 = vsel %vm2061_vm4, %v10397_v28, %v2058_v61  ;;  %v10461_v52 = vpop.eup %7193  ;;  %v13197_v61 = vld [vmem:[#allocation84_spill] sm:$0xff] }
 0x6f1   : > { %7195 = vrcp.f32 %v13194_v10  ;;  %v3315_v4 = vmul.f32 %v3195_v51, %v13195_v20  ;;  %vm2047_vm8 = vmor %vm2045_vm6, %vm2046_vm2  ;;  %v2066_v35 = vor.u32 1.1754944e-38, %v2065_v47  ;;  %vm2064_vm9 = vcmp.eq.f32.partialorder %v2063_v39, 8.507059e+37 }
 0x6f2   : > { %v3458_v11 = vunpack.c.l.b16 %v2752_v19  ;;  %v2048_v42 = vsel %vm2047_vm8, %v10402_v21, %v2044_v25  ;;  %v3330_v53 = vpack.c.bf16 %v3314_v22, %v3314_v22  ;;  %v2052_v63 = vor.u32 1.1754944e-38, %v2051_v49  ;;  %v13198_v49 = vld [vmem:[#allocation85_spill] sm:$0xff] }
 0x6f3   : > { %v2067_v18 = vsel %vm2064_vm9, %v2066_v35, %v2062_v12  ;;  %vm2050_vm10 = vcmp.eq.f32.partialorder %v2049_v1, 8.507059e+37  ;;  %v3331_v34 = vpack.c.bf16 %v3315_v4, %v3315_v4  ;;  %v1397_v2 = vmul.f32 %v10461_v52, %v13192_v55 }
 0x6f4   : > { %v3471_v62 = vpack.c.b16 %v3459_v6, %v3458_v11  ;;  %v2053_v44 = vsel %vm2050_vm10, %v2052_v63, %v2048_v42  ;;  %v2161_v30 = vmul.f32 %v2067_v18, %v13196_v13  ;;  %v3514_v19 = vunpack.c.l.b16 %v3330_v53 }
 0x6f5   : > { %v2160_v21 = vmul.f32 %v2053_v44, %v13197_v61  ;;  %v3515_v47 = vunpack.c.l.b16 %v3331_v34  ;;  %v1398_v25 = vsub.f32 1.0, %v1397_v2  ;;  %vm1402_vm12 = vweird.f32 %v10461_v52  ;;  %v13199_v44 = vld [vmem:[#allocation63_spill] sm:$0xff] }
 0x6f6   : > { %v2177_v6 = vpack.c.bf16 %v2161_v30, %v2161_v30  ;;  %v4918_v22 = vpop.xlane.xlu1 %4917  ;;  %v1407_v53 = vand.u32 2147483648, %v13192_v55  ;;  %vm1401_vm13 = vweird.f32 %v13192_v55  ;;  %v1405_v34 = vand.u32 2147483647, %v13192_v55  ;;  %v13203_v55 = vld [vmem:[#allocation67_spill] sm:$0xff] }
 0x6f7   : > { %v7196_v28 = vpop.eup %7195  ;;  %v3527_v51 = vpack.c.b16 %v3515_v47, %v3514_v19  ;;  %v2176_v0 = vpack.c.bf16 %v2160_v21, %v2160_v21  ;;  %v1399_v1 = vmul.f32 %v10461_v52, %v1398_v25  ;;  %v4936_v4 = vsub.f32 %v10047_v7, %v4918_v22  ;;  %vm10485_vm15 = vmor %vm1401_vm13, %vm1402_vm12  ;;  %v13202_v19 = vld [vmem:[#allocation64_spill] sm:$0xff]  ;;  %v10496_v21 = vpop.f32.mrf.mxu3 }
 0x6f8   : > { %v1383_v46 = vmul.f32 %v7196_v28, %v13194_v10  ;;  %v3405_v11 = vunpack.c.l.b16 %v2177_v6  ;;  %vm1388_vm11 = vweird.f32 %v7196_v28  ;;  %7197 = vrcp.f32 %v13199_v44 }
 0x6f9   : > { %v3404_v20 = vunpack.c.l.b16 %v2176_v0  ;;  %v4965_v63 = vmul.f32 1.442695, %v4936_v4  ;;  %vm1387_vm14 = vweird.f32 %v13194_v10  ;;  %v1393_v13 = vand.u32 2147483648, %v13194_v10  ;;  %v13206_v4 = vld [vmem:[#allocation50_spill] sm:$0xff] }
 0x6fa   : > { %v1384_v39 = vsub.f32 1.0, %v1383_v46  ;;  %7199 = vrcp.f32 %v13202_v19  ;;  %v1391_v46 = vand.u32 2147483647, %v13194_v10  ;;  %vm1389_vm1 = vmor %vm1387_vm14, %vm1388_vm11  ;;  %v1408_v61 = vor.u32 1.1754944e-38, %v1407_v53  ;;  %v10516_v53 = vpop.f32.mrf.mxu1 }
 0x6fb   : > { %v3416_v35 = vpack.c.b16 %v3405_v11, %v3404_v20  ;;  %7201 = vrcp.f32 %v13203_v55  ;;  %vm1406_vm2 = vcmp.eq.f32.partialorder %v1405_v34, 8.507059e+37  ;;  %vm2073_vm6 = vweird.f32 %v13203_v55 }
 0x6fc   : > { %v1385_v12 = vmul.f32 %v7196_v28, %v1384_v39  ;;  %7203 = vpow2.f32 %v4965_v63  ;;  %vm1392_vm3 = vcmp.eq.f32.partialorder %v1391_v46, 8.507059e+37  ;;  %v13204_v39 = vld [vmem:[#allocation66_spill] sm:$0xff]  ;;  %vm2637_vm10 = vweird.f32 %v13202_v19 }
 0x6fd   : > { %vm2087_vm4 = vweird.f32 %v13204_v39  ;;  %vm2623_vm13 = vweird.f32 %v13199_v44 }
 0x6fe   : > { %v1386_v42 = vadd.f32 %v7196_v28, %v1385_v12  ;;  %v10499_v25 = vpop.eup %7197 }
 0x6ff   : > { %3482 = vrot.lane.b32.xlu0 %v3471_v62, %s7647_s18  ;;  %v1400_v62 = vadd.f32 %v10461_v52, %v1399_v1  ;;  %v13205_v1 = vld [vmem:[#allocation24_spill] sm:$0xff]  ;;  %vm2624_vm9 = vweird.f32 %v10499_v25 }
 0x700   : > { %v1390_v6 = vsel %vm1389_vm1, %v7196_v28, %v1386_v42 }
 0x708   : > { %3538 = vrot.lane.b32.xlu2 %v3527_v51, %s7645_s14  ;;  %v1394_v51 = vor.u32 1.1754944e-38, %v1393_v13 }
 0x709   : > { %4385 = vadd.xlane.f32.xlu1 %v13198_v49 }
 0x70a   : > { %v1395_v0 = vsel %vm1392_vm3, %v1394_v51, %v1390_v6 }
 0x710   : > { %v4916_v18 = vpop.xlane.xlu0 %4915  ;;  %3428 = vrot.lane.b32.xlu2 %v3416_v35, %s7646_s17  ;;  %v1554_v35 = vmul.f32 %v1395_v0, %v13206_v4  ;;  %v10547_v4 = vpop.f32.mrf.mxu1 }
 0x711   : > { %v4935_v7 = vsub.f32 %v10011_v43, %v4916_v18  ;;  %4973 = vadd.xlane.f32.xlu1 %v9836_v29  ;;  %v1404_v43 = vsel %vm10485_vm15, %v10461_v52, %v1400_v62  ;;  %v10502_v52 = vpop.eup %7199  ;;  %vm10590_vm15 = vmor %vm2623_vm13, %vm2624_vm9 }
 0x712   : > { %v5494_v2 = vpop.xlane.xlu2 %5493  ;;  %v1409_v10 = vsel %vm1406_vm2, %v1408_v61, %v1404_v43  ;;  %v10504_v11 = vpop.eup %7201  ;;  %v2633_v62 = vmul.f32 %v10502_v52, %v13202_v19  ;;  %v1570_v13 = vpack.c.bf16 %v1554_v35, %v1554_v35  ;;  %vm2638_vm8 = vweird.f32 %v10502_v52 }
 0x713   : > { %v4963_v29 = vmul.f32 1.442695, %v4935_v7  ;;  %v5513_v47 = vsub.f32 %v10164_v26, %v5494_v2  ;;  %v1555_v12 = vmul.f32 %v1409_v10, %v13205_v1  ;;  %v10509_v28 = vpop.eup %7203  ;;  %v2069_v34 = vmul.f32 %v10504_v11, %v13203_v55  ;;  %v10526_v7 = vpop.f32.mrf.mxu3  ;;  %vm10573_vm11 = vmor %vm2637_vm10, %vm2638_vm8 }
 0x714   : > { %v2634_v30 = vsub.f32 1.0, %v2633_v62  ;;  %v3360_v51 = vunpack.c.l.b16 %v1570_v13  ;;  %v2079_v62 = vand.u32 2147483648, %v13203_v55  ;;  %v13208_v13 = vld [vmem:[#allocation81_spill] sm:$0xff]  ;;  %vm2074_vm12 = vweird.f32 %v10504_v11 }
 0x715   : > { %7205 = vpow2.f32 %v4963_v29  ;;  %v5541_v22 = vmul.f32 1.442695, %v5513_v47  ;;  %v2070_v61 = vsub.f32 1.0, %v2069_v34  ;;  %v10536_v47 = vld [vmem:[%s12745_s6] ss:$0 sm:$0xff]  ;;  %v2643_v34 = vand.u32 2147483648, %v13202_v19  ;;  %vm10599_vm1 = vmor %vm2073_vm6, %vm2074_vm12 }
 0x716   : > { %7207 = vrcp.f32 %v13204_v39  ;;  %v2635_v10 = vmul.f32 %v10502_v52, %v2634_v30  ;;  %vm3201_vm13 = vweird.f32 %v13208_v13 }
 0x717   : > { %7209 = vpow2.f32 %v5541_v22 }
 0x718   : > { %v5496_v49 = vpop.xlane.xlu0 %5495 }
 0x719   : > { %v5514_v26 = vsub.f32 %v10237_v50, %v5496_v49  ;;  %5549 = vadd.xlane.f32.xlu1 %v9903_v37  ;;  %v2619_v37 = vmul.f32 %v10499_v25, %v13199_v44  ;;  %v1571_v50 = vpack.c.bf16 %v1555_v12, %v1555_v12  ;;  %v2071_v12 = vmul.f32 %v10504_v11, %v2070_v61  ;;  %v13210_v61 = vld [vmem:[#allocation86_spill] sm:$0xff] }
 0x71a   : > { %v3481_v30 = vpop.permute.xlu2 %3480 }
 0x71b   : > { %v10511_v20 = vpop.eup %7205  ;;  %v5543_v42 = vmul.f32 1.442695, %v5514_v26  ;;  %v2620_v46 = vsub.f32 1.0, %v2619_v37  ;;  %v3361_v43 = vunpack.c.l.b16 %v1571_v50  ;;  %v13207_v26 = vld [vmem:[#allocation62_spill] sm:$0xff]  ;;  %v2077_v37 = vand.u32 2147483647, %v13203_v55 }
 0x71c   : > { %v5009_v63 = vpack.c.bf16 %v10509_v28, %v10511_v20  ;;  %v10520_v18 = vpop.eup %7207  ;;  %vm3215_vm12 = vweird.f32 %v13207_v26 }
 0x71d   : > { %7211 = vpow2.f32 %v5543_v42  ;;  %v2083_v2 = vmul.f32 %v10520_v18, %v13204_v39  ;;  %v10531_v29 = vpop.eup %7209  ;;  %v2621_v49 = vmul.f32 %v10499_v25, %v2620_v46  ;;  %v2636_v42 = vadd.f32 %v10502_v52, %v2635_v10 }
 0x71e   : > { %5073 = vmatmul.bf16.gmra.mxu3 %v5009_v63  ;;  %7213 = vrcp.f32 %v13207_v26  ;;  %v3425_v63 = vpop.permute.xlu1 %3424  ;;  %v2641_v46 = vand.u32 2147483647, %v13202_v19  ;;  %v2629_v10 = vand.u32 2147483648, %v13199_v44  ;;  %v2627_v19 = vand.u32 2147483647, %v13199_v44 }
 0x71f   : > { %v2084_v0 = vsub.f32 1.0, %v2083_v2  ;;  %7215 = vrcp.f32 %v13208_v13  ;;  %v2622_v2 = vadd.f32 %v10499_v25, %v2621_v49  ;;  %v2640_v49 = vsel %vm10573_vm11, %v10502_v52, %v2636_v42 }
 0x720   : > { %vm2088_vm14 = vweird.f32 %v10520_v18  ;;  %v2644_v44 = vor.u32 1.1754944e-38, %v2643_v34  ;;  %v2091_v42 = vand.u32 2147483647, %v13204_v39  ;;  %vm2642_vm2 = vcmp.eq.f32.partialorder %v2641_v46, 8.507059e+37 }
 0x721   : > { %5551 = vadd.xlane.f32.xlu1 %v9897_v33  ;;  %v3374_v33 = vpack.c.b16 %v3361_v43, %v3360_v51  ;;  %v2085_v50 = vmul.f32 %v10520_v18, %v2084_v0  ;;  %v13209_v43 = vld [vmem:[#allocation98_spill] sm:$0xff]  ;;  %v2072_v51 = vadd.f32 %v10504_v11, %v2071_v12  ;;  %v2630_v0 = vor.u32 1.1754944e-38, %v2629_v10  ;;  %vm2089_vm3 = vmor %vm2087_vm4, %vm2088_vm14 }
 0x722   : > { %vm2628_vm6 = vcmp.eq.f32.partialorder %v2627_v19, 8.507059e+37  ;;  %vm2078_vm8 = vcmp.eq.f32.partialorder %v2077_v37, 8.507059e+37  ;;  %vm2092_vm9 = vcmp.eq.f32.partialorder %v2091_v42, 8.507059e+37  ;;  %v13218_v37 = vld [vmem:[#allocation99_spill] sm:$0xff] }
 0x723   : > { %v10538_v6 = vpop.eup %7211  ;;  %v2076_v55 = vsel %vm10599_vm1, %v10504_v11, %v2072_v51 }
 0x724   : > { %v5587_v22 = vpack.c.bf16 %v10538_v6, %v10531_v29 }
 0x725   : > { %v6267_v1 = vpop.f32.mrf.mxu2 }
 0x726   : > { %v6268_v35 = vadd.f32 %v10536_v47, %v6267_v1  ;;  %5651 = vmatmul.bf16.gmra.mxu1 %v5587_v22  ;;  %v3556_v22 = vsel %vm1059_vm0, %v3374_v33, %v3425_v63 }
 0x727   : > { %v3578_v1 = vsel %vm3572_vm5, %v3556_v22, %v3481_v30  ;;  %v2626_v30 = vsel %vm10590_vm15, %v10499_v25, %v2622_v2  ;;  %v2645_v22 = vsel %vm2642_vm2, %v2644_v44, %v2640_v49 }
 0x728   : > { %6347 = vst [vmem:[%s10559_s12] sm:$0xff] %v6268_v35  ;;  %v10584_v35 = vpop.eup %7213  ;;  %v2739_v25 = vmul.f32 %v2645_v22, %v9840_v41  ;;  %v2631_v11 = vsel %vm2628_vm6, %v2630_v0, %v2626_v30  ;;  %v13217_v41 = vld [vmem:[#allocation96_spill] sm:$0xff] }
 0x729   : > { %4389 = vadd.xlane.f32.xlu1 %v13209_v43  ;;  %4387 = vadd.xlane.f32.xlu0 %v13210_v61  ;;  %v2086_v43 = vadd.f32 %v10520_v18, %v2085_v50  ;;  %v2093_v50 = vand.u32 2147483648, %v13204_v39  ;;  %v10608_v61 = vpop.eup %7215  ;;  %v3211_v2 = vmul.f32 %v10584_v35, %v13207_v26  ;;  %vm3216_vm4 = vweird.f32 %v10584_v35 }
 0x72a   : > { %v3197_v49 = vmul.f32 %v10608_v61, %v13208_v13  ;;  %v2755_v19 = vpack.c.bf16 %v2739_v25, %v2739_v25  ;;  %vm3202_vm10 = vweird.f32 %v10608_v61  ;;  %v3219_v25 = vand.u32 2147483647, %v13207_v26  ;;  %vm3217_vm11 = vmor %vm3215_vm12, %vm3216_vm4 }
 0x72b   : > { %v3537_v12 = vpop.permute.xlu0 %3536  ;;  %v2090_v46 = vsel %vm2089_vm3, %v10520_v18, %v2086_v43  ;;  %v2094_v10 = vor.u32 1.1754944e-38, %v2093_v50  ;;  %v3212_v33 = vsub.f32 1.0, %v3211_v2  ;;  %v3207_v2 = vand.u32 2147483648, %v13208_v13  ;;  %vm3203_vm14 = vmor %vm3201_vm13, %vm3202_vm10 }
 0x72c   : > { %v3597_v63 = vsel %vm3589_vm7, %v3578_v1, %v3537_v12  ;;  %v2080_v12 = vor.u32 1.1754944e-38, %v2079_v62  ;;  %v2738_v62 = vmul.f32 %v2631_v11, %v9826_v38  ;;  %v3198_v52 = vsub.f32 1.0, %v3197_v49  ;;  %v13219_v49 = vld [vmem:[#allocation28_spill] sm:$0xff] }
 0x72d   : > { %v6269_v34 = vpop.f32.mrf.mxu2  ;;  %6276 = vmatmul.bf16.gmra.mxu2 %v3597_v63  ;;  %v2095_v39 = vsel %vm2092_vm9, %v2094_v10, %v2090_v46  ;;  %v3461_v18 = vunpack.c.l.b16 %v2755_v19  ;;  %v3213_v43 = vmul.f32 %v10584_v35, %v3212_v33  ;;  %v3205_v46 = vand.u32 2147483647, %v13208_v13  ;;  %v13220_v19 = vld [vmem:[#allocation49_spill] sm:$0xff] }
 0x72e   : > { %v6270_v1 = vadd.f32 %v10536_v47, %v6269_v34  ;;  %v2081_v51 = vsel %vm2078_vm8, %v2080_v12, %v2076_v55  ;;  %v2754_v63 = vpack.c.bf16 %v2738_v62, %v2738_v62  ;;  %v2163_v34 = vmul.f32 %v2095_v39, %v13218_v37 }
 0x72f   : > { %v2162_v44 = vmul.f32 %v2081_v51, %v13217_v41  ;;  %v3199_v38 = vmul.f32 %v10608_v61, %v3198_v52  ;;  %v3214_v0 = vadd.f32 %v10584_v35, %v3213_v43  ;;  %vm3220_vm15 = vcmp.eq.f32.partialorder %v3219_v25, 8.507059e+37 }
 0x730   : > { %6348 = vst [vmem:[%s10559_s12 + $0x8] sm:$0xff] %v6270_v1  ;;  %v3460_v50 = vunpack.c.l.b16 %v2754_v63  ;;  %v2179_v55 = vpack.c.bf16 %v2163_v34, %v2163_v34  ;;  %v3221_v1 = vand.u32 2147483648, %v13207_v26  ;;  %7217 = vrcp.f32 %v13219_v49 }
 0x731   : > { %v2178_v30 = vpack.c.bf16 %v2162_v44, %v2162_v44  ;;  %v3200_v12 = vadd.f32 %v10608_v61, %v3199_v38  ;;  %v3218_v11 = vsel %vm3217_vm11, %v10584_v35, %v3214_v0  ;;  %v3208_v26 = vor.u32 1.1754944e-38, %v3207_v2 }
 0x732   : > { %v3472_v42 = vpack.c.b16 %v3461_v18, %v3460_v50  ;;  %v3222_v10 = vor.u32 1.1754944e-38, %v3221_v1  ;;  %7219 = vrcp.f32 %v13220_v19  ;;  %vm3206_vm1 = vcmp.eq.f32.partialorder %v3205_v46, 8.507059e+37 }
 0x733   : > { %v3406_v22 = vunpack.c.l.b16 %v2178_v30  ;;  %v3204_v62 = vsel %vm3203_vm14, %v10608_v61, %v3200_v12  ;;  %vm1415_vm2 = vweird.f32 %v13219_v49  ;;  %vm1429_vm9 = vweird.f32 %v13220_v19 }
 0x734   : > { %v3223_v39 = vsel %vm3220_vm15, %v3222_v10, %v3218_v11  ;;  %v3209_v13 = vsel %vm3206_vm1, %v3208_v26, %v3204_v62  ;;  %v10662_v10 = vpop.f32.mrf.mxu3  ;;  %v1435_v62 = vand.u32 2147483648, %v13220_v19 }
 0x735   : > { %v3317_v33 = vmul.f32 %v3223_v39, %v9879_v16  ;;  %v3316_v35 = vmul.f32 %v3209_v13, %v9860_v15  ;;  %v13222_v15 = vld [vmem:[#allocation65_spill] sm:$0xff]  ;;  %13223 = vst [vmem:[#allocation52_spill] sm:$0xff] %v10662_v10 }
 0x736   : > { %v7218_v44 = vpop.eup %7217  ;;  %vm2651_vm1 = vweird.f32 %v13222_v15 }
 0x737   : > { %v3333_v41 = vpack.c.bf16 %v3317_v33, %v3317_v33  ;;  %v3332_v52 = vpack.c.bf16 %v3316_v35, %v3316_v35  ;;  %v1411_v37 = vmul.f32 %v7218_v44, %v13219_v49  ;;  %vm1416_vm3 = vweird.f32 %v7218_v44 }
 0x738   : > { %v7220_v63 = vpop.eup %7219  ;;  %vm10668_vm8 = vmor %vm1415_vm2, %vm1416_vm3  ;;  %v1433_v33 = vand.u32 2147483647, %v13220_v19 }
 0x739   : > { %4971 = vadd.xlane.f32.xlu2 %v9833_v57  ;;  %v3407_v57 = vunpack.c.l.b16 %v2179_v55  ;;  %v3517_v61 = vunpack.c.l.b16 %v3333_v41  ;;  %v1425_v34 = vmul.f32 %v7220_v63, %v13220_v19  ;;  %v3516_v18 = vunpack.c.l.b16 %v3332_v52  ;;  %v4922_v43 = vpop.xlane.xlu1 %4921  ;;  %v13221_v55 = vld [vmem:[#allocation69_spill] sm:$0xff] }
 0x73a   : > { %v1412_v50 = vsub.f32 1.0, %v1411_v37  ;;  %7221 = vrcp.f32 %v13221_v55  ;;  %v4938_v16 = vsub.f32 %v10283_v56, %v4922_v43  ;;  %vm1430_vm6 = vweird.f32 %v7220_v63 }
 0x73b   : > { %v3417_v51 = vpack.c.b16 %v3407_v57, %v3406_v22  ;;  %v3528_v30 = vpack.c.b16 %v3517_v61, %v3516_v18  ;;  %v1426_v38 = vsub.f32 1.0, %v1425_v34  ;;  %7223 = vrcp.f32 %v13222_v15  ;;  %vm10675_vm4 = vmor %vm1429_vm9, %vm1430_vm6 }
 0x73c   : > { %v1413_v0 = vmul.f32 %v7218_v44, %v1412_v50  ;;  %v4969_v12 = vmul.f32 1.442695, %v4938_v16  ;;  %v1436_v18 = vor.u32 1.1754944e-38, %v1435_v62  ;;  %vm1434_vm12 = vcmp.eq.f32.partialorder %v1433_v33, 8.507059e+37  ;;  %v13231_v33 = vld [vmem:[#allocation97_spill] sm:$0xff] }
 0x73d   : > { %3484 = vrot.lane.b32.xlu0 %v3472_v42, %s7647_s18  ;;  %v1427_v22 = vmul.f32 %v7220_v63, %v1426_v38  ;;  %vm2665_vm14 = vweird.f32 %v13221_v55 }
 0x73e   : > { %v1414_v11 = vadd.f32 %v7218_v44, %v1413_v0  ;;  %v10690_v0 = vpop.f32.mrf.mxu1 }
 0x740   : > { %v10656_v25 = vpop.eup %7221  ;;  %v1418_v61 = vsel %vm10668_vm8, %v7218_v44, %v1414_v11 }
 0x741   : > { %v10660_v56 = vpop.eup %7223  ;;  %v2661_v26 = vmul.f32 %v10656_v25, %v13221_v55  ;;  %vm2666_vm11 = vweird.f32 %v10656_v25 }
 0x742   : > { %3430 = vrot.lane.b32.xlu1 %v3417_v51, %s7646_s17  ;;  %v1428_v51 = vadd.f32 %v7220_v63, %v1427_v22  ;;  %v2647_v35 = vmul.f32 %v10660_v56, %v13222_v15  ;;  %vm2652_vm13 = vweird.f32 %v10660_v56  ;;  %vm10716_vm15 = vmor %vm2665_vm14, %vm2666_vm11 }
 0x743   : > { %v2662_v19 = vsub.f32 1.0, %v2661_v26  ;;  %v2671_v26 = vand.u32 2147483648, %v13221_v55  ;;  %vm10734_vm2 = vmor %vm2651_vm1, %vm2652_vm13 }
 0x744   : > { %v1432_v37 = vsel %vm10675_vm4, %v7220_v63, %v1428_v51  ;;  %v13228_v63 = vld [vmem:[#allocation22_spill] sm:$0xff] }
 0x745   : > { %v1437_v16 = vsel %vm1434_vm12, %v1436_v18, %v1432_v37  ;;  %v2663_v44 = vmul.f32 %v10656_v25, %v2662_v19  ;;  %v2655_v37 = vand.u32 2147483647, %v13222_v15  ;;  %v13235_v19 = vld [vmem:[#allocation68_spill] sm:$0xff] }
 0x746   : > { %vm2101_vm12 = vweird.f32 %v13235_v19 }
 0x747   : > { %v2664_v11 = vadd.f32 %v10656_v25, %v2663_v44  ;;  %vm2656_vm6 = vcmp.eq.f32.partialorder %v2655_v37, 8.507059e+37 }
 0x751   : > { %3540 = vrot.lane.b32.xlu2 %v3528_v30, %s7645_s14 }
 0x753   : > { %v4920_v42 = vpop.xlane.xlu2 %4919 }
 0x754   : > { %v4937_v1 = vsub.f32 %v10272_v36, %v4920_v42  ;;  %v1421_v36 = vand.u32 2147483648, %v13219_v49  ;;  %v2648_v42 = vsub.f32 1.0, %v2647_v35  ;;  %v13232_v35 = vld [vmem:[#allocation73_spill] sm:$0xff] }
 0x755   : > { %vm2115_vm4 = vweird.f32 %v13232_v35 }
 0x756   : > { %v4967_v57 = vmul.f32 1.442695, %v4937_v1  ;;  %v5498_v2 = vpop.xlane.xlu0 %5497  ;;  %v1422_v34 = vor.u32 1.1754944e-38, %v1421_v36  ;;  %v13229_v1 = vld [vmem:[#allocation37_spill] sm:$0xff] }
 0x757   : > { %v5515_v46 = vsub.f32 %v10369_v59, %v5498_v2  ;;  %v1419_v59 = vand.u32 2147483647, %v13219_v49  ;;  %v2649_v2 = vmul.f32 %v10660_v56, %v2648_v42 }
 0x758   : > { %7225 = vpow2.f32 %v4967_v57  ;;  %v10697_v57 = vpop.f32.mrf.mxu3 }
 0x759   : > { %7227 = vpow2.f32 %v4969_v12  ;;  %v5545_v41 = vmul.f32 1.442695, %v5515_v46  ;;  %vm1420_vm10 = vcmp.eq.f32.partialorder %v1419_v59, 8.507059e+37  ;;  %v1557_v12 = vmul.f32 %v1437_v16, %v13229_v1  ;;  %13230 = vst [vmem:[#allocation26_spill] sm:$0xff] %v10697_v57 }
 0x75a   : > { %v1423_v38 = vsel %vm1420_vm10, %v1422_v34, %v1418_v61  ;;  %v2650_v39 = vadd.f32 %v10660_v56, %v2649_v2  ;;  %v2669_v59 = vand.u32 2147483647, %v13221_v55  ;;  %v2668_v55 = vsel %vm10716_vm15, %v10656_v25, %v2664_v11  ;;  %v3427_v2 = vpop.permute.xlu1 %3426 }
 0x75b   : > { %v5500_v52 = vpop.xlane.xlu2 %5499  ;;  %7229 = vpow2.f32 %v5545_v41  ;;  %v1556_v22 = vmul.f32 %v1423_v38, %v13228_v63  ;;  %v1573_v62 = vpack.c.bf16 %v1557_v12, %v1557_v12  ;;  %v2657_v41 = vand.u32 2147483648, %v13222_v15 }
 0x75c   : > { %v5516_v49 = vsub.f32 %v10395_v8, %v5500_v52  ;;  %v2672_v15 = vor.u32 1.1754944e-38, %v2671_v26  ;;  %v2654_v25 = vsel %vm10734_vm2, %v10660_v56, %v2650_v39  ;;  %vm2670_vm3 = vcmp.eq.f32.partialorder %v2669_v59, 8.507059e+37 }
 0x75d   : > { %v1572_v36 = vpack.c.bf16 %v1556_v22, %v1556_v22  ;;  %v3363_v16 = vunpack.c.l.b16 %v1573_v62  ;;  %v13238_v22 = vld [vmem:[#allocation90_spill] sm:$0xff] }
 0x75e   : > { %v10686_v43 = vpop.eup %7225  ;;  %v5547_v30 = vmul.f32 1.442695, %v5516_v49  ;;  %v10727_v49 = vpop.f32.mrf.mxu1  ;;  %v2673_v44 = vsel %vm2670_vm3, %v2672_v15, %v2668_v55  ;;  %vm3229_vm15 = vweird.f32 %v13238_v22 }
 0x75f   : > { %v10688_v50 = vpop.eup %7227  ;;  %v10729_v34 = vpop.xlane.xlu0 %2999  ;;  %v3362_v18 = vunpack.c.l.b16 %v1572_v36  ;;  %v2741_v63 = vmul.f32 %v2673_v44, %v9998_v48 }
 0x760   : > { %7231 = vpow2.f32 %v5547_v30  ;;  %v5010_v8 = vpack.c.bf16 %v10688_v50, %v10686_v43 }
 0x761   : > { %v10700_v46 = vpop.eup %7229  ;;  %7233 = vrcp.f32 %v13232_v35  ;;  %v3375_v11 = vpack.c.b16 %v3363_v16, %v3362_v18  ;;  %v2757_v26 = vpack.c.bf16 %v2741_v63, %v2741_v63  ;;  %v13240_v18 = vld [vmem:[#allocation106_spill] sm:$0xff] }
 0x762   : > { %5078 = vmatmul.bf16.gmra.mxu3 %v5010_v8  ;;  %7235 = vrcp.f32 %v13235_v19  ;;  %v2658_v8 = vor.u32 1.1754944e-38, %v2657_v41 }
 0x763   : > { %v10720_v61 = vpop.xlane.xlu2 %3001  ;;  %7237 = vrcp.f32 %v13238_v22  ;;  %v3559_v48 = vsel %vm1059_vm0, %v3375_v11, %v3427_v2  ;;  %v3463_v15 = vunpack.c.l.b16 %v2757_v26  ;;  %v13241_v11 = vld [vmem:[#allocation104_spill] sm:$0xff] }
 0x764   : > { %v2659_v12 = vsel %vm2656_vm6, %v2658_v8, %v2654_v25 }
 0x765   : > { %v2740_v56 = vmul.f32 %v2659_v12, %v9976_v27 }
 0x766   : > { %v10704_v51 = vpop.eup %7231 }
 0x767   : > { %4391 = vadd.xlane.f32.xlu0 %v13231_v33  ;;  %v5588_v13 = vpack.c.bf16 %v10704_v51, %v10700_v46  ;;  %v10746_v1 = vpop.eup %7233  ;;  %v2756_v52 = vpack.c.bf16 %v2740_v56, %v2740_v56 }
 0x768   : > { %v10749_v36 = vpop.eup %7235  ;;  %v2111_v62 = vmul.f32 %v10746_v1, %v13232_v35  ;;  %vm2116_vm8 = vweird.f32 %v10746_v1 }
 0x769   : > { %5656 = vmatmul.bf16.gmra.mxu1 %v5588_v13  ;;  %v10756_v41 = vpop.eup %7237  ;;  %v2097_v27 = vmul.f32 %v10749_v36, %v13235_v19  ;;  %vm2102_vm9 = vweird.f32 %v10749_v36  ;;  %vm10784_vm10 = vmor %vm2115_vm4, %vm2116_vm8 }
 0x76a   : > { %v6272_v38 = vpop.f32.mrf.mxu2  ;;  %v2112_v30 = vsub.f32 1.0, %v2111_v62  ;;  %v2121_v62 = vand.u32 2147483648, %v13232_v35  ;;  %vm10793_vm11 = vmor %vm2101_vm12, %vm2102_vm9  ;;  %vm3230_vm13 = vweird.f32 %v10756_v41 }
 0x76b   : > { %v6273_v42 = vadd.f32 %v10536_v47, %v6272_v38  ;;  %v3539_v59 = vpop.permute.xlu2 %3538  ;;  %v3225_v38 = vmul.f32 %v10756_v41, %v13238_v22  ;;  %v2098_v25 = vsub.f32 1.0, %v2097_v27  ;;  %vm3231_vm2 = vmor %vm3229_vm15, %vm3230_vm13 }
 0x76c   : > { %4977 = vadd.xlane.f32.xlu1 %v10023_v23  ;;  %v13239_v23 = vld [vmem:[#allocation83_spill] sm:$0xff]  ;;  %v2113_v8 = vmul.f32 %v10746_v1, %v2112_v30  ;;  %v3233_v30 = vand.u32 2147483647, %v13238_v22 }
 0x76d   : > { %6349 = vst [vmem:[%s10559_s12 + $0x10] sm:$0xff] %v6273_v42  ;;  %7239 = vrcp.f32 %v13239_v23  ;;  %v3462_v42 = vunpack.c.l.b16 %v2756_v52  ;;  %v3226_v12 = vsub.f32 1.0, %v3225_v38  ;;  %v2099_v2 = vmul.f32 %v10749_v36, %v2098_v25  ;;  %v13246_v38 = vld [vmem:[#allocation39_spill] sm:$0xff] }
 0x76e   : > { %v2114_v56 = vadd.f32 %v10746_v1, %v2113_v8  ;;  %7241 = vrcp.f32 %v13246_v38  ;;  %vm3243_vm6 = vweird.f32 %v13239_v23  ;;  %vm3234_vm8 = vcmp.eq.f32.partialorder %v3233_v30, 8.507059e+37 }
 0x76f   : > { %v3473_v44 = vpack.c.b16 %v3463_v15, %v3462_v42  ;;  %v3249_v42 = vand.u32 2147483648, %v13239_v23 }
 0x770   : > { %v2118_v27 = vsel %vm10784_vm10, %v10746_v1, %v2114_v56  ;;  %v3235_v1 = vand.u32 2147483648, %v13238_v22  ;;  %v3247_v22 = vand.u32 2147483647, %v13239_v23 }
 0x771   : > { %v3483_v39 = vpop.permute.xlu0 %3482 }
 0x772   : > { %v3580_v33 = vsel %vm3572_vm5, %v3559_v48, %v3483_v39  ;;  %v6274_v13 = vpop.f32.mrf.mxu2  ;;  %v3227_v48 = vmul.f32 %v10756_v41, %v3226_v12  ;;  %v2100_v39 = vadd.f32 %v10749_v36, %v2099_v2  ;;  %v3236_v8 = vor.u32 1.1754944e-38, %v3235_v1  ;;  %v13248_v12 = vld [vmem:[#allocation46_spill] sm:$0xff]  ;;  %v13249_v2 = vld [vmem:[#allocation43_spill] sm:$0xff] }
 0x773   : > { %v6275_v37 = vadd.f32 %v10536_v47, %v6274_v13  ;;  %v3600_v55 = vsel %vm3589_vm7, %v3580_v33, %v3539_v59  ;;  %v10766_v16 = vpop.eup %7239  ;;  %v2107_v59 = vand.u32 2147483648, %v13235_v19  ;;  %v2105_v13 = vand.u32 2147483647, %v13235_v19 }
 0x774   : > { %4393 = vadd.xlane.f32.xlu1 %v13240_v18  ;;  %6281 = vmatmul.bf16.gmra.mxu2 %v3600_v55  ;;  %v3239_v63 = vmul.f32 %v10766_v16, %v13239_v23  ;;  %v3228_v55 = vadd.f32 %v10756_v41, %v3227_v48  ;;  %v2104_v19 = vsel %vm10793_vm11, %v10749_v36, %v2100_v39  ;;  %vm3244_vm3 = vweird.f32 %v10766_v16 }
 0x775   : > { %6350 = vst [vmem:[%s10559_s12 + $0x18] sm:$0xff] %v6275_v37  ;;  %v2122_v37 = vor.u32 1.1754944e-38, %v2121_v62  ;;  %v2108_v18 = vor.u32 1.1754944e-38, %v2107_v59  ;;  %vm2106_vm1 = vcmp.eq.f32.partialorder %v2105_v13, 8.507059e+37  ;;  %7243 = vrcp.f32 %v13248_v12  ;;  %vm3245_vm9 = vmor %vm3243_vm6, %vm3244_vm3 }
 0x776   : > { %v3240_v26 = vsub.f32 1.0, %v3239_v63  ;;  %v3232_v36 = vsel %vm3231_vm2, %v10756_v41, %v3228_v55  ;;  %v3250_v41 = vor.u32 1.1754944e-38, %v3249_v42  ;;  %vm3248_vm4 = vcmp.eq.f32.partialorder %v3247_v22, 8.507059e+37 }
 0x777   : > { %v2109_v25 = vsel %vm2106_vm1, %v2108_v18, %v2104_v19  ;;  %v3237_v56 = vsel %vm3234_vm8, %v3236_v8, %v3232_v36  ;;  %v1463_v8 = vand.u32 2147483648, %v13246_v38  ;;  %vm1457_vm11 = vweird.f32 %v13246_v38 }
 0x778   : > { %v3318_v39 = vmul.f32 %v3237_v56, %v9900_v60  ;;  %v13250_v60 = vld [vmem:[#allocation56_spill] sm:$0xff] }
 0x779   : > { %7245 = vrcp.f32 %v13250_v60  ;;  %vm2693_vm8 = vweird.f32 %v13250_v60 }
 0x77a   : > { %4975 = vadd.xlane.f32.xlu2 %v10015_v9  ;;  %v2119_v9 = vand.u32 2147483647, %v13232_v35  ;;  %v3241_v35 = vmul.f32 %v10766_v16, %v3240_v26  ;;  %v7242_v26 = vpop.eup %7241  ;;  %v3334_v52 = vpack.c.bf16 %v3318_v39, %v3318_v39 }
 0x77b   : > { %3486 = vrot.lane.b32.xlu0 %v3473_v44, %s7647_s18  ;;  %v13247_v44 = vld [vmem:[#allocation105_spill] sm:$0xff]  ;;  %v7244_v33 = vpop.eup %7243  ;;  %v1453_v23 = vmul.f32 %v7242_v26, %v13246_v38  ;;  %vm1458_vm10 = vweird.f32 %v7242_v26 }
 0x77c   : > { %4395 = vadd.xlane.f32.xlu1 %v13241_v11  ;;  %vm2120_vm14 = vcmp.eq.f32.partialorder %v2119_v9, 8.507059e+37  ;;  %v2164_v11 = vmul.f32 %v2109_v25, %v13249_v2  ;;  %v3518_v1 = vunpack.c.l.b16 %v3334_v52  ;;  %v13251_v25 = vld [vmem:[#allocation70_spill] sm:$0xff]  ;;  %vm1444_vm12 = vweird.f32 %v7244_v33  ;;  %vm1459_vm13 = vmor %vm1457_vm11, %vm1458_vm10  ;;  %v13252_v52 = vld [vmem:[#allocation60_spill] sm:$0xff] }
 0x77d   : > { %v2123_v15 = vsel %vm2120_vm14, %v2122_v37, %v2118_v27  ;;  %v1439_v37 = vmul.f32 %v7244_v33, %v13248_v12  ;;  %7247 = vrcp.f32 %v13251_v25  ;;  %v1449_v2 = vand.u32 2147483648, %v13248_v12 }
 0x77e   : > { %v2165_v63 = vmul.f32 %v2123_v15, %v13247_v44  ;;  %v2180_v9 = vpack.c.bf16 %v2164_v11, %v2164_v11  ;;  %vm1443_vm14 = vweird.f32 %v13248_v12  ;;  %v1447_v11 = vand.u32 2147483647, %v13248_v12 }
 0x77f   : > { %v1440_v18 = vsub.f32 1.0, %v1439_v37  ;;  %v7246_v42 = vpop.eup %7245  ;;  %vm1445_vm15 = vmor %vm1443_vm14, %vm1444_vm12 }
 0x780   : > { %v2181_v48 = vpack.c.bf16 %v2165_v63, %v2165_v63  ;;  %v1461_v63 = vand.u32 2147483647, %v13246_v38  ;;  %v2689_v56 = vmul.f32 %v7246_v42, %v13250_v60  ;;  %vm1448_vm2 = vcmp.eq.f32.partialorder %v1447_v11, 8.507059e+37  ;;  %v13259_v11 = vld [vmem:[#allocation88_spill] sm:$0xff] }
 0x781   : > { %vm2694_vm3 = vweird.f32 %v7246_v42 }
 0x782   : > { %5553 = vadd.xlane.f32.xlu2 %v9972_v58  ;;  %v3242_v58 = vadd.f32 %v10766_v16, %v3241_v35  ;;  %v3409_v27 = vunpack.c.l.b16 %v2181_v48  ;;  %v3408_v35 = vunpack.c.l.b16 %v2180_v9  ;;  %vm1462_vm1 = vcmp.eq.f32.partialorder %v1461_v63, 8.507059e+37 }
 0x783   : > { %v7248_v22 = vpop.eup %7247  ;;  %v1450_v9 = vor.u32 1.1754944e-38, %v1449_v2  ;;  %v2690_v38 = vsub.f32 1.0, %v2689_v56 }
 0x784   : > { %v3246_v62 = vsel %vm3245_vm9, %v10766_v16, %v3242_v58  ;;  %v1454_v16 = vsub.f32 1.0, %v1453_v23  ;;  %v3418_v19 = vpack.c.b16 %v3409_v27, %v3408_v35  ;;  %v1441_v58 = vmul.f32 %v7244_v33, %v1440_v18  ;;  %v3429_v23 = vpop.permute.xlu2 %3428  ;;  %v13253_v35 = vld [vmem:[#allocation42_spill] sm:$0xff]  ;;  %vm10846_vm9 = vmor %vm2693_vm8, %vm2694_vm3 }
 0x785   : > { %v3251_v59 = vsel %vm3248_vm4, %v3250_v41, %v3246_v62  ;;  %v1464_v41 = vor.u32 1.1754944e-38, %v1463_v8  ;;  %v2675_v48 = vmul.f32 %v7248_v22, %v13251_v25  ;;  %v2691_v12 = vmul.f32 %v7246_v42, %v2690_v38  ;;  %v13256_v8 = vld [vmem:[#allocation95_spill] sm:$0xff] }
 0x786   : > { %v3319_v13 = vmul.f32 %v3251_v59, %v9958_v3  ;;  %v1455_v15 = vmul.f32 %v7242_v26, %v1454_v16  ;;  %v1442_v44 = vadd.f32 %v7244_v33, %v1441_v58  ;;  %vm2680_vm6 = vweird.f32 %v7248_v22 }
 0x787   : > { %v2676_v27 = vsub.f32 1.0, %v2675_v48  ;;  %v2699_v18 = vand.u32 2147483648, %v13250_v60  ;;  %v2685_v58 = vand.u32 2147483648, %v13251_v25  ;;  %7249 = vrcp.f32 %v13256_v8 }
 0x788   : > { %v3335_v55 = vpack.c.bf16 %v3319_v13, %v3319_v13  ;;  %v1456_v36 = vadd.f32 %v7242_v26, %v1455_v15  ;;  %v1446_v39 = vsel %vm1445_vm15, %v7244_v33, %v1442_v44  ;;  %vm2679_vm4 = vweird.f32 %v13251_v25 }
 0x789   : > { %v1451_v13 = vsel %vm1448_vm2, %v1450_v9, %v1446_v39  ;;  %v2683_v44 = vand.u32 2147483647, %v13251_v25  ;;  %vm10856_vm10 = vmor %vm2679_vm4, %vm2680_vm6  ;;  %v2700_v2 = vor.u32 1.1754944e-38, %v2699_v18  ;;  %7251 = vrcp.f32 %v13259_v11 }
 0x78a   : > { %v3519_v30 = vunpack.c.l.b16 %v3335_v55  ;;  %v1460_v62 = vsel %vm1459_vm13, %v7242_v26, %v1456_v36  ;;  %v1558_v26 = vmul.f32 %v1451_v13, %v13253_v35  ;;  %v2677_v55 = vmul.f32 %v7248_v22, %v2676_v27 }
 0x78b   : > { %v1465_v59 = vsel %vm1462_vm1, %v1464_v41, %v1460_v62  ;;  %vm2684_vm11 = vcmp.eq.f32.partialorder %v2683_v44, 8.507059e+37  ;;  %vm3271_vm15 = vweird.f32 %v13256_v8  ;;  %vm3257_vm2 = vweird.f32 %v13259_v11 }
 0x78c   : > { %v3529_v3 = vpack.c.b16 %v3519_v30, %v3518_v1  ;;  %v1559_v37 = vmul.f32 %v1465_v59, %v13252_v52  ;;  %v2692_v1 = vadd.f32 %v7246_v42, %v2691_v12  ;;  %v1574_v33 = vpack.c.bf16 %v1558_v26, %v1558_v26 }
 0x78d   : > { %v2678_v15 = vadd.f32 %v7248_v22, %v2677_v55  ;;  %v7250_v38 = vpop.eup %7249 }
 0x78e   : > { %v1575_v16 = vpack.c.bf16 %v1559_v37, %v1559_v37  ;;  %v2696_v63 = vsel %vm10846_vm9, %v7246_v42, %v2692_v1  ;;  %v2686_v42 = vor.u32 1.1754944e-38, %v2685_v58  ;;  %v3267_v26 = vmul.f32 %v7250_v38, %v13256_v8  ;;  %v10873_v1 = vpop.f32.mrf.mxu3 }
 0x78f   : > { %v2682_v62 = vsel %vm10856_vm10, %v7248_v22, %v2678_v15  ;;  %v7252_v12 = vpop.eup %7251  ;;  %13260 = vst [vmem:[#allocation29_spill] sm:$0xff] %v10873_v1  ;;  %vm3272_vm13 = vweird.f32 %v7250_v38 }
 0x790   : > { %v2687_v13 = vsel %vm2684_vm11, %v2686_v42, %v2682_v62  ;;  %v3268_v18 = vsub.f32 1.0, %v3267_v26  ;;  %vm3258_vm14 = vweird.f32 %v7252_v12  ;;  %vm3273_vm1 = vmor %vm3271_vm15, %vm3272_vm13 }
 0x791   : > { %v2742_v22 = vmul.f32 %v2687_v13, %v10032_v32  ;;  %vm3259_vm3 = vmor %vm3257_vm2, %vm3258_vm14  ;;  %v13265_v13 = vld [vmem:[#allocation25_spill] sm:$0xff] }
 0x792   : > { %vm1485_vm11 = vweird.f32 %v13265_v13 }
 0x795   : > { %3432 = vrot.lane.b32.xlu1 %v3418_v19, %s7646_s17 }
 0x796   : > { %v10880_v44 = vpop.f32.mrf.mxu3 }
 0x797   : > { %13261 = vst [vmem:[#allocation89_spill] sm:$0xff] %v10880_v44 }
 0x79a   : > { %3542 = vrot.lane.b32.xlu2 %v3529_v3, %s7645_s14  ;;  %v3365_v3 = vunpack.c.l.b16 %v1575_v16 }
 0x79c   : > { %v10837_v19 = vpop.xlane.xlu0 %4387 }
 0x7a5   : > { %5555 = vadd.xlane.f32.xlu0 %v9969_v24  ;;  %v2697_v24 = vand.u32 2147483647, %v13250_v60  ;;  %v3364_v60 = vunpack.c.l.b16 %v1574_v33 }
 0x7a7   : > { %vm2698_vm12 = vcmp.eq.f32.partialorder %v2697_v24, 8.507059e+37  ;;  %v3376_v41 = vpack.c.b16 %v3365_v3, %v3364_v60  ;;  %v3269_v3 = vmul.f32 %v7250_v38, %v3268_v18  ;;  %v3275_v60 = vand.u32 2147483647, %v13256_v8 }
 0x7a8   : > { %v2701_v39 = vsel %vm2698_vm12, %v2700_v2, %v2696_v63  ;;  %v3261_v2 = vand.u32 2147483647, %v13259_v11 }
 0x7a9   : > { %v2743_v9 = vmul.f32 %v2701_v39, %v10093_v40  ;;  %v3562_v59 = vsel %vm1059_vm0, %v3376_v41, %v3429_v23  ;;  %v2758_v40 = vpack.c.bf16 %v2742_v22, %v2742_v22  ;;  %v3253_v23 = vmul.f32 %v7252_v12, %v13259_v11  ;;  %v13268_v22 = vld [vmem:[#allocation72_spill] sm:$0xff] }
 0x7aa   : > { %v3270_v36 = vadd.f32 %v7250_v38, %v3269_v3  ;;  %vm3276_vm6 = vcmp.eq.f32.partialorder %v3275_v60, 8.507059e+37  ;;  %vm3262_vm8 = vcmp.eq.f32.partialorder %v3261_v2, 8.507059e+37  ;;  %v13271_v2 = vld [vmem:[#allocation77_spill] sm:$0xff]  ;;  %vm2143_vm2 = vweird.f32 %v13268_v22 }
 0x7ab   : > { %v2759_v35 = vpack.c.bf16 %v2743_v9, %v2743_v9  ;;  %v3464_v15 = vunpack.c.l.b16 %v2758_v40  ;;  %v3254_v32 = vsub.f32 1.0, %v3253_v23  ;;  %v10891_v9 = vpop.f32.mrf.mxu3 }
 0x7ac   : > { %v10840_v30 = vpop.xlane.xlu2 %4971  ;;  %13264 = vst [vmem:[#allocation61_spill] sm:$0xff] %v10891_v9 }
 0x7ad   : > { %4981 = vadd.xlane.f32.xlu0 %v10125_v14  ;;  %v3465_v33 = vunpack.c.l.b16 %v2759_v35  ;;  %v3255_v58 = vmul.f32 %v7252_v12, %v3254_v32  ;;  %v13262_v14 = vld [vmem:[#allocation44_spill] sm:$0xff] }
 0x7ae   : > { %7253 = vrcp.f32 %v13262_v14  ;;  %vm1471_vm4 = vweird.f32 %v13262_v14 }
 0x7af   : > { %v3485_v25 = vpop.permute.xlu0 %3484  ;;  %v3474_v24 = vpack.c.b16 %v3465_v33, %v3464_v15  ;;  %v3256_v63 = vadd.f32 %v7252_v12, %v3255_v58  ;;  %7255 = vrcp.f32 %v13265_v13  ;;  %v13270_v15 = vld [vmem:[#allocation108_spill] sm:$0xff] }
 0x7b0   : > { %v6277_v56 = vpop.f32.mrf.mxu2  ;;  %v3582_v27 = vsel %vm3572_vm5, %v3562_v59, %v3485_v25  ;;  %v10889_v25 = vpop.xlane.xlu1 %4385 }
 0x7b1   : > { %v6278_v48 = vadd.f32 %v10536_v47, %v6277_v56  ;;  %v3274_v56 = vsel %vm3273_vm1, %v7250_v38, %v3270_v36  ;;  %v3260_v41 = vsel %vm3259_vm3, %v7252_v12, %v3256_v63  ;;  %v1477_v63 = vand.u32 2147483648, %v13262_v14 }
 0x7b3   : > { %6351 = vst [vmem:[%s10559_s12 + $0x20] sm:$0xff] %v6278_v48  ;;  %v10910_v23 = vpop.f32.mrf.mxu3 }
 0x7b4   : > { %v3541_v52 = vpop.permute.xlu2 %3540  ;;  %v7254_v42 = vpop.eup %7253  ;;  %13269 = vst [vmem:[#allocation33_spill] sm:$0xff] %v10910_v23  ;;  %v13290_v23 = vld [vmem:[#allocation136_spill] sm:$0xff] }
 0x7b5   : > { %v3603_v37 = vsel %vm3589_vm7, %v3582_v27, %v3541_v52  ;;  %v13266_v27 = vld [vmem:[#allocation35_spill] sm:$0xff]  ;;  %v10904_v26 = vpop.eup %7255  ;;  %vm1472_vm9 = vweird.f32 %v7254_v42 }
 0x7b6   : > { %6286 = vmatmul.bf16.gmra.mxu2 %v3603_v37  ;;  %v13267_v52 = vld [vmem:[#allocation71_spill] sm:$0xff]  ;;  %vm10937_vm10 = vmor %vm1471_vm4, %vm1472_vm9  ;;  %vm1486_vm14 = vweird.f32 %v10904_v26 }
 0x7b7   : > { %7257 = vrcp.f32 %v13267_v52  ;;  %vm2129_vm15 = vweird.f32 %v13267_v52 }
 0x7b8   : > { %v6279_v55 = vpop.f32.mrf.mxu2  ;;  %7259 = vrcp.f32 %v13268_v22 }
 0x7b9   : > { %v6280_v16 = vadd.f32 %v10536_v47, %v6279_v55  ;;  %v3277_v47 = vand.u32 2147483648, %v13256_v8  ;;  %7261 = vrcp.f32 %v10729_v34  ;;  %v10906_v55 = vpop.f32.mrf.mxu1 }
 0x7ba   : > { %7263 = vrcp.f32 %v10720_v61 }
 0x7bb   : > { %6352 = vst [vmem:[%s10559_s12 + $0x28] sm:$0xff] %v6280_v16  ;;  %v3278_v62 = vor.u32 1.1754944e-38, %v3277_v47  ;;  %7265 = vrcp.f32 %v13271_v2 }
 0x7bd   : > { %v3279_v8 = vsel %vm3276_vm6, %v3278_v62, %v3274_v56  ;;  %v10908_v40 = vpop.eup %7257  ;;  %v1475_v62 = vand.u32 2147483647, %v13262_v14  ;;  %vm10978_vm6 = vmor %vm1485_vm11, %vm1486_vm14  ;;  %vm3299_vm14 = vweird.f32 %v10720_v61 }
 0x7be   : > { %v3321_v59 = vmul.f32 %v3279_v8, %v10005_v5  ;;  %v10902_v5 = vpop.xlane.xlu1 %4973  ;;  %v10912_v16 = vpop.eup %7259  ;;  %v2125_v36 = vmul.f32 %v10908_v40, %v13267_v52  ;;  %vm2130_vm1 = vweird.f32 %v10908_v40 }
 0x7bf   : > { %5557 = vadd.xlane.f32.xlu1 %v10019_v45  ;;  %v3263_v45 = vand.u32 2147483648, %v13259_v11  ;;  %v1467_v11 = vmul.f32 %v7254_v42, %v13262_v14  ;;  %v10915_v32 = vpop.eup %7261  ;;  %v2139_v60 = vmul.f32 %v10912_v16, %v13268_v22  ;;  %v1478_v14 = vor.u32 1.1754944e-38, %v1477_v63  ;;  %vm10995_vm9 = vmor %vm2129_vm15, %vm2130_vm1 }
 0x7c0   : > { %v3337_v37 = vpack.c.bf16 %v3321_v59, %v3321_v59  ;;  %v10919_v3 = vpop.eup %7263  ;;  %vm1476_vm12 = vcmp.eq.f32.partialorder %v1475_v62, 8.507059e+37  ;;  %vm2144_vm3 = vweird.f32 %v10912_v16 }
 0x7c1   : > { %3488 = vrot.lane.b32.xlu0 %v3474_v24, %s7647_s18  ;;  %v3264_v48 = vor.u32 1.1754944e-38, %v3263_v45  ;;  %v1468_v12 = vsub.f32 1.0, %v1467_v11  ;;  %v1481_v24 = vmul.f32 %v10904_v26, %v13265_v13  ;;  %v3295_v56 = vmul.f32 %v10919_v3, %v10720_v61 }
 0x7c2   : > { %v1489_v11 = vand.u32 2147483647, %v13265_v13  ;;  %vm3300_vm4 = vweird.f32 %v10919_v3 }
 0x7c3   : > { %4979 = vadd.xlane.f32.xlu2 %v10128_v17  ;;  %v13263_v17 = vld [vmem:[#allocation57_spill] sm:$0xff]  ;;  %v3265_v39 = vsel %vm3262_vm8, %v3264_v48, %v3260_v41  ;;  %v1469_v33 = vmul.f32 %v7254_v42, %v1468_v12  ;;  %v1482_v45 = vsub.f32 1.0, %v1481_v24  ;;  %v13272_v41 = vld [vmem:[#allocation74_spill] sm:$0xff]  ;;  %vm3286_vm8 = vweird.f32 %v10915_v32  ;;  %vm11034_vm15 = vmor %vm3299_vm14, %vm3300_vm4 }
 0x7c4   : > { %v3320_v38 = vmul.f32 %v3265_v39, %v9984_v54  ;;  %v3521_v54 = vunpack.c.l.b16 %v3337_v37  ;;  %7267 = vrcp.f32 %v13272_v41  ;;  %v2126_v39 = vsub.f32 1.0, %v2125_v36  ;;  %v10945_v37 = vpop.f32.mrf.mxu1 }
 0x7c5   : > { %v1470_v47 = vadd.f32 %v7254_v42, %v1469_v33  ;;  %v1483_v12 = vmul.f32 %v10904_v26, %v1482_v45  ;;  %v3296_v33 = vsub.f32 1.0, %v3295_v56  ;;  %vm10957_vm13 = vcmp.eq.f32.partialorder %v1489_v11, 8.507059e+37 }
 0x7c6   : > { %v3336_v35 = vpack.c.bf16 %v3320_v38, %v3320_v38  ;;  %v10935_v48 = vpop.xlane.xlu1 %5549  ;;  %v1491_v38 = vand.u32 2147483648, %v13265_v13  ;;  %v2135_v45 = vand.u32 2147483648, %v13267_v52  ;;  %v2149_v11 = vand.u32 2147483648, %v13268_v22 }
 0x7c7   : > { %3815 = vadd.xlane.f32.xlu1 %v13263_v17  ;;  %v3281_v17 = vmul.f32 %v10915_v32, %v10729_v34  ;;  %v1474_v59 = vsel %vm10937_vm10, %v7254_v42, %v1470_v47  ;;  %v1484_v47 = vadd.f32 %v10904_v26, %v1483_v12  ;;  %vm11007_vm10 = vmor %vm2143_vm2, %vm2144_vm3  ;;  %7269 = vrcp.f32 %v10902_v5 }
 0x7c8   : > { %v3520_v18 = vunpack.c.l.b16 %v3336_v35  ;;  %v10949_v35 = vpop.f32.mrf.mxu3  ;;  %v1479_v42 = vsel %vm1476_vm12, %v1478_v14, %v1474_v59  ;;  %v2147_v59 = vand.u32 2147483647, %v13268_v22  ;;  %v13280_v14 = vld [vmem:[#allocation140_spill] sm:$0xff]  ;;  %vm3285_vm12 = vweird.f32 %v10729_v34 }
 0x7c9   : > { %13275 = vst [vmem:[#allocation45_spill] sm:$0xff] %v10949_v35  ;;  %vm11019_vm11 = vmor %vm3285_vm12, %vm3286_vm8  ;;  %v3289_v22 = vand.u32 2147483647, %v10729_v34  ;;  %v2136_v8 = vor.u32 1.1754944e-38, %v2135_v45  ;;  %7271 = vrcp.f32 %v10840_v30 }
 0x7ca   : > { %v3530_v58 = vpack.c.b16 %v3521_v54, %v3520_v18  ;;  %v3282_v54 = vsub.f32 1.0, %v3281_v17  ;;  %v10951_v18 = vpop.eup %7265  ;;  %vm2148_vm1 = vcmp.eq.f32.partialorder %v2147_v59, 8.507059e+37  ;;  %v13294_v59 = vld [vmem:[#allocation109_spill] sm:$0xff]  ;;  %7273 = vrcp.f32 %v10889_v25 }
 0x7cb   : > { %v10954_v24 = vpop.eup %7267  ;;  %v2717_v17 = vmul.f32 %v10951_v18, %v13271_v2  ;;  %7275 = vrcp.f32 %v10837_v19 }
 0x7cc   : > { %v3283_v63 = vmul.f32 %v10915_v32, %v3282_v54  ;;  %v2703_v56 = vmul.f32 %v10954_v24, %v13272_v41  ;;  %vm2708_vm8 = vweird.f32 %v10954_v24  ;;  %7277 = vrcp.f32 %v10935_v48 }
 0x7ce   : > { %v3284_v12 = vadd.f32 %v10915_v32, %v3283_v63  ;;  %v3305_v63 = vand.u32 2147483648, %v10720_v61  ;;  %v2704_v9 = vsub.f32 1.0, %v2703_v56  ;;  %v13292_v56 = vld [vmem:[#allocation91_spill] sm:$0xff] }
 0x7cf   : > { %4397 = vadd.xlane.f32.xlu1 %v13266_v27  ;;  %v2140_v27 = vsub.f32 1.0, %v2139_v60  ;;  %v3297_v60 = vmul.f32 %v10919_v3, %v3296_v33  ;;  %v1488_v33 = vsel %vm10978_vm6, %v10904_v26, %v1484_v47  ;;  %v3303_v47 = vand.u32 2147483647, %v10720_v61 }
 0x7d0   : > { %v11015_v35 = vpop.f32.mrf.mxu3  ;;  %v2150_v61 = vor.u32 1.1754944e-38, %v2149_v11  ;;  %v1560_v11 = vmul.f32 %v1479_v42, %v13292_v56  ;;  %vm2722_vm6 = vweird.f32 %v10951_v18 }
 0x7d1   : > { %v2141_v36 = vmul.f32 %v10912_v16, %v2140_v27  ;;  %v10988_v27 = vpop.xlane.xlu1 %5551  ;;  %v3298_v54 = vadd.f32 %v10919_v3, %v3297_v60  ;;  %v2133_v60 = vand.u32 2147483647, %v13267_v52  ;;  %13285 = vst [vmem:[#allocation78_spill] sm:$0xff] %v11015_v35  ;;  %vm3304_vm2 = vcmp.eq.f32.partialorder %v3303_v47, 8.507059e+37 }
 0x7d2   : > { %v2705_v35 = vmul.f32 %v10954_v24, %v2704_v9  ;;  %v13297_v9 = vld [vmem:[#allocation82_spill] sm:$0xff]  ;;  %v1576_v47 = vpack.c.bf16 %v1560_v11, %v1560_v11  ;;  %v11089_v11 = vpop.eup %7269  ;;  %7279 = vrcp.f32 %v10988_v27 }
 0x7d3   : > { %vm2134_vm3 = vcmp.eq.f32.partialorder %v2133_v60, 8.507059e+37  ;;  %v13296_v60 = vld [vmem:[#allocation137_spill] sm:$0xff] }
 0x7d7   : > { %4399 = vadd.xlane.f32.xlu1 %v13270_v15  ;;  %v2127_v15 = vmul.f32 %v10908_v40, %v2126_v39  ;;  %v2142_v39 = vadd.f32 %v10912_v16, %v2141_v36  ;;  %v2718_v36 = vsub.f32 1.0, %v2717_v17 }
 0x7d9   : > { %v2128_v62 = vadd.f32 %v10908_v40, %v2127_v15  ;;  %v2146_v52 = vsel %vm11007_vm10, %v10912_v16, %v2142_v39  ;;  %v3302_v16 = vsel %vm11034_vm15, %v10919_v3, %v3298_v54  ;;  %v2719_v45 = vmul.f32 %v10951_v18, %v2718_v36 }
 0x7da   : > { %v3306_v39 = vor.u32 1.1754944e-38, %v3305_v63  ;;  %v11063_v63 = vpop.xlane.xlu0 %4391  ;;  %vm2707_vm10 = vweird.f32 %v13272_v41  ;;  %vm5104_vm15 = vweird.f32 %v11089_v11 }
 0x7db   : > { %3544 = vrot.lane.b32.xlu2 %v3530_v58, %s7645_s14  ;;  %v2132_v17 = vsel %vm10995_vm9, %v10908_v40, %v2128_v62  ;;  %v3288_v40 = vsel %vm11019_vm11, %v10915_v32, %v3284_v12  ;;  %v2151_v58 = vsel %vm2148_vm1, %v2150_v61, %v2146_v52  ;;  %v2720_v15 = vadd.f32 %v10951_v18, %v2719_v45  ;;  %vm11093_vm12 = vmor %vm2707_vm10, %vm2708_vm8 }
 0x7dc   : > { %v3307_v12 = vsel %vm3304_vm2, %v3306_v39, %v3302_v16  ;;  %v2137_v3 = vsel %vm2134_vm3, %v2136_v8, %v2132_v17  ;;  %v2167_v54 = vmul.f32 %v2151_v58, %v13294_v59  ;;  %v13298_v17 = vld [vmem:[#allocation107_spill] sm:$0xff]  ;;  %v2727_v52 = vand.u32 2147483648, %v13271_v2  ;;  %v11098_v59 = vpop.eup %7271 }
 0x7dd   : > { %v2166_v8 = vmul.f32 %v2137_v3, %v13298_v17  ;;  %vm2721_vm9 = vweird.f32 %v13271_v2  ;;  %v2725_v61 = vand.u32 2147483647, %v13271_v2  ;;  %v2713_v45 = vand.u32 2147483648, %v13272_v41  ;;  %v13304_v3 = vld [vmem:[#allocation93_spill] sm:$0xff]  ;;  %v13305_v17 = vld [vmem:[#allocation54_spill] sm:$0xff] }
 0x7de   : > { %v2183_v16 = vpack.c.bf16 %v2167_v54, %v2167_v54  ;;  %vm11078_vm4 = vmor %vm2721_vm9, %vm2722_vm6  ;;  %v11106_v54 = vld [vmem:[%s12745_s6] ss:$0 sm:$0xff]  ;;  %vm5090_vm1 = vweird.f32 %v11098_v59  ;;  %vm5089_vm3 = vweird.f32 %v10840_v30 }
 0x7df   : > { %4983 = vadd.xlane.f32.xlu1 %v10172_v31  ;;  %v1492_v31 = vor.u32 1.1754944e-38, %v1491_v38  ;;  %v10985_v38 = vpop.f32.mrf.mxu1  ;;  %v2724_v2 = vsel %vm11078_vm4, %v10951_v18, %v2720_v15  ;;  %vm2726_vm11 = vcmp.eq.f32.partialorder %v2725_v61, 8.507059e+37  ;;  %vm11161_vm6 = vmor %vm5089_vm3, %vm5090_vm1 }
 0x7e7   : > { %4985 = vadd.xlane.f32.xlu1 %v13280_v14  ;;  %v3291_v14 = vand.u32 2147483648, %v10729_v34  ;;  %v1493_v34 = vsel %vm10957_vm13, %v1492_v31, %v1488_v33  ;;  %vm3290_vm13 = vcmp.eq.f32.partialorder %v3289_v22, 8.507059e+37  ;;  %v13293_v33 = vld [vmem:[#allocation139_spill] sm:$0xff]  ;;  %v11057_v36 = vpop.f32.mrf.mxu1  ;;  %v3323_v22 = vmul.f32 %v3307_v12, %v13297_v9 }
 0x7e8   : > { %13295 = vst [vmem:[#allocation79_spill] sm:$0xff] %v11057_v36 }
 0x7e9   : > { %v3292_v62 = vor.u32 1.1754944e-38, %v3291_v14  ;;  %v11060_v14 = vpop.xlane.xlu1 %4389 }
 0x7eb   : > { %5559 = vadd.xlane.f32.xlu0 %v13290_v23  ;;  %v13291_v23 = vld [vmem:[#allocation94_spill] sm:$0xff]  ;;  %v3293_v32 = vsel %vm3290_vm13, %v3292_v62, %v3288_v40  ;;  %v11073_v40 = vpop.f32.mrf.mxu3  ;;  %v5099_v62 = vmul.f32 %v11089_v11, %v10902_v5  ;;  %vm5103_vm13 = vweird.f32 %v10902_v5 }
 0x7ec   : > { %v1561_v31 = vmul.f32 %v1493_v34, %v13291_v23  ;;  %v3322_v26 = vmul.f32 %v3293_v32, %v13296_v60  ;;  %v2706_v34 = vadd.f32 %v10954_v24, %v2705_v35  ;;  %13299 = vst [vmem:[#allocation130_spill] sm:$0xff] %v11073_v40  ;;  %v3339_v23 = vpack.c.bf16 %v3323_v22, %v3323_v22  ;;  %vm11151_vm2 = vmor %vm5103_vm13, %vm5104_vm15 }
 0x7ed   : > { %v11048_v13 = vpop.xlane.xlu2 %4975  ;;  %v3366_v32 = vunpack.c.l.b16 %v1576_v47  ;;  %v3411_v47 = vunpack.c.l.b16 %v2183_v16  ;;  %v13307_v16 = vld [vmem:[#allocation75_spill] sm:$0xff] }
 0x7ee   : > { %v1577_v42 = vpack.c.bf16 %v1561_v31, %v1561_v31  ;;  %v3338_v58 = vpack.c.bf16 %v3322_v26, %v3322_v26  ;;  %v2711_v31 = vand.u32 2147483647, %v13272_v41  ;;  %v2182_v41 = vpack.c.bf16 %v2166_v8, %v2166_v8 }
 0x7ef   : > { %5561 = vadd.xlane.f32.xlu1 %v13293_v33  ;;  %v2728_v33 = vor.u32 1.1754944e-38, %v2727_v52  ;;  %v2710_v18 = vsel %vm11093_vm12, %v10954_v24, %v2706_v34  ;;  %v11111_v22 = vunpack.c.l.b16 %v3339_v23  ;;  %v3487_v52 = vpop.permute.xlu0 %3486  ;;  %v11115_v61 = vpop.f32.mrf.mxu1  ;;  %vm4511_vm12 = vweird.f32 %v10889_v25 }
 0x7f0   : > { %v3367_v56 = vunpack.c.l.b16 %v1577_v42  ;;  %v2714_v42 = vor.u32 1.1754944e-38, %v2713_v45  ;;  %v11109_v9 = vunpack.c.l.b16 %v3338_v58  ;;  %vm2712_vm14 = vcmp.eq.f32.partialorder %v2711_v31, 8.507059e+37  ;;  %13306 = vst [vmem:[#allocation127_spill] sm:$0xff] %v11115_v61 }
 0x7f1   : > { %v2729_v60 = vsel %vm2726_vm11, %v2728_v33, %v2724_v2  ;;  %v3431_v26 = vpop.permute.xlu1 %3430  ;;  %v5085_v45 = vmul.f32 %v11098_v59, %v10840_v30  ;;  %v3410_v23 = vunpack.c.l.b16 %v2182_v41 }
 0x7f2   : > { %v2745_v8 = vmul.f32 %v2729_v60, %v13305_v17  ;;  %v3377_v24 = vpack.c.b16 %v3367_v56, %v3366_v32  ;;  %v2715_v34 = vsel %vm2712_vm14, %v2714_v42, %v2710_v18  ;;  %v3531_v58 = vpack.c.b16 %v11111_v22, %v11109_v9  ;;  %v13309_v42 = vld [vmem:[#allocation27_spill] sm:$0xff]  ;;  %v13322_v22 = vld [vmem:[#allocation92_spill] sm:$0xff] }
 0x7f3   : > { %v2744_v31 = vmul.f32 %v2715_v34, %v13307_v16  ;;  %v3419_v12 = vpack.c.b16 %v3411_v47, %v3410_v23  ;;  %v5100_v18 = vsub.f32 1.0, %v5099_v62  ;;  %vm4525_vm14 = vweird.f32 %v10837_v19 }
 0x7f4   : > { %v3565_v2 = vsel %vm1059_vm0, %v3377_v24, %v3431_v26  ;;  %v2761_v33 = vpack.c.bf16 %v2745_v8, %v2745_v8 }
 0x7f5   : > { %v11082_v39 = vpop.xlane.xlu2 %5553  ;;  %v3584_v56 = vsel %vm3572_vm5, %v3565_v2, %v3487_v52  ;;  %v2760_v41 = vpack.c.bf16 %v2744_v31, %v2744_v31  ;;  %v5101_v47 = vmul.f32 %v11089_v11, %v5100_v18  ;;  %v13310_v52 = vld [vmem:[#allocation48_spill] sm:$0xff]  ;;  %v13312_v31 = vld [vmem:[#allocation123_spill] sm:$0xff]  ;;  %v5109_v2 = vand.u32 2147483648, %v10902_v5 }
 0x7f6   : > { %v3467_v26 = vunpack.c.l.b16 %v2761_v33  ;;  %v5107_v33 = vand.u32 2147483647, %v10902_v5 }
 0x7f7   : > { %3819 = vadd.xlane.f32.xlu1 %v13304_v3  ;;  %v6282_v35 = vpop.f32.mrf.mxu2  ;;  %v11126_v3 = vpop.f32.mrf.mxu3  ;;  %v3466_v24 = vunpack.c.l.b16 %v2760_v41  ;;  %v5102_v23 = vadd.f32 %v11089_v11, %v5101_v47 }
 0x7f8   : > { %v6283_v15 = vadd.f32 %v11106_v54, %v6282_v35  ;;  %13308 = vst [vmem:[#allocation36_spill] sm:$0xff] %v11126_v3  ;;  %v11138_v34 = vpop.f32.mrf.mxu1  ;;  %vm5108_vm8 = vcmp.eq.f32.partialorder %v5107_v33, 8.507059e+37 }
 0x7f9   : > { %13311 = vst [vmem:[#allocation132_spill] sm:$0xff] %v11138_v34  ;;  %v3475_v62 = vpack.c.b16 %v3467_v26, %v3466_v24  ;;  %v13318_v26 = vld [vmem:[#allocation23_spill] sm:$0xff] }
 0x7fa   : > { %6353 = vst [vmem:[%s10559_s12 + $0x30] sm:$0xff] %v6283_v15  ;;  %v5086_v15 = vsub.f32 1.0, %v5085_v45  ;;  %7281 = vrcp.f32 %v13318_v26  ;;  %vm1499_vm1 = vweird.f32 %v13318_v26 }
 0x7fc   : > { %v5087_v8 = vmul.f32 %v11098_v59, %v5086_v15 }
 0x7fd   : > { %v3543_v32 = vpop.permute.xlu2 %3542 }
 0x7fe   : > { %v3606_v35 = vsel %vm3589_vm7, %v3584_v56, %v3543_v32  ;;  %v5088_v16 = vadd.f32 %v11098_v59, %v5087_v8  ;;  %v5095_v56 = vand.u32 2147483648, %v10840_v30  ;;  %v11149_v32 = vpop.eup %7273  ;;  %v13320_v8 = vld [vmem:[#allocation32_spill] sm:$0xff] }
 0x7ff   : > { %4403 = vadd.xlane.f32.xlu1 %v13309_v42  ;;  %v6284_v60 = vpop.f32.mrf.mxu2  ;;  %6291 = vmatmul.bf16.gmra.mxu2 %v3606_v35  ;;  %v5044_v45 = vpop.f32.mrf.mxu3  ;;  %v5093_v35 = vand.u32 2147483647, %v10840_v30  ;;  %v5106_v42 = vsel %vm11151_vm2, %v11089_v11, %v5102_v23  ;;  %v4507_v30 = vmul.f32 %v11149_v32, %v10889_v25  ;;  %7283 = vrcp.f32 %v13320_v8 }
 0x800   : > { %v6285_v17 = vadd.f32 %v11106_v54, %v6284_v60  ;;  %3434 = vrot.lane.b32.xlu0 %v3419_v12, %s7646_s17  ;;  %v11158_v18 = vpop.eup %7275  ;;  %v5092_v5 = vsel %vm11161_vm6, %v11098_v59, %v5088_v16  ;;  %v5110_v60 = vor.u32 1.1754944e-38, %v5109_v2  ;;  %v5096_v41 = vor.u32 1.1754944e-38, %v5095_v56  ;;  %v11176_v47 = vpop.f32.mrf.mxu1 }
 0x801   : > { %13319 = vst [vmem:[#allocation51_spill] sm:$0xff] %v11176_v47  ;;  %v4521_v11 = vmul.f32 %v11158_v18, %v10837_v19  ;;  %vm5094_vm9 = vcmp.eq.f32.partialorder %v5093_v35, 8.507059e+37  ;;  %v11184_v23 = vpop.eup %7277  ;;  %vm4512_vm4 = vweird.f32 %v11149_v32  ;;  %vm4526_vm10 = vweird.f32 %v11158_v18 }
 0x802   : > { %6354 = vst [vmem:[%s10559_s12 + $0x38] sm:$0xff] %v6285_v17  ;;  %v13317_v17 = vld [vmem:[#allocation138_spill] sm:$0xff]  ;;  %v5111_v24 = vsel %vm5108_vm8, %v5110_v60, %v5106_v42  ;;  %v5097_v59 = vsel %vm5094_vm9, %v5096_v41, %v5092_v5  ;;  %v11190_v2 = vpop.eup %7279  ;;  %vm11226_vm11 = vmor %vm4511_vm12, %vm4512_vm4  ;;  %vm5668_vm2 = vweird.f32 %v11184_v23  ;;  %vm5667_vm8 = vweird.f32 %v10935_v48 }
 0x803   : > { %v4522_v56 = vsub.f32 1.0, %v4521_v11  ;;  %v5308_v12 = vmul.f32 %v5097_v59, %v5044_v45  ;;  %v11192_v35 = vpop.eup %7281  ;;  %v5677_v9 = vmul.f32 %v11190_v2, %v10988_v27  ;;  %v13324_v59 = vld [vmem:[#allocation38_spill] sm:$0xff]  ;;  %vm11237_vm15 = vmor %vm4525_vm14, %vm4526_vm10  ;;  %vm5682_vm6 = vweird.f32 %v11190_v2 }
 0x804   : > { %3817 = vadd.xlane.f32.xlu2 %v13310_v52  ;;  %v11181_v52 = vpop.xlane.xlu1 %4977  ;;  %vm1513_vm9 = vweird.f32 %v13320_v8  ;;  %vm11258_vm4 = vmor %vm5667_vm8, %vm5668_vm2  ;;  %vm5681_vm10 = vweird.f32 %v10988_v27  ;;  %vm1500_vm12 = vweird.f32 %v11192_v35  ;;  %7285 = vrcp.f32 %v11060_v14 }
 0x805   : > { %v5324_v15 = vpack.c.bf16 %v5308_v12, %v5308_v12  ;;  %v11194_v5 = vpop.eup %7283  ;;  %vm11269_vm14 = vmor %vm5681_vm10, %vm5682_vm6  ;;  %7287 = vrcp.f32 %v11063_v63 }
 0x806   : > { %v1509_v11 = vmul.f32 %v11194_v5, %v13320_v8  ;;  %vm11289_vm2 = vmor %vm1499_vm1, %vm1500_vm12  ;;  %7289 = vrcp.f32 %v11181_v52 }
 0x807   : > { %4989 = vadd.xlane.f32.xlu1 %v13312_v31  ;;  %v5046_v16 = vpop.f32.mrf.mxu3  ;;  %v4508_v31 = vsub.f32 1.0, %v4507_v30  ;;  %v5663_v30 = vmul.f32 %v11184_v23, %v10935_v48  ;;  %v11203_v45 = vunpack.c.l.b16 %v5324_v15  ;;  %7291 = vrcp.f32 %v11048_v13 }
 0x808   : > { %3490 = vrot.lane.b32.xlu0 %v3475_v62, %s7647_s18  ;;  %v13321_v62 = vld [vmem:[#allocation47_spill] sm:$0xff]  ;;  %v5309_v33 = vmul.f32 %v5111_v24, %v5046_v16  ;;  %v11211_v24 = vpop.f32.mrf.mxu1 }
 0x809   : > { %v4509_v60 = vmul.f32 %v11149_v32, %v4508_v31  ;;  %13323 = vst [vmem:[#allocation135_spill] sm:$0xff] %v11211_v24  ;;  %v5664_v31 = vsub.f32 1.0, %v5663_v30  ;;  %v4529_v30 = vand.u32 2147483647, %v10837_v19 }
 0x80a   : > { %v5325_v42 = vpack.c.bf16 %v5309_v33, %v5309_v33  ;;  %v4517_v33 = vand.u32 2147483648, %v10889_v25 }
 0x80b   : > { %v4510_v16 = vadd.f32 %v11149_v32, %v4509_v60  ;;  %v1510_v60 = vsub.f32 1.0, %v1509_v11  ;;  %v13329_v11 = vld [vmem:[#allocation125_spill] sm:$0xff]  ;;  %vm4530_vm3 = vcmp.eq.f32.partialorder %v4529_v30, 8.507059e+37 }
 0x80c   : > { %5563 = vadd.xlane.f32.xlu2 %v13317_v17  ;;  %v11205_v41 = vunpack.c.l.b16 %v5325_v42  ;;  %v1495_v17 = vmul.f32 %v11192_v35, %v13318_v26  ;;  %v11218_v12 = vpop.xlane.xlu1 %4393  ;;  %v4518_v3 = vor.u32 1.1754944e-38, %v4517_v33 }
 0x80e   : > { %v1496_v42 = vsub.f32 1.0, %v1495_v17 }
 0x80f   : > { %5565 = vadd.xlane.f32.xlu1 %v13321_v62 }
 0x810   : > { %3546 = vrot.lane.b32.xlu0 %v3531_v58, %s7645_s14  ;;  %v4523_v58 = vmul.f32 %v11158_v18, %v4522_v56  ;;  %v5678_v56 = vsub.f32 1.0, %v5677_v9  ;;  %v4514_v9 = vsel %vm11226_vm11, %v11149_v32, %v4510_v16  ;;  %v1505_v32 = vand.u32 2147483648, %v13318_v26 }
 0x811   : > { %v1511_v16 = vmul.f32 %v11194_v5, %v1510_v60  ;;  %vm1514_vm11 = vweird.f32 %v11194_v5 }
 0x812   : > { %v4524_v15 = vadd.f32 %v11158_v18, %v4523_v58  ;;  %v5665_v58 = vmul.f32 %v11184_v23, %v5664_v31  ;;  %v5679_v17 = vmul.f32 %v11190_v2, %v5678_v56  ;;  %v5622_v31 = vpop.f32.mrf.mxu1 }
 0x814   : > { %3821 = vadd.xlane.f32.xlu2 %v13322_v22  ;;  %v4515_v22 = vand.u32 2147483647, %v10889_v25  ;;  %v4528_v40 = vsel %vm11237_vm15, %v11158_v18, %v4524_v15  ;;  %v5666_v33 = vadd.f32 %v11184_v23, %v5665_v58  ;;  %v5680_v25 = vadd.f32 %v11190_v2, %v5679_v17  ;;  %v11265_v60 = vpop.xlane.xlu1 %4395  ;;  %v13335_v17 = vld [vmem:[#allocation131_spill] sm:$0xff] }
 0x815   : > { %v1503_v15 = vand.u32 2147483647, %v13318_v26 }
 0x816   : > { %vm4516_vm13 = vcmp.eq.f32.partialorder %v4515_v22, 8.507059e+37  ;;  %v5687_v22 = vand.u32 2147483648, %v10988_v27  ;;  %v5684_v1 = vsel %vm11269_vm14, %v11190_v2, %v5680_v25 }
 0x817   : > { %5567 = vadd.xlane.f32.xlu1 %v13324_v59  ;;  %v4531_v59 = vand.u32 2147483648, %v10837_v19  ;;  %v1497_v19 = vmul.f32 %v11192_v35, %v1496_v42  ;;  %v4519_v56 = vsel %vm4516_vm13, %v4518_v3, %v4514_v9  ;;  %v5673_v42 = vand.u32 2147483648, %v10935_v48  ;;  %v13334_v9 = vld [vmem:[#allocation59_spill] sm:$0xff] }
 0x818   : > { %v4730_v58 = vmul.f32 %v4519_v56, %v13334_v9  ;;  %v5688_v24 = vor.u32 1.1754944e-38, %v5687_v22  ;;  %v1517_v56 = vand.u32 2147483647, %v13320_v8  ;;  %v11301_v22 = vpop.xlane.xlu0 %5555  ;;  %vm1504_vm1 = vcmp.eq.f32.partialorder %v1503_v15, 8.507059e+37 }
 0x819   : > { %v4532_v62 = vor.u32 1.1754944e-38, %v4531_v59  ;;  %v5671_v59 = vand.u32 2147483647, %v10935_v48  ;;  %v1498_v48 = vadd.f32 %v11192_v35, %v1497_v19  ;;  %v5674_v44 = vor.u32 1.1754944e-38, %v5673_v42 }
 0x81a   : > { %v4746_v47 = vpack.c.bf16 %v4730_v58, %v4730_v58  ;;  %v5624_v26 = vpop.f32.mrf.mxu1  ;;  %vm1518_vm6 = vcmp.eq.f32.partialorder %v1517_v56, 8.507059e+37 }
 0x81b   : > { %v4533_v18 = vsel %vm4530_vm3, %v4532_v62, %v4528_v40  ;;  %v5685_v40 = vand.u32 2147483647, %v10988_v27  ;;  %v1512_v62 = vadd.f32 %v11194_v5, %v1511_v16  ;;  %v5670_v27 = vsel %vm11258_vm4, %v11184_v23, %v5666_v33  ;;  %vm1515_vm3 = vmor %vm1513_vm9, %vm1514_vm11 }
 0x81c   : > { %4987 = vadd.xlane.f32.xlu2 %v13329_v11  ;;  %v4731_v11 = vmul.f32 %v4533_v18, %v13335_v17  ;;  %v1519_v18 = vand.u32 2147483648, %v13320_v8  ;;  %vm5672_vm15 = vcmp.eq.f32.partialorder %v5671_v59, 8.507059e+37  ;;  %v5974_v16 = vunpack.c.l.b16 %v4746_v47 }
 0x81d   : > { %vm5686_vm13 = vcmp.eq.f32.partialorder %v5685_v40, 8.507059e+37  ;;  %v5675_v19 = vsel %vm5672_vm15, %v5674_v44, %v5670_v27  ;;  %v1502_v25 = vsel %vm11289_vm2, %v11192_v35, %v1498_v48  ;;  %v1516_v42 = vsel %vm1515_vm3, %v11194_v5, %v1512_v62  ;;  %v13338_v35 = vld [vmem:[#allocation100_spill] sm:$0xff]  ;;  %v13339_v5 = vld [vmem:[#allocation103_spill] sm:$0xff] }
 0x81e   : > { %v4747_v34 = vpack.c.bf16 %v4731_v11, %v4731_v11  ;;  %v5689_v2 = vsel %vm5686_vm13, %v5688_v24, %v5684_v1  ;;  %v1506_v59 = vor.u32 1.1754944e-38, %v1505_v32  ;;  %v1520_v44 = vor.u32 1.1754944e-38, %v1519_v18  ;;  %v3433_v1 = vpop.permute.xlu1 %3432 }
 0x81f   : > { %v5886_v47 = vmul.f32 %v5675_v19, %v5622_v31  ;;  %v13340_v32 = vpack.c.b16 %v11205_v41, %v11203_v45  ;;  %v13341_v41 = vld [vmem:[#allocation30_spill] sm:$0xff]  ;;  %vm4539_vm9 = vweird.f32 %v11060_v14  ;;  %vm4553_vm11 = vweird.f32 %v11063_v63 }
 0x820   : > { %v5975_v33 = vunpack.c.l.b16 %v4747_v34  ;;  %v5887_v34 = vmul.f32 %v5689_v2, %v5624_v26  ;;  %v1507_v24 = vsel %vm1504_vm1, %v1506_v59, %v1502_v25  ;;  %v1521_v8 = vsel %vm1518_vm6, %v1520_v44, %v1516_v42  ;;  %v11311_v27 = vpop.xlane.xlu0 %4981  ;;  %v7286_v25 = vpop.eup %7285 }
 0x821   : > { %v5902_v40 = vpack.c.bf16 %v5886_v47, %v5886_v47  ;;  %v1562_v17 = vmul.f32 %v1507_v24, %v13338_v35  ;;  %v1563_v11 = vmul.f32 %v1521_v8, %v13339_v5  ;;  %v4535_v44 = vmul.f32 %v7286_v25, %v11060_v14  ;;  %v7288_v47 = vpop.eup %7287  ;;  %v13342_v24 = vld [vmem:[#allocation101_spill] sm:$0xff] }
 0x822   : > { %v5990_v3 = vpack.c.b16 %v5975_v33, %v5974_v16  ;;  %v5903_v30 = vpack.c.bf16 %v5887_v34, %v5887_v34  ;;  %v11336_v35 = vpop.eup %7289  ;;  %vm4540_vm8 = vweird.f32 %v7286_v25  ;;  %vm4554_vm10 = vweird.f32 %v7288_v47 }
 0x823   : > { %v6086_v9 = vunpack.c.l.b16 %v5902_v40  ;;  %v1578_v15 = vpack.c.bf16 %v1562_v17, %v1562_v17  ;;  %v1579_v62 = vpack.c.bf16 %v1563_v11, %v1563_v11  ;;  %v13343_v17 = vld [vmem:[#allocation115_spill] sm:$0xff]  ;;  %v11341_v11 = vpop.eup %7291  ;;  %vm4541_vm4 = vmor %vm4539_vm9, %vm4540_vm8  ;;  %vm5132_vm13 = vweird.f32 %v11336_v35 }
 0x824   : > { %v6087_v58 = vunpack.c.l.b16 %v5903_v30  ;;  %v4536_v30 = vsub.f32 1.0, %v4535_v44  ;;  %vm4555_vm14 = vmor %vm4553_vm11, %vm4554_vm10  ;;  %v13346_v44 = vld [vmem:[#allocation40_spill] sm:$0xff]  ;;  %vm5118_vm2 = vweird.f32 %v11341_v11  ;;  %vm5131_vm3 = vweird.f32 %v11181_v52 }
 0x825   : > { %v3368_v18 = vunpack.c.l.b16 %v1578_v15  ;;  %v3369_v23 = vunpack.c.l.b16 %v1579_v62  ;;  %v4545_v15 = vand.u32 2147483648, %v11060_v14  ;;  %v5127_v62 = vmul.f32 %v11336_v35, %v11181_v52  ;;  %vm11377_vm1 = vmor %vm5131_vm3, %vm5132_vm13 }
 0x826   : > { %v6102_v48 = vpack.c.b16 %v6087_v58, %v6086_v9  ;;  %v4549_v9 = vmul.f32 %v7288_v47, %v11063_v63  ;;  %vm5117_vm6 = vweird.f32 %v11048_v13  ;;  %v5165_v36 = vand.u32 2147483648, %v11311_v27 }
 0x827   : > { %v3378_v16 = vpack.c.b16 %v3369_v23, %v3368_v18  ;;  %v4543_v18 = vand.u32 2147483647, %v11060_v14  ;;  %v5113_v23 = vmul.f32 %v11341_v11, %v11048_v13  ;;  %v13345_v14 = vld [vmem:[#allocation116_spill] sm:$0xff]  ;;  %vm11391_vm8 = vmor %vm5117_vm6, %vm5118_vm2 }
 0x828   : > { %v4550_v58 = vsub.f32 1.0, %v4549_v9  ;;  %v13347_v9 = vld [vmem:[#allocation31_spill] sm:$0xff] }
 0x829   : > { %v3568_v42 = vsel %vm1059_vm0, %v3378_v16, %v3433_v1  ;;  %v4537_v1 = vmul.f32 %v7286_v25, %v4536_v30  ;;  %v4546_v16 = vor.u32 1.1754944e-38, %v4545_v15  ;;  %vm4544_vm12 = vcmp.eq.f32.partialorder %v4543_v18, 8.507059e+37  ;;  %v13348_v15 = vld [vmem:[#allocation55_spill] sm:$0xff]  ;;  %v13350_v18 = vld [vmem:[#allocation53_spill] sm:$0xff] }
 0x830   : > { %6054 = vrot.lane.b32.xlu1 %v13340_v32, %s7647_s18  ;;  %v4538_v32 = vadd.f32 %v7286_v25, %v4537_v1 }
 0x832   : > { %v11309_v31 = vpop.xlane.xlu1 %5557 }
 0x833   : > { %v3489_v33 = vpop.permute.xlu0 %3488 }
 0x834   : > { %5998 = vrot.lane.b32.xlu2 %v5990_v3, %s7646_s17  ;;  %v3586_v26 = vsel %vm3572_vm5, %v3568_v42, %v3489_v33  ;;  %v4559_v33 = vand.u32 2147483648, %v11063_v63  ;;  %v5128_v42 = vsub.f32 1.0, %v5127_v62  ;;  %v13349_v62 = vld [vmem:[#allocation58_spill] sm:$0xff] }
 0x836   : > { %v11314_v56 = vpop.xlane.xlu2 %4979 }
 0x839   : > { %v6287_v19 = vpop.f32.mrf.mxu2 }
 0x83a   : > { %v6288_v45 = vadd.f32 %v11106_v54, %v6287_v19  ;;  %4401 = vadd.xlane.f32.xlu0 %v13341_v41  ;;  %v11319_v2 = vpop.xlane.xlu1 %3815  ;;  %v4542_v19 = vsel %vm4541_vm4, %v7286_v25, %v4538_v32  ;;  %v13344_v41 = vld [vmem:[#allocation21_spill] sm:$0xff] }
 0x83b   : > { %7293 = vrcp.f32 %v13344_v41  ;;  %vm1527_vm10 = vweird.f32 %v13344_v41 }
 0x83c   : > { %6355 = vst [vmem:[%s10559_s12 + $0x40] sm:$0xff] %v6288_v45  ;;  %6110 = vrot.lane.b32.xlu2 %v6102_v48, %s7645_s14  ;;  %v4551_v48 = vmul.f32 %v7288_v47, %v4550_v58  ;;  %7295 = vrcp.f32 %v13346_v44 }
 0x83d   : > { %7297 = vrcp.f32 %v11082_v39 }
 0x83e   : > { %v3545_v3 = vpop.permute.xlu2 %3544  ;;  %v4552_v45 = vadd.f32 %v7288_v47, %v4551_v48  ;;  %7299 = vrcp.f32 %v11301_v22 }
 0x83f   : > { %v3609_v59 = vsel %vm3589_vm7, %v3586_v26, %v3545_v3  ;;  %v4557_v26 = vand.u32 2147483647, %v11063_v63  ;;  %v5114_v3 = vsub.f32 1.0, %v5113_v23  ;;  %7301 = vrcp.f32 %v11218_v12 }
 0x840   : > { %6296 = vmatmul.bf16.gmra.mxu2 %v3609_v59  ;;  %v4547_v59 = vsel %vm4544_vm12, %v4546_v16, %v4542_v19  ;;  %v4556_v25 = vsel %vm4555_vm14, %v7288_v47, %v4552_v45  ;;  %v5137_v16 = vand.u32 2147483648, %v11181_v52  ;;  %7303 = vrcp.f32 %v11265_v60 }
 0x841   : > { %v6289_v34 = vpop.f32.mrf.mxu2  ;;  %vm4558_vm15 = vcmp.eq.f32.partialorder %v4557_v26, 8.507059e+37  ;;  %v5115_v30 = vmul.f32 %v11341_v11, %v5114_v3  ;;  %v4732_v1 = vmul.f32 %v4547_v59, %v13347_v9  ;;  %v11361_v58 = vpop.eup %7293  ;;  %v5135_v26 = vand.u32 2147483647, %v11181_v52 }
 0x842   : > { %3823 = vadd.xlane.f32.xlu0 %v13342_v24  ;;  %v11329_v8 = vpop.xlane.xlu1 %4397  ;;  %v6290_v40 = vadd.f32 %v11106_v54, %v6289_v34  ;;  %v4560_v24 = vor.u32 1.1754944e-38, %v4559_v33  ;;  %v11365_v48 = vpop.eup %7295  ;;  %v1523_v45 = vmul.f32 %v11361_v58, %v13344_v41  ;;  %v5123_v33 = vand.u32 2147483648, %v11048_v13 }
 0x843   : > { %v5116_v47 = vadd.f32 %v11341_v11, %v5115_v30  ;;  %v4748_v19 = vpack.c.bf16 %v4732_v1, %v4732_v1  ;;  %v5121_v3 = vand.u32 2147483647, %v11048_v13  ;;  %v1537_v59 = vmul.f32 %v11365_v48, %v13346_v44 }
 0x844   : > { %6356 = vst [vmem:[%s10559_s12 + $0x48] sm:$0xff] %v6290_v40  ;;  %v5129_v40 = vmul.f32 %v11336_v35, %v5128_v42  ;;  %v4561_v63 = vsel %vm4558_vm15, %v4560_v24, %v4556_v25  ;;  %v5138_v9 = vor.u32 1.1754944e-38, %v5137_v16  ;;  %v1524_v1 = vsub.f32 1.0, %v1523_v45  ;;  %v13356_v45 = vld [vmem:[#allocation102_spill] sm:$0xff] }
 0x845   : > { %v4733_v23 = vmul.f32 %v4561_v63, %v13350_v18  ;;  %v5120_v13 = vsel %vm11391_vm8, %v11341_v11, %v5116_v47  ;;  %vm5136_vm9 = vcmp.eq.f32.partialorder %v5135_v26, 8.507059e+37  ;;  %vm5122_vm4 = vcmp.eq.f32.partialorder %v5121_v3, 8.507059e+37  ;;  %v13355_v18 = vld [vmem:[#allocation110_spill] sm:$0xff] }
 0x846   : > { %v5130_v32 = vadd.f32 %v11336_v35, %v5129_v40  ;;  %v5976_v40 = vunpack.c.l.b16 %v4748_v19  ;;  %v1525_v42 = vmul.f32 %v11361_v58, %v1524_v1  ;;  %vm1528_vm12 = vweird.f32 %v11361_v58 }
 0x847   : > { %v1533_v24 = vand.u32 2147483648, %v13344_v41  ;;  %vm1542_vm11 = vweird.f32 %v11365_v48  ;;  %vm11429_vm14 = vmor %vm1527_vm10, %vm1528_vm12  ;;  %vm1541_vm15 = vweird.f32 %v13346_v44  ;;  %7305 = vrcp.f32 %v11311_v27 }
 0x848   : > { %v5134_v25 = vsel %vm11377_vm1, %v11336_v35, %v5130_v32  ;;  %v5124_v35 = vor.u32 1.1754944e-38, %v5123_v33  ;;  %v1538_v32 = vsub.f32 1.0, %v1537_v59  ;;  %vm1543_vm13 = vmor %vm1541_vm15, %vm1542_vm11  ;;  %vm5695_vm8 = vweird.f32 %v11082_v39 }
 0x849   : > { %7307 = vrcp.f32 %v11314_v56 }
 0x84a   : > { %4405 = vadd.xlane.f32.xlu0 %v13343_v17  ;;  %v11339_v5 = vpop.xlane.xlu1 %4399  ;;  %v5049_v17 = vpop.f32.mrf.mxu3  ;;  %v1539_v16 = vmul.f32 %v11365_v48, %v1538_v32  ;;  %v13357_v32 = vld [vmem:[#allocation118_spill] sm:$0xff]  ;;  %7309 = vrcp.f32 %v11319_v2 }
 0x852   : > { %4407 = vadd.xlane.f32.xlu0 %v13345_v14  ;;  %v11356_v34 = vpop.xlane.xlu1 %4983  ;;  %v4749_v14 = vpack.c.bf16 %v4733_v23, %v4733_v23  ;;  %v11403_v23 = vpop.eup %7297 }
 0x853   : > { %v5051_v11 = vpop.f32.mrf.mxu3  ;;  %v11405_v47 = vpop.eup %7299  ;;  %v5691_v33 = vmul.f32 %v11403_v23, %v11082_v39  ;;  %vm5696_vm1 = vweird.f32 %v11403_v23 }
 0x854   : > { %v5977_v30 = vunpack.c.l.b16 %v4749_v14  ;;  %v5705_v26 = vmul.f32 %v11405_v47, %v11301_v22  ;;  %vm5710_vm6 = vweird.f32 %v11405_v47 }
 0x856   : > { %v5991_v63 = vpack.c.b16 %v5977_v30, %v5976_v40  ;;  %v1531_v30 = vand.u32 2147483647, %v13344_v41 }
 0x858   : > { %vm1532_vm2 = vcmp.eq.f32.partialorder %v1531_v30, 8.507059e+37 }
 0x85a   : > { %4993 = vadd.xlane.f32.xlu0 %v13348_v15  ;;  %4991 = vadd.xlane.f32.xlu1 %v13349_v62  ;;  %v11400_v52 = vpop.xlane.xlu1 %4985  ;;  %v5139_v15 = vsel %vm5136_vm9, %v5138_v9, %v5134_v25  ;;  %v5125_v62 = vsel %vm5122_vm4, %v5124_v35, %v5120_v13  ;;  %v1526_v25 = vadd.f32 %v11361_v58, %v1525_v42  ;;  %v1547_v9 = vand.u32 2147483648, %v13346_v44  ;;  %vm11467_vm9 = vmor %vm5695_vm8, %vm5696_vm1 }
 0x85b   : > { %v5310_v19 = vmul.f32 %v5125_v62, %v5049_v17  ;;  %v5311_v14 = vmul.f32 %v5139_v15, %v5051_v11  ;;  %v1540_v13 = vadd.f32 %v11365_v48, %v1539_v16  ;;  %v5692_v35 = vsub.f32 1.0, %v5691_v33 }
 0x85c   : > { %v5706_v11 = vsub.f32 1.0, %v5705_v26  ;;  %v1530_v41 = vsel %vm11429_vm14, %v11361_v58, %v1526_v25  ;;  %v5701_v62 = vand.u32 2147483648, %v11082_v39  ;;  %vm5709_vm4 = vweird.f32 %v11301_v22 }
 0x85d   : > { %v5326_v3 = vpack.c.bf16 %v5310_v19, %v5310_v19  ;;  %v5327_v59 = vpack.c.bf16 %v5311_v14, %v5311_v14  ;;  %v11438_v19 = vpop.eup %7301  ;;  %v1534_v14 = vor.u32 1.1754944e-38, %v1533_v24  ;;  %v1544_v16 = vsel %vm1543_vm13, %v11365_v48, %v1540_v13  ;;  %v5627_v24 = vpop.f32.mrf.mxu1  ;;  %v13361_v13 = vld [vmem:[#allocation34_spill] sm:$0xff]  ;;  %vm11478_vm10 = vmor %vm5709_vm4, %vm5710_vm6 }
 0x85e   : > { %v11426_v1 = vpop.xlane.xlu0 %5559  ;;  %v11442_v33 = vpop.eup %7303  ;;  %v5707_v58 = vmul.f32 %v11405_v47, %v5706_v11  ;;  %v4563_v25 = vmul.f32 %v11438_v19, %v11218_v12  ;;  %vm4567_vm14 = vweird.f32 %v11218_v12  ;;  %vm4568_vm15 = vweird.f32 %v11438_v19 }
 0x85f   : > { %v6032_v40 = vunpack.c.l.b16 %v5326_v3  ;;  %v6033_v15 = vunpack.c.l.b16 %v5327_v59  ;;  %v1548_v3 = vor.u32 1.1754944e-38, %v1547_v9  ;;  %v1535_v26 = vsel %vm1532_vm2, %v1534_v14, %v1530_v41 }
 0x860   : > { %v4577_v48 = vmul.f32 %v11442_v33, %v11265_v60  ;;  %v4564_v11 = vsub.f32 1.0, %v4563_v25  ;;  %v5699_v41 = vand.u32 2147483647, %v11082_v39  ;;  %v5715_v14 = vand.u32 2147483648, %v11301_v22 }
 0x861   : > { %v6047_v42 = vpack.c.b16 %v6033_v15, %v6032_v40  ;;  %v1564_v40 = vmul.f32 %v1535_v26, %v13361_v13  ;;  %vm4582_vm13 = vweird.f32 %v11442_v33  ;;  %vm4581_vm2 = vweird.f32 %v11265_v60 }
 0x862   : > { %3827 = vadd.xlane.f32.xlu1 %v13355_v18  ;;  %v11419_v17 = vpop.xlane.xlu1 %5561  ;;  %v1545_v18 = vand.u32 2147483647, %v13346_v44  ;;  %v5693_v44 = vmul.f32 %v11403_v23, %v5692_v35  ;;  %v13362_v35 = vld [vmem:[#allocation119_spill] sm:$0xff]  ;;  %vm5700_vm12 = vcmp.eq.f32.partialorder %v5699_v41, 8.507059e+37  ;;  %vm11532_vm1 = vmor %vm4581_vm2, %vm4582_vm13  ;;  %vm5159_vm4 = vweird.f32 %v11311_v27 }
 0x863   : > { %v1580_v26 = vpack.c.bf16 %v1564_v40, %v1564_v40  ;;  %v5716_v40 = vor.u32 1.1754944e-38, %v5715_v14  ;;  %v4571_v14 = vand.u32 2147483647, %v11218_v12 }
 0x864   : > { %vm1546_vm3 = vcmp.eq.f32.partialorder %v1545_v18, 8.507059e+37  ;;  %v5694_v30 = vadd.f32 %v11403_v23, %v5693_v44  ;;  %v5708_v18 = vadd.f32 %v11405_v47, %v5707_v58  ;;  %v13366_v44 = vld [vmem:[#allocation76_spill] sm:$0xff]  ;;  %v4587_v58 = vand.u32 2147483648, %v11265_v60 }
 0x865   : > { %3825 = vadd.xlane.f32.xlu2 %v13356_v45  ;;  %v13360_v45 = vld [vmem:[#allocation80_spill] sm:$0xff]  ;;  %v1549_v59 = vsel %vm1546_vm3, %v1548_v3, %v1544_v16  ;;  %v4578_v16 = vsub.f32 1.0, %v4577_v48  ;;  %v5713_v3 = vand.u32 2147483647, %v11301_v22  ;;  %v5702_v48 = vor.u32 1.1754944e-38, %v5701_v62  ;;  %vm11518_vm3 = vmor %vm4567_vm14, %vm4568_vm15 }
 0x866   : > { %v5698_v39 = vsel %vm11467_vm9, %v11403_v23, %v5694_v30  ;;  %v5712_v22 = vsel %vm11478_vm10, %v11405_v47, %v5708_v18  ;;  %v4565_v23 = vmul.f32 %v11438_v19, %v4564_v11  ;;  %v3370_v62 = vunpack.c.l.b16 %v1580_v26  ;;  %v5629_v11 = vpop.f32.mrf.mxu1 }
 0x867   : > { %v5703_v30 = vsel %vm5700_vm12, %v5702_v48, %v5698_v39  ;;  %vm5714_vm11 = vcmp.eq.f32.partialorder %v5713_v3, 8.507059e+37  ;;  %vm4572_vm6 = vcmp.eq.f32.partialorder %v4571_v14, 8.507059e+37  ;;  %vm5145_vm14 = vweird.f32 %v11314_v56 }
 0x868   : > { %v4566_v41 = vadd.f32 %v11438_v19, %v4565_v23 }
 0x86a   : > { %4409 = vadd.xlane.f32.xlu1 %v13357_v32  ;;  %v13363_v32 = vld [vmem:[#allocation112_spill] sm:$0xff] }
 0x86b   : > { %v1565_v15 = vmul.f32 %v1549_v59, %v13363_v32  ;;  %v11483_v59 = vpop.eup %7305 }
 0x86c   : > { %v5155_v32 = vmul.f32 %v11483_v59, %v11311_v27  ;;  %v11497_v47 = vpop.eup %7307  ;;  %vm5160_vm9 = vweird.f32 %v11483_v59 }
 0x86d   : > { %5569 = vadd.xlane.f32.xlu2 %v13360_v45  ;;  %v1581_v25 = vpack.c.bf16 %v1565_v15, %v1565_v15  ;;  %v5888_v45 = vmul.f32 %v5703_v30, %v5627_v24  ;;  %v11505_v3 = vpop.eup %7309  ;;  %v5141_v48 = vmul.f32 %v11497_v47, %v11314_v56  ;;  %vm11564_vm10 = vmor %vm5159_vm4, %vm5160_vm9  ;;  %vm5146_vm12 = vweird.f32 %v11497_v47 }
 0x86e   : > { %6000 = vrot.lane.b32.xlu0 %v5991_v63, %s7646_s17  ;;  %v11455_v63 = vpop.xlane.xlu1 %3819  ;;  %vm11579_vm15 = vmor %vm5145_vm14, %vm5146_vm12  ;;  %vm3910_vm13 = vweird.f32 %v11505_v3  ;;  %vm5723_vm14 = vweird.f32 %v11309_v31 }
 0x86f   : > { %v3371_v18 = vunpack.c.l.b16 %v1581_v25  ;;  %v5156_v25 = vsub.f32 1.0, %v5155_v32  ;;  %v4570_v32 = vsel %vm11518_vm3, %v11438_v19, %v4566_v41  ;;  %v5142_v19 = vsub.f32 1.0, %v5141_v48 }
 0x872   : > { %v11457_v9 = vpop.permute.xlu0 %3434  ;;  %4411 = vadd.xlane.f32.xlu1 %v13362_v35  ;;  %v5717_v35 = vsel %vm5714_vm11, %v5716_v40, %v5712_v22  ;;  %v4585_v22 = vand.u32 2147483647, %v11265_v60  ;;  %v3905_v60 = vmul.f32 %v11505_v3, %v11319_v2 }
 0x873   : > { %v5889_v26 = vmul.f32 %v5717_v35, %v5629_v11  ;;  %v3379_v35 = vpack.c.b16 %v3371_v18, %v3370_v62  ;;  %v4588_v18 = vor.u32 1.1754944e-38, %v4587_v58 }
 0x874   : > { %vm4586_vm8 = vcmp.eq.f32.partialorder %v4585_v22, 8.507059e+37 }
 0x875   : > { %5571 = vadd.xlane.f32.xlu2 %v13366_v44  ;;  %v5905_v30 = vpack.c.bf16 %v5889_v26, %v5889_v26  ;;  %v5157_v26 = vmul.f32 %v11483_v59, %v5156_v25  ;;  %v3571_v10 = vsel %vm1059_vm0, %v3379_v35, %v11457_v9  ;;  %v5143_v9 = vmul.f32 %v11497_v47, %v5142_v19  ;;  %v13381_v35 = vld [vmem:[#allocation117_spill] sm:$0xff] }
 0x876   : > { %6056 = vrot.lane.b32.xlu0 %v6047_v42, %s7647_s18  ;;  %v4579_v42 = vmul.f32 %v11442_v33, %v4578_v16  ;;  %v11503_v16 = vpop.xlane.xlu1 %4403 }
 0x877   : > { %v11489_v13 = vpop.xlane.xlu2 %3817  ;;  %v6089_v62 = vunpack.c.l.b16 %v5905_v30  ;;  %v5158_v48 = vadd.f32 %v11483_v59, %v5157_v26 }
 0x878   : > { %7311 = vrcp.f32 %v11489_v13  ;;  %v4580_v44 = vadd.f32 %v11442_v33, %v4579_v42  ;;  %v5904_v42 = vpack.c.bf16 %v5888_v45, %v5888_v45  ;;  %vm3923_vm2 = vweird.f32 %v11489_v13 }
 0x879   : > { %v3927_v19 = vand.u32 2147483647, %v11489_v13  ;;  %7313 = vrcp.f32 %v11309_v31 }
 0x87a   : > { %v3491_v15 = vpop.permute.xlu0 %3490  ;;  %4997 = vadd.xlane.f32.xlu1 %v10509_v28  ;;  %v4573_v28 = vand.u32 2147483648, %v11218_v12  ;;  %v4584_v45 = vsel %vm11532_vm1, %v11442_v33, %v4580_v44  ;;  %v6088_v14 = vunpack.c.l.b16 %v5904_v42  ;;  %v3906_v12 = vsub.f32 1.0, %v3905_v60  ;;  %v5054_v60 = vpop.f32.mrf.mxu3 }
 0x87b   : > { %v3588_v33 = vsel %vm3572_vm5, %v3571_v10, %v3491_v15  ;;  %vm3909_vm1 = vweird.f32 %v11319_v2  ;;  %7315 = vrcp.f32 %v11426_v1  ;;  %vm3928_vm9 = vcmp.eq.f32.partialorder %v3927_v19, 8.507059e+37 }
 0x87c   : > { %v4574_v11 = vor.u32 1.1754944e-38, %v4573_v28  ;;  %v4589_v28 = vsel %vm4586_vm8, %v4588_v18, %v4584_v45  ;;  %v6103_v25 = vpack.c.b16 %v6089_v62, %v6088_v14  ;;  %v3907_v30 = vmul.f32 %v11505_v3, %v3906_v12 }
 0x87d   : > { %v4735_v15 = vmul.f32 %v4589_v28, %v10547_v4  ;;  %v5162_v4 = vsel %vm11564_vm10, %v11483_v59, %v5158_v48  ;;  %v5149_v45 = vand.u32 2147483647, %v11314_v56  ;;  %v3929_v62 = vand.u32 2147483648, %v11489_v13 }
 0x87e   : > { %v11510_v39 = vpop.eup %7311  ;;  %v4575_v61 = vsel %vm4572_vm6, %v4574_v11, %v4570_v32  ;;  %v5166_v32 = vor.u32 1.1754944e-38, %v5165_v36  ;;  %v5151_v36 = vand.u32 2147483648, %v11314_v56  ;;  %v3908_v59 = vadd.f32 %v11505_v3, %v3907_v30  ;;  %vm11605_vm6 = vmor %vm3909_vm1, %vm3910_vm13 }
 0x87f   : > { %v3919_v23 = vmul.f32 %v11510_v39, %v11489_v13  ;;  %v11525_v40 = vpop.xlane.xlu2 %5563  ;;  %v4734_v42 = vmul.f32 %v4575_v61, %v10516_v53  ;;  %v4751_v61 = vpack.c.bf16 %v4735_v15, %v4735_v15  ;;  %vm3924_vm11 = vweird.f32 %v11510_v39 }
 0x880   : > { %vm11588_vm3 = vmor %vm3923_vm2, %vm3924_vm11  ;;  %v3913_v13 = vand.u32 2147483647, %v11319_v2  ;;  %vm5150_vm8 = vcmp.eq.f32.partialorder %v5149_v45, 8.507059e+37  ;;  %v13382_v45 = vld [vmem:[#allocation141_spill] sm:$0xff]  ;;  %vm5737_vm13 = vweird.f32 %v11426_v1  ;;  %7317 = vrcp.f32 %v11329_v8 }
 0x881   : > { %v3920_v41 = vsub.f32 1.0, %v3919_v23  ;;  %v11552_v23 = vpop.xlane.xlu1 %4989  ;;  %v4750_v53 = vpack.c.bf16 %v4734_v42, %v4734_v42  ;;  %v5979_v28 = vunpack.c.l.b16 %v4751_v61  ;;  %7319 = vrcp.f32 %v11339_v5 }
 0x882   : > { %v3547_v24 = vpop.permute.xlu0 %3546  ;;  %v6292_v57 = vpop.f32.mrf.mxu2  ;;  %vm3914_vm10 = vcmp.eq.f32.partialorder %v3913_v13, 8.507059e+37  ;;  %7321 = vrcp.f32 %v11455_v63 }
 0x883   : > { %v6293_v44 = vadd.f32 %v11106_v54, %v6292_v57  ;;  %v3612_v58 = vsel %vm3589_vm7, %v3588_v33, %v3547_v24  ;;  %v3921_v22 = vmul.f32 %v11510_v39, %v3920_v41  ;;  %v5163_v57 = vand.u32 2147483647, %v11311_v27  ;;  %v5056_v30 = vpop.f32.mrf.mxu3 }
 0x884   : > { %6301 = vmatmul.bf16.gmra.mxu2 %v3612_v58  ;;  %v5144_v27 = vadd.f32 %v11497_v47, %v5143_v9  ;;  %v3915_v41 = vand.u32 2147483648, %v11319_v2  ;;  %v5978_v14 = vunpack.c.l.b16 %v4750_v53  ;;  %v3930_v58 = vor.u32 1.1754944e-38, %v3929_v62 }
 0x885   : > { %6357 = vst [vmem:[%s10559_s12 + $0x50] sm:$0xff] %v6293_v44  ;;  %v3922_v11 = vadd.f32 %v11510_v39, %v3921_v22  ;;  %v5152_v44 = vor.u32 1.1754944e-38, %v5151_v36  ;;  %v3912_v2 = vsel %vm11605_vm6, %v11505_v3, %v3908_v59  ;;  %vm5164_vm4 = vcmp.eq.f32.partialorder %v5163_v57, 8.507059e+37 }
 0x886   : > { %v5148_v12 = vsel %vm11579_vm15, %v11497_v47, %v5144_v27  ;;  %v3916_v9 = vor.u32 1.1754944e-38, %v3915_v41  ;;  %v5167_v42 = vsel %vm5164_vm4, %v5166_v32, %v5162_v4  ;;  %v7314_v27 = vpop.eup %7313 }
 0x887   : > { %v11556_v10 = vpop.xlane.xlu2 %3821  ;;  %v3926_v33 = vsel %vm11588_vm3, %v11510_v39, %v3922_v11  ;;  %v5153_v48 = vsel %vm5150_vm8, %v5152_v44, %v5148_v12  ;;  %v5313_v3 = vmul.f32 %v5167_v42, %v5056_v30  ;;  %v7316_v11 = vpop.eup %7315  ;;  %v5719_v59 = vmul.f32 %v7314_v27, %v11309_v31 }
 0x888   : > { %v3931_v22 = vsel %vm3928_vm9, %v3930_v58, %v3926_v33  ;;  %v3917_v15 = vsel %vm3914_vm10, %v3916_v9, %v3912_v2  ;;  %v5312_v61 = vmul.f32 %v5153_v48, %v5054_v60  ;;  %v5733_v32 = vmul.f32 %v7316_v11, %v11426_v1  ;;  %v13383_v33 = vld [vmem:[#allocation111_spill] sm:$0xff]  ;;  %v5632_v9 = vpop.f32.mrf.mxu1 }
 0x889   : > { %v11616_v39 = vpop.xlane.xlu1 %5565  ;;  %v4129_v53 = vmul.f32 %v3931_v22, %v13381_v35  ;;  %v4128_v36 = vmul.f32 %v3917_v15, %v13382_v45  ;;  %vm5724_vm12 = vweird.f32 %v7314_v27  ;;  %vm5738_vm11 = vweird.f32 %v7316_v11 }
 0x88a   : > { %v6294_v18 = vpop.f32.mrf.mxu2  ;;  %v5328_v62 = vpack.c.bf16 %v5312_v61, %v5312_v61  ;;  %v5729_v30 = vand.u32 2147483648, %v11309_v31  ;;  %v5743_v35 = vand.u32 2147483648, %v11426_v1  ;;  %vm5725_vm15 = vmor %vm5723_vm14, %vm5724_vm12  ;;  %v5741_v61 = vand.u32 2147483647, %v11426_v1 }
 0x88b   : > { %v6295_v24 = vadd.f32 %v11106_v54, %v6294_v18  ;;  %v5329_v18 = vpack.c.bf16 %v5313_v3, %v5313_v3  ;;  %v4145_v57 = vpack.c.bf16 %v4129_v53, %v4129_v53  ;;  %v4144_v56 = vpack.c.bf16 %v4128_v36, %v4128_v36  ;;  %vm5739_vm2 = vmor %vm5737_vm13, %vm5738_vm11 }
 0x88c   : > { %v6034_v26 = vunpack.c.l.b16 %v5328_v62  ;;  %v5727_v53 = vand.u32 2147483647, %v11309_v31  ;;  %v5730_v36 = vor.u32 1.1754944e-38, %v5729_v30  ;;  %v5744_v62 = vor.u32 1.1754944e-38, %v5743_v35 }
 0x88d   : > { %6112 = vrot.lane.b32.xlu2 %v6103_v25, %s7645_s14  ;;  %6358 = vst [vmem:[%s10559_s12 + $0x58] sm:$0xff] %v6295_v24  ;;  %v5992_v25 = vpack.c.b16 %v5979_v28, %v5978_v14  ;;  %v6035_v19 = vunpack.c.l.b16 %v5329_v18  ;;  %v5935_v60 = vunpack.c.l.b16 %v4145_v57  ;;  %v5720_v14 = vsub.f32 1.0, %v5719_v59 }
 0x88e   : > { %v5734_v28 = vsub.f32 1.0, %v5733_v32  ;;  %v5934_v12 = vunpack.c.l.b16 %v4144_v56  ;;  %vm5728_vm3 = vcmp.eq.f32.partialorder %v5727_v53, 8.507059e+37  ;;  %vm5742_vm1 = vcmp.eq.f32.partialorder %v5741_v61, 8.507059e+37  ;;  %v11639_v32 = vpop.eup %7317 }
 0x88f   : > { %v11610_v47 = vpop.xlane.xlu2 %4987  ;;  %v6048_v24 = vpack.c.b16 %v6035_v19, %v6034_v26  ;;  %v5721_v44 = vmul.f32 %v7314_v27, %v5720_v14  ;;  %v11647_v56 = vpop.eup %7319  ;;  %7323 = vrcp.f32 %v11556_v10  ;;  %vm4596_vm6 = vweird.f32 %v11639_v32 }
 0x890   : > { %v5950_v13 = vpack.c.b16 %v5935_v60, %v5934_v12  ;;  %v5735_v54 = vmul.f32 %v7316_v11, %v5734_v28  ;;  %v5634_v26 = vpop.f32.mrf.mxu1  ;;  %7325 = vrcp.f32 %v11356_v34  ;;  %v11655_v14 = vpop.eup %7321  ;;  %vm4595_vm8 = vweird.f32 %v11329_v8 }
 0x891   : > { %v11623_v41 = vpop.xlane.xlu1 %5567  ;;  %v5722_v42 = vadd.f32 %v7314_v27, %v5721_v44  ;;  %7327 = vrcp.f32 %v11400_v52  ;;  %vm11682_vm9 = vmor %vm4595_vm8, %vm4596_vm6  ;;  %vm4610_vm10 = vweird.f32 %v11647_v56  ;;  %vm4609_vm12 = vweird.f32 %v11339_v5 }
 0x892   : > { %v5736_v15 = vadd.f32 %v7316_v11, %v5735_v54  ;;  %7329 = vrcp.f32 %v11419_v17  ;;  %vm11723_vm11 = vmor %vm4609_vm12, %vm4610_vm10  ;;  %vm5173_vm14 = vweird.f32 %v11356_v34  ;;  %vm5187_vm13 = vweird.f32 %v11400_v52 }
 0x893   : > { %6002 = vrot.lane.b32.xlu1 %v5992_v25, %s7646_s17  ;;  %v5726_v3 = vsel %vm5725_vm15, %v7314_v27, %v5722_v42  ;;  %v4591_v27 = vmul.f32 %v11639_v32, %v11329_v8  ;;  %7331 = vrcp.f32 %v11503_v16  ;;  %vm3937_vm6 = vweird.f32 %v11455_v63 }
 0x894   : > { %v5740_v45 = vsel %vm5739_vm2, %v7316_v11, %v5736_v15  ;;  %v5731_v18 = vsel %vm5728_vm3, %v5730_v36, %v5726_v3  ;;  %7333 = vrcp.f32 %v11552_v23  ;;  %vm3938_vm2 = vweird.f32 %v11655_v14 }
 0x895   : > { %v5745_v57 = vsel %vm5742_vm1, %v5744_v62, %v5740_v45  ;;  %v5890_v31 = vmul.f32 %v5731_v18, %v5632_v9  ;;  %v4592_v60 = vsub.f32 1.0, %v4591_v27  ;;  %v11657_v28 = vpop.eup %7323  ;;  %v4615_v45 = vand.u32 2147483648, %v11339_v5 }
 0x896   : > { %v5891_v59 = vmul.f32 %v5745_v57, %v5634_v26  ;;  %v3947_v54 = vmul.f32 %v11657_v28, %v11556_v10  ;;  %v5179_v18 = vand.u32 2147483648, %v11356_v34  ;;  %v11705_v57 = vld [vmem:[%s12745_s6] ss:$0 sm:$0xff]  ;;  %vm3952_vm1 = vweird.f32 %v11657_v28 }
 0x897   : > { %v5999_v4 = vpop.permute.xlu2 %5998  ;;  %v4593_v12 = vmul.f32 %v11639_v32, %v4592_v60  ;;  %v3941_v35 = vand.u32 2147483647, %v11455_v63  ;;  %7335 = vrcp.f32 %v11525_v40 }
 0x898   : > { %v6128_v58 = vsel %vm1059_vm0, %v5950_v13, %v5999_v4  ;;  %v5907_v1 = vpack.c.bf16 %v5891_v59, %v5891_v59  ;;  %v3948_v53 = vsub.f32 1.0, %v3947_v54  ;;  %v11740_v54 = vor.u32 1.1754944e-38, %v5179_v18 }
 0x89a   : > { %v6091_v4 = vunpack.c.l.b16 %v5907_v1  ;;  %v4613_v1 = vand.u32 2147483647, %v11339_v5 }
 0x89b   : > { %6058 = vrot.lane.b32.xlu1 %v6048_v24, %s7647_s18 }
 0x89c   : > { %vm11750_vm3 = vcmp.eq.f32.partialorder %v4613_v1, 8.507059e+37 }
 0x89f   : > { %v6111_v2 = vpop.permute.xlu2 %6110 }
 0x8a0   : > { %3829 = vadd.xlane.f32.xlu0 %v13383_v33  ;;  %v11660_v33 = vpop.eup %7325 }
 0x8a1   : > { %v11665_v44 = vpop.eup %7327  ;;  %v5169_v42 = vmul.f32 %v11660_v33, %v11356_v34  ;;  %vm5174_vm15 = vweird.f32 %v11660_v33 }
 0x8a2   : > { %v6055_v25 = vpop.permute.xlu1 %6054  ;;  %v5183_v15 = vmul.f32 %v11665_v44, %v11400_v52  ;;  %v11687_v61 = vpop.eup %7329  ;;  %vm5188_vm12 = vweird.f32 %v11665_v44 }
 0x8a3   : > { %v6151_v48 = vsel %vm3572_vm5, %v6128_v58, %v6055_v25  ;;  %v13384_v25 = vld [vmem:[#allocation114_spill] sm:$0xff]  ;;  %v5170_v59 = vsub.f32 1.0, %v5169_v42  ;;  %v5747_v27 = vmul.f32 %v11687_v61, %v11419_v17 }
 0x8a4   : > { %v6167_v22 = vsel %vm3589_vm7, %v6151_v48, %v6111_v2  ;;  %v4594_v2 = vadd.f32 %v11639_v32, %v4593_v12  ;;  %v4599_v48 = vand.u32 2147483647, %v11329_v8  ;;  %v13392_v12 = vld [vmem:[#allocation113_spill] sm:$0xff] }
 0x8a5   : > { %6306 = vmatmul.bf16.gmra.mxu2 %v6167_v22  ;;  %v4601_v22 = vand.u32 2147483648, %v11329_v8  ;;  %v5748_v42 = vsub.f32 1.0, %v5747_v27  ;;  %v5755_v27 = vand.u32 2147483647, %v11419_v17 }
 0x8a6   : > { %v4598_v8 = vsel %vm11682_vm9, %v11639_v32, %v4594_v2  ;;  %vm11692_vm4 = vcmp.eq.f32.partialorder %v4599_v48, 8.507059e+37  ;;  %v5184_v32 = vsub.f32 1.0, %v5183_v15  ;;  %v5171_v48 = vmul.f32 %v11660_v33, %v5170_v59  ;;  %vm11766_vm9 = vmor %vm3937_vm6, %vm3938_vm2 }
 0x8a7   : > { %v3943_v15 = vand.u32 2147483648, %v11455_v63  ;;  %vm5751_vm6 = vweird.f32 %v11419_v17 }
 0x8a8   : > { %5573 = vadd.xlane.f32.xlu0 %v10531_v29  ;;  %v5906_v29 = vpack.c.bf16 %v5890_v31, %v5890_v31  ;;  %v4602_v31 = vor.u32 1.1754944e-38, %v4601_v22 }
 0x8aa   : > { %v6090_v11 = vunpack.c.l.b16 %v5906_v29 }
 0x8ac   : > { %v6104_v24 = vpack.c.b16 %v6091_v4, %v6090_v11  ;;  %v3949_v11 = vmul.f32 %v11657_v28, %v3948_v53  ;;  %v13389_v4 = vld [vmem:[#allocation133_spill] sm:$0xff] }
 0x8ad   : > { %v11645_v19 = vpop.xlane.xlu0 %4401 }
 0x8ae   : > { %7337 = vrcp.f32 %v11645_v19 }
 0x8af   : > { %7339 = vrcp.f32 %v11616_v39 }
 0x8b0   : > { %5575 = vadd.xlane.f32.xlu0 %v10538_v6  ;;  %v4605_v6 = vmul.f32 %v11647_v56, %v11339_v5  ;;  %v5177_v5 = vand.u32 2147483647, %v11356_v34  ;;  %7341 = vrcp.f32 %v11610_v47  ;;  %v11916_v34 = vpop.f32.mrf.mxu1 }
 0x8b2   : > { %v4606_v13 = vsub.f32 1.0, %v4605_v6  ;;  %v11727_v6 = vor.u32 1.1754944e-38, %v4615_v45  ;;  %vm11762_vm8 = vcmp.eq.f32.partialorder %v5177_v5, 8.507059e+37 }
 0x8b4   : > { %v4607_v9 = vmul.f32 %v11647_v56, %v4606_v13  ;;  %v11732_v13 = vpop.eup %7331 }
 0x8b5   : > { %v11669_v58 = vpop.xlane.xlu0 %3823  ;;  %v4633_v53 = vmul.f32 %v11732_v13, %v11503_v16  ;;  %v11774_v18 = vpop.eup %7333 }
 0x8b6   : > { %4995 = vadd.xlane.f32.xlu2 %v10511_v20  ;;  %v3933_v20 = vmul.f32 %v11655_v14, %v11455_v63  ;;  %v11698_v62 = vadd.f32 %v11647_v56, %v4607_v9  ;;  %v5185_v9 = vmul.f32 %v11665_v44, %v5184_v32  ;;  %v3955_v63 = vand.u32 2147483647, %v11556_v10 }
 0x8b7   : > { %v5211_v60 = vmul.f32 %v11774_v18, %v11552_v23  ;;  %7343 = vrcp.f32 %v11669_v58 }
 0x8b8   : > { %v3934_v30 = vsub.f32 1.0, %v3933_v20  ;;  %v4612_v20 = vsel %vm11723_vm11, %v11647_v56, %v11698_v62  ;;  %vm3942_vm11 = vcmp.eq.f32.partialorder %v3941_v35, 8.507059e+37  ;;  %vm3956_vm2 = vcmp.eq.f32.partialorder %v3955_v63, 8.507059e+37 }
 0x8ba   : > { %v3935_v29 = vmul.f32 %v11655_v14, %v3934_v30  ;;  %v3950_v30 = vadd.f32 %v11657_v28, %v3949_v11 }
 0x8bc   : > { %v3936_v22 = vadd.f32 %v11655_v14, %v3935_v29  ;;  %v3944_v29 = vor.u32 1.1754944e-38, %v3943_v15 }
 0x8bd   : > { %v11743_v2 = vpop.xlane.xlu0 %4405 }
 0x8be   : > { %3831 = vadd.xlane.f32.xlu2 %v13384_v25  ;;  %v5191_v25 = vand.u32 2147483647, %v11400_v52  ;;  %v3940_v59 = vsel %vm11766_vm9, %v11655_v14, %v3936_v22  ;;  %v5186_v14 = vadd.f32 %v11665_v44, %v5185_v9  ;;  %v11811_v9 = vpop.eup %7335 }
 0x8bf   : > { %v3945_v5 = vsel %vm3942_vm11, %v3944_v29, %v3940_v59  ;;  %v4643_v59 = vand.u32 2147483648, %v11503_v16  ;;  %v11878_v29 = vpop.f32.mrf.mxu3  ;;  %vm5216_vm11 = vweird.f32 %v11774_v18 }
 0x8c3   : > { %v6297_v36 = vpop.f32.mrf.mxu2 }
 0x8c4   : > { %v6298_v26 = vadd.f32 %v11705_v57, %v6297_v36  ;;  %6114 = vrot.lane.b32.xlu0 %v6104_v24, %s7645_s14  ;;  %v11719_v24 = vsel %vm11692_vm4, %v4602_v31, %v4598_v8  ;;  %v3957_v8 = vand.u32 2147483648, %v11556_v10  ;;  %vm3951_vm4 = vweird.f32 %v11556_v10 }
 0x8c5   : > { %3833 = vadd.xlane.f32.xlu1 %v13392_v12  ;;  %v5193_v31 = vand.u32 2147483648, %v11400_v52  ;;  %vm11783_vm10 = vmor %vm3951_vm4, %vm3952_vm1  ;;  %v5749_v10 = vmul.f32 %v11687_v61, %v5748_v42  ;;  %v11826_v15 = vpop.xlane.xlu0 %4407  ;;  %v5212_v36 = vsub.f32 1.0, %v5211_v60  ;;  %vm4637_vm4 = vweird.f32 %v11503_v16 }
 0x8c6   : > { %6359 = vst [vmem:[%s10559_s12 + $0x60] sm:$0xff] %v6298_v26  ;;  %4413 = vadd.xlane.f32.xlu2 %v13389_v4  ;;  %v5172_v26 = vadd.f32 %v11660_v33, %v5171_v48  ;;  %v3954_v1 = vsel %vm11783_vm10, %v11657_v28, %v3950_v30  ;;  %v3958_v11 = vor.u32 1.1754944e-38, %v3957_v8  ;;  %v4634_v4 = vsub.f32 1.0, %v4633_v53  ;;  %vm11804_vm1 = vmor %vm5173_vm14, %vm5174_vm15  ;;  %v13406_v30 = vld [vmem:[#allocation41_spill] sm:$0xff]  ;;  %v11829_v53 = vpop.eup %7337 }
 0x8c7   : > { %v5757_v28 = vand.u32 2147483648, %v11419_v17  ;;  %vm11820_vm14 = vmor %vm5187_vm13, %vm5188_vm12  ;;  %v5750_v42 = vadd.f32 %v11687_v61, %v5749_v10  ;;  %vm5752_vm15 = vweird.f32 %v11687_v61  ;;  %vm5192_vm13 = vcmp.eq.f32.partialorder %v5191_v25, 8.507059e+37 }
 0x8c8   : > { %v3959_v12 = vsel %vm3956_vm2, %v3958_v11, %v3954_v1  ;;  %v5176_v22 = vsel %vm11804_vm1, %v11660_v33, %v5172_v26  ;;  %v11834_v33 = vsel %vm11750_vm3, %v11727_v6, %v4612_v20  ;;  %v5190_v52 = vsel %vm11820_vm14, %v11665_v44, %v5186_v14  ;;  %vm11846_vm9 = vmor %vm5751_vm6, %vm5752_vm15  ;;  %v11864_v26 = vpop.eup %7339 }
 0x8c9   : > { %v4131_v35 = vmul.f32 %v3959_v12, %v13406_v30  ;;  %v5194_v8 = vor.u32 1.1754944e-38, %v5193_v31  ;;  %vm11850_vm3 = vcmp.eq.f32.partialorder %v5755_v27, 8.507059e+37  ;;  %v5758_v44 = vor.u32 1.1754944e-38, %v5757_v28 }
 0x8ca   : > { %v5754_v56 = vsel %vm11846_vm9, %v11687_v61, %v5750_v42  ;;  %v4619_v45 = vmul.f32 %v11829_v53, %v11645_v19  ;;  %v4641_v31 = vand.u32 2147483647, %v11503_v16  ;;  %v5213_v32 = vmul.f32 %v11774_v18, %v5212_v36 }
 0x8cb   : > { %v6299_v3 = vpop.f32.mrf.mxu2  ;;  %v4147_v63 = vpack.c.bf16 %v4131_v35, %v4131_v35  ;;  %v11854_v17 = vsel %vm5192_vm13, %v5194_v8, %v5190_v52  ;;  %v5221_v1 = vand.u32 2147483648, %v11552_v23  ;;  %v5775_v27 = vmul.f32 %v11864_v26, %v11616_v39 }
 0x8cc   : > { %v6300_v62 = vadd.f32 %v11705_v57, %v6299_v3  ;;  %v4635_v3 = vmul.f32 %v11732_v13, %v4634_v4  ;;  %v4620_v11 = vsub.f32 1.0, %v4619_v45  ;;  %v11890_v4 = vsel %vm11850_vm3, %v5758_v44, %v5754_v56  ;;  %v13417_v56 = vld [vmem:[#allocation121_spill] sm:$0xff] }
 0x8cd   : > { %5577 = vadd.xlane.f32.xlu1 %v10700_v46  ;;  %v13403_v46 = vld [vmem:[#allocation120_spill] sm:$0xff]  ;;  %vm11898_vm12 = vcmp.eq.f32.partialorder %v4641_v31, 8.507059e+37  ;;  %v4644_v12 = vor.u32 1.1754944e-38, %v4643_v59  ;;  %vm5215_vm2 = vweird.f32 %v11552_v23  ;;  %v5219_v42 = vand.u32 2147483647, %v11552_v23 }
 0x8ce   : > { %6360 = vst [vmem:[%s10559_s12 + $0x68] sm:$0xff] %v6300_v62  ;;  %4999 = vadd.xlane.f32.xlu2 %v10686_v43  ;;  %v4130_v48 = vmul.f32 %v3945_v5, %v13403_v46  ;;  %v11844_v62 = vsel %vm11762_vm8, %v11740_v54, %v5176_v22  ;;  %v5761_v54 = vmul.f32 %v11811_v9, %v11525_v40  ;;  %vm4638_vm8 = vweird.f32 %v11732_v13  ;;  %v11914_v22 = vpop.eup %7341  ;;  %vm11936_vm14 = vmor %vm5215_vm2, %vm5216_vm11 }
 0x8cf   : > { %v4636_v61 = vadd.f32 %v11732_v13, %v4635_v3  ;;  %vm11894_vm10 = vmor %vm4637_vm4, %vm4638_vm8  ;;  %v5771_v5 = vand.u32 2147483648, %v11525_v40  ;;  %v11909_v46 = vadd.f32 %v11774_v18, %v5213_v32  ;;  %v11920_v30 = vor.u32 1.1754944e-38, %v5221_v1  ;;  %v11923_v35 = vpop.eup %7343 }
 0x8d0   : > { %v4146_v25 = vpack.c.bf16 %v4130_v48, %v4130_v48  ;;  %v11912_v48 = vpop.xlane.xlu0 %4993  ;;  %vm5765_vm1 = vweird.f32 %v11525_v40  ;;  %v5776_v8 = vsub.f32 1.0, %v5775_v27  ;;  %v4621_v3 = vmul.f32 %v11829_v53, %v4620_v11 }
 0x8d1   : > { %v4640_v28 = vsel %vm11894_vm10, %v11732_v13, %v4636_v61  ;;  %v5769_v13 = vand.u32 2147483647, %v11525_v40  ;;  %v5772_v20 = vor.u32 1.1754944e-38, %v5771_v5  ;;  %v5783_v44 = vand.u32 2147483647, %v11616_v39 }
 0x8d2   : > { %v11883_v14 = vunpack.c.l.b16 %v4146_v25  ;;  %v5218_v45 = vsel %vm11936_vm14, %v11774_v18, %v11909_v46  ;;  %vm5766_vm15 = vweird.f32 %v11811_v9  ;;  %vm5779_vm13 = vweird.f32 %v11616_v39 }
 0x8d3   : > { %v5197_v31 = vmul.f32 %v11914_v22, %v11610_v47  ;;  %v4737_v61 = vmul.f32 %v11834_v33, %v10727_v49  ;;  %vm11957_vm6 = vcmp.eq.f32.partialorder %v5769_v13, 8.507059e+37  ;;  %vm5780_vm9 = vweird.f32 %v11864_v26  ;;  %v5061_v33 = vpop.f32.mrf.mxu3  ;;  %vm11980_vm8 = vmor %vm5765_vm1, %vm5766_vm15 }
 0x8d4   : > { %v3961_v1 = vmul.f32 %v11923_v35, %v11669_v58  ;;  %v4736_v27 = vmul.f32 %v11719_v24, %v10690_v0  ;;  %v5777_v16 = vmul.f32 %v11864_v26, %v5776_v8  ;;  %v4622_v49 = vadd.f32 %v11829_v53, %v4621_v3  ;;  %vm12014_vm11 = vmor %vm5779_vm13, %vm5780_vm9 }
 0x8d5   : > { %5579 = vadd.xlane.f32.xlu1 %v10704_v51  ;;  %v5762_v51 = vsub.f32 1.0, %v5761_v54  ;;  %vm4624_vm3 = vweird.f32 %v11829_v53  ;;  %v5198_v24 = vsub.f32 1.0, %v5197_v31  ;;  %vm4623_vm4 = vweird.f32 %v11645_v19 }
 0x8d6   : > { %5001 = vadd.xlane.f32.xlu2 %v10688_v50  ;;  %v11876_v50 = vunpack.c.l.b16 %v4147_v63  ;;  %v11932_v63 = vsel %vm11898_vm12, %v4644_v12, %v4640_v28  ;;  %v4629_v28 = vand.u32 2147483648, %v11645_v19  ;;  %v4753_v12 = vpack.c.bf16 %v4737_v61, %v4737_v61  ;;  %vm11988_vm10 = vmor %vm4623_vm4, %vm4624_vm3 }
 0x8d7   : > { %v5763_v52 = vmul.f32 %v11811_v9, %v5762_v51  ;;  %v4627_v13 = vand.u32 2147483647, %v11645_v19  ;;  %v5315_v8 = vmul.f32 %v11854_v17, %v5061_v33  ;;  %v3962_v61 = vsub.f32 1.0, %v3961_v1  ;;  %v12003_v33 = vpop.f32.mrf.mxu1 }
 0x8d8   : > { %v11874_v10 = vpop.xlane.xlu2 %3825  ;;  %v5951_v43 = vpack.c.b16 %v11876_v50, %v11883_v14  ;;  %v4752_v5 = vpack.c.bf16 %v4736_v27, %v4736_v27  ;;  %v11996_v25 = vadd.f32 %v11864_v26, %v5777_v16  ;;  %v4626_v19 = vsel %vm11988_vm10, %v11829_v53, %v4622_v49 }
 0x8d9   : > { %7345 = vrcp.f32 %v11874_v10  ;;  %v5764_v11 = vadd.f32 %v11811_v9, %v5763_v52  ;;  %v5314_v17 = vmul.f32 %v11844_v62, %v11878_v29  ;;  %v5207_v1 = vand.u32 2147483648, %v11610_v47 }
 0x8da   : > { %7347 = vrcp.f32 %v11623_v41  ;;  %v5981_v27 = vunpack.c.l.b16 %v4753_v12  ;;  %v5199_v0 = vmul.f32 %v11914_v22, %v5198_v24  ;;  %vm4628_vm12 = vcmp.eq.f32.partialorder %v4627_v13, 8.507059e+37 }
 0x8db   : > { %v5768_v31 = vsel %vm11980_vm8, %v11811_v9, %v5764_v11  ;;  %v5205_v9 = vand.u32 2147483647, %v11610_v47  ;;  %v5331_v16 = vpack.c.bf16 %v5315_v8, %v5315_v8  ;;  %v3963_v29 = vmul.f32 %v11923_v35, %v3962_v61  ;;  %v5064_v61 = vpop.f32.mrf.mxu3 }
 0x8dc   : > { %v5782_v12 = vsel %vm12014_vm11, %v11864_v26, %v11996_v25  ;;  %vm5201_vm2 = vweird.f32 %v11610_v47  ;;  %v5330_v24 = vpack.c.bf16 %v5314_v17, %v5314_v17  ;;  %v5208_v8 = vor.u32 1.1754944e-38, %v5207_v1 }
 0x8dd   : > { %3835 = vadd.xlane.f32.xlu1 %v13417_v56  ;;  %vm12031_vm15 = vcmp.eq.f32.partialorder %v5219_v42, 8.507059e+37  ;;  %vm12037_vm9 = vcmp.eq.f32.partialorder %v5205_v9, 8.507059e+37  ;;  %vm3966_vm3 = vweird.f32 %v11923_v35  ;;  %v6037_v32 = vunpack.c.l.b16 %v5331_v16 }
 0x8de   : > { %v5200_v23 = vadd.f32 %v11914_v22, %v5199_v0  ;;  %v3964_v42 = vadd.f32 %v11923_v35, %v3963_v29  ;;  %vm12049_vm4 = vcmp.eq.f32.partialorder %v5783_v44, 8.507059e+37  ;;  %vm3965_vm10 = vweird.f32 %v11669_v58 }
 0x8df   : > { %v11928_v36 = vpop.eup %7345  ;;  %v3985_v17 = vand.u32 2147483648, %v11874_v10  ;;  %v3969_v0 = vand.u32 2147483647, %v11669_v58  ;;  %vm3979_vm13 = vweird.f32 %v11874_v10  ;;  %v3983_v9 = vand.u32 2147483647, %v11874_v10 }
 0x8e0   : > { %v11943_v54 = vpop.eup %7347  ;;  %v11953_v59 = vpop.xlane.xlu2 %5569  ;;  %v3975_v51 = vmul.f32 %v11928_v36, %v11874_v10  ;;  %vm3980_vm8 = vweird.f32 %v11928_v36  ;;  %v5892_v10 = vmul.f32 %v11890_v4, %v11916_v34  ;;  %v13444_v6 = vand.u32 2147483647, %v11623_v41 }
 0x8e1   : > { %v5789_v60 = vmul.f32 %v11943_v54, %v11623_v41  ;;  %v6001_v52 = vpop.permute.xlu0 %6000  ;;  %vm12075_vm1 = vmor %vm3979_vm13, %vm3980_vm8  ;;  %v3986_v47 = vor.u32 1.1754944e-38, %v3985_v17  ;;  %v13447_v46 = vand.u32 2147483648, %v11623_v41  ;;  %7349 = vrcp.f32 %v11743_v2 }
 0x8e2   : > { %v3976_v40 = vsub.f32 1.0, %v3975_v51  ;;  %v4630_v51 = vor.u32 1.1754944e-38, %v4629_v28  ;;  %v5773_v28 = vsel %vm11957_vm6, %v5772_v20, %v5768_v31  ;;  %vm5202_vm6 = vweird.f32 %v11914_v22 }
 0x8e3   : > { %v5790_v3 = vsub.f32 1.0, %v5789_v60  ;;  %v5980_v60 = vunpack.c.l.b16 %v4752_v5  ;;  %v6131_v16 = vsel %vm1059_vm0, %v5951_v43, %v6001_v52  ;;  %vm12088_vm13 = vmor %vm5201_vm2, %vm5202_vm6  ;;  %vm3970_vm2 = vcmp.eq.f32.partialorder %v3969_v0, 8.507059e+37 }
 0x8e4   : > { %v4631_v62 = vsel %vm4628_vm12, %v4630_v51, %v4626_v19  ;;  %v3977_v49 = vmul.f32 %v11928_v36, %v3976_v40  ;;  %v3971_v19 = vand.u32 2147483648, %v11669_v58  ;;  %v13432_v51 = vld [vmem:[#allocation134_spill] sm:$0xff]  ;;  %vm12062_vm12 = vmor %vm3965_vm10, %vm3966_vm3  ;;  %v4739_v58 = vmul.f32 %v11932_v63, %v10945_v37 }
 0x8e5   : > { %v5791_v13 = vmul.f32 %v11943_v54, %v5790_v3  ;;  %v5993_v56 = vpack.c.b16 %v5981_v27, %v5980_v60  ;;  %v4738_v3 = vmul.f32 %v4631_v62, %v10906_v55  ;;  %v12055_v55 = vpop.xlane.xlu1 %4991  ;;  %v6036_v27 = vunpack.c.l.b16 %v5330_v24  ;;  %v5642_v24 = vpop.f32.mrf.mxu1 }
 0x8e6   : > { %v3978_v40 = vadd.f32 %v11928_v36, %v3977_v49  ;;  %v3968_v43 = vsel %vm12062_vm12, %v11923_v35, %v3964_v42  ;;  %v5204_v34 = vsel %vm12088_vm13, %v11914_v22, %v5200_v23  ;;  %v3972_v63 = vor.u32 1.1754944e-38, %v3971_v19 }
 0x8e7   : > { %v6049_v49 = vpack.c.b16 %v6037_v32, %v6036_v27  ;;  %v4754_v60 = vpack.c.bf16 %v4738_v3, %v4738_v3  ;;  %v5792_v50 = vadd.f32 %v11943_v54, %v5791_v13  ;;  %vm3984_vm6 = vcmp.eq.f32.partialorder %v3983_v9, 8.507059e+37 }
 0x8e8   : > { %v12008_v11 = vpop.xlane.xlu2 %5571  ;;  %v3982_v37 = vsel %vm12075_vm1, %v11928_v36, %v3978_v40  ;;  %v4755_v13 = vpack.c.bf16 %v4739_v58, %v4739_v58  ;;  %v5893_v35 = vmul.f32 %v5773_v28, %v12003_v33  ;;  %v5908_v32 = vpack.c.bf16 %v5892_v10, %v5892_v10  ;;  %v5066_v40 = vpop.f32.mrf.mxu3 }
 0x8e9   : > { %v6057_v1 = vpop.permute.xlu0 %6056  ;;  %v3987_v3 = vsel %vm3984_vm6, %v3986_v47, %v3982_v37  ;;  %v3973_v36 = vsel %vm3970_vm2, %v3972_v63, %v3968_v43  ;;  %v5223_v22 = vsel %vm12031_vm15, %v11920_v30, %v5218_v45  ;;  %v13439_v23 = vand.u32 2147483648, %v11616_v39  ;;  %v7350_v43 = vpop.eup %7349 }
 0x8ea   : > { %v6153_v4 = vsel %vm3572_vm5, %v6131_v16, %v6057_v1  ;;  %vm13440_vm1 = vweird.f32 %v11943_v54  ;;  %vm13441_vm3 = vweird.f32 %v11623_v41  ;;  %vm12124_vm10 = vcmp.eq.f32.partialorder %v13444_v6, 8.507059e+37 }
 0x8eb   : > { %v5786_v42 = vor.u32 1.1754944e-38, %v13439_v23  ;;  %vm12118_vm8 = vmor %vm13441_vm3, %vm13440_vm1  ;;  %v5209_v18 = vsel %vm12037_vm9, %v5208_v8, %v5204_v34  ;;  %v5800_v30 = vor.u32 1.1754944e-38, %v13447_v46  ;;  %v5983_v45 = vunpack.c.l.b16 %v4755_v13 }
 0x8ec   : > { %v5796_v39 = vsel %vm12118_vm8, %v11943_v54, %v5792_v50  ;;  %v5909_v5 = vpack.c.bf16 %v5893_v35, %v5893_v35  ;;  %v6092_v20 = vunpack.c.l.b16 %v5908_v32  ;;  %v4133_v19 = vmul.f32 %v3987_v3, %v10526_v7 }
 0x8ed   : > { %v5787_v8 = vsel %vm12049_vm4, %v5786_v42, %v5782_v12  ;;  %v4132_v54 = vmul.f32 %v3973_v36, %v10496_v21  ;;  %v12145_v41 = vpop.xlane.xlu1 %3827  ;;  %v5317_v27 = vmul.f32 %v5223_v22, %v5066_v40  ;;  %v5801_v53 = vsel %vm12124_vm10, %v5800_v30, %v5796_v39  ;;  %v5644_v31 = vpop.f32.mrf.mxu1 }
 0x8ee   : > { %4415 = vadd.xlane.f32.xlu0 %v13432_v51  ;;  %6004 = vrot.lane.b32.xlu2 %v5993_v56, %s7646_s17  ;;  %v5982_v56 = vunpack.c.l.b16 %v4754_v60  ;;  %v6093_v1 = vunpack.c.l.b16 %v5909_v5  ;;  %v5316_v51 = vmul.f32 %v5209_v18, %v5064_v61  ;;  %v4149_v44 = vpack.c.bf16 %v4133_v19, %v4133_v19 }
 0x8ef   : > { %v4148_v0 = vpack.c.bf16 %v4132_v54, %v4132_v54  ;;  %v5333_v12 = vpack.c.bf16 %v5317_v27, %v5317_v27  ;;  %v5894_v9 = vmul.f32 %v5787_v8, %v5642_v24  ;;  %v5895_v61 = vmul.f32 %v5801_v53, %v5644_v31 }
 0x8f0   : > { %v6113_v29 = vpop.permute.xlu2 %6112  ;;  %v5994_v17 = vpack.c.b16 %v5983_v45, %v5982_v56  ;;  %v6105_v26 = vpack.c.b16 %v6093_v1, %v6092_v20  ;;  %v5332_v25 = vpack.c.bf16 %v5316_v51, %v5316_v51  ;;  %v12150_v7 = vunpack.c.l.b16 %v4149_v44 }
 0x8f1   : > { %v6170_v52 = vsel %vm3589_vm7, %v6153_v4, %v6113_v29  ;;  %v12152_v21 = vunpack.c.l.b16 %v4148_v0  ;;  %v6039_v62 = vunpack.c.l.b16 %v5333_v12  ;;  %v5911_v60 = vpack.c.bf16 %v5895_v61, %v5895_v61  ;;  %v13450_v61 = vld [vmem:[#allocation122_spill] sm:$0xff] }
 0x8f2   : > { %6311 = vmatmul.bf16.gmra.mxu2 %v6170_v52  ;;  %v6038_v16 = vunpack.c.l.b16 %v5332_v25  ;;  %7351 = vrcp.f32 %v11826_v15  ;;  %v4647_v63 = vmul.f32 %v7350_v43, %v11743_v2  ;;  %vm4651_vm14 = vweird.f32 %v11743_v2 }
 0x8f3   : > { %v5952_v29 = vpack.c.b16 %v12150_v7, %v12152_v21  ;;  %v6095_v50 = vunpack.c.l.b16 %v5911_v60  ;;  %7353 = vrcp.f32 %v11953_v59  ;;  %vm4652_vm11 = vweird.f32 %v7350_v43 }
 0x8f4   : > { %v6050_v58 = vpack.c.b16 %v6039_v62, %v6038_v16  ;;  %7355 = vrcp.f32 %v12008_v11  ;;  %v4648_v13 = vsub.f32 1.0, %v4647_v63  ;;  %v4655_v46 = vand.u32 2147483647, %v11743_v2  ;;  %vm12197_vm9 = vmor %vm4651_vm14, %vm4652_vm11 }
 0x8f5   : > { %v12158_v14 = vpop.xlane.xlu1 %4409  ;;  %7357 = vrcp.f32 %v11912_v48  ;;  %v4657_v45 = vand.u32 2147483648, %v11743_v2  ;;  %v4671_v5 = vand.u32 2147483648, %v11826_v15  ;;  %vm4665_vm4 = vweird.f32 %v11826_v15 }
 0x8f6   : > { %6060 = vrot.lane.b32.xlu2 %v6049_v49, %s7647_s18  ;;  %6006 = vrot.lane.b32.xlu1 %v5994_v17, %s7646_s17  ;;  %v5910_v49 = vpack.c.bf16 %v5894_v9, %v5894_v9  ;;  %7359 = vrcp.f32 %v12055_v55  ;;  %v4649_v22 = vmul.f32 %v7350_v43, %v4648_v13  ;;  %v4669_v19 = vand.u32 2147483647, %v11826_v15 }
 0x8f7   : > { %v4658_v27 = vor.u32 1.1754944e-38, %v4657_v45  ;;  %v4672_v53 = vor.u32 1.1754944e-38, %v4671_v5  ;;  %vm4656_vm13 = vcmp.eq.f32.partialorder %v4655_v46, 8.507059e+37  ;;  %v5247_v16 = vand.u32 2147483647, %v11912_v48 }
 0x8f8   : > { %v6094_v10 = vunpack.c.l.b16 %v5910_v49  ;;  %v7352_v37 = vpop.eup %7351  ;;  %v4650_v39 = vadd.f32 %v7350_v43, %v4649_v22  ;;  %vm4670_vm2 = vcmp.eq.f32.partialorder %v4669_v19, 8.507059e+37  ;;  %v5249_v62 = vand.u32 2147483648, %v11912_v48  ;;  %v13454_v22 = vld [vmem:[#allocation126_spill] sm:$0xff] }
 0x8f9   : > { %v4661_v47 = vmul.f32 %v7352_v37, %v11826_v15  ;;  %v12172_v32 = vpop.eup %7353  ;;  %vm4666_vm15 = vweird.f32 %v7352_v37  ;;  %v12209_v15 = vpop.f32.mrf.mxu3  ;;  %v5235_v60 = vand.u32 2147483648, %v12055_v55  ;;  %vm5243_vm1 = vweird.f32 %v11912_v48 }
 0x8fa   : > { %v6106_v24 = vpack.c.b16 %v6095_v50, %v6094_v10  ;;  %v12176_v36 = vpop.eup %7355  ;;  %v5803_v6 = vmul.f32 %v12172_v32, %v11953_v59  ;;  %vm4667_vm12 = vmor %vm4665_vm4, %vm4666_vm15  ;;  %v4654_v1 = vsel %vm12197_vm9, %v7350_v43, %v4650_v39  ;;  %v5647_v10 = vpop.f32.mrf.mxu1  ;;  %vm5808_vm3 = vweird.f32 %v12172_v32  ;;  %v13451_v43 = vld [vmem:[#allocation79_spill] sm:$0xff] }
 0x8fb   : > { %v4662_v56 = vsub.f32 1.0, %v4661_v47  ;;  %v12178_v42 = vpop.eup %7357  ;;  %v5817_v28 = vmul.f32 %v12176_v36, %v12008_v11  ;;  %v4659_v25 = vsel %vm4656_vm13, %v4658_v27, %v4654_v1  ;;  %vm5822_vm8 = vweird.f32 %v12176_v36 }
 0x8fc   : > { %v12181_v33 = vpop.eup %7359  ;;  %v5239_v40 = vmul.f32 %v12178_v42, %v11912_v48  ;;  %v5804_v54 = vsub.f32 1.0, %v5803_v6  ;;  %vm5244_vm6 = vweird.f32 %v12178_v42  ;;  %vm5807_vm10 = vweird.f32 %v11953_v59 }
 0x8fd   : > { %v12166_v52 = vpop.xlane.xlu1 %4411  ;;  %v4663_v23 = vmul.f32 %v7352_v37, %v4662_v56  ;;  %v5225_v8 = vmul.f32 %v12181_v33, %v12055_v55  ;;  %v5818_v2 = vsub.f32 1.0, %v5817_v28  ;;  %v5811_v47 = vand.u32 2147483647, %v11953_v59  ;;  %vm12236_vm11 = vmor %vm5807_vm10, %vm5808_vm3 }
 0x8fe   : > { %v5240_v44 = vsub.f32 1.0, %v5239_v40  ;;  %v5827_v13 = vand.u32 2147483648, %v12008_v11  ;;  %vm5230_vm14 = vweird.f32 %v12181_v33  ;;  %vm5821_vm15 = vweird.f32 %v12008_v11  ;;  %vm12284_vm3 = vmor %vm5243_vm1, %vm5244_vm6 }
 0x8ff   : > { %v4664_v30 = vadd.f32 %v7352_v37, %v4663_v23  ;;  %v5226_v0 = vsub.f32 1.0, %v5225_v8  ;;  %v5819_v31 = vmul.f32 %v12176_v36, %v5818_v2  ;;  %vm12252_vm9 = vmor %vm5821_vm15, %vm5822_vm8  ;;  %vm5812_vm4 = vcmp.eq.f32.partialorder %v5811_v47, 8.507059e+37 }
 0x900   : > { %v5241_v49 = vmul.f32 %v12178_v42, %v5240_v44  ;;  %v5828_v45 = vor.u32 1.1754944e-38, %v5827_v13  ;;  %v5233_v8 = vand.u32 2147483647, %v12055_v55  ;;  %vm5248_vm1 = vcmp.eq.f32.partialorder %v5247_v16, 8.507059e+37 }
 0x901   : > { %v4668_v51 = vsel %vm4667_vm12, %v7352_v37, %v4664_v30  ;;  %v5071_v40 = vpop.f32.mrf.mxu3  ;;  %vm5229_vm12 = vweird.f32 %v12055_v55 }
 0x902   : > { %6116 = vrot.lane.b32.xlu0 %v6105_v26, %s7645_s14  ;;  %v5805_v26 = vmul.f32 %v12172_v32, %v5804_v54  ;;  %v4673_v12 = vsel %vm4670_vm2, %v4672_v53, %v4668_v51  ;;  %vm12268_vm2 = vmor %vm5229_vm12, %vm5230_vm14  ;;  %vm5234_vm6 = vcmp.eq.f32.partialorder %v5233_v8, 8.507059e+37 }
 0x903   : > { %v4741_v37 = vmul.f32 %v4673_v12, %v13451_v43  ;;  %v5236_v12 = vor.u32 1.1754944e-38, %v5235_v60 }
 0x904   : > { %v5806_v50 = vadd.f32 %v12172_v32, %v5805_v26  ;;  %v5649_v26 = vpop.f32.mrf.mxu1 }
 0x905   : > { %v12188_v18 = vpop.xlane.xlu1 %4997  ;;  %v4757_v39 = vpack.c.bf16 %v4741_v37, %v4741_v37 }
 0x906   : > { %7361 = vrcp.f32 %v12188_v18  ;;  %v5810_v6 = vsel %vm12236_vm11, %v12172_v32, %v5806_v50  ;;  %vm5271_vm10 = vweird.f32 %v12188_v18  ;;  %v5277_v28 = vand.u32 2147483648, %v12188_v18 }
 0x907   : > { %v6302_v4 = vpop.f32.mrf.mxu2  ;;  %7363 = vrcp.f32 %v12145_v41  ;;  %v12262_v32 = vunpack.c.l.b16 %v4757_v39 }
 0x908   : > { %v6303_v34 = vadd.f32 %v11705_v57, %v6302_v4  ;;  %v5813_v4 = vand.u32 2147483648, %v11953_v59  ;;  %v5242_v59 = vadd.f32 %v12178_v42, %v5241_v49  ;;  %7365 = vrcp.f32 %v12158_v14 }
 0x909   : > { %7367 = vrcp.f32 %v12166_v52  ;;  %v5250_v49 = vor.u32 1.1754944e-38, %v5249_v62  ;;  %v5278_v8 = vor.u32 1.1754944e-38, %v5277_v28 }
 0x90a   : > { %6062 = vrot.lane.b32.xlu0 %v6050_v58, %s7647_s18  ;;  %6361 = vst [vmem:[%s10559_s12 + $0x70] sm:$0xff] %v6303_v34  ;;  %v5227_v58 = vmul.f32 %v12181_v33, %v5226_v0  ;;  %v5820_v34 = vadd.f32 %v12176_v36, %v5819_v31 }
 0x90c   : > { %v12212_v9 = vpop.eup %7361  ;;  %v5228_v23 = vadd.f32 %v12181_v33, %v5227_v58  ;;  %v5824_v46 = vsel %vm12252_vm9, %v12176_v36, %v5820_v34 }
 0x90d   : > { %v5267_v63 = vmul.f32 %v12212_v9, %v12188_v18  ;;  %v6003_v2 = vpop.permute.xlu1 %6002  ;;  %v12278_v27 = vpop.eup %7363  ;;  %vm5272_vm8 = vweird.f32 %v12212_v9 }
 0x90e   : > { %v5232_v44 = vsel %vm12268_vm2, %v12181_v33, %v5228_v23  ;;  %v3989_v62 = vmul.f32 %v12278_v27, %v12145_v41  ;;  %vm12322_vm14 = vmor %vm5271_vm10, %vm5272_vm8  ;;  %vm3994_vm2 = vweird.f32 %v12278_v27 }
 0x90f   : > { %v6304_v35 = vpop.f32.mrf.mxu2  ;;  %v5268_v30 = vsub.f32 1.0, %v5267_v63  ;;  %v5237_v58 = vsel %vm5234_vm6, %v5236_v12, %v5232_v44 }
 0x910   : > { %v6305_v3 = vadd.f32 %v11705_v57, %v6304_v35  ;;  %v5825_v35 = vand.u32 2147483647, %v12008_v11  ;;  %v5814_v11 = vor.u32 1.1754944e-38, %v5813_v4  ;;  %v12312_v4 = vpop.f32.mrf.mxu3  ;;  %v5318_v63 = vmul.f32 %v5237_v58, %v12209_v15 }
 0x911   : > { %v5269_v0 = vmul.f32 %v12212_v9, %v5268_v30 }
 0x912   : > { %6118 = vrot.lane.b32.xlu0 %v6106_v24, %s7645_s14  ;;  %6362 = vst [vmem:[%s10559_s12 + $0x78] sm:$0xff] %v6305_v3  ;;  %v4740_v24 = vmul.f32 %v4659_v25, %v10985_v38  ;;  %v5815_v20 = vsel %vm5812_vm4, %v5814_v11, %v5810_v6  ;;  %vm5826_vm13 = vcmp.eq.f32.partialorder %v5825_v35, 8.507059e+37  ;;  %v5246_v25 = vsel %vm12284_vm3, %v12178_v42, %v5242_v59 }
 0x913   : > { %v12204_v17 = vpop.xlane.xlu0 %3829  ;;  %v5829_v36 = vsel %vm5826_vm13, %v5828_v45, %v5824_v46  ;;  %v5896_v31 = vmul.f32 %v5815_v20, %v5647_v10  ;;  %v5270_v42 = vadd.f32 %v12212_v9, %v5269_v0  ;;  %v5275_v6 = vand.u32 2147483647, %v12188_v18 }
 0x914   : > { %v4756_v56 = vpack.c.bf16 %v4740_v24, %v4740_v24  ;;  %v5897_v33 = vmul.f32 %v5829_v36, %v5649_v26  ;;  %v5251_v24 = vsel %vm5248_vm1, %v5250_v49, %v5246_v25  ;;  %v5334_v7 = vpack.c.bf16 %v5318_v63, %v5318_v63 }
 0x915   : > { %v5912_v50 = vpack.c.bf16 %v5896_v31, %v5896_v31  ;;  %v5319_v59 = vmul.f32 %v5251_v24, %v5071_v40  ;;  %v5274_v15 = vsel %vm12322_vm14, %v12212_v9, %v5270_v42  ;;  %v6059_v39 = vpop.permute.xlu1 %6058  ;;  %vm5276_vm15 = vcmp.eq.f32.partialorder %v5275_v6, 8.507059e+37  ;;  %v13463_v42 = vld [vmem:[#allocation124_spill] sm:$0xff] }
 0x916   : > { %v12260_v5 = vunpack.c.l.b16 %v4756_v56  ;;  %v5913_v10 = vpack.c.bf16 %v5897_v33, %v5897_v33  ;;  %vm3993_vm13 = vweird.f32 %v12145_v41  ;;  %v3999_v49 = vand.u32 2147483648, %v12145_v41 }
 0x917   : > { %v5335_v21 = vpack.c.bf16 %v5319_v59, %v5319_v59  ;;  %vm4679_vm3 = vweird.f32 %v12158_v14  ;;  %v4685_v63 = vand.u32 2147483648, %v12158_v14  ;;  %vm4693_vm1 = vweird.f32 %v12166_v52  ;;  %vm12392_vm10 = vmor %vm3993_vm13, %vm3994_vm2 }
 0x918   : > { %v5995_v55 = vpack.c.b16 %v12262_v32, %v12260_v5  ;;  %v12317_v34 = vunpack.c.l.b16 %v5913_v10  ;;  %v5076_v5 = vpop.f32.mrf.mxu3  ;;  %v4013_v28 = vand.u32 2147483648, %v12204_v17 }
 0x919   : > { %v6041_v12 = vunpack.c.l.b16 %v5335_v21 }
 0x91b   : > { %v12242_v3 = vpop.xlane.xlu0 %5573 }
 0x91f   : > { %3837 = vadd.xlane.f32.xlu2 %v13450_v61  ;;  %v12298_v61 = vpop.eup %7365 }
 0x920   : > { %3839 = vadd.xlane.f32.xlu1 %v13454_v22  ;;  %v12308_v43 = vpop.eup %7367  ;;  %v4675_v48 = vmul.f32 %v12298_v61, %v12158_v14  ;;  %v6096_v22 = vunpack.c.l.b16 %v5912_v50  ;;  %vm4680_vm6 = vweird.f32 %v12298_v61 }
 0x921   : > { %v4689_v23 = vmul.f32 %v12308_v43, %v12166_v52  ;;  %vm4694_vm8 = vweird.f32 %v12308_v43 }
 0x922   : > { %v6107_v46 = vpack.c.b16 %v12317_v34, %v6096_v22  ;;  %v4676_v40 = vsub.f32 1.0, %v4675_v48 }
 0x923   : > { %v12306_v60 = vpop.xlane.xlu0 %5575 }
 0x924   : > { %v4677_v58 = vmul.f32 %v12298_v61, %v4676_v40 }
 0x926   : > { %v4678_v59 = vadd.f32 %v12298_v61, %v4677_v58 }
 0x928   : > { %v6307_v19 = vpop.f32.mrf.mxu2 }
 0x929   : > { %v6308_v1 = vadd.f32 %v11705_v57, %v6307_v19  ;;  %v12274_v51 = vpop.xlane.xlu2 %4995 }
 0x92a   : > { %7369 = vrcp.f32 %v12274_v51  ;;  %v5261_v9 = vand.u32 2147483647, %v12274_v51  ;;  %v5263_v18 = vand.u32 2147483648, %v12274_v51  ;;  %vm5257_vm9 = vweird.f32 %v12274_v51 }
 0x92b   : > { %7371 = vrcp.f32 %v12204_v17  ;;  %6363 = vst [vmem:[%s10559_s12 + $0x80] sm:$0xff] %v6308_v1  ;;  %v5279_v1 = vsel %vm5276_vm15, %v5278_v8, %v5274_v15  ;;  %vm12413_vm15 = vmor %vm4693_vm1, %vm4694_vm8  ;;  %v4014_v8 = vor.u32 1.1754944e-38, %v4013_v28 }
 0x92c   : > { %7373 = vrcp.f32 %v12242_v3  ;;  %v5264_v44 = vor.u32 1.1754944e-38, %v5263_v18  ;;  %vm5262_vm12 = vcmp.eq.f32.partialorder %v5261_v9, 8.507059e+37  ;;  %v5321_v33 = vmul.f32 %v5279_v1, %v5076_v5 }
 0x92d   : > { %7375 = vrcp.f32 %v12306_v60  ;;  %v4011_v9 = vand.u32 2147483647, %v12204_v17 }
 0x92f   : > { %vm4012_vm2 = vcmp.eq.f32.partialorder %v4011_v9, 8.507059e+37 }
 0x930   : > { %v7370_v37 = vpop.eup %7369  ;;  %v6309_v16 = vpop.f32.mrf.mxu2 }
 0x931   : > { %v12320_v47 = vpop.eup %7371  ;;  %v5253_v56 = vmul.f32 %v7370_v37, %v12274_v51  ;;  %v6310_v38 = vadd.f32 %v11705_v57, %v6309_v16  ;;  %v12328_v35 = vpop.xlane.xlu2 %3831  ;;  %v6134_v57 = vsel %vm1059_vm0, %v5952_v29, %v6003_v2  ;;  %vm5258_vm11 = vweird.f32 %v7370_v37 }
 0x932   : > { %v4003_v30 = vmul.f32 %v12320_v47, %v12204_v17  ;;  %v3990_v29 = vsub.f32 1.0, %v3989_v62  ;;  %v6155_v20 = vsel %vm3572_vm5, %v6134_v57, %v6059_v39  ;;  %v4690_v2 = vsub.f32 1.0, %v4689_v23  ;;  %vm5259_vm4 = vmor %vm5257_vm9, %vm5258_vm11  ;;  %v12357_v0 = vpop.eup %7373 }
 0x933   : > { %v5254_v11 = vsub.f32 1.0, %v5253_v56  ;;  %6364 = vst [vmem:[%s10559_s12 + $0x88] sm:$0xff] %v6310_v38  ;;  %v6040_v51 = vunpack.c.l.b16 %v5334_v7  ;;  %v12361_v31 = vpop.eup %7375  ;;  %v4683_v62 = vand.u32 2147483647, %v12158_v14  ;;  %v5337_v38 = vpack.c.bf16 %v5321_v33, %v5321_v33  ;;  %vm12402_vm11 = vmor %vm4679_vm3, %vm4680_vm6  ;;  %v13473_v33 = vld [vmem:[#allocation26_spill] sm:$0xff] }
 0x934   : > { %v4004_v53 = vsub.f32 1.0, %v4003_v30  ;;  %v3991_v32 = vmul.f32 %v12278_v27, %v3990_v29  ;;  %v4691_v50 = vmul.f32 %v12308_v43, %v4690_v2  ;;  %v5845_v48 = vmul.f32 %v12361_v31, %v12306_v60 }
 0x935   : > { %v5255_v45 = vmul.f32 %v7370_v37, %v5254_v11  ;;  %v6051_v16 = vpack.c.b16 %v6041_v12, %v6040_v51  ;;  %vm4008_vm14 = vweird.f32 %v12320_v47  ;;  %v4697_v14 = vand.u32 2147483647, %v12166_v52 }
 0x936   : > { %v6115_v19 = vpop.permute.xlu0 %6114  ;;  %v4005_v24 = vmul.f32 %v12320_v47, %v4004_v53  ;;  %v3992_v34 = vadd.f32 %v12278_v27, %v3991_v32  ;;  %v4692_v23 = vadd.f32 %v12308_v43, %v4691_v50  ;;  %v5846_v39 = vsub.f32 1.0, %v5845_v48 }
 0x937   : > { %v5256_v54 = vadd.f32 %v7370_v37, %v5255_v45  ;;  %6008 = vrot.lane.b32.xlu2 %v5995_v55, %s7646_s17  ;;  %v6173_v36 = vsel %vm3589_vm7, %v6155_v20, %v6115_v19  ;;  %vm4007_vm9 = vweird.f32 %v12204_v17  ;;  %v3997_v45 = vand.u32 2147483647, %v12145_v41 }
 0x938   : > { %6316 = vmatmul.bf16.gmra.mxu2 %v6173_v36  ;;  %v12385_v56 = vpop.xlane.xlu1 %3833  ;;  %v4006_v15 = vadd.f32 %v12320_v47, %v4005_v24  ;;  %v3996_v18 = vsel %vm12392_vm10, %v12278_v27, %v3992_v34  ;;  %v4686_v7 = vor.u32 1.1754944e-38, %v4685_v63  ;;  %v4682_v17 = vsel %vm12402_vm11, %v12298_v61, %v4678_v59  ;;  %v13472_v27 = vld [vmem:[#allocation129_spill] sm:$0xff] }
 0x939   : > { %v5260_v26 = vsel %vm5259_vm4, %v7370_v37, %v5256_v54  ;;  %v12359_v25 = vpop.xlane.xlu2 %4413  ;;  %v5831_v37 = vmul.f32 %v12357_v0, %v12242_v3  ;;  %6120 = vrot.lane.b32.xlu1 %v6107_v46, %s7645_s14  ;;  %vm12427_vm4 = vmor %vm4007_vm9, %vm4008_vm14  ;;  %v4696_v29 = vsel %vm12413_vm15, %v12308_v43, %v4692_v23  ;;  %v5847_v19 = vmul.f32 %v12361_v31, %v5846_v39 }
 0x93a   : > { %v5265_v55 = vsel %vm5262_vm12, %v5264_v44, %v5260_v26  ;;  %v4010_v41 = vsel %vm12427_vm4, %v12320_v47, %v4006_v15  ;;  %v4000_v36 = vor.u32 1.1754944e-38, %v3999_v49  ;;  %vm4684_vm12 = vcmp.eq.f32.partialorder %v4683_v62, 8.507059e+37  ;;  %v5652_v47 = vpop.f32.mrf.mxu1 }
 0x93b   : > { %v5320_v10 = vmul.f32 %v5265_v55, %v12312_v4  ;;  %v4699_v4 = vand.u32 2147483648, %v12166_v52  ;;  %v5832_v57 = vsub.f32 1.0, %v5831_v37  ;;  %v6043_v52 = vunpack.c.l.b16 %v5337_v38 }
 0x93c   : > { %3841 = vadd.xlane.f32.xlu0 %v13463_v42  ;;  %vm4698_vm13 = vcmp.eq.f32.partialorder %v4697_v14, 8.507059e+37  ;;  %vm3998_vm3 = vcmp.eq.f32.partialorder %v3997_v45, 8.507059e+37  ;;  %v4687_v61 = vsel %vm4684_vm12, %v4686_v7, %v4682_v17  ;;  %v4015_v2 = vsel %vm4012_vm2, %v4014_v8, %v4010_v41 }
 0x93d   : > { %v5336_v13 = vpack.c.bf16 %v5320_v10, %v5320_v10  ;;  %v4700_v40 = vor.u32 1.1754944e-38, %v4699_v4  ;;  %v5833_v20 = vmul.f32 %v12357_v0, %v5832_v57  ;;  %vm5835_vm6 = vweird.f32 %v12242_v3  ;;  %v13476_v10 = vld [vmem:[#allocation52_spill] sm:$0xff] }
 0x93e   : > { %vm5836_vm1 = vweird.f32 %v12357_v0  ;;  %v5839_v53 = vand.u32 2147483647, %v12242_v3  ;;  %v4001_v44 = vsel %vm3998_vm3, %v4000_v36, %v3996_v18  ;;  %v5848_v51 = vadd.f32 %v12361_v31, %v5847_v19 }
 0x93f   : > { %6064 = vrot.lane.b32.xlu2 %v6051_v16, %s7647_s18  ;;  %v6042_v46 = vunpack.c.l.b16 %v5336_v13  ;;  %v4701_v43 = vsel %vm4698_vm13, %v4700_v40, %v4696_v29  ;;  %v5834_v26 = vadd.f32 %v12357_v0, %v5833_v20  ;;  %vm5850_vm8 = vweird.f32 %v12361_v31  ;;  %vm12462_vm10 = vmor %vm5835_vm6, %vm5836_vm1  ;;  %v13479_v16 = vld [vmem:[#allocation127_spill] sm:$0xff] }
 0x940   : > { %v12452_v12 = vpop.xlane.xlu1 %5577  ;;  %v5841_v55 = vand.u32 2147483648, %v12242_v3  ;;  %v5855_v49 = vand.u32 2147483648, %v12306_v60  ;;  %v4135_v58 = vmul.f32 %v4015_v2, %v13473_v33  ;;  %vm5849_vm14 = vweird.f32 %v12306_v60 }
 0x941   : > { %v12407_v11 = vpop.xlane.xlu2 %4999  ;;  %v6052_v54 = vpack.c.b16 %v6043_v52, %v6042_v46  ;;  %v5853_v24 = vand.u32 2147483647, %v12306_v60  ;;  %v4134_v62 = vmul.f32 %v4001_v44, %v13476_v10  ;;  %vm12469_vm11 = vmor %vm5849_vm14, %vm5850_vm8  ;;  %v5838_v3 = vsel %vm12462_vm10, %v12357_v0, %v5834_v26  ;;  %v13480_v60 = vld [vmem:[#allocation132_spill] sm:$0xff]  ;;  %v5079_v46 = vpop.f32.mrf.mxu3 }
 0x942   : > { %7377 = vrcp.f32 %v12407_v11  ;;  %v5852_v48 = vsel %vm12469_vm11, %v12361_v31, %v5848_v51  ;;  %v4742_v34 = vmul.f32 %v4687_v61, %v13479_v16  ;;  %v4743_v63 = vmul.f32 %v4701_v43, %v13480_v60  ;;  %v5654_v39 = vpop.f32.mrf.mxu1 }
 0x943   : > { %6066 = vrot.lane.b32.xlu1 %v6052_v54, %s7647_s18  ;;  %7379 = vrcp.f32 %v12359_v25  ;;  %v5842_v13 = vor.u32 1.1754944e-38, %v5841_v55  ;;  %v5856_v4 = vor.u32 1.1754944e-38, %v5855_v49  ;;  %v4151_v22 = vpack.c.bf16 %v4135_v58, %v4135_v58 }
 0x944   : > { %3843 = vadd.xlane.f32.xlu0 %v13472_v27  ;;  %vm5840_vm15 = vcmp.eq.f32.partialorder %v5839_v53, 8.507059e+37  ;;  %vm5854_vm9 = vcmp.eq.f32.partialorder %v5853_v24, 8.507059e+37  ;;  %v4150_v59 = vpack.c.bf16 %v4134_v62, %v4134_v62  ;;  %v4758_v31 = vpack.c.bf16 %v4742_v34, %v4742_v34 }
 0x945   : > { %v5843_v15 = vsel %vm5840_vm15, %v5842_v13, %v5838_v3  ;;  %v5857_v0 = vsel %vm5854_vm9, %v5856_v4, %v5852_v48  ;;  %v12486_v6 = vunpack.c.l.b16 %v4151_v22  ;;  %v4759_v28 = vpack.c.bf16 %v4743_v63, %v4743_v63 }
 0x946   : > { %v12496_v45 = vunpack.c.l.b16 %v4150_v59  ;;  %v5899_v7 = vmul.f32 %v5857_v0, %v5654_v39  ;;  %vm5285_vm12 = vweird.f32 %v12407_v11  ;;  %v5289_v21 = vand.u32 2147483647, %v12407_v11 }
 0x947   : > { %v5291_v52 = vand.u32 2147483648, %v12407_v11  ;;  %v5898_v17 = vmul.f32 %v5843_v15, %v5652_v47  ;;  %v5986_v27 = vunpack.c.l.b16 %v4758_v31  ;;  %v5987_v8 = vunpack.c.l.b16 %v4759_v28 }
 0x948   : > { %v12444_v1 = vpop.eup %7377  ;;  %v12493_v9 = vpop.xlane.xlu1 %5579  ;;  %v5953_v41 = vpack.c.b16 %v12486_v6, %v12496_v45  ;;  %v5915_v43 = vpack.c.bf16 %v5899_v7, %v5899_v7  ;;  %vm5290_vm3 = vcmp.eq.f32.partialorder %v5289_v21, 8.507059e+37  ;;  %v4027_v4 = vand.u32 2147483648, %v12328_v35 }
 0x949   : > { %v5281_v5 = vmul.f32 %v12444_v1, %v12407_v11  ;;  %v12456_v32 = vpop.xlane.xlu2 %5001  ;;  %v12483_v23 = vpop.eup %7379  ;;  %vm5286_vm4 = vweird.f32 %v12444_v1  ;;  %v5996_v61 = vpack.c.b16 %v5987_v8, %v5986_v27  ;;  %v5292_v47 = vor.u32 1.1754944e-38, %v5291_v52  ;;  %v13485_v8 = vld [vmem:[#allocation128_spill] sm:$0xff] }
 0x94a   : > { %7381 = vrcp.f32 %v12456_v32  ;;  %v4703_v14 = vmul.f32 %v12483_v23, %v12359_v25  ;;  %vm12501_vm13 = vmor %vm5285_vm12, %vm5286_vm4  ;;  %v5303_v19 = vand.u32 2147483647, %v12456_v32  ;;  %v5305_v11 = vand.u32 2147483648, %v12456_v32  ;;  %v5081_v33 = vpop.f32.mrf.mxu3 }
 0x94b   : > { %v5282_v42 = vsub.f32 1.0, %v5281_v5  ;;  %7383 = vrcp.f32 %v12328_v35  ;;  %vm5299_vm6 = vweird.f32 %v12456_v32  ;;  %v6099_v55 = vunpack.c.l.b16 %v5915_v43 }
 0x94c   : > { %7385 = vrcp.f32 %v12385_v56  ;;  %v5306_v26 = vor.u32 1.1754944e-38, %v5305_v11  ;;  %v4704_v51 = vsub.f32 1.0, %v4703_v14  ;;  %vm5304_vm8 = vcmp.eq.f32.partialorder %v5303_v19, 8.507059e+37 }
 0x94d   : > { %v5283_v38 = vmul.f32 %v12444_v1, %v5282_v42  ;;  %7387 = vrcp.f32 %v12493_v9  ;;  %vm4708_vm10 = vweird.f32 %v12483_v23  ;;  %vm4707_vm14 = vweird.f32 %v12359_v25 }
 0x94e   : > { %7389 = vrcp.f32 %v12452_v12  ;;  %v4705_v37 = vmul.f32 %v12483_v23, %v4704_v51  ;;  %v4711_v0 = vand.u32 2147483647, %v12359_v25  ;;  %v4713_v31 = vand.u32 2147483648, %v12359_v25  ;;  %vm12550_vm15 = vmor %vm4707_vm14, %vm4708_vm10 }
 0x94f   : > { %v5284_v30 = vadd.f32 %v12444_v1, %v5283_v38  ;;  %vm4021_vm11 = vweird.f32 %v12328_v35  ;;  %v12547_v14 = vor.u32 1.1754944e-38, %v4027_v4  ;;  %vm4035_vm4 = vweird.f32 %v12385_v56 }
 0x950   : > { %v7382_v57 = vpop.eup %7381  ;;  %v4706_v22 = vadd.f32 %v12483_v23, %v4705_v37  ;;  %vm4712_vm12 = vcmp.eq.f32.partialorder %v4711_v0, 8.507059e+37  ;;  %v4714_v27 = vor.u32 1.1754944e-38, %v4713_v31  ;;  %vm5877_vm10 = vweird.f32 %v12493_v9 }
 0x951   : > { %v5295_v18 = vmul.f32 %v7382_v57, %v12456_v32  ;;  %v5288_v20 = vsel %vm12501_vm13, %v12444_v1, %v5284_v30  ;;  %v12513_v54 = vpop.eup %7383  ;;  %vm5300_vm2 = vweird.f32 %v7382_v57  ;;  %v5914_v1 = vpack.c.bf16 %v5898_v17, %v5898_v17  ;;  %v6005_v52 = vpop.permute.xlu2 %6004 }
 0x952   : > { %v12515_v2 = vpop.eup %7385  ;;  %v5293_v44 = vsel %vm5290_vm3, %v5292_v47, %v5288_v20  ;;  %vm5301_vm1 = vmor %vm5299_vm6, %vm5300_vm2  ;;  %v4017_v50 = vmul.f32 %v12513_v54, %v12328_v35  ;;  %v4025_v30 = vand.u32 2147483647, %v12328_v35  ;;  %vm4022_vm9 = vweird.f32 %v12513_v54 }
 0x953   : > { %v5296_v40 = vsub.f32 1.0, %v5295_v18  ;;  %v12520_v49 = vpop.eup %7387  ;;  %v6098_v24 = vunpack.c.l.b16 %v5914_v1  ;;  %v5322_v42 = vmul.f32 %v5293_v44, %v5079_v46  ;;  %v4031_v62 = vmul.f32 %v12515_v2, %v12385_v56 }
 0x954   : > { %v12524_v10 = vpop.eup %7389  ;;  %v5873_v3 = vmul.f32 %v12520_v49, %v12493_v9  ;;  %v4018_v34 = vsub.f32 1.0, %v4017_v50  ;;  %v4710_v25 = vsel %vm12550_vm15, %v12483_v23, %v4706_v22  ;;  %vm12572_vm2 = vcmp.eq.f32.partialorder %v4025_v30, 8.507059e+37 }
 0x955   : > { %v5297_v36 = vmul.f32 %v7382_v57, %v5296_v40  ;;  %v6108_v48 = vpack.c.b16 %v6099_v55, %v6098_v24  ;;  %v5859_v60 = vmul.f32 %v12524_v10, %v12452_v12  ;;  %v5338_v13 = vpack.c.bf16 %v5322_v42, %v5322_v42 }
 0x956   : > { %v4032_v38 = vsub.f32 1.0, %v4031_v62  ;;  %v5874_v59 = vsub.f32 1.0, %v5873_v3  ;;  %v4019_v28 = vmul.f32 %v12513_v54, %v4018_v34  ;;  %v4041_v40 = vand.u32 2147483648, %v12385_v56 }
 0x957   : > { %v5298_v53 = vadd.f32 %v7382_v57, %v5297_v36  ;;  %v5860_v39 = vsub.f32 1.0, %v5859_v60  ;;  %v6044_v46 = vunpack.c.l.b16 %v5338_v13  ;;  %v12570_v36 = vpop.f32.mrf.mxu1  ;;  %vm4036_vm3 = vweird.f32 %v12515_v2 }
 0x958   : > { %6010 = vrot.lane.b32.xlu0 %v5996_v61, %s7646_s17  ;;  %v4033_v18 = vmul.f32 %v12515_v2, %v4032_v38  ;;  %v5875_v21 = vmul.f32 %v12520_v49, %v5874_v59  ;;  %v4020_v20 = vadd.f32 %v12513_v54, %v4019_v28  ;;  %v4715_v47 = vsel %vm4712_vm12, %v4714_v27, %v4710_v25  ;;  %vm12596_vm14 = vmor %vm4035_vm4, %vm4036_vm3  ;;  %v12654_v25 = vld [vmem:[%s12745_s6] ss:$0 sm:$0xff] }
 0x959   : > { %v5302_v5 = vsel %vm5301_vm1, %v7382_v57, %v5298_v53  ;;  %v4039_v57 = vand.u32 2147483647, %v12385_v56  ;;  %v5861_v23 = vmul.f32 %v12524_v10, %v5860_v39  ;;  %v5867_v53 = vand.u32 2147483647, %v12452_v12  ;;  %v6061_v60 = vpop.permute.xlu2 %6060 }
 0x95a   : > { %v5307_v58 = vsel %vm5304_vm8, %v5306_v26, %v5302_v5  ;;  %v4034_v43 = vadd.f32 %v12515_v2, %v4033_v18  ;;  %vm5864_vm6 = vweird.f32 %v12524_v10  ;;  %v5876_v1 = vadd.f32 %v12520_v49, %v5875_v21  ;;  %vm12586_vm8 = vmor %vm4021_vm11, %vm4022_vm9  ;;  %v13503_v18 = vld [vmem:[#allocation29_spill] sm:$0xff] }
 0x95b   : > { %v5323_v32 = vmul.f32 %v5307_v58, %v5081_v33  ;;  %vm12563_vm13 = vcmp.eq.f32.partialorder %v4039_v57, 8.507059e+37  ;;  %vm5878_vm1 = vweird.f32 %v12520_v49  ;;  %v5881_v51 = vand.u32 2147483647, %v12493_v9 }
 0x95c   : > { %v5883_v5 = vand.u32 2147483648, %v12493_v9  ;;  %v5862_v35 = vadd.f32 %v12524_v10, %v5861_v23  ;;  %v4038_v24 = vsel %vm12596_vm14, %v12515_v2, %v4034_v43  ;;  %v4042_v42 = vor.u32 1.1754944e-38, %v4041_v40  ;;  %vm12609_vm9 = vmor %vm5877_vm10, %vm5878_vm1  ;;  %v3836_v40 = vpop.xlane.xlu1 %3835 }
 0x95d   : > { %v5339_v16 = vpack.c.bf16 %v5323_v32, %v5323_v32  ;;  %vm5863_vm15 = vweird.f32 %v12452_v12  ;;  %v5869_v9 = vand.u32 2147483648, %v12452_v12  ;;  %v5880_v2 = vsel %vm12609_vm9, %v12520_v49, %v5876_v1  ;;  %v13498_v12 = vld [vmem:[#allocation51_spill] sm:$0xff] }
 0x95e   : > { %vm12615_vm4 = vmor %vm5863_vm15, %vm5864_vm6  ;;  %v4744_v37 = vmul.f32 %v4715_v47, %v13498_v12  ;;  %v4024_v3 = vsel %vm12586_vm8, %v12513_v54, %v4020_v20  ;;  %vm12627_vm3 = vcmp.eq.f32.partialorder %v5867_v53, 8.507059e+37  ;;  %vm5882_vm1 = vcmp.eq.f32.partialorder %v5881_v51, 8.507059e+37 }
 0x95f   : > { %v6045_v15 = vunpack.c.l.b16 %v5339_v16  ;;  %v5884_v16 = vor.u32 1.1754944e-38, %v5883_v5  ;;  %v5866_v49 = vsel %vm12615_vm4, %v12524_v10, %v5862_v35  ;;  %v5870_v13 = vor.u32 1.1754944e-38, %v5869_v9  ;;  %v13501_v10 = vld [vmem:[#allocation135_spill] sm:$0xff]  ;;  %v5659_v31 = vpop.f32.mrf.mxu1 }
 0x960   : > { %6122 = vrot.lane.b32.xlu0 %v6108_v48, %s7645_s14  ;;  %v4043_v54 = vsel %vm12563_vm13, %v4042_v42, %v4038_v24  ;;  %v6137_v22 = vsel %vm1059_vm0, %v5953_v41, %v6005_v52  ;;  %v4029_v59 = vsel %vm12572_vm2, %v12547_v14, %v4024_v3  ;;  %v4760_v0 = vpack.c.bf16 %v4744_v37, %v4744_v37 }
 0x961   : > { %v12534_v63 = vpop.xlane.xlu0 %4415  ;;  %v6053_v17 = vpack.c.b16 %v6045_v15, %v6044_v46  ;;  %v5885_v4 = vsel %vm5882_vm1, %v5884_v16, %v5880_v2  ;;  %v5871_v28 = vsel %vm12627_vm3, %v5870_v13, %v5866_v49  ;;  %v6157_v57 = vsel %vm3572_vm5, %v6137_v22, %v6061_v60  ;;  %v13502_v46 = vld [vmem:[#allocation89_spill] sm:$0xff] }
 0x962   : > { %7391 = vrcp.f32 %v12534_v63  ;;  %v4727_v55 = vand.u32 2147483648, %v12534_v63  ;;  %v4725_v50 = vand.u32 2147483647, %v12534_v63  ;;  %vm4721_vm12 = vweird.f32 %v12534_v63  ;;  %v13504_v13 = vld [vmem:[#allocation61_spill] sm:$0xff] }
 0x963   : > { %v4137_v30 = vmul.f32 %v4043_v54, %v13502_v46  ;;  %v5901_v41 = vmul.f32 %v5885_v4, %v5659_v31  ;;  %v4136_v7 = vmul.f32 %v4029_v59, %v13503_v18  ;;  %v5988_v52 = vunpack.c.l.b16 %v4760_v0 }
 0x964   : > { %v4728_v34 = vor.u32 1.1754944e-38, %v4727_v55  ;;  %vm4726_vm10 = vcmp.eq.f32.partialorder %v4725_v50, 8.507059e+37  ;;  %7393 = vrcp.f32 %v3836_v40  ;;  %v4055_v32 = vand.u32 2147483648, %v3836_v40 }
 0x965   : > { %v4153_v27 = vpack.c.bf16 %v4137_v30, %v4137_v30  ;;  %v5917_v20 = vpack.c.bf16 %v5901_v41, %v5901_v41  ;;  %v4152_v19 = vpack.c.bf16 %v4136_v7, %v4136_v7  ;;  %vm4049_vm2 = vweird.f32 %v3836_v40 }
 0x966   : > { %v4053_v2 = vand.u32 2147483647, %v3836_v40  ;;  %v4056_v3 = vor.u32 1.1754944e-38, %v4055_v32 }
 0x967   : > { %v5943_v61 = vunpack.c.l.b16 %v4153_v27  ;;  %v6101_v43 = vunpack.c.l.b16 %v5917_v20  ;;  %v5942_v53 = vunpack.c.l.b16 %v4152_v19 }
 0x968   : > { %v7392_v29 = vpop.eup %7391  ;;  %3845 = vadd.xlane.f32.xlu2 %v13485_v8  ;;  %6068 = vrot.lane.b32.xlu0 %v6053_v17, %s7647_s18  ;;  %v6007_v26 = vpop.permute.xlu1 %6006  ;;  %vm4054_vm14 = vcmp.eq.f32.partialorder %v4053_v2, 8.507059e+37 }
 0x969   : > { %v4717_v11 = vmul.f32 %v7392_v29, %v12534_v63  ;;  %vm4722_vm11 = vweird.f32 %v7392_v29 }
 0x96a   : > { %vm4723_vm6 = vmor %vm4721_vm12, %vm4722_vm11 }
 0x96b   : > { %v4718_v44 = vsub.f32 1.0, %v4717_v11 }
 0x96d   : > { %v4719_v58 = vmul.f32 %v7392_v29, %v4718_v44 }
 0x96f   : > { %v4720_v62 = vadd.f32 %v7392_v29, %v4719_v58  ;;  %v7394_v58 = vpop.eup %7393 }
 0x970   : > { %v4045_v50 = vmul.f32 %v7394_v58, %v3836_v40  ;;  %vm4050_vm13 = vweird.f32 %v7394_v58 }
 0x971   : > { %v4724_v63 = vsel %vm4723_vm6, %v7392_v29, %v4720_v62  ;;  %v5900_v29 = vmul.f32 %v5871_v28, %v12570_v36  ;;  %v5954_v36 = vpack.c.b16 %v5943_v61, %v5942_v53  ;;  %vm4051_vm8 = vmor %vm4049_vm2, %vm4050_vm13 }
 0x972   : > { %v4729_v38 = vsel %vm4726_vm10, %v4728_v34, %v4724_v63  ;;  %v4046_v24 = vsub.f32 1.0, %v4045_v50 }
 0x973   : > { %v4745_v15 = vmul.f32 %v4729_v38, %v13501_v10  ;;  %v5916_v23 = vpack.c.bf16 %v5900_v29, %v5900_v29  ;;  %v6140_v5 = vsel %vm1059_vm0, %v5954_v36, %v6007_v26 }
 0x974   : > { %v6117_v39 = vpop.permute.xlu0 %6116  ;;  %v4047_v42 = vmul.f32 %v7394_v58, %v4046_v24  ;;  %v13507_v24 = vld [vmem:[#allocation45_spill] sm:$0xff] }
 0x975   : > { %v6176_v6 = vsel %vm3589_vm7, %v6157_v57, %v6117_v39  ;;  %v4761_v45 = vpack.c.bf16 %v4745_v15, %v4745_v15  ;;  %v6312_v14 = vpop.f32.mrf.mxu2  ;;  %v6100_v44 = vunpack.c.l.b16 %v5916_v23  ;;  %v13505_v15 = vld [vmem:[#allocation33_spill] sm:$0xff] }
 0x976   : > { %6321 = vmatmul.bf16.gmra.mxu2 %v6176_v6  ;;  %v6313_v21 = vadd.f32 %v12654_v25, %v6312_v14  ;;  %v4048_v56 = vadd.f32 %v7394_v58, %v4047_v42 }
 0x977   : > { %v5989_v17 = vunpack.c.l.b16 %v4761_v45  ;;  %v6109_v51 = vpack.c.b16 %v6101_v43, %v6100_v44 }
 0x978   : > { %6365 = vst [vmem:[%s10559_s12 + $0x90] sm:$0xff] %v6313_v21  ;;  %v4052_v12 = vsel %vm4051_vm8, %v7394_v58, %v4048_v56 }
 0x979   : > { %v5997_v8 = vpack.c.b16 %v5989_v17, %v5988_v52  ;;  %v4057_v34 = vsel %vm4054_vm14, %v4056_v3, %v4052_v12 }
 0x97a   : > { %v4138_v4 = vmul.f32 %v4057_v34, %v13504_v13 }
 0x97b   : > { %6012 = vrot.lane.b32.xlu1 %v5997_v8, %s7646_s17  ;;  %s13510_s17 = sld [smem:[#allocation145_spill]] }
 0x97c   : > { %v6063_v11 = vpop.permute.xlu0 %6062  ;;  %v4154_v31 = vpack.c.bf16 %v4138_v4, %v4138_v4 }
 0x97d   : > { %v6314_v47 = vpop.f32.mrf.mxu2  ;;  %v6159_v55 = vsel %vm3572_vm5, %v6140_v5, %v6063_v11 }
 0x97e   : > { %v6315_v1 = vadd.f32 %v12654_v25, %v6314_v47  ;;  %v5944_v57 = vunpack.c.l.b16 %v4154_v31 }
 0x980   : > { %6366 = vst [vmem:[%s10559_s12 + $0x98] sm:$0xff] %v6315_v1 }
 0x981   : > { %s6392_s18 = scalar_lea.hbm %s13510_s17, %s6792_s7  ;;  %s7581_s5 = scalar_lea.hbm %s13510_s17, 512 }
 0x982   : > { %s6395_s27 = sshll.u32 %s6392_s18, 4  ;;  %s6396_s27 = int_to_ptr.hbm [resolvable:$true] %s6395_s27 }
 0x983   : > { %6124 = vrot.lane.b32.xlu1 %v6109_v51, %s7645_s14  ;;  %s7575_s21 = sshra.s32 %s6396_s27, 4  ;;  %s7576_s21 = int_to_ptr.hbm [resolvable:$true] %s7575_s21 }
 0x984   : > { %v6119_v33 = vpop.permute.xlu0 %6118  ;;  %s7577_s28 = scalar_lea.hbm %s7576_s21, 256  ;;  %p7582_p5 = scmp.lt.s32.totalorder %s7576_s21, %s13510_s17 }
 0x985   : > { %v6179_v35 = vsel %vm3589_vm7, %v6159_v55, %v6119_v33  ;;  %v13506_v55 = vld [vmem:[#allocation78_spill] sm:$0xff]  ;;  %p7578_p4 = scmp.ne.s32.totalorder %s7576_s21, %s7577_s28  ;;  %p7583_p1 = scmp.lt.s32.totalorder %s7581_s5, %s7577_s28 }
 0x986   : > { %6326 = vmatmul.bf16.gmra.mxu2 %v6179_v35 }
 0x987   : > { %p7579_p12 = pnand %p7578_p4, %p7763_p7  ;;  %p7584_p11 = por %p7583_p1, %p7582_p5 }
 0x989   : > { %p7580_p3 = pneg %p7579_p12 }
 0x98b   : > { %p7585_p2 = pnand %p7584_p11, %p7580_p3 }
 0x992   : > { %v3838_v9 = vpop.xlane.xlu2 %3837 }
 0x993   : > { %7395 = vrcp.f32 %v3838_v9  ;;  %v4069_v16 = vand.u32 2147483648, %v3838_v9  ;;  %v4067_v60 = vand.u32 2147483647, %v3838_v9  ;;  %vm4063_vm15 = vweird.f32 %v3838_v9  ;;  %v3840_v22 = vpop.xlane.xlu1 %3839 }
 0x994   : > { %7397 = vrcp.f32 %v3840_v22  ;;  %v4083_v19 = vand.u32 2147483648, %v3840_v22  ;;  %vm4077_vm6 = vweird.f32 %v3840_v22  ;;  %v4081_v43 = vand.u32 2147483647, %v3840_v22 }
 0x995   : > { %v4070_v38 = vor.u32 1.1754944e-38, %v4069_v16  ;;  %vm4068_vm4 = vcmp.eq.f32.partialorder %v4067_v60, 8.507059e+37 }
 0x996   : > { %v4084_v26 = vor.u32 1.1754944e-38, %v4083_v19  ;;  %vm4082_vm8 = vcmp.eq.f32.partialorder %v4081_v43, 8.507059e+37 }
 0x999   : > { %v7396_v62 = vpop.eup %7395 }
 0x99a   : > { %v4059_v37 = vmul.f32 %v7396_v62, %v3838_v9  ;;  %vm4064_vm11 = vweird.f32 %v7396_v62  ;;  %v6009_v10 = vpop.permute.xlu2 %6008  ;;  %v7398_v30 = vpop.eup %7397 }
 0x99b   : > { %vm4065_vm9 = vmor %vm4063_vm15, %vm4064_vm11  ;;  %v4073_v41 = vmul.f32 %v7398_v30, %v3840_v22  ;;  %vm4078_vm12 = vweird.f32 %v7398_v30 }
 0x99c   : > { %v4060_v48 = vsub.f32 1.0, %v4059_v37  ;;  %vm4079_vm1 = vmor %vm4077_vm6, %vm4078_vm12 }
 0x99d   : > { %v4074_v52 = vsub.f32 1.0, %v4073_v41 }
 0x99e   : > { %v4061_v49 = vmul.f32 %v7396_v62, %v4060_v48 }
 0x99f   : > { %v4075_v29 = vmul.f32 %v7398_v30, %v4074_v52 }
 0x9a0   : > { %v4062_v63 = vadd.f32 %v7396_v62, %v4061_v49 }
 0x9a1   : > { %v4076_v8 = vadd.f32 %v7398_v30, %v4075_v29 }
 0x9a2   : > { %v4066_v54 = vsel %vm4065_vm9, %v7396_v62, %v4062_v63  ;;  %v6065_v45 = vpop.permute.xlu2 %6064 }
 0x9a3   : > { %v4071_v59 = vsel %vm4068_vm4, %v4070_v38, %v4066_v54  ;;  %v4080_v1 = vsel %vm4079_vm1, %v7398_v30, %v4076_v8 }
 0x9a4   : > { %v4139_v0 = vmul.f32 %v4071_v59, %v13505_v15  ;;  %v4085_v5 = vsel %vm4082_vm8, %v4084_v26, %v4080_v1 }
 0x9a5   : > { %v4140_v42 = vmul.f32 %v4085_v5, %v13507_v24 }
 0x9a6   : > { %v4155_v28 = vpack.c.bf16 %v4139_v0, %v4139_v0 }
 0x9a7   : > { %v4156_v56 = vpack.c.bf16 %v4140_v42, %v4140_v42 }
 0x9a8   : > { %v5945_v39 = vunpack.c.l.b16 %v4155_v28 }
 0x9a9   : > { %v5946_v62 = vunpack.c.l.b16 %v4156_v56 }
 0x9aa   : > { %v5955_v46 = vpack.c.b16 %v5945_v39, %v5944_v57 }
 0x9ab   : > { %v6121_v14 = vpop.permute.xlu1 %6120 }
 0x9ac   : > { %v6143_v6 = vsel %vm1059_vm0, %v5955_v46, %v6009_v10 }
 0x9ad   : > { %v6161_v18 = vsel %vm3572_vm5, %v6143_v6, %v6065_v45  ;;  %v13508_v6 = vld [vmem:[#allocation130_spill] sm:$0xff] }
 0x9ae   : > { %v6182_v21 = vsel %vm3589_vm7, %v6161_v18, %v6121_v14  ;;  %v13509_v14 = vld [vmem:[#allocation36_spill] sm:$0xff] }
 0x9af   : > { %v3842_v7 = vpop.xlane.xlu0 %3841  ;;  %6331 = vmatmul.bf16.gmra.mxu2 %v6182_v21 }
 0x9b0   : > { %7399 = vrcp.f32 %v3842_v7  ;;  %v4097_v20 = vand.u32 2147483648, %v3842_v7  ;;  %v4095_v11 = vand.u32 2147483647, %v3842_v7  ;;  %vm4091_vm10 = vweird.f32 %v3842_v7 }
 0x9b2   : > { %v4098_v44 = vor.u32 1.1754944e-38, %v4097_v20  ;;  %vm4096_vm2 = vcmp.eq.f32.partialorder %v4095_v11, 8.507059e+37 }
 0x9b5   : > { %v6067_v48 = vpop.permute.xlu1 %6066 }
 0x9b6   : > { %v7400_v17 = vpop.eup %7399 }
 0x9b7   : > { %v4087_v40 = vmul.f32 %v7400_v17, %v3842_v7  ;;  %vm4092_vm3 = vweird.f32 %v7400_v17  ;;  %v3844_v35 = vpop.xlane.xlu0 %3843 }
 0x9b8   : > { %vm4093_vm13 = vmor %vm4091_vm10, %vm4092_vm3  ;;  %7401 = vrcp.f32 %v3844_v35  ;;  %v4111_v54 = vand.u32 2147483648, %v3844_v35  ;;  %vm4105_vm11 = vweird.f32 %v3844_v35  ;;  %v4109_v22 = vand.u32 2147483647, %v3844_v35 }
 0x9b9   : > { %v4088_v27 = vsub.f32 1.0, %v4087_v40 }
 0x9ba   : > { %v4112_v0 = vor.u32 1.1754944e-38, %v4111_v54  ;;  %vm4110_vm9 = vcmp.eq.f32.partialorder %v4109_v22, 8.507059e+37 }
 0x9bb   : > { %v4089_v23 = vmul.f32 %v7400_v17, %v4088_v27  ;;  %v6317_v61 = vpop.f32.mrf.mxu2 }
 0x9bc   : > { %v6318_v47 = vadd.f32 %v12654_v25, %v6317_v61 }
 0x9bd   : > { %v4090_v53 = vadd.f32 %v7400_v17, %v4089_v23 }
 0x9be   : > { %6367 = vst [vmem:[%s10559_s12 + $0xa0] sm:$0xff] %v6318_v47  ;;  %v7402_v37 = vpop.eup %7401 }
 0x9bf   : > { %v4094_v36 = vsel %vm4093_vm13, %v7400_v17, %v4090_v53  ;;  %v4101_v16 = vmul.f32 %v7402_v37, %v3844_v35  ;;  %vm4106_vm14 = vweird.f32 %v7402_v37 }
 0x9c0   : > { %v4099_v51 = vsel %vm4096_vm2, %v4098_v44, %v4094_v36  ;;  %vm4107_vm15 = vmor %vm4105_vm11, %vm4106_vm14 }
 0x9c1   : > { %v4141_v33 = vmul.f32 %v4099_v51, %v13506_v55  ;;  %v4102_v63 = vsub.f32 1.0, %v4101_v16 }
 0x9c3   : > { %v6319_v58 = vpop.f32.mrf.mxu2  ;;  %v4157_v9 = vpack.c.bf16 %v4141_v33, %v4141_v33  ;;  %v4103_v13 = vmul.f32 %v7402_v37, %v4102_v63 }
 0x9c4   : > { %v6320_v50 = vadd.f32 %v12654_v25, %v6319_v58 }
 0x9c5   : > { %v5947_v32 = vunpack.c.l.b16 %v4157_v9  ;;  %v4104_v38 = vadd.f32 %v7402_v37, %v4103_v13 }
 0x9c6   : > { %6368 = vst [vmem:[%s10559_s12 + $0xa8] sm:$0xff] %v6320_v50 }
 0x9c7   : > { %v5956_v12 = vpack.c.b16 %v5947_v32, %v5946_v62  ;;  %v4108_v10 = vsel %vm4107_vm15, %v7402_v37, %v4104_v38 }
 0x9c8   : > { %v4113_v57 = vsel %vm4110_vm9, %v4112_v0, %v4108_v10 }
 0x9c9   : > { %v4142_v45 = vmul.f32 %v4113_v57, %v13508_v6 }
 0x9ca   : > { %v6011_v2 = vpop.permute.xlu0 %6010 }
 0x9cb   : > { %v6146_v3 = vsel %vm1059_vm0, %v5956_v12, %v6011_v2  ;;  %v4158_v17 = vpack.c.bf16 %v4142_v45, %v4142_v45 }
 0x9cc   : > { %v6163_v49 = vsel %vm3572_vm5, %v6146_v3, %v6067_v48 }
 0x9cd   : > { %v5948_v27 = vunpack.c.l.b16 %v4158_v17 }
 0x9d2   : > { %v6123_v34 = vpop.permute.xlu0 %6122 }
 0x9d3   : > { %v6185_v60 = vsel %vm3589_vm7, %v6163_v49, %v6123_v34 }
 0x9d4   : > { %6336 = vmatmul.bf16.gmra.mxu2 %v6185_v60 }
 0x9da   : > { %v6069_v20 = vpop.permute.xlu0 %6068 }
 0x9db   : > { %v3846_v4 = vpop.xlane.xlu2 %3845 }
 0x9dc   : > { %7403 = vrcp.f32 %v3846_v4  ;;  %v4125_v28 = vand.u32 2147483648, %v3846_v4  ;;  %v4123_v46 = vand.u32 2147483647, %v3846_v4  ;;  %vm4119_vm12 = vweird.f32 %v3846_v4 }
 0x9de   : > { %v4126_v41 = vor.u32 1.1754944e-38, %v4125_v28  ;;  %vm4124_vm6 = vcmp.eq.f32.partialorder %v4123_v46, 8.507059e+37 }
 0x9e2   : > { %v7404_v59 = vpop.eup %7403 }
 0x9e3   : > { %v4115_v15 = vmul.f32 %v7404_v59, %v3846_v4  ;;  %vm4120_vm4 = vweird.f32 %v7404_v59 }
 0x9e4   : > { %vm4121_vm3 = vmor %vm4119_vm12, %vm4120_vm4 }
 0x9e5   : > { %v4116_v31 = vsub.f32 1.0, %v4115_v15 }
 0x9e7   : > { %v4117_v39 = vmul.f32 %v7404_v59, %v4116_v31 }
 0x9e9   : > { %v4118_v30 = vadd.f32 %v7404_v59, %v4117_v39 }
 0x9eb   : > { %v4122_v18 = vsel %vm4121_vm3, %v7404_v59, %v4118_v30 }
 0x9ec   : > { %v4127_v7 = vsel %vm4124_vm6, %v4126_v41, %v4122_v18 }
 0x9ed   : > { %v4143_v21 = vmul.f32 %v4127_v7, %v13509_v14  ;;  %v6013_v52 = vpop.permute.xlu1 %6012 }
 0x9ef   : > { %v4159_v29 = vpack.c.bf16 %v4143_v21, %v4143_v21 }
 0x9f1   : > { %v5949_v40 = vunpack.c.l.b16 %v4159_v29 }
 0x9f3   : > { %v5957_v8 = vpack.c.b16 %v5949_v40, %v5948_v27 }
 0x9f5   : > { %v6149_v19 = vsel %vm1059_vm0, %v5957_v8, %v6013_v52  ;;  %v6125_v23 = vpop.permute.xlu1 %6124 }
 0x9f6   : > { %v6165_v11 = vsel %vm3572_vm5, %v6149_v19, %v6069_v20 }
 0x9f7   : > { %v6188_v61 = vsel %vm3589_vm7, %v6165_v11, %v6125_v23 }
 0x9f8   : > { %6341 = vmatmul.bf16.gmra.mxu2 %v6188_v61 }
 0x9f9   : > { %v6322_v43 = vpop.f32.mrf.mxu2 }
 0x9fa   : > { %v6323_v47 = vadd.f32 %v12654_v25, %v6322_v43 }
 0x9fc   : > { %6369 = vst [vmem:[%s10559_s12 + $0xb0] sm:$0xff] %v6323_v47 }
 0xa01   : > { %v6324_v53 = vpop.f32.mrf.mxu2 }
 0xa02   : > { %v6325_v1 = vadd.f32 %v12654_v25, %v6324_v53 }
 0xa04   : > { %6370 = vst [vmem:[%s10559_s12 + $0xb8] sm:$0xff] %v6325_v1 }
 0xa09   : > { %v6327_v44 = vpop.f32.mrf.mxu2 }
 0xa0a   : > { %v6328_v26 = vadd.f32 %v12654_v25, %v6327_v44 }
 0xa0c   : > { %6371 = vst [vmem:[%s10559_s12 + $0xc0] sm:$0xff] %v6328_v26 }
 0xa11   : > { %v6329_v36 = vpop.f32.mrf.mxu2 }
 0xa12   : > { %v6330_v51 = vadd.f32 %v12654_v25, %v6329_v36 }
 0xa14   : > { %6372 = vst [vmem:[%s10559_s12 + $0xc8] sm:$0xff] %v6330_v51 }
 0xa32   : > { %v6332_v5 = vpop.f32.mrf.mxu2 }
 0xa33   : > { %v6333_v55 = vadd.f32 %v12654_v25, %v6332_v5 }
 0xa35   : > { %6373 = vst [vmem:[%s10559_s12 + $0xd0] sm:$0xff] %v6333_v55 }
 0xa3a   : > { %v6334_v33 = vpop.f32.mrf.mxu2 }
 0xa3b   : > { %v6335_v35 = vadd.f32 %v12654_v25, %v6334_v33 }
 0xa3d   : > { %6374 = vst [vmem:[%s10559_s12 + $0xd8] sm:$0xff] %v6335_v35 }
 0xa57   : > { %v6337_v58 = vpop.f32.mrf.mxu2 }
 0xa58   : > { %v6338_v50 = vadd.f32 %v12654_v25, %v6337_v58 }
 0xa5a   : > { %6375 = vst [vmem:[%s10559_s12 + $0xe0] sm:$0xff] %v6338_v50 }
 0xa5f   : > { %v6339_v24 = vpop.f32.mrf.mxu2 }
 0xa60   : > { %v6340_v42 = vadd.f32 %v12654_v25, %v6339_v24 }
 0xa62   : > { %6376 = vst [vmem:[%s10559_s12 + $0xe8] sm:$0xff] %v6340_v42 }
 0xa7b   : > { %v6342_v9 = vpop.f32.mrf.mxu2 }
 0xa7c   : > { %v6343_v56 = vadd.f32 %v12654_v25, %v6342_v9 }
 0xa7e   : > { %6377 = vst [vmem:[%s10559_s12 + $0xf0] sm:$0xff] %v6343_v56 }
 0xa83   : > { %v6344_v32 = vpop.f32.mrf.mxu2 }
 0xa84   : > { %v6345_v2 = vadd.f32 %v12654_v25, %v6344_v32 }
 0xa86   : > { %6378 = vst [vmem:[%s10559_s12 + $0xf8] sm:$0xff] %v6345_v2 }
 0xa87   : > { %7588 = shalt.err (!%p7585_p2)
}
 0xa88   : > { %s7648_s29 = smov 128   ;;  %s7649_s11 = smov 8  }
 0xa89   : > { %6815 = dma.vmem_to_hbm [thread:$0]  (%p7763_p7), %s6394_s20, 4096, %s6396_s27, %s6380_s15, %s7648_s29, %s7648_s29, %s7649_s11  }
 0xa8a PF: > { %s13511_s12 = sld [smem:[#allocation16_spill]] }
 0xa8b   : > { %s13513_s16 = sld [smem:[#allocation17_spill]] }
 0xa90   : > { %s6410_s10 = sand.u32 1, %s13511_s12  }
 0xa91   : > { %p13514_p10 = scmp.ge.s32.totalorder %s13513_s16, 2  ;;  %s6411_s3 = scalar_lea.sflag [#allocation4], %s6410_s10 }
 0xa93   : > { %p6835_p13 = pnand %p13514_p10, %p7725_p6 }
 0xa95   : > { %p6836_p0 = pneg %p6835_p13 }
 0xa97   : > { %7618 = dma.done.wait (%p6836_p0), %s6411_s3, 4096  }
 0xa98   : > { %7620 = vsyncadd (%p6836_p0), %s6411_s3, 4294963200  ;;  %s13515_s27 = sld [smem:[#allocation19_spill]]  ;;  %s13517_s24 = smov %s7627_s25 }
 0xa99   : > { %s13516_s30 = sld [smem:[#allocation20_spill]]  ;;  %s13518_s25 = smov %s7631_s26 }
 0xa9e   : > { %p24_p8 = scmp.ge.s32.totalorder %s13515_s27, 4  }
 0xa9f   : > { %s13519_s26 = smov %s13516_s30 }
 0xaa0   :  { %26 = sbr.rel (!%p24_p8) target bundleno = 13 (0xd), region = 125 }
 0xaa5   :  { %6417 = vsyncpa [#allocation3], 1 }
 0xaa6   :  { %6419 = vsyncpa [#allocation3 + $0x1], 1 }
 0xaa7   :  { %6420 = vsyncpa [#allocation6], 1 }
 0xaa8   :  { %6422 = vsyncpa [#allocation6 + $0x1], 1 }
 0xaa9   :  { %6423 = vsyncpa [#allocation9], 1 }
 0xaaa   :  { %6424 = vsyncpa [#allocation4], 1 }
 0xaab   :  { %6426 = vsyncpa [#allocation4 + $0x1], 1 }

</bundles_post_ra>
